<compile_context>
chip_gen: v5e
topology: v5e:2x2
jax: 0.10.0
libtpu: 0.0.40
codegen_flags: <defaults>
</compile_context>

<pallas_src>
import jax
import jax.numpy as jnp
from jax import lax
from jax.experimental import pallas as pl
from jax.experimental.pallas import tpu as pltpu

# ----------------------------- model constants ------------------------------
HIDDEN = 32                 # hidden_dim (peptdeep default 256; small for demo)
NLAYERS = 4                 # n_lstm_layers (module default)
MOD_FEATURE_SIZE = 109      # peptdeep mod feature size
MOD_FIX_K = 6               # Mod_Embedding_FixFirstK keeps first 6 features
MOD_EMB = 8                 # mod embedding out dim
AA_EMB = HIDDEN - MOD_EMB   # ascii aa-embedding dim
HD = HIDDEN // 2            # per-direction LSTM hidden
CNN_OUT = 4 * HIDDEN        # 128 lanes: [x | c3 | c5 | c7]
KMAX = 7                    # largest conv kernel
PAD = KMAX // 2             # = 3
GW = 8 * HD                 # fused bi-dir gate width (128)
AA_VOCAB = 128              # ascii embedding vocab
EMB_IN = 2 * AA_VOCAB       # 256 = [aa one-hot | zero-padded mod features]
B = 2                       # batch
L = 8                       # sequence length

# dtype for the batch-parallel feed-forward MXU operands (embedding, CNN taps,
# per-layer input projection).  f32 here to stay bit-close to the PyTorch f32
# reference at demo scale; set jnp.bfloat16 on v6e/v7x at hidden_dim=256 to
# halve im2col/xproj VMEM + DMA.  The LSTM h/c state, gate nonlinearities and
# the softmax stay f32 regardless.
MXU_IN_DTYPE = jnp.float32


# ------------------------------ math helpers --------------------------------
def _erf(x):
    # Abramowitz & Stegun 7.1.26, |err| < 1.5e-7 vs PyTorch's exact-erf GELU.
    a1, a2, a3, a4, a5 = 0.254829592, -0.284496736, 1.421413741, -1.453152027, 1.061405429
    p = 0.3275911
    s = jnp.where(x >= 0.0, 1.0, -1.0)
    ax = jnp.abs(x)
    t = 1.0 / (1.0 + p * ax)
    poly = ((((a5 * t + a4) * t + a3) * t + a2) * t + a1) * t
    return s * (1.0 - poly * jnp.exp(-ax * ax))


def _gelu(x):
    # PyTorch nn.GELU() default = exact erf formulation (approximated by _erf).
    return 0.5 * x * (1.0 + _erf(x * 0.7071067811865476))


# --------------------------------- kernel -----------------------------------
def model_kernel(aa_ref, mod_ref, rev_ref, wemb_ref, wcnn_ref, bcnn_ref,
                 wih0_ref, wihr_ref, whh_ref, blstm_ref,
                 wattn_ref, w1_ref, b1_ref, w2t_ref, b2_ref,
                 out_ref, seq_scr, xp_scr):
    f32 = jnp.float32
    mx = lambda a: a.astype(MXU_IN_DTYPE)

    # ---- hoisted constants (JAX does not CSE broadcasts/iotas inside loops)
    rev_mat = rev_ref[...]                               # (B*L, B*L) per-batch time reversal
    fwd_mask = (lax.broadcasted_iota(jnp.int32, (B * L, GW), 1) % (2 * HD)) < HD
    lane_lo = lax.broadcasted_iota(jnp.int32, (B * L, HIDDEN), 1) < HD

    # ---- fused embeddings: one (B*L, 256) [one-hot(aa) | padded mod] matrix
    #      against a single packed (256, HIDDEN) weight -> one MXU pass.
    aa = aa_ref[...]                                     # (B*L, 1) int32 ascii
    aa = jnp.where(aa < AA_VOCAB, aa, -1)                # out-of-vocab -> zero embedding
    lane = lax.broadcasted_iota(jnp.int32, (B * L, EMB_IN), 1)
    combined = jnp.where(lane == aa, 1.0, mod_ref[...])  # lanes 0:128 one-hot, 128:256 mod
    x = jnp.dot(mx(combined), mx(wemb_ref[...]), preferred_element_type=f32)

    # ---- SeqCNN: zero-padded VMEM scratch + 7 per-tap accumulated matmuls
    #      (no im2col slab, no concatenates).  Tap 3 of the packed weight also
    #      carries the identity passthrough for x, so the result is directly
    #      the lane-dense [x | conv3 | conv5 | conv7] slab.
    xp_scr[:, 0:PAD, :] = jnp.zeros((B, PAD, HIDDEN), f32)
    xp_scr[:, L + PAD:L + 2 * PAD, :] = jnp.zeros((B, PAD, HIDDEN), f32)
    xp_scr[:, PAD:PAD + L, :] = x.reshape(B, L, HIDDEN)
    acc = None
    for t in range(KMAX):
        xt = xp_scr[:, t:t + L, :].reshape(B * L, HIDDEN)
        contrib = jnp.dot(mx(xt), mx(wcnn_ref[t]), preferred_element_type=f32)
        acc = contrib if acc is None else acc + contrib
    seq_flat = acc + bcnn_ref[...]                       # (B*L, 128)
    # Dropout(0.1): identity in eval mode.

    # ---- fused bidirectional multi-layer LSTM
    # gate column layout (8*HD = 128): [i_f,i_b,f_f,f_b,o_f,o_b,g_f,g_b]
    for layer in range(NLAYERS):
        w_ih = wih0_ref[...] if layer == 0 else wihr_ref[layer - 1]
        # both directions' input projection + (b_ih + b_hh) in one matmul
        xproj = (jnp.dot(mx(seq_flat), mx(w_ih), preferred_element_type=f32)
                 + blstm_ref[layer])                     # (B*L, GW)
        # pre-select per-gate time direction OFF the serial chain:
        # forward lanes read time s, backward lanes read time L-1-s.
        xproj_rev = jnp.dot(rev_mat, xproj, preferred_element_type=f32)
        gxsel = jnp.where(fwd_mask, xproj, xproj_rev).reshape(B, L, GW)

        whh = whh_ref[layer]                             # (2*HD, 8*HD) block-diag
        h = jnp.zeros((B, 2 * HD), f32)                  # [h_fwd | h_bwd]
        c = jnp.zeros((B, 2 * HD), f32)
        # TODO(synk): at realistic L (~100 residues) switch this to
        # lax.fori_loop(..., unroll=4) carrying (h, c) to bound live ranges.
        for s in range(L):                               # 8 static steps / layer
            raw = gxsel[:, s, :] + jnp.dot(h, whh, preferred_element_type=f32)
            # full-width transcendentals (EUP slot is free); 32-lane clean views
            sg = jax.nn.sigmoid(raw)
            tg = jnp.tanh(raw)
            gi = sg[:, 0:2 * HD]
            gf = sg[:, 2 * HD:4 * HD]
            go = sg[:, 4 * HD:6 * HD]
            g = tg[:, 6 * HD:8 * HD]
            c = gf * c + gi * g
            h = go * jnp.tanh(c)
            seq_scr[:, s, :] = h                         # one lane-dense store / step
        # time-reverse the backward half ONCE per layer (tiny permutation matmul)
        full = seq_scr[...].reshape(B * L, HIDDEN)
        seq_flat = jnp.where(lane_lo, full,
                             jnp.dot(rev_mat, full, preferred_element_type=f32))
    # Dropout: identity in eval mode.

    seq = seq_flat.reshape(B, L, HIDDEN)

    # ---- SeqAttentionSum: softmax over seq axis of Linear(HIDDEN, 1, no bias)
    scores = jnp.sum(seq * wattn_ref[...][None, :, :], axis=-1, keepdims=True)
    scores = scores - jnp.max(scores, axis=1, keepdims=True)
    e = jnp.exp(scores)
    attn = e / jnp.sum(e, axis=1, keepdims=True)
    feat = jnp.sum(seq * attn, axis=1)                   # (B, HIDDEN)

    # ---- head: (Dropout) Linear(HIDDEN,64) -> GELU -> Linear(64,1) -> sigmoid
    h1 = _gelu(jnp.dot(feat, w1_ref[...], preferred_element_type=f32) + b1_ref[...])
    # N=1 output: VPU multiply + lane reduce instead of a 1-lane MXU matmul
    logit = jnp.sum(h1 * w2t_ref[...], axis=-1, keepdims=True) + b2_ref[...]
    out_ref[...] = jax.nn.sigmoid(logit)                 # (B, 1)


# --------------------------- parameter construction --------------------------
def build_raw_params(key):
    """Deterministic synthetic parameters in (near) PyTorch-native layouts.

    LSTM gates are in PyTorch order (i, f, g, o) per direction; conv taps are
    stored channels-last (k, in, out); b_ih + b_hh are pre-summed per direction.
    """
    ks = jax.random.split(key, 16)
    n = lambda k, shape, scale: scale * jax.random.normal(k, shape, jnp.float32)
    emb = n(ks[0], (AA_VOCAB, AA_EMB), 0.3)
    emb = emb.at[0].set(0.0)                             # padding_idx=0
    return dict(
        emb=emb,
        w_mod=n(ks[1], (MOD_FEATURE_SIZE - MOD_FIX_K, MOD_EMB - MOD_FIX_K), 0.1),
        cw3=n(ks[2], (3, HIDDEN, HIDDEN), 0.08), cb3=n(ks[3], (HIDDEN,), 0.02),
        cw5=n(ks[4], (5, HIDDEN, HIDDEN), 0.06), cb5=n(ks[5], (HIDDEN,), 0.02),
        cw7=n(ks[6], (7, HIDDEN, HIDDEN), 0.05), cb7=n(ks[7], (HIDDEN,), 0.02),
        wih0=n(ks[8], (2, CNN_OUT, 4 * HD), 0.08),
        wihr=n(ks[9], (NLAYERS - 1, 2, HIDDEN, 4 * HD), 0.1),
        whh=n(ks[10], (NLAYERS, 2, HD, 4 * HD), 0.1),
        blstm=n(ks[11], (NLAYERS, 2, 4 * HD), 0.05),
        wattn=n(ks[12], (1, HIDDEN), 0.2),
        w1=n(ks[13], (HIDDEN, 64), 0.15), b1=n(ks[14], (1, 64), 0.02),
        w2=n(ks[15], (64, 1), 0.15), b2=jnp.zeros((1, 1), jnp.float32),
    )


def pack_params(p):
    """Repack raw params into the fused layouts the kernel consumes (exact math).

    NOTE: when importing real PyTorch weights the same gate permutation
    (i,f,g,o per direction -> [i_f,i_b,f_f,f_b,o_f,o_b,g_f,g_b]) and the
    b_ih+b_hh summation must be applied here.
    """
    f32 = jnp.float32

    # single fused embedding weight (256, HIDDEN):
    #   rows   0:128  aa one-hot -> aa embedding (cols 0:AA_EMB)
    #   rows 128:134  identity passthrough for first 6 mod features (cols 24:30)
    #   rows 134:237  Linear(103 -> 2, no bias)                     (cols 30:32)
    wemb = jnp.zeros((EMB_IN, HIDDEN), f32)
    wemb = wemb.at[:AA_VOCAB, :AA_EMB].set(p["emb"])
    wemb = wemb.at[AA_VOCAB:AA_VOCAB + MOD_FIX_K,
                   AA_EMB:AA_EMB + MOD_FIX_K].set(jnp.eye(MOD_FIX_K, dtype=f32))
    wemb = wemb.at[AA_VOCAB + MOD_FIX_K:AA_VOCAB + MOD_FEATURE_SIZE,
                   AA_EMB + MOD_FIX_K:].set(p["w_mod"])

    # per-tap conv weights (KMAX, HIDDEN, CNN_OUT); tap 3 also carries the
    # identity passthrough of x into output columns 0:HIDDEN.
    wcnn = jnp.zeros((KMAX, HIDDEN, CNN_OUT), f32)
    wcnn = wcnn.at[3, :, 0:HIDDEN].set(jnp.eye(HIDDEN, dtype=f32))
    for u in range(3):                                   # k=3, pad=1 -> taps 2..4
        wcnn = wcnn.at[u + 2, :, HIDDEN:2 * HIDDEN].set(p["cw3"][u])
    for u in range(5):                                   # k=5, pad=2 -> taps 1..5
        wcnn = wcnn.at[u + 1, :, 2 * HIDDEN:3 * HIDDEN].set(p["cw5"][u])
    for u in range(7):                                   # k=7, pad=3 -> taps 0..6
        wcnn = wcnn.at[u, :, 3 * HIDDEN:4 * HIDDEN].set(p["cw7"][u])
    bcnn = jnp.concatenate(
        [jnp.zeros((HIDDEN,), f32), p["cb3"], p["cb5"], p["cb7"]])[None, :]

    # fused bidirectional LSTM weights
    def gates(w):                                        # PyTorch order (i, f, g, o)
        return (w[..., 0:HD], w[..., HD:2 * HD],
                w[..., 2 * HD:3 * HD], w[..., 3 * HD:4 * HD])

    def fuse_cols(wf, wb):                               # dense fused columns
        i_f, f_f, g_f, o_f = gates(wf)
        i_b, f_b, g_b, o_b = gates(wb)
        return jnp.concatenate([i_f, i_b, f_f, f_b, o_f, o_b, g_f, g_b], axis=-1)

    def fuse_whh(wf, wb):                                # block-diag over directions
        i_f, f_f, g_f, o_f = gates(wf)
        i_b, f_b, g_b, o_b = gates(wb)
        zz = jnp.zeros((HD, HD), f32)
        top = jnp.concatenate([i_f, zz, f_f, zz, o_f, zz, g_f, zz], axis=-1)
        bot = jnp.concatenate([zz, i_b, zz, f_b, zz, o_b, zz, g_b], axis=-1)
        return jnp.concatenate([top, bot], axis=0)       # (2*HD, 8*HD)

    wih0 = fuse_cols(p["wih0"][0], p["wih0"][1])                        # (4H, 8HD)
    wihr = jnp.stack([fuse_cols(p["wihr"][l, 0], p["wihr"][l, 1])
                      for l in range(NLAYERS - 1)])                     # (3, H, 8HD)
    whh = jnp.stack([fuse_whh(p["whh"][l, 0], p["whh"][l, 1])
                     for l in range(NLAYERS)])                          # (4, 2HD, 8HD)
    blstm = jnp.stack([fuse_cols(p["blstm"][l, 0], p["blstm"][l, 1])
                       for l in range(NLAYERS)])[:, None, :]            # (4, 1, 8HD)

    return dict(wemb=wemb, wcnn=wcnn, bcnn=bcnn,
                wih0=wih0, wihr=wihr, whh=whh, blstm=blstm,
                wattn=p["wattn"], w1=p["w1"], b1=p["b1"],
                w2t=p["w2"].T, b2=p["b2"])


# ------------------------------ wrapper / glue -------------------------------
PARAM_ORDER = ("wemb", "wcnn", "bcnn", "wih0", "wihr", "whh", "blstm",
               "wattn", "w1", "b1", "w2t", "b2")


@jax.jit
def forward(aa_x, mod_x, packed):
    # wrapper-side layout plumbing (free relative to the kernel):
    aa_flat = aa_x.reshape(B * L, 1).astype(jnp.int32)
    mod_pad = jnp.zeros((B * L, EMB_IN), jnp.float32)
    mod_pad = mod_pad.at[:, AA_VOCAB:AA_VOCAB + MOD_FEATURE_SIZE].set(
        mod_x.astype(jnp.float32).reshape(B * L, MOD_FEATURE_SIZE))
    # per-batch time-reversal permutation for the bidirectional recurrence
    idx = jnp.arange(B * L)
    rev_idx = (idx // L) * L + (L - 1 - idx % L)
    rev_mat = jax.nn.one_hot(rev_idx, B * L, dtype=jnp.float32)

    inputs = (aa_flat, mod_pad, rev_mat) + tuple(packed[k] for k in PARAM_ORDER)
    out = pl.pallas_call(
        model_kernel,
        out_shape=jax.ShapeDtypeStruct((B, 1), jnp.float32),
        in_specs=[pl.BlockSpec(memory_space=pltpu.MemorySpace.VMEM)
                  for _ in inputs],
        out_specs=pl.BlockSpec(memory_space=pltpu.MemorySpace.VMEM),
        scratch_shapes=[pltpu.VMEM((B, L, HIDDEN), jnp.float32),          # LSTM outputs
                        pltpu.VMEM((B, L + 2 * PAD, HIDDEN), jnp.float32)],  # padded CNN input
        # TODO(synk): at realistic shapes add grid=(B//TB,) with batch-tiled
        # BlockSpecs and dimension_semantics=("parallel",) for v7x's 2 TCs,
        # plus vmem_limit_bytes re-derived for its 64 MiB VMEM.
    )(*inputs)
    return out[:, 0]                                     # .squeeze(-1)


if __name__ == "__main__":
    key = jax.random.PRNGKey(0)
    kp, ka, km = jax.random.split(key, 3)
    packed = pack_params(build_raw_params(kp))
    # aa_x: ascii codes of amino acids (A..Z); mod_x: modification feature vectors
    aa_x = jax.random.randint(ka, (B, L), minval=65, maxval=91, dtype=jnp.int32)
    mod_x = jax.random.uniform(km, (B, L, MOD_FEATURE_SIZE), dtype=jnp.float32)

    probs = forward(aa_x, mod_x, packed)
    jax.block_until_ready(probs)
    assert probs.shape == (B,)
    assert bool(jnp.all((probs >= 0.0) & (probs <= 1.0)))
    print("KERNEL_OK")
</pallas_src>

<mosaic_0001>
module attributes {stable_mosaic.version = 11 : i64} {
  func.func @model_kernel(%arg0: memref<16x1xi32, #tpu.memory_space<vmem>>, %arg1: memref<16x256xf32, #tpu.memory_space<vmem>>, %arg2: memref<16x16xf32, #tpu.memory_space<vmem>>, %arg3: memref<256x32xf32, #tpu.memory_space<vmem>>, %arg4: memref<7x32x128xf32, #tpu.memory_space<vmem>>, %arg5: memref<1x128xf32, #tpu.memory_space<vmem>>, %arg6: memref<128x128xf32, #tpu.memory_space<vmem>>, %arg7: memref<3x32x128xf32, #tpu.memory_space<vmem>>, %arg8: memref<4x32x128xf32, #tpu.memory_space<vmem>>, %arg9: memref<4x1x128xf32, #tpu.memory_space<vmem>>, %arg10: memref<1x32xf32, #tpu.memory_space<vmem>>, %arg11: memref<32x64xf32, #tpu.memory_space<vmem>>, %arg12: memref<1x64xf32, #tpu.memory_space<vmem>>, %arg13: memref<1x64xf32, #tpu.memory_space<vmem>>, %arg14: memref<1x1xf32, #tpu.memory_space<vmem>>, %arg15: memref<2x1xf32, #tpu.memory_space<vmem>>, %arg16: memref<2x8x32xf32, #tpu.memory_space<vmem>>, %arg17: memref<2x14x32xf32, #tpu.memory_space<vmem>>) attributes {dimension_semantics = [], scalar_prefetch = 0 : i64, scratch_operands = 2 : i64, tpu.core_type = #tpu.core_type<tc>} {
    %c0 = arith.constant 0 : index
    %c0_0 = arith.constant 0 : index
    %0 = vector.load %arg2[%c0, %c0_0] : memref<16x16xf32, #tpu.memory_space<vmem>>, vector<16x16xf32>
    %1 = tpu.iota {dimensions = array<i32: 1>} : vector<16x128xi32>
    %c32_i32 = arith.constant 32 : i32
    %c0_i32 = arith.constant 0 : i32
    %2 = arith.cmpi eq, %c32_i32, %c0_i32 : i32
    %c1_i32 = arith.constant 1 : i32
    %3 = arith.select %2, %c1_i32, %c32_i32 : i32
    %4 = vector.broadcast %3 : i32 to vector<16x128xi32>
    %5 = arith.remsi %1, %4 : vector<16x128xi32>
    %c0_i32_1 = arith.constant 0 : i32
    %6 = vector.broadcast %c0_i32_1 : i32 to vector<16x128xi32>
    %7 = arith.cmpi ne, %5, %6 : vector<16x128xi32>
    %c0_i32_2 = arith.constant 0 : i32
    %8 = vector.broadcast %c0_i32_2 : i32 to vector<16x128xi32>
    %9 = arith.cmpi slt, %5, %8 : vector<16x128xi32>
    %c0_i32_3 = arith.constant 0 : i32
    %10 = arith.cmpi slt, %3, %c0_i32_3 : i32
    %11 = vector.broadcast %10 : i1 to vector<16x128xi1>
    %12 = vector.broadcast %11 : vector<16x128xi1> to vector<16x128xi1>
    %13 = arith.xori %9, %12 : vector<16x128xi1>
    %14 = arith.andi %13, %7 : vector<16x128xi1>
    %15 = vector.broadcast %3 : i32 to vector<16x128xi32>
    %16 = arith.addi %5, %15 : vector<16x128xi32>
    %17 = arith.select %14, %16, %5 : vector<16x128xi1>, vector<16x128xi32>
    %c16_i32 = arith.constant 16 : i32
    %18 = vector.broadcast %c16_i32 : i32 to vector<16x128xi32>
    %19 = arith.cmpi slt, %17, %18 : vector<16x128xi32>
    %20 = tpu.iota {dimensions = array<i32: 1>} : vector<16x32xi32>
    %c16_i32_4 = arith.constant 16 : i32
    %21 = vector.broadcast %c16_i32_4 : i32 to vector<16x32xi32>
    %22 = arith.cmpi slt, %20, %21 : vector<16x32xi32>
    %c0_5 = arith.constant 0 : index
    %c0_6 = arith.constant 0 : index
    %23 = vector.load %arg0[%c0_5, %c0_6] : memref<16x1xi32, #tpu.memory_space<vmem>>, vector<16x1xi32>
    %c128_i32 = arith.constant 128 : i32
    %24 = vector.broadcast %c128_i32 : i32 to vector<16x1xi32>
    %25 = arith.cmpi slt, %23, %24 : vector<16x1xi32>
    %c-1_i32 = arith.constant -1 : i32
    %26 = vector.broadcast %c-1_i32 : i32 to vector<16x1xi32>
    %27 = arith.select %25, %23, %26 : vector<16x1xi1>, vector<16x1xi32>
    %28 = tpu.iota {dimensions = array<i32: 1>} : vector<16x256xi32>
    %29 = vector.broadcast %27 : vector<16x1xi32> to vector<16x256xi32>
    %30 = arith.cmpi eq, %28, %29 : vector<16x256xi32>
    %c0_7 = arith.constant 0 : index
    %c0_8 = arith.constant 0 : index
    %31 = vector.load %arg1[%c0_7, %c0_8] : memref<16x256xf32, #tpu.memory_space<vmem>>, vector<16x256xf32>
    %cst = arith.constant 1.000000e+00 : f32
    %32 = vector.broadcast %cst : f32 to vector<16x256xf32>
    %33 = arith.select %30, %32, %31 : vector<16x256xi1>, vector<16x256xf32>
    %c0_9 = arith.constant 0 : index
    %c0_10 = arith.constant 0 : index
    %34 = vector.load %arg3[%c0_9, %c0_10] : memref<256x32xf32, #tpu.memory_space<vmem>>, vector<256x32xf32>
    %cst_11 = arith.constant dense<0.000000e+00> : vector<16x32xf32>
    %35 = tpu.matmul %33, %34, %cst_11 {dimension_numbers = #tpu.dot_dimension_numbers<[1], [0], [0], [1], [0, 0, 1, 1], [], []>} : vector<16x256xf32>, vector<256x32xf32>, vector<16x32xf32> -> vector<16x32xf32>
    %cst_12 = arith.constant 0.000000e+00 : f32
    %36 = vector.broadcast %cst_12 : f32 to vector<2x3x32xf32>
    %c0_13 = arith.constant 0 : index
    %c0_14 = arith.constant 0 : index
    %c0_15 = arith.constant 0 : index
    %37 = vector.load %arg17[%c0_13, %c0_14, %c0_15] : memref<2x14x32xf32, #tpu.memory_space<vmem>>, vector<2x3x32xf32>
    tpu.vector_store %arg17[%c0_13, %c0_14, %c0_15], %36 {strides = array<i32>} : memref<2x14x32xf32, #tpu.memory_space<vmem>>, vector<2x3x32xf32>,
    %cst_16 = arith.constant 0.000000e+00 : f32
    %38 = vector.broadcast %cst_16 : f32 to vector<2x3x32xf32>
    %c0_17 = arith.constant 0 : index
    %c11 = arith.constant 11 : index
    %c0_18 = arith.constant 0 : index
    %39 = vector.load %arg17[%c0_17, %c11, %c0_18] : memref<2x14x32xf32, #tpu.memory_space<vmem>>, vector<2x3x32xf32>
    tpu.vector_store %arg17[%c0_17, %c11, %c0_18], %38 {strides = array<i32>} : memref<2x14x32xf32, #tpu.memory_space<vmem>>, vector<2x3x32xf32>,
    %40 = vector.shape_cast %35 : vector<16x32xf32> to vector<2x8x32xf32>
    %c0_19 = arith.constant 0 : index
    %c3 = arith.constant 3 : index
    %c0_20 = arith.constant 0 : index
    %41 = vector.load %arg17[%c0_19, %c3, %c0_20] : memref<2x14x32xf32, #tpu.memory_space<vmem>>, vector<2x8x32xf32>
    tpu.vector_store %arg17[%c0_19, %c3, %c0_20], %40 {strides = array<i32>} : memref<2x14x32xf32, #tpu.memory_space<vmem>>, vector<2x8x32xf32>,
    %c0_21 = arith.constant 0 : index
    %c0_22 = arith.constant 0 : index
    %c0_23 = arith.constant 0 : index
    %42 = vector.load %arg17[%c0_21, %c0_22, %c0_23] : memref<2x14x32xf32, #tpu.memory_space<vmem>>, vector<2x8x32xf32>
    %43 = vector.shape_cast %42 : vector<2x8x32xf32> to vector<16x32xf32>
    %c0_24 = arith.constant 0 : index
    %c0_25 = arith.constant 0 : index
    %c0_26 = arith.constant 0 : index
    %44 = vector.load %arg4[%c0_24, %c0_25, %c0_26] : memref<7x32x128xf32, #tpu.memory_space<vmem>>, vector<1x32x128xf32>
    %45 = vector.shape_cast %44 : vector<1x32x128xf32> to vector<32x128xf32>
    %cst_27 = arith.constant dense<0.000000e+00> : vector<16x128xf32>
    %46 = tpu.matmul %43, %45, %cst_27 {dimension_numbers = #tpu.dot_dimension_numbers<[1], [0], [0], [1], [0, 0, 1, 1], [], []>} : vector<16x32xf32>, vector<32x128xf32>, vector<16x128xf32> -> vector<16x128xf32>
    %c0_28 = arith.constant 0 : index
    %c1 = arith.constant 1 : index
    %c0_29 = arith.constant 0 : index
    %47 = vector.load %arg17[%c0_28, %c1, %c0_29] : memref<2x14x32xf32, #tpu.memory_space<vmem>>, vector<2x8x32xf32>
    %48 = vector.shape_cast %47 : vector<2x8x32xf32> to vector<16x32xf32>
    %c1_30 = arith.constant 1 : index
    %c0_31 = arith.constant 0 : index
    %c0_32 = arith.constant 0 : index
    %49 = vector.load %arg4[%c1_30, %c0_31, %c0_32] : memref<7x32x128xf32, #tpu.memory_space<vmem>>, vector<1x32x128xf32>
    %50 = vector.shape_cast %49 : vector<1x32x128xf32> to vector<32x128xf32>
    %cst_33 = arith.constant dense<0.000000e+00> : vector<16x128xf32>
    %51 = tpu.matmul %48, %50, %cst_33 {dimension_numbers = #tpu.dot_dimension_numbers<[1], [0], [0], [1], [0, 0, 1, 1], [], []>} : vector<16x32xf32>, vector<32x128xf32>, vector<16x128xf32> -> vector<16x128xf32>
    %52 = arith.addf %46, %51 : vector<16x128xf32>
    %c0_34 = arith.constant 0 : index
    %c2 = arith.constant 2 : index
    %c0_35 = arith.constant 0 : index
    %53 = vector.load %arg17[%c0_34, %c2, %c0_35] : memref<2x14x32xf32, #tpu.memory_space<vmem>>, vector<2x8x32xf32>
    %54 = vector.shape_cast %53 : vector<2x8x32xf32> to vector<16x32xf32>
    %c2_36 = arith.constant 2 : index
    %c0_37 = arith.constant 0 : index
    %c0_38 = arith.constant 0 : index
    %55 = vector.load %arg4[%c2_36, %c0_37, %c0_38] : memref<7x32x128xf32, #tpu.memory_space<vmem>>, vector<1x32x128xf32>
    %56 = vector.shape_cast %55 : vector<1x32x128xf32> to vector<32x128xf32>
    %cst_39 = arith.constant dense<0.000000e+00> : vector<16x128xf32>
    %57 = tpu.matmul %54, %56, %cst_39 {dimension_numbers = #tpu.dot_dimension_numbers<[1], [0], [0], [1], [0, 0, 1, 1], [], []>} : vector<16x32xf32>, vector<32x128xf32>, vector<16x128xf32> -> vector<16x128xf32>
    %58 = arith.addf %52, %57 : vector<16x128xf32>
    %c0_40 = arith.constant 0 : index
    %c3_41 = arith.constant 3 : index
    %c0_42 = arith.constant 0 : index
    %59 = vector.load %arg17[%c0_40, %c3_41, %c0_42] : memref<2x14x32xf32, #tpu.memory_space<vmem>>, vector<2x8x32xf32>
    %60 = vector.shape_cast %59 : vector<2x8x32xf32> to vector<16x32xf32>
    %c3_43 = arith.constant 3 : index
    %c0_44 = arith.constant 0 : index
    %c0_45 = arith.constant 0 : index
    %61 = vector.load %arg4[%c3_43, %c0_44, %c0_45] : memref<7x32x128xf32, #tpu.memory_space<vmem>>, vector<1x32x128xf32>
    %62 = vector.shape_cast %61 : vector<1x32x128xf32> to vector<32x128xf32>
    %cst_46 = arith.constant dense<0.000000e+00> : vector<16x128xf32>
    %63 = tpu.matmul %60, %62, %cst_46 {dimension_numbers = #tpu.dot_dimension_numbers<[1], [0], [0], [1], [0, 0, 1, 1], [], []>} : vector<16x32xf32>, vector<32x128xf32>, vector<16x128xf32> -> vector<16x128xf32>
    %64 = arith.addf %58, %63 : vector<16x128xf32>
    %c0_47 = arith.constant 0 : index
    %c4 = arith.constant 4 : index
    %c0_48 = arith.constant 0 : index
    %65 = vector.load %arg17[%c0_47, %c4, %c0_48] : memref<2x14x32xf32, #tpu.memory_space<vmem>>, vector<2x8x32xf32>
    %66 = vector.shape_cast %65 : vector<2x8x32xf32> to vector<16x32xf32>
    %c4_49 = arith.constant 4 : index
    %c0_50 = arith.constant 0 : index
    %c0_51 = arith.constant 0 : index
    %67 = vector.load %arg4[%c4_49, %c0_50, %c0_51] : memref<7x32x128xf32, #tpu.memory_space<vmem>>, vector<1x32x128xf32>
    %68 = vector.shape_cast %67 : vector<1x32x128xf32> to vector<32x128xf32>
    %cst_52 = arith.constant dense<0.000000e+00> : vector<16x128xf32>
    %69 = tpu.matmul %66, %68, %cst_52 {dimension_numbers = #tpu.dot_dimension_numbers<[1], [0], [0], [1], [0, 0, 1, 1], [], []>} : vector<16x32xf32>, vector<32x128xf32>, vector<16x128xf32> -> vector<16x128xf32>
    %70 = arith.addf %64, %69 : vector<16x128xf32>
    %c0_53 = arith.constant 0 : index
    %c5 = arith.constant 5 : index
    %c0_54 = arith.constant 0 : index
    %71 = vector.load %arg17[%c0_53, %c5, %c0_54] : memref<2x14x32xf32, #tpu.memory_space<vmem>>, vector<2x8x32xf32>
    %72 = vector.shape_cast %71 : vector<2x8x32xf32> to vector<16x32xf32>
    %c5_55 = arith.constant 5 : index
    %c0_56 = arith.constant 0 : index
    %c0_57 = arith.constant 0 : index
    %73 = vector.load %arg4[%c5_55, %c0_56, %c0_57] : memref<7x32x128xf32, #tpu.memory_space<vmem>>, vector<1x32x128xf32>
    %74 = vector.shape_cast %73 : vector<1x32x128xf32> to vector<32x128xf32>
    %cst_58 = arith.constant dense<0.000000e+00> : vector<16x128xf32>
    %75 = tpu.matmul %72, %74, %cst_58 {dimension_numbers = #tpu.dot_dimension_numbers<[1], [0], [0], [1], [0, 0, 1, 1], [], []>} : vector<16x32xf32>, vector<32x128xf32>, vector<16x128xf32> -> vector<16x128xf32>
    %76 = arith.addf %70, %75 : vector<16x128xf32>
    %c0_59 = arith.constant 0 : index
    %c6 = arith.constant 6 : index
    %c0_60 = arith.constant 0 : index
    %77 = vector.load %arg17[%c0_59, %c6, %c0_60] : memref<2x14x32xf32, #tpu.memory_space<vmem>>, vector<2x8x32xf32>
    %78 = vector.shape_cast %77 : vector<2x8x32xf32> to vector<16x32xf32>
    %c6_61 = arith.constant 6 : index
    %c0_62 = arith.constant 0 : index
    %c0_63 = arith.constant 0 : index
    %79 = vector.load %arg4[%c6_61, %c0_62, %c0_63] : memref<7x32x128xf32, #tpu.memory_space<vmem>>, vector<1x32x128xf32>
    %80 = vector.shape_cast %79 : vector<1x32x128xf32> to vector<32x128xf32>
    %cst_64 = arith.constant dense<0.000000e+00> : vector<16x128xf32>
    %81 = tpu.matmul %78, %80, %cst_64 {dimension_numbers = #tpu.dot_dimension_numbers<[1], [0], [0], [1], [0, 0, 1, 1], [], []>} : vector<16x32xf32>, vector<32x128xf32>, vector<16x128xf32> -> vector<16x128xf32>
    %82 = arith.addf %76, %81 : vector<16x128xf32>
    %c0_65 = arith.constant 0 : index
    %c0_66 = arith.constant 0 : index
    %83 = vector.load %arg5[%c0_65, %c0_66] : memref<1x128xf32, #tpu.memory_space<vmem>>, vector<1x128xf32>
    %84 = vector.broadcast %83 : vector<1x128xf32> to vector<16x128xf32>
    %85 = arith.addf %82, %84 : vector<16x128xf32>
    %c0_67 = arith.constant 0 : index
    %c0_68 = arith.constant 0 : index
    %86 = vector.load %arg6[%c0_67, %c0_68] : memref<128x128xf32, #tpu.memory_space<vmem>>, vector<128x128xf32>
    %cst_69 = arith.constant dense<0.000000e+00> : vector<16x128xf32>
    %87 = tpu.matmul %85, %86, %cst_69 {dimension_numbers = #tpu.dot_dimension_numbers<[1], [0], [0], [1], [0, 0, 1, 1], [], []>} : vector<16x128xf32>, vector<128x128xf32>, vector<16x128xf32> -> vector<16x128xf32>
    %c0_70 = arith.constant 0 : index
    %c0_71 = arith.constant 0 : index
    %c0_72 = arith.constant 0 : index
    %88 = vector.load %arg9[%c0_70, %c0_71, %c0_72] : memref<4x1x128xf32, #tpu.memory_space<vmem>>, vector<1x1x128xf32>
    %89 = vector.shape_cast %88 : vector<1x1x128xf32> to vector<1x128xf32>
    %90 = vector.broadcast %89 : vector<1x128xf32> to vector<16x128xf32>
    %91 = arith.addf %87, %90 : vector<16x128xf32>
    %cst_73 = arith.constant dense<0.000000e+00> : vector<16x128xf32>
    %92 = tpu.matmul %0, %91, %cst_73 {dimension_numbers = #tpu.dot_dimension_numbers<[1], [0], [0], [1], [0, 0, 1, 1], [], []>} : vector<16x16xf32>, vector<16x128xf32>, vector<16x128xf32> -> vector<16x128xf32>
    %93 = arith.select %19, %91, %92 : vector<16x128xi1>, vector<16x128xf32>
    %94 = vector.shape_cast %93 : vector<16x128xf32> to vector<2x8x128xf32>
    %c0_74 = arith.constant 0 : index
    %c0_75 = arith.constant 0 : index
    %c0_76 = arith.constant 0 : index
    %95 = vector.load %arg8[%c0_74, %c0_75, %c0_76] : memref<4x32x128xf32, #tpu.memory_space<vmem>>, vector<1x32x128xf32>
    %96 = vector.shape_cast %95 : vector<1x32x128xf32> to vector<32x128xf32>
    %cst_77 = arith.constant 0.000000e+00 : f32
    %97 = vector.broadcast %cst_77 : f32 to vector<2x32xf32>
    %cst_78 = arith.constant 0.000000e+00 : f32
    %98 = vector.broadcast %cst_78 : f32 to vector<2x32xf32>
    %99 = vector.extract_strided_slice %94 {offsets = [0, 0, 0], sizes = [2, 1, 128], strides = [1, 1, 1]} : vector<2x8x128xf32> to vector<2x1x128xf32>
    %100 = vector.shape_cast %99 : vector<2x1x128xf32> to vector<2x128xf32>
    %cst_79 = arith.constant dense<0.000000e+00> : vector<2x128xf32>
    %101 = tpu.matmul %97, %96, %cst_79 {dimension_numbers = #tpu.dot_dimension_numbers<[1], [0], [0], [1], [0, 0, 1, 1], [], []>} : vector<2x32xf32>, vector<32x128xf32>, vector<2x128xf32> -> vector<2x128xf32>
    %102 = arith.addf %100, %101 : vector<2x128xf32>
    %103 = arith.negf %102 : vector<2x128xf32>
    %104 = math.exp %103 : vector<2x128xf32>
    %cst_80 = arith.constant 1.000000e+00 : f32
    %105 = vector.broadcast %cst_80 : f32 to vector<2x128xf32>
    %106 = arith.addf %105, %104 : vector<2x128xf32>
    %107 = arith.divf %105, %106 : vector<2x128xf32>
    %108 = math.tanh %102 : vector<2x128xf32>
    %109 = vector.extract_strided_slice %107 {offsets = [0, 0], sizes = [2, 32], strides = [1, 1]} : vector<2x128xf32> to vector<2x32xf32>
    %110 = vector.extract_strided_slice %107 {offsets = [0, 32], sizes = [2, 32], strides = [1, 1]} : vector<2x128xf32> to vector<2x32xf32>
    %111 = vector.extract_strided_slice %107 {offsets = [0, 64], sizes = [2, 32], strides = [1, 1]} : vector<2x128xf32> to vector<2x32xf32>
    %112 = vector.extract_strided_slice %108 {offsets = [0, 96], sizes = [2, 32], strides = [1, 1]} : vector<2x128xf32> to vector<2x32xf32>
    %113 = arith.mulf %110, %98 : vector<2x32xf32>
    %114 = arith.mulf %109, %112 : vector<2x32xf32>
    %115 = arith.addf %113, %114 : vector<2x32xf32>
    %116 = math.tanh %115 : vector<2x32xf32>
    %117 = arith.mulf %111, %116 : vector<2x32xf32>
    %c0_81 = arith.constant 0 : index
    %c0_82 = arith.constant 0 : index
    %c0_83 = arith.constant 0 : index
    %118 = vector.load %arg16[%c0_81, %c0_82, %c0_83] : memref<2x8x32xf32, #tpu.memory_space<vmem>>, vector<2x1x32xf32>
    %119 = vector.shape_cast %118 : vector<2x1x32xf32> to vector<2x32xf32>
    %120 = vector.shape_cast %117 : vector<2x32xf32> to vector<2x1x32xf32>
    tpu.vector_store %arg16[%c0_81, %c0_82, %c0_83], %120 {strides = array<i32>} : memref<2x8x32xf32, #tpu.memory_space<vmem>>, vector<2x1x32xf32>,
    %121 = vector.extract_strided_slice %94 {offsets = [0, 1, 0], sizes = [2, 1, 128], strides = [1, 1, 1]} : vector<2x8x128xf32> to vector<2x1x128xf32>
    %122 = vector.shape_cast %121 : vector<2x1x128xf32> to vector<2x128xf32>
    %cst_84 = arith.constant dense<0.000000e+00> : vector<2x128xf32>
    %123 = tpu.matmul %117, %96, %cst_84 {dimension_numbers = #tpu.dot_dimension_numbers<[1], [0], [0], [1], [0, 0, 1, 1], [], []>} : vector<2x32xf32>, vector<32x128xf32>, vector<2x128xf32> -> vector<2x128xf32>
    %124 = arith.addf %122, %123 : vector<2x128xf32>
    %125 = arith.negf %124 : vector<2x128xf32>
    %126 = math.exp %125 : vector<2x128xf32>
    %cst_85 = arith.constant 1.000000e+00 : f32
    %127 = vector.broadcast %cst_85 : f32 to vector<2x128xf32>
    %128 = arith.addf %127, %126 : vector<2x128xf32>
    %129 = arith.divf %127, %128 : vector<2x128xf32>
    %130 = math.tanh %124 : vector<2x128xf32>
    %131 = vector.extract_strided_slice %129 {offsets = [0, 0], sizes = [2, 32], strides = [1, 1]} : vector<2x128xf32> to vector<2x32xf32>
    %132 = vector.extract_strided_slice %129 {offsets = [0, 32], sizes = [2, 32], strides = [1, 1]} : vector<2x128xf32> to vector<2x32xf32>
    %133 = vector.extract_strided_slice %129 {offsets = [0, 64], sizes = [2, 32], strides = [1, 1]} : vector<2x128xf32> to vector<2x32xf32>
    %134 = vector.extract_strided_slice %130 {offsets = [0, 96], sizes = [2, 32], strides = [1, 1]} : vector<2x128xf32> to vector<2x32xf32>
    %135 = arith.mulf %132, %115 : vector<2x32xf32>
    %136 = arith.mulf %131, %134 : vector<2x32xf32>
    %137 = arith.addf %135, %136 : vector<2x32xf32>
    %138 = math.tanh %137 : vector<2x32xf32>
    %139 = arith.mulf %133, %138 : vector<2x32xf32>
    %c0_86 = arith.constant 0 : index
    %c1_87 = arith.constant 1 : index
    %c0_88 = arith.constant 0 : index
    %140 = vector.load %arg16[%c0_86, %c1_87, %c0_88] : memref<2x8x32xf32, #tpu.memory_space<vmem>>, vector<2x1x32xf32>
    %141 = vector.shape_cast %140 : vector<2x1x32xf32> to vector<2x32xf32>
    %142 = vector.shape_cast %139 : vector<2x32xf32> to vector<2x1x32xf32>
    tpu.vector_store %arg16[%c0_86, %c1_87, %c0_88], %142 {strides = array<i32>} : memref<2x8x32xf32, #tpu.memory_space<vmem>>, vector<2x1x32xf32>,
    %143 = vector.extract_strided_slice %94 {offsets = [0, 2, 0], sizes = [2, 1, 128], strides = [1, 1, 1]} : vector<2x8x128xf32> to vector<2x1x128xf32>
    %144 = vector.shape_cast %143 : vector<2x1x128xf32> to vector<2x128xf32>
    %cst_89 = arith.constant dense<0.000000e+00> : vector<2x128xf32>
    %145 = tpu.matmul %139, %96, %cst_89 {dimension_numbers = #tpu.dot_dimension_numbers<[1], [0], [0], [1], [0, 0, 1, 1], [], []>} : vector<2x32xf32>, vector<32x128xf32>, vector<2x128xf32> -> vector<2x128xf32>
    %146 = arith.addf %144, %145 : vector<2x128xf32>
    %147 = arith.negf %146 : vector<2x128xf32>
    %148 = math.exp %147 : vector<2x128xf32>
    %cst_90 = arith.constant 1.000000e+00 : f32
    %149 = vector.broadcast %cst_90 : f32 to vector<2x128xf32>
    %150 = arith.addf %149, %148 : vector<2x128xf32>
    %151 = arith.divf %149, %150 : vector<2x128xf32>
    %152 = math.tanh %146 : vector<2x128xf32>
    %153 = vector.extract_strided_slice %151 {offsets = [0, 0], sizes = [2, 32], strides = [1, 1]} : vector<2x128xf32> to vector<2x32xf32>
    %154 = vector.extract_strided_slice %151 {offsets = [0, 32], sizes = [2, 32], strides = [1, 1]} : vector<2x128xf32> to vector<2x32xf32>
    %155 = vector.extract_strided_slice %151 {offsets = [0, 64], sizes = [2, 32], strides = [1, 1]} : vector<2x128xf32> to vector<2x32xf32>
    %156 = vector.extract_strided_slice %152 {offsets = [0, 96], sizes = [2, 32], strides = [1, 1]} : vector<2x128xf32> to vector<2x32xf32>
    %157 = arith.mulf %154, %137 : vector<2x32xf32>
    %158 = arith.mulf %153, %156 : vector<2x32xf32>
    %159 = arith.addf %157, %158 : vector<2x32xf32>
    %160 = math.tanh %159 : vector<2x32xf32>
    %161 = arith.mulf %155, %160 : vector<2x32xf32>
    %c0_91 = arith.constant 0 : index
    %c2_92 = arith.constant 2 : index
    %c0_93 = arith.constant 0 : index
    %162 = vector.load %arg16[%c0_91, %c2_92, %c0_93] : memref<2x8x32xf32, #tpu.memory_space<vmem>>, vector<2x1x32xf32>
    %163 = vector.shape_cast %162 : vector<2x1x32xf32> to vector<2x32xf32>
    %164 = vector.shape_cast %161 : vector<2x32xf32> to vector<2x1x32xf32>
    tpu.vector_store %arg16[%c0_91, %c2_92, %c0_93], %164 {strides = array<i32>} : memref<2x8x32xf32, #tpu.memory_space<vmem>>, vector<2x1x32xf32>,
    %165 = vector.extract_strided_slice %94 {offsets = [0, 3, 0], sizes = [2, 1, 128], strides = [1, 1, 1]} : vector<2x8x128xf32> to vector<2x1x128xf32>
    %166 = vector.shape_cast %165 : vector<2x1x128xf32> to vector<2x128xf32>
    %cst_94 = arith.constant dense<0.000000e+00> : vector<2x128xf32>
    %167 = tpu.matmul %161, %96, %cst_94 {dimension_numbers = #tpu.dot_dimension_numbers<[1], [0], [0], [1], [0, 0, 1, 1], [], []>} : vector<2x32xf32>, vector<32x128xf32>, vector<2x128xf32> -> vector<2x128xf32>
    %168 = arith.addf %166, %167 : vector<2x128xf32>
    %169 = arith.negf %168 : vector<2x128xf32>
    %170 = math.exp %169 : vector<2x128xf32>
    %cst_95 = arith.constant 1.000000e+00 : f32
    %171 = vector.broadcast %cst_95 : f32 to vector<2x128xf32>
    %172 = arith.addf %171, %170 : vector<2x128xf32>
    %173 = arith.divf %171, %172 : vector<2x128xf32>
    %174 = math.tanh %168 : vector<2x128xf32>
    %175 = vector.extract_strided_slice %173 {offsets = [0, 0], sizes = [2, 32], strides = [1, 1]} : vector<2x128xf32> to vector<2x32xf32>
    %176 = vector.extract_strided_slice %173 {offsets = [0, 32], sizes = [2, 32], strides = [1, 1]} : vector<2x128xf32> to vector<2x32xf32>
    %177 = vector.extract_strided_slice %173 {offsets = [0, 64], sizes = [2, 32], strides = [1, 1]} : vector<2x128xf32> to vector<2x32xf32>
    %178 = vector.extract_strided_slice %174 {offsets = [0, 96], sizes = [2, 32], strides = [1, 1]} : vector<2x128xf32> to vector<2x32xf32>
    %179 = arith.mulf %176, %159 : vector<2x32xf32>
    %180 = arith.mulf %175, %178 : vector<2x32xf32>
    %181 = arith.addf %179, %180 : vector<2x32xf32>
    %182 = math.tanh %181 : vector<2x32xf32>
    %183 = arith.mulf %177, %182 : vector<2x32xf32>
    %c0_96 = arith.constant 0 : index
    %c3_97 = arith.constant 3 : index
    %c0_98 = arith.constant 0 : index
    %184 = vector.load %arg16[%c0_96, %c3_97, %c0_98] : memref<2x8x32xf32, #tpu.memory_space<vmem>>, vector<2x1x32xf32>
    %185 = vector.shape_cast %184 : vector<2x1x32xf32> to vector<2x32xf32>
    %186 = vector.shape_cast %183 : vector<2x32xf32> to vector<2x1x32xf32>
    tpu.vector_store %arg16[%c0_96, %c3_97, %c0_98], %186 {strides = array<i32>} : memref<2x8x32xf32, #tpu.memory_space<vmem>>, vector<2x1x32xf32>,
    %187 = vector.extract_strided_slice %94 {offsets = [0, 4, 0], sizes = [2, 1, 128], strides = [1, 1, 1]} : vector<2x8x128xf32> to vector<2x1x128xf32>
    %188 = vector.shape_cast %187 : vector<2x1x128xf32> to vector<2x128xf32>
    %cst_99 = arith.constant dense<0.000000e+00> : vector<2x128xf32>
    %189 = tpu.matmul %183, %96, %cst_99 {dimension_numbers = #tpu.dot_dimension_numbers<[1], [0], [0], [1], [0, 0, 1, 1], [], []>} : vector<2x32xf32>, vector<32x128xf32>, vector<2x128xf32> -> vector<2x128xf32>
    %190 = arith.addf %188, %189 : vector<2x128xf32>
    %191 = arith.negf %190 : vector<2x128xf32>
    %192 = math.exp %191 : vector<2x128xf32>
    %cst_100 = arith.constant 1.000000e+00 : f32
    %193 = vector.broadcast %cst_100 : f32 to vector<2x128xf32>
    %194 = arith.addf %193, %192 : vector<2x128xf32>
    %195 = arith.divf %193, %194 : vector<2x128xf32>
    %196 = math.tanh %190 : vector<2x128xf32>
    %197 = vector.extract_strided_slice %195 {offsets = [0, 0], sizes = [2, 32], strides = [1, 1]} : vector<2x128xf32> to vector<2x32xf32>
    %198 = vector.extract_strided_slice %195 {offsets = [0, 32], sizes = [2, 32], strides = [1, 1]} : vector<2x128xf32> to vector<2x32xf32>
    %199 = vector.extract_strided_slice %195 {offsets = [0, 64], sizes = [2, 32], strides = [1, 1]} : vector<2x128xf32> to vector<2x32xf32>
    %200 = vector.extract_strided_slice %196 {offsets = [0, 96], sizes = [2, 32], strides = [1, 1]} : vector<2x128xf32> to vector<2x32xf32>
    %201 = arith.mulf %198, %181 : vector<2x32xf32>
    %202 = arith.mulf %197, %200 : vector<2x32xf32>
    %203 = arith.addf %201, %202 : vector<2x32xf32>
    %204 = math.tanh %203 : vector<2x32xf32>
    %205 = arith.mulf %199, %204 : vector<2x32xf32>
    %c0_101 = arith.constant 0 : index
    %c4_102 = arith.constant 4 : index
    %c0_103 = arith.constant 0 : index
    %206 = vector.load %arg16[%c0_101, %c4_102, %c0_103] : memref<2x8x32xf32, #tpu.memory_space<vmem>>, vector<2x1x32xf32>
    %207 = vector.shape_cast %206 : vector<2x1x32xf32> to vector<2x32xf32>
    %208 = vector.shape_cast %205 : vector<2x32xf32> to vector<2x1x32xf32>
    tpu.vector_store %arg16[%c0_101, %c4_102, %c0_103], %208 {strides = array<i32>} : memref<2x8x32xf32, #tpu.memory_space<vmem>>, vector<2x1x32xf32>,
    %209 = vector.extract_strided_slice %94 {offsets = [0, 5, 0], sizes = [2, 1, 128], strides = [1, 1, 1]} : vector<2x8x128xf32> to vector<2x1x128xf32>
    %210 = vector.shape_cast %209 : vector<2x1x128xf32> to vector<2x128xf32>
    %cst_104 = arith.constant dense<0.000000e+00> : vector<2x128xf32>
    %211 = tpu.matmul %205, %96, %cst_104 {dimension_numbers = #tpu.dot_dimension_numbers<[1], [0], [0], [1], [0, 0, 1, 1], [], []>} : vector<2x32xf32>, vector<32x128xf32>, vector<2x128xf32> -> vector<2x128xf32>
    %212 = arith.addf %210, %211 : vector<2x128xf32>
    %213 = arith.negf %212 : vector<2x128xf32>
    %214 = math.exp %213 : vector<2x128xf32>
    %cst_105 = arith.constant 1.000000e+00 : f32
    %215 = vector.broadcast %cst_105 : f32 to vector<2x128xf32>
    %216 = arith.addf %215, %214 : vector<2x128xf32>
    %217 = arith.divf %215, %216 : vector<2x128xf32>
    %218 = math.tanh %212 : vector<2x128xf32>
    %219 = vector.extract_strided_slice %217 {offsets = [0, 0], sizes = [2, 32], strides = [1, 1]} : vector<2x128xf32> to vector<2x32xf32>
    %220 = vector.extract_strided_slice %217 {offsets = [0, 32], sizes = [2, 32], strides = [1, 1]} : vector<2x128xf32> to vector<2x32xf32>
    %221 = vector.extract_strided_slice %217 {offsets = [0, 64], sizes = [2, 32], strides = [1, 1]} : vector<2x128xf32> to vector<2x32xf32>
    %222 = vector.extract_strided_slice %218 {offsets = [0, 96], sizes = [2, 32], strides = [1, 1]} : vector<2x128xf32> to vector<2x32xf32>
    %223 = arith.mulf %220, %203 : vector<2x32xf32>
    %224 = arith.mulf %219, %222 : vector<2x32xf32>
    %225 = arith.addf %223, %224 : vector<2x32xf32>
    %226 = math.tanh %225 : vector<2x32xf32>
    %227 = arith.mulf %221, %226 : vector<2x32xf32>
    %c0_106 = arith.constant 0 : index
    %c5_107 = arith.constant 5 : index
    %c0_108 = arith.constant 0 : index
    %228 = vector.load %arg16[%c0_106, %c5_107, %c0_108] : memref<2x8x32xf32, #tpu.memory_space<vmem>>, vector<2x1x32xf32>
    %229 = vector.shape_cast %228 : vector<2x1x32xf32> to vector<2x32xf32>
    %230 = vector.shape_cast %227 : vector<2x32xf32> to vector<2x1x32xf32>
    tpu.vector_store %arg16[%c0_106, %c5_107, %c0_108], %230 {strides = array<i32>} : memref<2x8x32xf32, #tpu.memory_space<vmem>>, vector<2x1x32xf32>,
    %231 = vector.extract_strided_slice %94 {offsets = [0, 6, 0], sizes = [2, 1, 128], strides = [1, 1, 1]} : vector<2x8x128xf32> to vector<2x1x128xf32>
    %232 = vector.shape_cast %231 : vector<2x1x128xf32> to vector<2x128xf32>
    %cst_109 = arith.constant dense<0.000000e+00> : vector<2x128xf32>
    %233 = tpu.matmul %227, %96, %cst_109 {dimension_numbers = #tpu.dot_dimension_numbers<[1], [0], [0], [1], [0, 0, 1, 1], [], []>} : vector<2x32xf32>, vector<32x128xf32>, vector<2x128xf32> -> vector<2x128xf32>
    %234 = arith.addf %232, %233 : vector<2x128xf32>
    %235 = arith.negf %234 : vector<2x128xf32>
    %236 = math.exp %235 : vector<2x128xf32>
    %cst_110 = arith.constant 1.000000e+00 : f32
    %237 = vector.broadcast %cst_110 : f32 to vector<2x128xf32>
    %238 = arith.addf %237, %236 : vector<2x128xf32>
    %239 = arith.divf %237, %238 : vector<2x128xf32>
    %240 = math.tanh %234 : vector<2x128xf32>
    %241 = vector.extract_strided_slice %239 {offsets = [0, 0], sizes = [2, 32], strides = [1, 1]} : vector<2x128xf32> to vector<2x32xf32>
    %242 = vector.extract_strided_slice %239 {offsets = [0, 32], sizes = [2, 32], strides = [1, 1]} : vector<2x128xf32> to vector<2x32xf32>
    %243 = vector.extract_strided_slice %239 {offsets = [0, 64], sizes = [2, 32], strides = [1, 1]} : vector<2x128xf32> to vector<2x32xf32>
    %244 = vector.extract_strided_slice %240 {offsets = [0, 96], sizes = [2, 32], strides = [1, 1]} : vector<2x128xf32> to vector<2x32xf32>
    %245 = arith.mulf %242, %225 : vector<2x32xf32>
    %246 = arith.mulf %241, %244 : vector<2x32xf32>
    %247 = arith.addf %245, %246 : vector<2x32xf32>
    %248 = math.tanh %247 : vector<2x32xf32>
    %249 = arith.mulf %243, %248 : vector<2x32xf32>
    %c0_111 = arith.constant 0 : index
    %c6_112 = arith.constant 6 : index
    %c0_113 = arith.constant 0 : index
    %250 = vector.load %arg16[%c0_111, %c6_112, %c0_113] : memref<2x8x32xf32, #tpu.memory_space<vmem>>, vector<2x1x32xf32>
    %251 = vector.shape_cast %250 : vector<2x1x32xf32> to vector<2x32xf32>
    %252 = vector.shape_cast %249 : vector<2x32xf32> to vector<2x1x32xf32>
    tpu.vector_store %arg16[%c0_111, %c6_112, %c0_113], %252 {strides = array<i32>} : memref<2x8x32xf32, #tpu.memory_space<vmem>>, vector<2x1x32xf32>,
    %253 = vector.extract_strided_slice %94 {offsets = [0, 7, 0], sizes = [2, 1, 128], strides = [1, 1, 1]} : vector<2x8x128xf32> to vector<2x1x128xf32>
    %254 = vector.shape_cast %253 : vector<2x1x128xf32> to vector<2x128xf32>
    %cst_114 = arith.constant dense<0.000000e+00> : vector<2x128xf32>
    %255 = tpu.matmul %249, %96, %cst_114 {dimension_numbers = #tpu.dot_dimension_numbers<[1], [0], [0], [1], [0, 0, 1, 1], [], []>} : vector<2x32xf32>, vector<32x128xf32>, vector<2x128xf32> -> vector<2x128xf32>
    %256 = arith.addf %254, %255 : vector<2x128xf32>
    %257 = arith.negf %256 : vector<2x128xf32>
    %258 = math.exp %257 : vector<2x128xf32>
    %cst_115 = arith.constant 1.000000e+00 : f32
    %259 = vector.broadcast %cst_115 : f32 to vector<2x128xf32>
    %260 = arith.addf %259, %258 : vector<2x128xf32>
    %261 = arith.divf %259, %260 : vector<2x128xf32>
    %262 = math.tanh %256 : vector<2x128xf32>
    %263 = vector.extract_strided_slice %261 {offsets = [0, 0], sizes = [2, 32], strides = [1, 1]} : vector<2x128xf32> to vector<2x32xf32>
    %264 = vector.extract_strided_slice %261 {offsets = [0, 32], sizes = [2, 32], strides = [1, 1]} : vector<2x128xf32> to vector<2x32xf32>
    %265 = vector.extract_strided_slice %261 {offsets = [0, 64], sizes = [2, 32], strides = [1, 1]} : vector<2x128xf32> to vector<2x32xf32>
    %266 = vector.extract_strided_slice %262 {offsets = [0, 96], sizes = [2, 32], strides = [1, 1]} : vector<2x128xf32> to vector<2x32xf32>
    %267 = arith.mulf %264, %247 : vector<2x32xf32>
    %268 = arith.mulf %263, %266 : vector<2x32xf32>
    %269 = arith.addf %267, %268 : vector<2x32xf32>
    %270 = math.tanh %269 : vector<2x32xf32>
    %271 = arith.mulf %265, %270 : vector<2x32xf32>
    %c0_116 = arith.constant 0 : index
    %c7 = arith.constant 7 : index
    %c0_117 = arith.constant 0 : index
    %272 = vector.load %arg16[%c0_116, %c7, %c0_117] : memref<2x8x32xf32, #tpu.memory_space<vmem>>, vector<2x1x32xf32>
    %273 = vector.shape_cast %272 : vector<2x1x32xf32> to vector<2x32xf32>
    %274 = vector.shape_cast %271 : vector<2x32xf32> to vector<2x1x32xf32>
    tpu.vector_store %arg16[%c0_116, %c7, %c0_117], %274 {strides = array<i32>} : memref<2x8x32xf32, #tpu.memory_space<vmem>>, vector<2x1x32xf32>,
    %c0_118 = arith.constant 0 : index
    %c0_119 = arith.constant 0 : index
    %c0_120 = arith.constant 0 : index
    %275 = vector.load %arg16[%c0_118, %c0_119, %c0_120] : memref<2x8x32xf32, #tpu.memory_space<vmem>>, vector<2x8x32xf32>
    %276 = vector.shape_cast %275 : vector<2x8x32xf32> to vector<16x32xf32>
    %cst_121 = arith.constant dense<0.000000e+00> : vector<16x32xf32>
    %277 = tpu.matmul %0, %276, %cst_121 {dimension_numbers = #tpu.dot_dimension_numbers<[1], [0], [0], [1], [0, 0, 1, 1], [], []>} : vector<16x16xf32>, vector<16x32xf32>, vector<16x32xf32> -> vector<16x32xf32>
    %278 = arith.select %22, %276, %277 : vector<16x32xi1>, vector<16x32xf32>
    %c0_122 = arith.constant 0 : index
    %c0_123 = arith.constant 0 : index
    %c0_124 = arith.constant 0 : index
    %279 = vector.load %arg7[%c0_122, %c0_123, %c0_124] : memref<3x32x128xf32, #tpu.memory_space<vmem>>, vector<1x32x128xf32>
    %280 = vector.shape_cast %279 : vector<1x32x128xf32> to vector<32x128xf32>
    %cst_125 = arith.constant dense<0.000000e+00> : vector<16x128xf32>
    %281 = tpu.matmul %278, %280, %cst_125 {dimension_numbers = #tpu.dot_dimension_numbers<[1], [0], [0], [1], [0, 0, 1, 1], [], []>} : vector<16x32xf32>, vector<32x128xf32>, vector<16x128xf32> -> vector<16x128xf32>
    %c1_126 = arith.constant 1 : index
    %c0_127 = arith.constant 0 : index
    %c0_128 = arith.constant 0 : index
    %282 = vector.load %arg9[%c1_126, %c0_127, %c0_128] : memref<4x1x128xf32, #tpu.memory_space<vmem>>, vector<1x1x128xf32>
    %283 = vector.shape_cast %282 : vector<1x1x128xf32> to vector<1x128xf32>
    %284 = vector.broadcast %283 : vector<1x128xf32> to vector<16x128xf32>
    %285 = arith.addf %281, %284 : vector<16x128xf32>
    %cst_129 = arith.constant dense<0.000000e+00> : vector<16x128xf32>
    %286 = tpu.matmul %0, %285, %cst_129 {dimension_numbers = #tpu.dot_dimension_numbers<[1], [0], [0], [1], [0, 0, 1, 1], [], []>} : vector<16x16xf32>, vector<16x128xf32>, vector<16x128xf32> -> vector<16x128xf32>
    %287 = arith.select %19, %285, %286 : vector<16x128xi1>, vector<16x128xf32>
    %288 = vector.shape_cast %287 : vector<16x128xf32> to vector<2x8x128xf32>
    %c1_130 = arith.constant 1 : index
    %c0_131 = arith.constant 0 : index
    %c0_132 = arith.constant 0 : index
    %289 = vector.load %arg8[%c1_130, %c0_131, %c0_132] : memref<4x32x128xf32, #tpu.memory_space<vmem>>, vector<1x32x128xf32>
    %290 = vector.shape_cast %289 : vector<1x32x128xf32> to vector<32x128xf32>
    %cst_133 = arith.constant 0.000000e+00 : f32
    %291 = vector.broadcast %cst_133 : f32 to vector<2x32xf32>
    %cst_134 = arith.constant 0.000000e+00 : f32
    %292 = vector.broadcast %cst_134 : f32 to vector<2x32xf32>
    %293 = vector.extract_strided_slice %288 {offsets = [0, 0, 0], sizes = [2, 1, 128], strides = [1, 1, 1]} : vector<2x8x128xf32> to vector<2x1x128xf32>
    %294 = vector.shape_cast %293 : vector<2x1x128xf32> to vector<2x128xf32>
    %cst_135 = arith.constant dense<0.000000e+00> : vector<2x128xf32>
    %295 = tpu.matmul %291, %290, %cst_135 {dimension_numbers = #tpu.dot_dimension_numbers<[1], [0], [0], [1], [0, 0, 1, 1], [], []>} : vector<2x32xf32>, vector<32x128xf32>, vector<2x128xf32> -> vector<2x128xf32>
    %296 = arith.addf %294, %295 : vector<2x128xf32>
    %297 = arith.negf %296 : vector<2x128xf32>
    %298 = math.exp %297 : vector<2x128xf32>
    %cst_136 = arith.constant 1.000000e+00 : f32
    %299 = vector.broadcast %cst_136 : f32 to vector<2x128xf32>
    %300 = arith.addf %299, %298 : vector<2x128xf32>
    %301 = arith.divf %299, %300 : vector<2x128xf32>
    %302 = math.tanh %296 : vector<2x128xf32>
    %303 = vector.extract_strided_slice %301 {offsets = [0, 0], sizes = [2, 32], strides = [1, 1]} : vector<2x128xf32> to vector<2x32xf32>
    %304 = vector.extract_strided_slice %301 {offsets = [0, 32], sizes = [2, 32], strides = [1, 1]} : vector<2x128xf32> to vector<2x32xf32>
    %305 = vector.extract_strided_slice %301 {offsets = [0, 64], sizes = [2, 32], strides = [1, 1]} : vector<2x128xf32> to vector<2x32xf32>
    %306 = vector.extract_strided_slice %302 {offsets = [0, 96], sizes = [2, 32], strides = [1, 1]} : vector<2x128xf32> to vector<2x32xf32>
    %307 = arith.mulf %304, %292 : vector<2x32xf32>
    %308 = arith.mulf %303, %306 : vector<2x32xf32>
    %309 = arith.addf %307, %308 : vector<2x32xf32>
    %310 = math.tanh %309 : vector<2x32xf32>
    %311 = arith.mulf %305, %310 : vector<2x32xf32>
    %c0_137 = arith.constant 0 : index
    %c0_138 = arith.constant 0 : index
    %c0_139 = arith.constant 0 : index
    %312 = vector.load %arg16[%c0_137, %c0_138, %c0_139] : memref<2x8x32xf32, #tpu.memory_space<vmem>>, vector<2x1x32xf32>
    %313 = vector.shape_cast %312 : vector<2x1x32xf32> to vector<2x32xf32>
    %314 = vector.shape_cast %311 : vector<2x32xf32> to vector<2x1x32xf32>
    tpu.vector_store %arg16[%c0_137, %c0_138, %c0_139], %314 {strides = array<i32>} : memref<2x8x32xf32, #tpu.memory_space<vmem>>, vector<2x1x32xf32>,
    %315 = vector.extract_strided_slice %288 {offsets = [0, 1, 0], sizes = [2, 1, 128], strides = [1, 1, 1]} : vector<2x8x128xf32> to vector<2x1x128xf32>
    %316 = vector.shape_cast %315 : vector<2x1x128xf32> to vector<2x128xf32>
    %cst_140 = arith.constant dense<0.000000e+00> : vector<2x128xf32>
    %317 = tpu.matmul %311, %290, %cst_140 {dimension_numbers = #tpu.dot_dimension_numbers<[1], [0], [0], [1], [0, 0, 1, 1], [], []>} : vector<2x32xf32>, vector<32x128xf32>, vector<2x128xf32> -> vector<2x128xf32>
    %318 = arith.addf %316, %317 : vector<2x128xf32>
    %319 = arith.negf %318 : vector<2x128xf32>
    %320 = math.exp %319 : vector<2x128xf32>
    %cst_141 = arith.constant 1.000000e+00 : f32
    %321 = vector.broadcast %cst_141 : f32 to vector<2x128xf32>
    %322 = arith.addf %321, %320 : vector<2x128xf32>
    %323 = arith.divf %321, %322 : vector<2x128xf32>
    %324 = math.tanh %318 : vector<2x128xf32>
    %325 = vector.extract_strided_slice %323 {offsets = [0, 0], sizes = [2, 32], strides = [1, 1]} : vector<2x128xf32> to vector<2x32xf32>
    %326 = vector.extract_strided_slice %323 {offsets = [0, 32], sizes = [2, 32], strides = [1, 1]} : vector<2x128xf32> to vector<2x32xf32>
    %327 = vector.extract_strided_slice %323 {offsets = [0, 64], sizes = [2, 32], strides = [1, 1]} : vector<2x128xf32> to vector<2x32xf32>
    %328 = vector.extract_strided_slice %324 {offsets = [0, 96], sizes = [2, 32], strides = [1, 1]} : vector<2x128xf32> to vector<2x32xf32>
    %329 = arith.mulf %326, %309 : vector<2x32xf32>
    %330 = arith.mulf %325, %328 : vector<2x32xf32>
    %331 = arith.addf %329, %330 : vector<2x32xf32>
    %332 = math.tanh %331 : vector<2x32xf32>
    %333 = arith.mulf %327, %332 : vector<2x32xf32>
    %c0_142 = arith.constant 0 : index
    %c1_143 = arith.constant 1 : index
    %c0_144 = arith.constant 0 : index
    %334 = vector.load %arg16[%c0_142, %c1_143, %c0_144] : memref<2x8x32xf32, #tpu.memory_space<vmem>>, vector<2x1x32xf32>
    %335 = vector.shape_cast %334 : vector<2x1x32xf32> to vector<2x32xf32>
    %336 = vector.shape_cast %333 : vector<2x32xf32> to vector<2x1x32xf32>
    tpu.vector_store %arg16[%c0_142, %c1_143, %c0_144], %336 {strides = array<i32>} : memref<2x8x32xf32, #tpu.memory_space<vmem>>, vector<2x1x32xf32>,
    %337 = vector.extract_strided_slice %288 {offsets = [0, 2, 0], sizes = [2, 1, 128], strides = [1, 1, 1]} : vector<2x8x128xf32> to vector<2x1x128xf32>
    %338 = vector.shape_cast %337 : vector<2x1x128xf32> to vector<2x128xf32>
    %cst_145 = arith.constant dense<0.000000e+00> : vector<2x128xf32>
    %339 = tpu.matmul %333, %290, %cst_145 {dimension_numbers = #tpu.dot_dimension_numbers<[1], [0], [0], [1], [0, 0, 1, 1], [], []>} : vector<2x32xf32>, vector<32x128xf32>, vector<2x128xf32> -> vector<2x128xf32>
    %340 = arith.addf %338, %339 : vector<2x128xf32>
    %341 = arith.negf %340 : vector<2x128xf32>
    %342 = math.exp %341 : vector<2x128xf32>
    %cst_146 = arith.constant 1.000000e+00 : f32
    %343 = vector.broadcast %cst_146 : f32 to vector<2x128xf32>
    %344 = arith.addf %343, %342 : vector<2x128xf32>
    %345 = arith.divf %343, %344 : vector<2x128xf32>
    %346 = math.tanh %340 : vector<2x128xf32>
    %347 = vector.extract_strided_slice %345 {offsets = [0, 0], sizes = [2, 32], strides = [1, 1]} : vector<2x128xf32> to vector<2x32xf32>
    %348 = vector.extract_strided_slice %345 {offsets = [0, 32], sizes = [2, 32], strides = [1, 1]} : vector<2x128xf32> to vector<2x32xf32>
    %349 = vector.extract_strided_slice %345 {offsets = [0, 64], sizes = [2, 32], strides = [1, 1]} : vector<2x128xf32> to vector<2x32xf32>
    %350 = vector.extract_strided_slice %346 {offsets = [0, 96], sizes = [2, 32], strides = [1, 1]} : vector<2x128xf32> to vector<2x32xf32>
    %351 = arith.mulf %348, %331 : vector<2x32xf32>
    %352 = arith.mulf %347, %350 : vector<2x32xf32>
    %353 = arith.addf %351, %352 : vector<2x32xf32>
    %354 = math.tanh %353 : vector<2x32xf32>
    %355 = arith.mulf %349, %354 : vector<2x32xf32>
    %c0_147 = arith.constant 0 : index
    %c2_148 = arith.constant 2 : index
    %c0_149 = arith.constant 0 : index
    %356 = vector.load %arg16[%c0_147, %c2_148, %c0_149] : memref<2x8x32xf32, #tpu.memory_space<vmem>>, vector<2x1x32xf32>
    %357 = vector.shape_cast %356 : vector<2x1x32xf32> to vector<2x32xf32>
    %358 = vector.shape_cast %355 : vector<2x32xf32> to vector<2x1x32xf32>
    tpu.vector_store %arg16[%c0_147, %c2_148, %c0_149], %358 {strides = array<i32>} : memref<2x8x32xf32, #tpu.memory_space<vmem>>, vector<2x1x32xf32>,
    %359 = vector.extract_strided_slice %288 {offsets = [0, 3, 0], sizes = [2, 1, 128], strides = [1, 1, 1]} : vector<2x8x128xf32> to vector<2x1x128xf32>
    %360 = vector.shape_cast %359 : vector<2x1x128xf32> to vector<2x128xf32>
    %cst_150 = arith.constant dense<0.000000e+00> : vector<2x128xf32>
    %361 = tpu.matmul %355, %290, %cst_150 {dimension_numbers = #tpu.dot_dimension_numbers<[1], [0], [0], [1], [0, 0, 1, 1], [], []>} : vector<2x32xf32>, vector<32x128xf32>, vector<2x128xf32> -> vector<2x128xf32>
    %362 = arith.addf %360, %361 : vector<2x128xf32>
    %363 = arith.negf %362 : vector<2x128xf32>
    %364 = math.exp %363 : vector<2x128xf32>
    %cst_151 = arith.constant 1.000000e+00 : f32
    %365 = vector.broadcast %cst_151 : f32 to vector<2x128xf32>
    %366 = arith.addf %365, %364 : vector<2x128xf32>
    %367 = arith.divf %365, %366 : vector<2x128xf32>
    %368 = math.tanh %362 : vector<2x128xf32>
    %369 = vector.extract_strided_slice %367 {offsets = [0, 0], sizes = [2, 32], strides = [1, 1]} : vector<2x128xf32> to vector<2x32xf32>
    %370 = vector.extract_strided_slice %367 {offsets = [0, 32], sizes = [2, 32], strides = [1, 1]} : vector<2x128xf32> to vector<2x32xf32>
    %371 = vector.extract_strided_slice %367 {offsets = [0, 64], sizes = [2, 32], strides = [1, 1]} : vector<2x128xf32> to vector<2x32xf32>
    %372 = vector.extract_strided_slice %368 {offsets = [0, 96], sizes = [2, 32], strides = [1, 1]} : vector<2x128xf32> to vector<2x32xf32>
    %373 = arith.mulf %370, %353 : vector<2x32xf32>
    %374 = arith.mulf %369, %372 : vector<2x32xf32>
    %375 = arith.addf %373, %374 : vector<2x32xf32>
    %376 = math.tanh %375 : vector<2x32xf32>
    %377 = arith.mulf %371, %376 : vector<2x32xf32>
    %c0_152 = arith.constant 0 : index
    %c3_153 = arith.constant 3 : index
    %c0_154 = arith.constant 0 : index
    %378 = vector.load %arg16[%c0_152, %c3_153, %c0_154] : memref<2x8x32xf32, #tpu.memory_space<vmem>>, vector<2x1x32xf32>
    %379 = vector.shape_cast %378 : vector<2x1x32xf32> to vector<2x32xf32>
    %380 = vector.shape_cast %377 : vector<2x32xf32> to vector<2x1x32xf32>
    tpu.vector_store %arg16[%c0_152, %c3_153, %c0_154], %380 {strides = array<i32>} : memref<2x8x32xf32, #tpu.memory_space<vmem>>, vector<2x1x32xf32>,
    %381 = vector.extract_strided_slice %288 {offsets = [0, 4, 0], sizes = [2, 1, 128], strides = [1, 1, 1]} : vector<2x8x128xf32> to vector<2x1x128xf32>
    %382 = vector.shape_cast %381 : vector<2x1x128xf32> to vector<2x128xf32>
    %cst_155 = arith.constant dense<0.000000e+00> : vector<2x128xf32>
    %383 = tpu.matmul %377, %290, %cst_155 {dimension_numbers = #tpu.dot_dimension_numbers<[1], [0], [0], [1], [0, 0, 1, 1], [], []>} : vector<2x32xf32>, vector<32x128xf32>, vector<2x128xf32> -> vector<2x128xf32>
    %384 = arith.addf %382, %383 : vector<2x128xf32>
    %385 = arith.negf %384 : vector<2x128xf32>
    %386 = math.exp %385 : vector<2x128xf32>
    %cst_156 = arith.constant 1.000000e+00 : f32
    %387 = vector.broadcast %cst_156 : f32 to vector<2x128xf32>
    %388 = arith.addf %387, %386 : vector<2x128xf32>
    %389 = arith.divf %387, %388 : vector<2x128xf32>
    %390 = math.tanh %384 : vector<2x128xf32>
    %391 = vector.extract_strided_slice %389 {offsets = [0, 0], sizes = [2, 32], strides = [1, 1]} : vector<2x128xf32> to vector<2x32xf32>
    %392 = vector.extract_strided_slice %389 {offsets = [0, 32], sizes = [2, 32], strides = [1, 1]} : vector<2x128xf32> to vector<2x32xf32>
    %393 = vector.extract_strided_slice %389 {offsets = [0, 64], sizes = [2, 32], strides = [1, 1]} : vector<2x128xf32> to vector<2x32xf32>
    %394 = vector.extract_strided_slice %390 {offsets = [0, 96], sizes = [2, 32], strides = [1, 1]} : vector<2x128xf32> to vector<2x32xf32>
    %395 = arith.mulf %392, %375 : vector<2x32xf32>
    %396 = arith.mulf %391, %394 : vector<2x32xf32>
    %397 = arith.addf %395, %396 : vector<2x32xf32>
    %398 = math.tanh %397 : vector<2x32xf32>
    %399 = arith.mulf %393, %398 : vector<2x32xf32>
    %c0_157 = arith.constant 0 : index
    %c4_158 = arith.constant 4 : index
    %c0_159 = arith.constant 0 : index
    %400 = vector.load %arg16[%c0_157, %c4_158, %c0_159] : memref<2x8x32xf32, #tpu.memory_space<vmem>>, vector<2x1x32xf32>
    %401 = vector.shape_cast %400 : vector<2x1x32xf32> to vector<2x32xf32>
    %402 = vector.shape_cast %399 : vector<2x32xf32> to vector<2x1x32xf32>
    tpu.vector_store %arg16[%c0_157, %c4_158, %c0_159], %402 {strides = array<i32>} : memref<2x8x32xf32, #tpu.memory_space<vmem>>, vector<2x1x32xf32>,
    %403 = vector.extract_strided_slice %288 {offsets = [0, 5, 0], sizes = [2, 1, 128], strides = [1, 1, 1]} : vector<2x8x128xf32> to vector<2x1x128xf32>
    %404 = vector.shape_cast %403 : vector<2x1x128xf32> to vector<2x128xf32>
    %cst_160 = arith.constant dense<0.000000e+00> : vector<2x128xf32>
    %405 = tpu.matmul %399, %290, %cst_160 {dimension_numbers = #tpu.dot_dimension_numbers<[1], [0], [0], [1], [0, 0, 1, 1], [], []>} : vector<2x32xf32>, vector<32x128xf32>, vector<2x128xf32> -> vector<2x128xf32>
    %406 = arith.addf %404, %405 : vector<2x128xf32>
    %407 = arith.negf %406 : vector<2x128xf32>
    %408 = math.exp %407 : vector<2x128xf32>
    %cst_161 = arith.constant 1.000000e+00 : f32
    %409 = vector.broadcast %cst_161 : f32 to vector<2x128xf32>
    %410 = arith.addf %409, %408 : vector<2x128xf32>
    %411 = arith.divf %409, %410 : vector<2x128xf32>
    %412 = math.tanh %406 : vector<2x128xf32>
    %413 = vector.extract_strided_slice %411 {offsets = [0, 0], sizes = [2, 32], strides = [1, 1]} : vector<2x128xf32> to vector<2x32xf32>
    %414 = vector.extract_strided_slice %411 {offsets = [0, 32], sizes = [2, 32], strides = [1, 1]} : vector<2x128xf32> to vector<2x32xf32>
    %415 = vector.extract_strided_slice %411 {offsets = [0, 64], sizes = [2, 32], strides = [1, 1]} : vector<2x128xf32> to vector<2x32xf32>
    %416 = vector.extract_strided_slice %412 {offsets = [0, 96], sizes = [2, 32], strides = [1, 1]} : vector<2x128xf32> to vector<2x32xf32>
    %417 = arith.mulf %414, %397 : vector<2x32xf32>
    %418 = arith.mulf %413, %416 : vector<2x32xf32>
    %419 = arith.addf %417, %418 : vector<2x32xf32>
    %420 = math.tanh %419 : vector<2x32xf32>
    %421 = arith.mulf %415, %420 : vector<2x32xf32>
    %c0_162 = arith.constant 0 : index
    %c5_163 = arith.constant 5 : index
    %c0_164 = arith.constant 0 : index
    %422 = vector.load %arg16[%c0_162, %c5_163, %c0_164] : memref<2x8x32xf32, #tpu.memory_space<vmem>>, vector<2x1x32xf32>
    %423 = vector.shape_cast %422 : vector<2x1x32xf32> to vector<2x32xf32>
    %424 = vector.shape_cast %421 : vector<2x32xf32> to vector<2x1x32xf32>
    tpu.vector_store %arg16[%c0_162, %c5_163, %c0_164], %424 {strides = array<i32>} : memref<2x8x32xf32, #tpu.memory_space<vmem>>, vector<2x1x32xf32>,
    %425 = vector.extract_strided_slice %288 {offsets = [0, 6, 0], sizes = [2, 1, 128], strides = [1, 1, 1]} : vector<2x8x128xf32> to vector<2x1x128xf32>
    %426 = vector.shape_cast %425 : vector<2x1x128xf32> to vector<2x128xf32>
    %cst_165 = arith.constant dense<0.000000e+00> : vector<2x128xf32>
    %427 = tpu.matmul %421, %290, %cst_165 {dimension_numbers = #tpu.dot_dimension_numbers<[1], [0], [0], [1], [0, 0, 1, 1], [], []>} : vector<2x32xf32>, vector<32x128xf32>, vector<2x128xf32> -> vector<2x128xf32>
    %428 = arith.addf %426, %427 : vector<2x128xf32>
    %429 = arith.negf %428 : vector<2x128xf32>
    %430 = math.exp %429 : vector<2x128xf32>
    %cst_166 = arith.constant 1.000000e+00 : f32
    %431 = vector.broadcast %cst_166 : f32 to vector<2x128xf32>
    %432 = arith.addf %431, %430 : vector<2x128xf32>
    %433 = arith.divf %431, %432 : vector<2x128xf32>
    %434 = math.tanh %428 : vector<2x128xf32>
    %435 = vector.extract_strided_slice %433 {offsets = [0, 0], sizes = [2, 32], strides = [1, 1]} : vector<2x128xf32> to vector<2x32xf32>
    %436 = vector.extract_strided_slice %433 {offsets = [0, 32], sizes = [2, 32], strides = [1, 1]} : vector<2x128xf32> to vector<2x32xf32>
    %437 = vector.extract_strided_slice %433 {offsets = [0, 64], sizes = [2, 32], strides = [1, 1]} : vector<2x128xf32> to vector<2x32xf32>
    %438 = vector.extract_strided_slice %434 {offsets = [0, 96], sizes = [2, 32], strides = [1, 1]} : vector<2x128xf32> to vector<2x32xf32>
    %439 = arith.mulf %436, %419 : vector<2x32xf32>
    %440 = arith.mulf %435, %438 : vector<2x32xf32>
    %441 = arith.addf %439, %440 : vector<2x32xf32>
    %442 = math.tanh %441 : vector<2x32xf32>
    %443 = arith.mulf %437, %442 : vector<2x32xf32>
    %c0_167 = arith.constant 0 : index
    %c6_168 = arith.constant 6 : index
    %c0_169 = arith.constant 0 : index
    %444 = vector.load %arg16[%c0_167, %c6_168, %c0_169] : memref<2x8x32xf32, #tpu.memory_space<vmem>>, vector<2x1x32xf32>
    %445 = vector.shape_cast %444 : vector<2x1x32xf32> to vector<2x32xf32>
    %446 = vector.shape_cast %443 : vector<2x32xf32> to vector<2x1x32xf32>
    tpu.vector_store %arg16[%c0_167, %c6_168, %c0_169], %446 {strides = array<i32>} : memref<2x8x32xf32, #tpu.memory_space<vmem>>, vector<2x1x32xf32>,
    %447 = vector.extract_strided_slice %288 {offsets = [0, 7, 0], sizes = [2, 1, 128], strides = [1, 1, 1]} : vector<2x8x128xf32> to vector<2x1x128xf32>
    %448 = vector.shape_cast %447 : vector<2x1x128xf32> to vector<2x128xf32>
    %cst_170 = arith.constant dense<0.000000e+00> : vector<2x128xf32>
    %449 = tpu.matmul %443, %290, %cst_170 {dimension_numbers = #tpu.dot_dimension_numbers<[1], [0], [0], [1], [0, 0, 1, 1], [], []>} : vector<2x32xf32>, vector<32x128xf32>, vector<2x128xf32> -> vector<2x128xf32>
    %450 = arith.addf %448, %449 : vector<2x128xf32>
    %451 = arith.negf %450 : vector<2x128xf32>
    %452 = math.exp %451 : vector<2x128xf32>
    %cst_171 = arith.constant 1.000000e+00 : f32
    %453 = vector.broadcast %cst_171 : f32 to vector<2x128xf32>
    %454 = arith.addf %453, %452 : vector<2x128xf32>
    %455 = arith.divf %453, %454 : vector<2x128xf32>
    %456 = math.tanh %450 : vector<2x128xf32>
    %457 = vector.extract_strided_slice %455 {offsets = [0, 0], sizes = [2, 32], strides = [1, 1]} : vector<2x128xf32> to vector<2x32xf32>
    %458 = vector.extract_strided_slice %455 {offsets = [0, 32], sizes = [2, 32], strides = [1, 1]} : vector<2x128xf32> to vector<2x32xf32>
    %459 = vector.extract_strided_slice %455 {offsets = [0, 64], sizes = [2, 32], strides = [1, 1]} : vector<2x128xf32> to vector<2x32xf32>
    %460 = vector.extract_strided_slice %456 {offsets = [0, 96], sizes = [2, 32], strides = [1, 1]} : vector<2x128xf32> to vector<2x32xf32>
    %461 = arith.mulf %458, %441 : vector<2x32xf32>
    %462 = arith.mulf %457, %460 : vector<2x32xf32>
    %463 = arith.addf %461, %462 : vector<2x32xf32>
    %464 = math.tanh %463 : vector<2x32xf32>
    %465 = arith.mulf %459, %464 : vector<2x32xf32>
    %c0_172 = arith.constant 0 : index
    %c7_173 = arith.constant 7 : index
    %c0_174 = arith.constant 0 : index
    %466 = vector.load %arg16[%c0_172, %c7_173, %c0_174] : memref<2x8x32xf32, #tpu.memory_space<vmem>>, vector<2x1x32xf32>
    %467 = vector.shape_cast %466 : vector<2x1x32xf32> to vector<2x32xf32>
    %468 = vector.shape_cast %465 : vector<2x32xf32> to vector<2x1x32xf32>
    tpu.vector_store %arg16[%c0_172, %c7_173, %c0_174], %468 {strides = array<i32>} : memref<2x8x32xf32, #tpu.memory_space<vmem>>, vector<2x1x32xf32>,
    %c0_175 = arith.constant 0 : index
    %c0_176 = arith.constant 0 : index
    %c0_177 = arith.constant 0 : index
    %469 = vector.load %arg16[%c0_175, %c0_176, %c0_177] : memref<2x8x32xf32, #tpu.memory_space<vmem>>, vector<2x8x32xf32>
    %470 = vector.shape_cast %469 : vector<2x8x32xf32> to vector<16x32xf32>
    %cst_178 = arith.constant dense<0.000000e+00> : vector<16x32xf32>
    %471 = tpu.matmul %0, %470, %cst_178 {dimension_numbers = #tpu.dot_dimension_numbers<[1], [0], [0], [1], [0, 0, 1, 1], [], []>} : vector<16x16xf32>, vector<16x32xf32>, vector<16x32xf32> -> vector<16x32xf32>
    %472 = arith.select %22, %470, %471 : vector<16x32xi1>, vector<16x32xf32>
    %c1_179 = arith.constant 1 : index
    %c0_180 = arith.constant 0 : index
    %c0_181 = arith.constant 0 : index
    %473 = vector.load %arg7[%c1_179, %c0_180, %c0_181] : memref<3x32x128xf32, #tpu.memory_space<vmem>>, vector<1x32x128xf32>
    %474 = vector.shape_cast %473 : vector<1x32x128xf32> to vector<32x128xf32>
    %cst_182 = arith.constant dense<0.000000e+00> : vector<16x128xf32>
    %475 = tpu.matmul %472, %474, %cst_182 {dimension_numbers = #tpu.dot_dimension_numbers<[1], [0], [0], [1], [0, 0, 1, 1], [], []>} : vector<16x32xf32>, vector<32x128xf32>, vector<16x128xf32> -> vector<16x128xf32>
    %c2_183 = arith.constant 2 : index
    %c0_184 = arith.constant 0 : index
    %c0_185 = arith.constant 0 : index
    %476 = vector.load %arg9[%c2_183, %c0_184, %c0_185] : memref<4x1x128xf32, #tpu.memory_space<vmem>>, vector<1x1x128xf32>
    %477 = vector.shape_cast %476 : vector<1x1x128xf32> to vector<1x128xf32>
    %478 = vector.broadcast %477 : vector<1x128xf32> to vector<16x128xf32>
    %479 = arith.addf %475, %478 : vector<16x128xf32>
    %cst_186 = arith.constant dense<0.000000e+00> : vector<16x128xf32>
    %480 = tpu.matmul %0, %479, %cst_186 {dimension_numbers = #tpu.dot_dimension_numbers<[1], [0], [0], [1], [0, 0, 1, 1], [], []>} : vector<16x16xf32>, vector<16x128xf32>, vector<16x128xf32> -> vector<16x128xf32>
    %481 = arith.select %19, %479, %480 : vector<16x128xi1>, vector<16x128xf32>
    %482 = vector.shape_cast %481 : vector<16x128xf32> to vector<2x8x128xf32>
    %c2_187 = arith.constant 2 : index
    %c0_188 = arith.constant 0 : index
    %c0_189 = arith.constant 0 : index
    %483 = vector.load %arg8[%c2_187, %c0_188, %c0_189] : memref<4x32x128xf32, #tpu.memory_space<vmem>>, vector<1x32x128xf32>
    %484 = vector.shape_cast %483 : vector<1x32x128xf32> to vector<32x128xf32>
    %cst_190 = arith.constant 0.000000e+00 : f32
    %485 = vector.broadcast %cst_190 : f32 to vector<2x32xf32>
    %cst_191 = arith.constant 0.000000e+00 : f32
    %486 = vector.broadcast %cst_191 : f32 to vector<2x32xf32>
    %487 = vector.extract_strided_slice %482 {offsets = [0, 0, 0], sizes = [2, 1, 128], strides = [1, 1, 1]} : vector<2x8x128xf32> to vector<2x1x128xf32>
    %488 = vector.shape_cast %487 : vector<2x1x128xf32> to vector<2x128xf32>
    %cst_192 = arith.constant dense<0.000000e+00> : vector<2x128xf32>
    %489 = tpu.matmul %485, %484, %cst_192 {dimension_numbers = #tpu.dot_dimension_numbers<[1], [0], [0], [1], [0, 0, 1, 1], [], []>} : vector<2x32xf32>, vector<32x128xf32>, vector<2x128xf32> -> vector<2x128xf32>
    %490 = arith.addf %488, %489 : vector<2x128xf32>
    %491 = arith.negf %490 : vector<2x128xf32>
    %492 = math.exp %491 : vector<2x128xf32>
    %cst_193 = arith.constant 1.000000e+00 : f32
    %493 = vector.broadcast %cst_193 : f32 to vector<2x128xf32>
    %494 = arith.addf %493, %492 : vector<2x128xf32>
    %495 = arith.divf %493, %494 : vector<2x128xf32>
    %496 = math.tanh %490 : vector<2x128xf32>
    %497 = vector.extract_strided_slice %495 {offsets = [0, 0], sizes = [2, 32], strides = [1, 1]} : vector<2x128xf32> to vector<2x32xf32>
    %498 = vector.extract_strided_slice %495 {offsets = [0, 32], sizes = [2, 32], strides = [1, 1]} : vector<2x128xf32> to vector<2x32xf32>
    %499 = vector.extract_strided_slice %495 {offsets = [0, 64], sizes = [2, 32], strides = [1, 1]} : vector<2x128xf32> to vector<2x32xf32>
    %500 = vector.extract_strided_slice %496 {offsets = [0, 96], sizes = [2, 32], strides = [1, 1]} : vector<2x128xf32> to vector<2x32xf32>
    %501 = arith.mulf %498, %486 : vector<2x32xf32>
    %502 = arith.mulf %497, %500 : vector<2x32xf32>
    %503 = arith.addf %501, %502 : vector<2x32xf32>
    %504 = math.tanh %503 : vector<2x32xf32>
    %505 = arith.mulf %499, %504 : vector<2x32xf32>
    %c0_194 = arith.constant 0 : index
    %c0_195 = arith.constant 0 : index
    %c0_196 = arith.constant 0 : index
    %506 = vector.load %arg16[%c0_194, %c0_195, %c0_196] : memref<2x8x32xf32, #tpu.memory_space<vmem>>, vector<2x1x32xf32>
    %507 = vector.shape_cast %506 : vector<2x1x32xf32> to vector<2x32xf32>
    %508 = vector.shape_cast %505 : vector<2x32xf32> to vector<2x1x32xf32>
    tpu.vector_store %arg16[%c0_194, %c0_195, %c0_196], %508 {strides = array<i32>} : memref<2x8x32xf32, #tpu.memory_space<vmem>>, vector<2x1x32xf32>,
    %509 = vector.extract_strided_slice %482 {offsets = [0, 1, 0], sizes = [2, 1, 128], strides = [1, 1, 1]} : vector<2x8x128xf32> to vector<2x1x128xf32>
    %510 = vector.shape_cast %509 : vector<2x1x128xf32> to vector<2x128xf32>
    %cst_197 = arith.constant dense<0.000000e+00> : vector<2x128xf32>
    %511 = tpu.matmul %505, %484, %cst_197 {dimension_numbers = #tpu.dot_dimension_numbers<[1], [0], [0], [1], [0, 0, 1, 1], [], []>} : vector<2x32xf32>, vector<32x128xf32>, vector<2x128xf32> -> vector<2x128xf32>
    %512 = arith.addf %510, %511 : vector<2x128xf32>
    %513 = arith.negf %512 : vector<2x128xf32>
    %514 = math.exp %513 : vector<2x128xf32>
    %cst_198 = arith.constant 1.000000e+00 : f32
    %515 = vector.broadcast %cst_198 : f32 to vector<2x128xf32>
    %516 = arith.addf %515, %514 : vector<2x128xf32>
    %517 = arith.divf %515, %516 : vector<2x128xf32>
    %518 = math.tanh %512 : vector<2x128xf32>
    %519 = vector.extract_strided_slice %517 {offsets = [0, 0], sizes = [2, 32], strides = [1, 1]} : vector<2x128xf32> to vector<2x32xf32>
    %520 = vector.extract_strided_slice %517 {offsets = [0, 32], sizes = [2, 32], strides = [1, 1]} : vector<2x128xf32> to vector<2x32xf32>
    %521 = vector.extract_strided_slice %517 {offsets = [0, 64], sizes = [2, 32], strides = [1, 1]} : vector<2x128xf32> to vector<2x32xf32>
    %522 = vector.extract_strided_slice %518 {offsets = [0, 96], sizes = [2, 32], strides = [1, 1]} : vector<2x128xf32> to vector<2x32xf32>
    %523 = arith.mulf %520, %503 : vector<2x32xf32>
    %524 = arith.mulf %519, %522 : vector<2x32xf32>
    %525 = arith.addf %523, %524 : vector<2x32xf32>
    %526 = math.tanh %525 : vector<2x32xf32>
    %527 = arith.mulf %521, %526 : vector<2x32xf32>
    %c0_199 = arith.constant 0 : index
    %c1_200 = arith.constant 1 : index
    %c0_201 = arith.constant 0 : index
    %528 = vector.load %arg16[%c0_199, %c1_200, %c0_201] : memref<2x8x32xf32, #tpu.memory_space<vmem>>, vector<2x1x32xf32>
    %529 = vector.shape_cast %528 : vector<2x1x32xf32> to vector<2x32xf32>
    %530 = vector.shape_cast %527 : vector<2x32xf32> to vector<2x1x32xf32>
    tpu.vector_store %arg16[%c0_199, %c1_200, %c0_201], %530 {strides = array<i32>} : memref<2x8x32xf32, #tpu.memory_space<vmem>>, vector<2x1x32xf32>,
    %531 = vector.extract_strided_slice %482 {offsets = [0, 2, 0], sizes = [2, 1, 128], strides = [1, 1, 1]} : vector<2x8x128xf32> to vector<2x1x128xf32>
    %532 = vector.shape_cast %531 : vector<2x1x128xf32> to vector<2x128xf32>
    %cst_202 = arith.constant dense<0.000000e+00> : vector<2x128xf32>
    %533 = tpu.matmul %527, %484, %cst_202 {dimension_numbers = #tpu.dot_dimension_numbers<[1], [0], [0], [1], [0, 0, 1, 1], [], []>} : vector<2x32xf32>, vector<32x128xf32>, vector<2x128xf32> -> vector<2x128xf32>
    %534 = arith.addf %532, %533 : vector<2x128xf32>
    %535 = arith.negf %534 : vector<2x128xf32>
    %536 = math.exp %535 : vector<2x128xf32>
    %cst_203 = arith.constant 1.000000e+00 : f32
    %537 = vector.broadcast %cst_203 : f32 to vector<2x128xf32>
    %538 = arith.addf %537, %536 : vector<2x128xf32>
    %539 = arith.divf %537, %538 : vector<2x128xf32>
    %540 = math.tanh %534 : vector<2x128xf32>
    %541 = vector.extract_strided_slice %539 {offsets = [0, 0], sizes = [2, 32], strides = [1, 1]} : vector<2x128xf32> to vector<2x32xf32>
    %542 = vector.extract_strided_slice %539 {offsets = [0, 32], sizes = [2, 32], strides = [1, 1]} : vector<2x128xf32> to vector<2x32xf32>
    %543 = vector.extract_strided_slice %539 {offsets = [0, 64], sizes = [2, 32], strides = [1, 1]} : vector<2x128xf32> to vector<2x32xf32>
    %544 = vector.extract_strided_slice %540 {offsets = [0, 96], sizes = [2, 32], strides = [1, 1]} : vector<2x128xf32> to vector<2x32xf32>
    %545 = arith.mulf %542, %525 : vector<2x32xf32>
    %546 = arith.mulf %541, %544 : vector<2x32xf32>
    %547 = arith.addf %545, %546 : vector<2x32xf32>
    %548 = math.tanh %547 : vector<2x32xf32>
    %549 = arith.mulf %543, %548 : vector<2x32xf32>
    %c0_204 = arith.constant 0 : index
    %c2_205 = arith.constant 2 : index
    %c0_206 = arith.constant 0 : index
    %550 = vector.load %arg16[%c0_204, %c2_205, %c0_206] : memref<2x8x32xf32, #tpu.memory_space<vmem>>, vector<2x1x32xf32>
    %551 = vector.shape_cast %550 : vector<2x1x32xf32> to vector<2x32xf32>
    %552 = vector.shape_cast %549 : vector<2x32xf32> to vector<2x1x32xf32>
    tpu.vector_store %arg16[%c0_204, %c2_205, %c0_206], %552 {strides = array<i32>} : memref<2x8x32xf32, #tpu.memory_space<vmem>>, vector<2x1x32xf32>,
    %553 = vector.extract_strided_slice %482 {offsets = [0, 3, 0], sizes = [2, 1, 128], strides = [1, 1, 1]} : vector<2x8x128xf32> to vector<2x1x128xf32>
    %554 = vector.shape_cast %553 : vector<2x1x128xf32> to vector<2x128xf32>
    %cst_207 = arith.constant dense<0.000000e+00> : vector<2x128xf32>
    %555 = tpu.matmul %549, %484, %cst_207 {dimension_numbers = #tpu.dot_dimension_numbers<[1], [0], [0], [1], [0, 0, 1, 1], [], []>} : vector<2x32xf32>, vector<32x128xf32>, vector<2x128xf32> -> vector<2x128xf32>
    %556 = arith.addf %554, %555 : vector<2x128xf32>
    %557 = arith.negf %556 : vector<2x128xf32>
    %558 = math.exp %557 : vector<2x128xf32>
    %cst_208 = arith.constant 1.000000e+00 : f32
    %559 = vector.broadcast %cst_208 : f32 to vector<2x128xf32>
    %560 = arith.addf %559, %558 : vector<2x128xf32>
    %561 = arith.divf %559, %560 : vector<2x128xf32>
    %562 = math.tanh %556 : vector<2x128xf32>
    %563 = vector.extract_strided_slice %561 {offsets = [0, 0], sizes = [2, 32], strides = [1, 1]} : vector<2x128xf32> to vector<2x32xf32>
    %564 = vector.extract_strided_slice %561 {offsets = [0, 32], sizes = [2, 32], strides = [1, 1]} : vector<2x128xf32> to vector<2x32xf32>
    %565 = vector.extract_strided_slice %561 {offsets = [0, 64], sizes = [2, 32], strides = [1, 1]} : vector<2x128xf32> to vector<2x32xf32>
    %566 = vector.extract_strided_slice %562 {offsets = [0, 96], sizes = [2, 32], strides = [1, 1]} : vector<2x128xf32> to vector<2x32xf32>
    %567 = arith.mulf %564, %547 : vector<2x32xf32>
    %568 = arith.mulf %563, %566 : vector<2x32xf32>
    %569 = arith.addf %567, %568 : vector<2x32xf32>
    %570 = math.tanh %569 : vector<2x32xf32>
    %571 = arith.mulf %565, %570 : vector<2x32xf32>
    %c0_209 = arith.constant 0 : index
    %c3_210 = arith.constant 3 : index
    %c0_211 = arith.constant 0 : index
    %572 = vector.load %arg16[%c0_209, %c3_210, %c0_211] : memref<2x8x32xf32, #tpu.memory_space<vmem>>, vector<2x1x32xf32>
    %573 = vector.shape_cast %572 : vector<2x1x32xf32> to vector<2x32xf32>
    %574 = vector.shape_cast %571 : vector<2x32xf32> to vector<2x1x32xf32>
    tpu.vector_store %arg16[%c0_209, %c3_210, %c0_211], %574 {strides = array<i32>} : memref<2x8x32xf32, #tpu.memory_space<vmem>>, vector<2x1x32xf32>,
    %575 = vector.extract_strided_slice %482 {offsets = [0, 4, 0], sizes = [2, 1, 128], strides = [1, 1, 1]} : vector<2x8x128xf32> to vector<2x1x128xf32>
    %576 = vector.shape_cast %575 : vector<2x1x128xf32> to vector<2x128xf32>
    %cst_212 = arith.constant dense<0.000000e+00> : vector<2x128xf32>
    %577 = tpu.matmul %571, %484, %cst_212 {dimension_numbers = #tpu.dot_dimension_numbers<[1], [0], [0], [1], [0, 0, 1, 1], [], []>} : vector<2x32xf32>, vector<32x128xf32>, vector<2x128xf32> -> vector<2x128xf32>
    %578 = arith.addf %576, %577 : vector<2x128xf32>
    %579 = arith.negf %578 : vector<2x128xf32>
    %580 = math.exp %579 : vector<2x128xf32>
    %cst_213 = arith.constant 1.000000e+00 : f32
    %581 = vector.broadcast %cst_213 : f32 to vector<2x128xf32>
    %582 = arith.addf %581, %580 : vector<2x128xf32>
    %583 = arith.divf %581, %582 : vector<2x128xf32>
    %584 = math.tanh %578 : vector<2x128xf32>
    %585 = vector.extract_strided_slice %583 {offsets = [0, 0], sizes = [2, 32], strides = [1, 1]} : vector<2x128xf32> to vector<2x32xf32>
    %586 = vector.extract_strided_slice %583 {offsets = [0, 32], sizes = [2, 32], strides = [1, 1]} : vector<2x128xf32> to vector<2x32xf32>
    %587 = vector.extract_strided_slice %583 {offsets = [0, 64], sizes = [2, 32], strides = [1, 1]} : vector<2x128xf32> to vector<2x32xf32>
    %588 = vector.extract_strided_slice %584 {offsets = [0, 96], sizes = [2, 32], strides = [1, 1]} : vector<2x128xf32> to vector<2x32xf32>
    %589 = arith.mulf %586, %569 : vector<2x32xf32>
    %590 = arith.mulf %585, %588 : vector<2x32xf32>
    %591 = arith.addf %589, %590 : vector<2x32xf32>
    %592 = math.tanh %591 : vector<2x32xf32>
    %593 = arith.mulf %587, %592 : vector<2x32xf32>
    %c0_214 = arith.constant 0 : index
    %c4_215 = arith.constant 4 : index
    %c0_216 = arith.constant 0 : index
    %594 = vector.load %arg16[%c0_214, %c4_215, %c0_216] : memref<2x8x32xf32, #tpu.memory_space<vmem>>, vector<2x1x32xf32>
    %595 = vector.shape_cast %594 : vector<2x1x32xf32> to vector<2x32xf32>
    %596 = vector.shape_cast %593 : vector<2x32xf32> to vector<2x1x32xf32>
    tpu.vector_store %arg16[%c0_214, %c4_215, %c0_216], %596 {strides = array<i32>} : memref<2x8x32xf32, #tpu.memory_space<vmem>>, vector<2x1x32xf32>,
    %597 = vector.extract_strided_slice %482 {offsets = [0, 5, 0], sizes = [2, 1, 128], strides = [1, 1, 1]} : vector<2x8x128xf32> to vector<2x1x128xf32>
    %598 = vector.shape_cast %597 : vector<2x1x128xf32> to vector<2x128xf32>
    %cst_217 = arith.constant dense<0.000000e+00> : vector<2x128xf32>
    %599 = tpu.matmul %593, %484, %cst_217 {dimension_numbers = #tpu.dot_dimension_numbers<[1], [0], [0], [1], [0, 0, 1, 1], [], []>} : vector<2x32xf32>, vector<32x128xf32>, vector<2x128xf32> -> vector<2x128xf32>
    %600 = arith.addf %598, %599 : vector<2x128xf32>
    %601 = arith.negf %600 : vector<2x128xf32>
    %602 = math.exp %601 : vector<2x128xf32>
    %cst_218 = arith.constant 1.000000e+00 : f32
    %603 = vector.broadcast %cst_218 : f32 to vector<2x128xf32>
    %604 = arith.addf %603, %602 : vector<2x128xf32>
    %605 = arith.divf %603, %604 : vector<2x128xf32>
    %606 = math.tanh %600 : vector<2x128xf32>
    %607 = vector.extract_strided_slice %605 {offsets = [0, 0], sizes = [2, 32], strides = [1, 1]} : vector<2x128xf32> to vector<2x32xf32>
    %608 = vector.extract_strided_slice %605 {offsets = [0, 32], sizes = [2, 32], strides = [1, 1]} : vector<2x128xf32> to vector<2x32xf32>
    %609 = vector.extract_strided_slice %605 {offsets = [0, 64], sizes = [2, 32], strides = [1, 1]} : vector<2x128xf32> to vector<2x32xf32>
    %610 = vector.extract_strided_slice %606 {offsets = [0, 96], sizes = [2, 32], strides = [1, 1]} : vector<2x128xf32> to vector<2x32xf32>
    %611 = arith.mulf %608, %591 : vector<2x32xf32>
    %612 = arith.mulf %607, %610 : vector<2x32xf32>
    %613 = arith.addf %611, %612 : vector<2x32xf32>
    %614 = math.tanh %613 : vector<2x32xf32>
    %615 = arith.mulf %609, %614 : vector<2x32xf32>
    %c0_219 = arith.constant 0 : index
    %c5_220 = arith.constant 5 : index
    %c0_221 = arith.constant 0 : index
    %616 = vector.load %arg16[%c0_219, %c5_220, %c0_221] : memref<2x8x32xf32, #tpu.memory_space<vmem>>, vector<2x1x32xf32>
    %617 = vector.shape_cast %616 : vector<2x1x32xf32> to vector<2x32xf32>
    %618 = vector.shape_cast %615 : vector<2x32xf32> to vector<2x1x32xf32>
    tpu.vector_store %arg16[%c0_219, %c5_220, %c0_221], %618 {strides = array<i32>} : memref<2x8x32xf32, #tpu.memory_space<vmem>>, vector<2x1x32xf32>,
    %619 = vector.extract_strided_slice %482 {offsets = [0, 6, 0], sizes = [2, 1, 128], strides = [1, 1, 1]} : vector<2x8x128xf32> to vector<2x1x128xf32>
    %620 = vector.shape_cast %619 : vector<2x1x128xf32> to vector<2x128xf32>
    %cst_222 = arith.constant dense<0.000000e+00> : vector<2x128xf32>
    %621 = tpu.matmul %615, %484, %cst_222 {dimension_numbers = #tpu.dot_dimension_numbers<[1], [0], [0], [1], [0, 0, 1, 1], [], []>} : vector<2x32xf32>, vector<32x128xf32>, vector<2x128xf32> -> vector<2x128xf32>
    %622 = arith.addf %620, %621 : vector<2x128xf32>
    %623 = arith.negf %622 : vector<2x128xf32>
    %624 = math.exp %623 : vector<2x128xf32>
    %cst_223 = arith.constant 1.000000e+00 : f32
    %625 = vector.broadcast %cst_223 : f32 to vector<2x128xf32>
    %626 = arith.addf %625, %624 : vector<2x128xf32>
    %627 = arith.divf %625, %626 : vector<2x128xf32>
    %628 = math.tanh %622 : vector<2x128xf32>
    %629 = vector.extract_strided_slice %627 {offsets = [0, 0], sizes = [2, 32], strides = [1, 1]} : vector<2x128xf32> to vector<2x32xf32>
    %630 = vector.extract_strided_slice %627 {offsets = [0, 32], sizes = [2, 32], strides = [1, 1]} : vector<2x128xf32> to vector<2x32xf32>
    %631 = vector.extract_strided_slice %627 {offsets = [0, 64], sizes = [2, 32], strides = [1, 1]} : vector<2x128xf32> to vector<2x32xf32>
    %632 = vector.extract_strided_slice %628 {offsets = [0, 96], sizes = [2, 32], strides = [1, 1]} : vector<2x128xf32> to vector<2x32xf32>
    %633 = arith.mulf %630, %613 : vector<2x32xf32>
    %634 = arith.mulf %629, %632 : vector<2x32xf32>
    %635 = arith.addf %633, %634 : vector<2x32xf32>
    %636 = math.tanh %635 : vector<2x32xf32>
    %637 = arith.mulf %631, %636 : vector<2x32xf32>
    %c0_224 = arith.constant 0 : index
    %c6_225 = arith.constant 6 : index
    %c0_226 = arith.constant 0 : index
    %638 = vector.load %arg16[%c0_224, %c6_225, %c0_226] : memref<2x8x32xf32, #tpu.memory_space<vmem>>, vector<2x1x32xf32>
    %639 = vector.shape_cast %638 : vector<2x1x32xf32> to vector<2x32xf32>
    %640 = vector.shape_cast %637 : vector<2x32xf32> to vector<2x1x32xf32>
    tpu.vector_store %arg16[%c0_224, %c6_225, %c0_226], %640 {strides = array<i32>} : memref<2x8x32xf32, #tpu.memory_space<vmem>>, vector<2x1x32xf32>,
    %641 = vector.extract_strided_slice %482 {offsets = [0, 7, 0], sizes = [2, 1, 128], strides = [1, 1, 1]} : vector<2x8x128xf32> to vector<2x1x128xf32>
    %642 = vector.shape_cast %641 : vector<2x1x128xf32> to vector<2x128xf32>
    %cst_227 = arith.constant dense<0.000000e+00> : vector<2x128xf32>
    %643 = tpu.matmul %637, %484, %cst_227 {dimension_numbers = #tpu.dot_dimension_numbers<[1], [0], [0], [1], [0, 0, 1, 1], [], []>} : vector<2x32xf32>, vector<32x128xf32>, vector<2x128xf32> -> vector<2x128xf32>
    %644 = arith.addf %642, %643 : vector<2x128xf32>
    %645 = arith.negf %644 : vector<2x128xf32>
    %646 = math.exp %645 : vector<2x128xf32>
    %cst_228 = arith.constant 1.000000e+00 : f32
    %647 = vector.broadcast %cst_228 : f32 to vector<2x128xf32>
    %648 = arith.addf %647, %646 : vector<2x128xf32>
    %649 = arith.divf %647, %648 : vector<2x128xf32>
    %650 = math.tanh %644 : vector<2x128xf32>
    %651 = vector.extract_strided_slice %649 {offsets = [0, 0], sizes = [2, 32], strides = [1, 1]} : vector<2x128xf32> to vector<2x32xf32>
    %652 = vector.extract_strided_slice %649 {offsets = [0, 32], sizes = [2, 32], strides = [1, 1]} : vector<2x128xf32> to vector<2x32xf32>
    %653 = vector.extract_strided_slice %649 {offsets = [0, 64], sizes = [2, 32], strides = [1, 1]} : vector<2x128xf32> to vector<2x32xf32>
    %654 = vector.extract_strided_slice %650 {offsets = [0, 96], sizes = [2, 32], strides = [1, 1]} : vector<2x128xf32> to vector<2x32xf32>
    %655 = arith.mulf %652, %635 : vector<2x32xf32>
    %656 = arith.mulf %651, %654 : vector<2x32xf32>
    %657 = arith.addf %655, %656 : vector<2x32xf32>
    %658 = math.tanh %657 : vector<2x32xf32>
    %659 = arith.mulf %653, %658 : vector<2x32xf32>
    %c0_229 = arith.constant 0 : index
    %c7_230 = arith.constant 7 : index
    %c0_231 = arith.constant 0 : index
    %660 = vector.load %arg16[%c0_229, %c7_230, %c0_231] : memref<2x8x32xf32, #tpu.memory_space<vmem>>, vector<2x1x32xf32>
    %661 = vector.shape_cast %660 : vector<2x1x32xf32> to vector<2x32xf32>
    %662 = vector.shape_cast %659 : vector<2x32xf32> to vector<2x1x32xf32>
    tpu.vector_store %arg16[%c0_229, %c7_230, %c0_231], %662 {strides = array<i32>} : memref<2x8x32xf32, #tpu.memory_space<vmem>>, vector<2x1x32xf32>,
    %c0_232 = arith.constant 0 : index
    %c0_233 = arith.constant 0 : index
    %c0_234 = arith.constant 0 : index
    %663 = vector.load %arg16[%c0_232, %c0_233, %c0_234] : memref<2x8x32xf32, #tpu.memory_space<vmem>>, vector<2x8x32xf32>
    %664 = vector.shape_cast %663 : vector<2x8x32xf32> to vector<16x32xf32>
    %cst_235 = arith.constant dense<0.000000e+00> : vector<16x32xf32>
    %665 = tpu.matmul %0, %664, %cst_235 {dimension_numbers = #tpu.dot_dimension_numbers<[1], [0], [0], [1], [0, 0, 1, 1], [], []>} : vector<16x16xf32>, vector<16x32xf32>, vector<16x32xf32> -> vector<16x32xf32>
    %666 = arith.select %22, %664, %665 : vector<16x32xi1>, vector<16x32xf32>
    %c2_236 = arith.constant 2 : index
    %c0_237 = arith.constant 0 : index
    %c0_238 = arith.constant 0 : index
    %667 = vector.load %arg7[%c2_236, %c0_237, %c0_238] : memref<3x32x128xf32, #tpu.memory_space<vmem>>, vector<1x32x128xf32>
    %668 = vector.shape_cast %667 : vector<1x32x128xf32> to vector<32x128xf32>
    %cst_239 = arith.constant dense<0.000000e+00> : vector<16x128xf32>
    %669 = tpu.matmul %666, %668, %cst_239 {dimension_numbers = #tpu.dot_dimension_numbers<[1], [0], [0], [1], [0, 0, 1, 1], [], []>} : vector<16x32xf32>, vector<32x128xf32>, vector<16x128xf32> -> vector<16x128xf32>
    %c3_240 = arith.constant 3 : index
    %c0_241 = arith.constant 0 : index
    %c0_242 = arith.constant 0 : index
    %670 = vector.load %arg9[%c3_240, %c0_241, %c0_242] : memref<4x1x128xf32, #tpu.memory_space<vmem>>, vector<1x1x128xf32>
    %671 = vector.shape_cast %670 : vector<1x1x128xf32> to vector<1x128xf32>
    %672 = vector.broadcast %671 : vector<1x128xf32> to vector<16x128xf32>
    %673 = arith.addf %669, %672 : vector<16x128xf32>
    %cst_243 = arith.constant dense<0.000000e+00> : vector<16x128xf32>
    %674 = tpu.matmul %0, %673, %cst_243 {dimension_numbers = #tpu.dot_dimension_numbers<[1], [0], [0], [1], [0, 0, 1, 1], [], []>} : vector<16x16xf32>, vector<16x128xf32>, vector<16x128xf32> -> vector<16x128xf32>
    %675 = arith.select %19, %673, %674 : vector<16x128xi1>, vector<16x128xf32>
    %676 = vector.shape_cast %675 : vector<16x128xf32> to vector<2x8x128xf32>
    %c3_244 = arith.constant 3 : index
    %c0_245 = arith.constant 0 : index
    %c0_246 = arith.constant 0 : index
    %677 = vector.load %arg8[%c3_244, %c0_245, %c0_246] : memref<4x32x128xf32, #tpu.memory_space<vmem>>, vector<1x32x128xf32>
    %678 = vector.shape_cast %677 : vector<1x32x128xf32> to vector<32x128xf32>
    %cst_247 = arith.constant 0.000000e+00 : f32
    %679 = vector.broadcast %cst_247 : f32 to vector<2x32xf32>
    %cst_248 = arith.constant 0.000000e+00 : f32
    %680 = vector.broadcast %cst_248 : f32 to vector<2x32xf32>
    %681 = vector.extract_strided_slice %676 {offsets = [0, 0, 0], sizes = [2, 1, 128], strides = [1, 1, 1]} : vector<2x8x128xf32> to vector<2x1x128xf32>
    %682 = vector.shape_cast %681 : vector<2x1x128xf32> to vector<2x128xf32>
    %cst_249 = arith.constant dense<0.000000e+00> : vector<2x128xf32>
    %683 = tpu.matmul %679, %678, %cst_249 {dimension_numbers = #tpu.dot_dimension_numbers<[1], [0], [0], [1], [0, 0, 1, 1], [], []>} : vector<2x32xf32>, vector<32x128xf32>, vector<2x128xf32> -> vector<2x128xf32>
    %684 = arith.addf %682, %683 : vector<2x128xf32>
    %685 = arith.negf %684 : vector<2x128xf32>
    %686 = math.exp %685 : vector<2x128xf32>
    %cst_250 = arith.constant 1.000000e+00 : f32
    %687 = vector.broadcast %cst_250 : f32 to vector<2x128xf32>
    %688 = arith.addf %687, %686 : vector<2x128xf32>
    %689 = arith.divf %687, %688 : vector<2x128xf32>
    %690 = math.tanh %684 : vector<2x128xf32>
    %691 = vector.extract_strided_slice %689 {offsets = [0, 0], sizes = [2, 32], strides = [1, 1]} : vector<2x128xf32> to vector<2x32xf32>
    %692 = vector.extract_strided_slice %689 {offsets = [0, 32], sizes = [2, 32], strides = [1, 1]} : vector<2x128xf32> to vector<2x32xf32>
    %693 = vector.extract_strided_slice %689 {offsets = [0, 64], sizes = [2, 32], strides = [1, 1]} : vector<2x128xf32> to vector<2x32xf32>
    %694 = vector.extract_strided_slice %690 {offsets = [0, 96], sizes = [2, 32], strides = [1, 1]} : vector<2x128xf32> to vector<2x32xf32>
    %695 = arith.mulf %692, %680 : vector<2x32xf32>
    %696 = arith.mulf %691, %694 : vector<2x32xf32>
    %697 = arith.addf %695, %696 : vector<2x32xf32>
    %698 = math.tanh %697 : vector<2x32xf32>
    %699 = arith.mulf %693, %698 : vector<2x32xf32>
    %c0_251 = arith.constant 0 : index
    %c0_252 = arith.constant 0 : index
    %c0_253 = arith.constant 0 : index
    %700 = vector.load %arg16[%c0_251, %c0_252, %c0_253] : memref<2x8x32xf32, #tpu.memory_space<vmem>>, vector<2x1x32xf32>
    %701 = vector.shape_cast %700 : vector<2x1x32xf32> to vector<2x32xf32>
    %702 = vector.shape_cast %699 : vector<2x32xf32> to vector<2x1x32xf32>
    tpu.vector_store %arg16[%c0_251, %c0_252, %c0_253], %702 {strides = array<i32>} : memref<2x8x32xf32, #tpu.memory_space<vmem>>, vector<2x1x32xf32>,
    %703 = vector.extract_strided_slice %676 {offsets = [0, 1, 0], sizes = [2, 1, 128], strides = [1, 1, 1]} : vector<2x8x128xf32> to vector<2x1x128xf32>
    %704 = vector.shape_cast %703 : vector<2x1x128xf32> to vector<2x128xf32>
    %cst_254 = arith.constant dense<0.000000e+00> : vector<2x128xf32>
    %705 = tpu.matmul %699, %678, %cst_254 {dimension_numbers = #tpu.dot_dimension_numbers<[1], [0], [0], [1], [0, 0, 1, 1], [], []>} : vector<2x32xf32>, vector<32x128xf32>, vector<2x128xf32> -> vector<2x128xf32>
    %706 = arith.addf %704, %705 : vector<2x128xf32>
    %707 = arith.negf %706 : vector<2x128xf32>
    %708 = math.exp %707 : vector<2x128xf32>
    %cst_255 = arith.constant 1.000000e+00 : f32
    %709 = vector.broadcast %cst_255 : f32 to vector<2x128xf32>
    %710 = arith.addf %709, %708 : vector<2x128xf32>
    %711 = arith.divf %709, %710 : vector<2x128xf32>
    %712 = math.tanh %706 : vector<2x128xf32>
    %713 = vector.extract_strided_slice %711 {offsets = [0, 0], sizes = [2, 32], strides = [1, 1]} : vector<2x128xf32> to vector<2x32xf32>
    %714 = vector.extract_strided_slice %711 {offsets = [0, 32], sizes = [2, 32], strides = [1, 1]} : vector<2x128xf32> to vector<2x32xf32>
    %715 = vector.extract_strided_slice %711 {offsets = [0, 64], sizes = [2, 32], strides = [1, 1]} : vector<2x128xf32> to vector<2x32xf32>
    %716 = vector.extract_strided_slice %712 {offsets = [0, 96], sizes = [2, 32], strides = [1, 1]} : vector<2x128xf32> to vector<2x32xf32>
    %717 = arith.mulf %714, %697 : vector<2x32xf32>
    %718 = arith.mulf %713, %716 : vector<2x32xf32>
    %719 = arith.addf %717, %718 : vector<2x32xf32>
    %720 = math.tanh %719 : vector<2x32xf32>
    %721 = arith.mulf %715, %720 : vector<2x32xf32>
    %c0_256 = arith.constant 0 : index
    %c1_257 = arith.constant 1 : index
    %c0_258 = arith.constant 0 : index
    %722 = vector.load %arg16[%c0_256, %c1_257, %c0_258] : memref<2x8x32xf32, #tpu.memory_space<vmem>>, vector<2x1x32xf32>
    %723 = vector.shape_cast %722 : vector<2x1x32xf32> to vector<2x32xf32>
    %724 = vector.shape_cast %721 : vector<2x32xf32> to vector<2x1x32xf32>
    tpu.vector_store %arg16[%c0_256, %c1_257, %c0_258], %724 {strides = array<i32>} : memref<2x8x32xf32, #tpu.memory_space<vmem>>, vector<2x1x32xf32>,
    %725 = vector.extract_strided_slice %676 {offsets = [0, 2, 0], sizes = [2, 1, 128], strides = [1, 1, 1]} : vector<2x8x128xf32> to vector<2x1x128xf32>
    %726 = vector.shape_cast %725 : vector<2x1x128xf32> to vector<2x128xf32>
    %cst_259 = arith.constant dense<0.000000e+00> : vector<2x128xf32>
    %727 = tpu.matmul %721, %678, %cst_259 {dimension_numbers = #tpu.dot_dimension_numbers<[1], [0], [0], [1], [0, 0, 1, 1], [], []>} : vector<2x32xf32>, vector<32x128xf32>, vector<2x128xf32> -> vector<2x128xf32>
    %728 = arith.addf %726, %727 : vector<2x128xf32>
    %729 = arith.negf %728 : vector<2x128xf32>
    %730 = math.exp %729 : vector<2x128xf32>
    %cst_260 = arith.constant 1.000000e+00 : f32
    %731 = vector.broadcast %cst_260 : f32 to vector<2x128xf32>
    %732 = arith.addf %731, %730 : vector<2x128xf32>
    %733 = arith.divf %731, %732 : vector<2x128xf32>
    %734 = math.tanh %728 : vector<2x128xf32>
    %735 = vector.extract_strided_slice %733 {offsets = [0, 0], sizes = [2, 32], strides = [1, 1]} : vector<2x128xf32> to vector<2x32xf32>
    %736 = vector.extract_strided_slice %733 {offsets = [0, 32], sizes = [2, 32], strides = [1, 1]} : vector<2x128xf32> to vector<2x32xf32>
    %737 = vector.extract_strided_slice %733 {offsets = [0, 64], sizes = [2, 32], strides = [1, 1]} : vector<2x128xf32> to vector<2x32xf32>
    %738 = vector.extract_strided_slice %734 {offsets = [0, 96], sizes = [2, 32], strides = [1, 1]} : vector<2x128xf32> to vector<2x32xf32>
    %739 = arith.mulf %736, %719 : vector<2x32xf32>
    %740 = arith.mulf %735, %738 : vector<2x32xf32>
    %741 = arith.addf %739, %740 : vector<2x32xf32>
    %742 = math.tanh %741 : vector<2x32xf32>
    %743 = arith.mulf %737, %742 : vector<2x32xf32>
    %c0_261 = arith.constant 0 : index
    %c2_262 = arith.constant 2 : index
    %c0_263 = arith.constant 0 : index
    %744 = vector.load %arg16[%c0_261, %c2_262, %c0_263] : memref<2x8x32xf32, #tpu.memory_space<vmem>>, vector<2x1x32xf32>
    %745 = vector.shape_cast %744 : vector<2x1x32xf32> to vector<2x32xf32>
    %746 = vector.shape_cast %743 : vector<2x32xf32> to vector<2x1x32xf32>
    tpu.vector_store %arg16[%c0_261, %c2_262, %c0_263], %746 {strides = array<i32>} : memref<2x8x32xf32, #tpu.memory_space<vmem>>, vector<2x1x32xf32>,
    %747 = vector.extract_strided_slice %676 {offsets = [0, 3, 0], sizes = [2, 1, 128], strides = [1, 1, 1]} : vector<2x8x128xf32> to vector<2x1x128xf32>
    %748 = vector.shape_cast %747 : vector<2x1x128xf32> to vector<2x128xf32>
    %cst_264 = arith.constant dense<0.000000e+00> : vector<2x128xf32>
    %749 = tpu.matmul %743, %678, %cst_264 {dimension_numbers = #tpu.dot_dimension_numbers<[1], [0], [0], [1], [0, 0, 1, 1], [], []>} : vector<2x32xf32>, vector<32x128xf32>, vector<2x128xf32> -> vector<2x128xf32>
    %750 = arith.addf %748, %749 : vector<2x128xf32>
    %751 = arith.negf %750 : vector<2x128xf32>
    %752 = math.exp %751 : vector<2x128xf32>
    %cst_265 = arith.constant 1.000000e+00 : f32
    %753 = vector.broadcast %cst_265 : f32 to vector<2x128xf32>
    %754 = arith.addf %753, %752 : vector<2x128xf32>
    %755 = arith.divf %753, %754 : vector<2x128xf32>
    %756 = math.tanh %750 : vector<2x128xf32>
    %757 = vector.extract_strided_slice %755 {offsets = [0, 0], sizes = [2, 32], strides = [1, 1]} : vector<2x128xf32> to vector<2x32xf32>
    %758 = vector.extract_strided_slice %755 {offsets = [0, 32], sizes = [2, 32], strides = [1, 1]} : vector<2x128xf32> to vector<2x32xf32>
    %759 = vector.extract_strided_slice %755 {offsets = [0, 64], sizes = [2, 32], strides = [1, 1]} : vector<2x128xf32> to vector<2x32xf32>
    %760 = vector.extract_strided_slice %756 {offsets = [0, 96], sizes = [2, 32], strides = [1, 1]} : vector<2x128xf32> to vector<2x32xf32>
    %761 = arith.mulf %758, %741 : vector<2x32xf32>
    %762 = arith.mulf %757, %760 : vector<2x32xf32>
    %763 = arith.addf %761, %762 : vector<2x32xf32>
    %764 = math.tanh %763 : vector<2x32xf32>
    %765 = arith.mulf %759, %764 : vector<2x32xf32>
    %c0_266 = arith.constant 0 : index
    %c3_267 = arith.constant 3 : index
    %c0_268 = arith.constant 0 : index
    %766 = vector.load %arg16[%c0_266, %c3_267, %c0_268] : memref<2x8x32xf32, #tpu.memory_space<vmem>>, vector<2x1x32xf32>
    %767 = vector.shape_cast %766 : vector<2x1x32xf32> to vector<2x32xf32>
    %768 = vector.shape_cast %765 : vector<2x32xf32> to vector<2x1x32xf32>
    tpu.vector_store %arg16[%c0_266, %c3_267, %c0_268], %768 {strides = array<i32>} : memref<2x8x32xf32, #tpu.memory_space<vmem>>, vector<2x1x32xf32>,
    %769 = vector.extract_strided_slice %676 {offsets = [0, 4, 0], sizes = [2, 1, 128], strides = [1, 1, 1]} : vector<2x8x128xf32> to vector<2x1x128xf32>
    %770 = vector.shape_cast %769 : vector<2x1x128xf32> to vector<2x128xf32>
    %cst_269 = arith.constant dense<0.000000e+00> : vector<2x128xf32>
    %771 = tpu.matmul %765, %678, %cst_269 {dimension_numbers = #tpu.dot_dimension_numbers<[1], [0], [0], [1], [0, 0, 1, 1], [], []>} : vector<2x32xf32>, vector<32x128xf32>, vector<2x128xf32> -> vector<2x128xf32>
    %772 = arith.addf %770, %771 : vector<2x128xf32>
    %773 = arith.negf %772 : vector<2x128xf32>
    %774 = math.exp %773 : vector<2x128xf32>
    %cst_270 = arith.constant 1.000000e+00 : f32
    %775 = vector.broadcast %cst_270 : f32 to vector<2x128xf32>
    %776 = arith.addf %775, %774 : vector<2x128xf32>
    %777 = arith.divf %775, %776 : vector<2x128xf32>
    %778 = math.tanh %772 : vector<2x128xf32>
    %779 = vector.extract_strided_slice %777 {offsets = [0, 0], sizes = [2, 32], strides = [1, 1]} : vector<2x128xf32> to vector<2x32xf32>
    %780 = vector.extract_strided_slice %777 {offsets = [0, 32], sizes = [2, 32], strides = [1, 1]} : vector<2x128xf32> to vector<2x32xf32>
    %781 = vector.extract_strided_slice %777 {offsets = [0, 64], sizes = [2, 32], strides = [1, 1]} : vector<2x128xf32> to vector<2x32xf32>
    %782 = vector.extract_strided_slice %778 {offsets = [0, 96], sizes = [2, 32], strides = [1, 1]} : vector<2x128xf32> to vector<2x32xf32>
    %783 = arith.mulf %780, %763 : vector<2x32xf32>
    %784 = arith.mulf %779, %782 : vector<2x32xf32>
    %785 = arith.addf %783, %784 : vector<2x32xf32>
    %786 = math.tanh %785 : vector<2x32xf32>
    %787 = arith.mulf %781, %786 : vector<2x32xf32>
    %c0_271 = arith.constant 0 : index
    %c4_272 = arith.constant 4 : index
    %c0_273 = arith.constant 0 : index
    %788 = vector.load %arg16[%c0_271, %c4_272, %c0_273] : memref<2x8x32xf32, #tpu.memory_space<vmem>>, vector<2x1x32xf32>
    %789 = vector.shape_cast %788 : vector<2x1x32xf32> to vector<2x32xf32>
    %790 = vector.shape_cast %787 : vector<2x32xf32> to vector<2x1x32xf32>
    tpu.vector_store %arg16[%c0_271, %c4_272, %c0_273], %790 {strides = array<i32>} : memref<2x8x32xf32, #tpu.memory_space<vmem>>, vector<2x1x32xf32>,
    %791 = vector.extract_strided_slice %676 {offsets = [0, 5, 0], sizes = [2, 1, 128], strides = [1, 1, 1]} : vector<2x8x128xf32> to vector<2x1x128xf32>
    %792 = vector.shape_cast %791 : vector<2x1x128xf32> to vector<2x128xf32>
    %cst_274 = arith.constant dense<0.000000e+00> : vector<2x128xf32>
    %793 = tpu.matmul %787, %678, %cst_274 {dimension_numbers = #tpu.dot_dimension_numbers<[1], [0], [0], [1], [0, 0, 1, 1], [], []>} : vector<2x32xf32>, vector<32x128xf32>, vector<2x128xf32> -> vector<2x128xf32>
    %794 = arith.addf %792, %793 : vector<2x128xf32>
    %795 = arith.negf %794 : vector<2x128xf32>
    %796 = math.exp %795 : vector<2x128xf32>
    %cst_275 = arith.constant 1.000000e+00 : f32
    %797 = vector.broadcast %cst_275 : f32 to vector<2x128xf32>
    %798 = arith.addf %797, %796 : vector<2x128xf32>
    %799 = arith.divf %797, %798 : vector<2x128xf32>
    %800 = math.tanh %794 : vector<2x128xf32>
    %801 = vector.extract_strided_slice %799 {offsets = [0, 0], sizes = [2, 32], strides = [1, 1]} : vector<2x128xf32> to vector<2x32xf32>
    %802 = vector.extract_strided_slice %799 {offsets = [0, 32], sizes = [2, 32], strides = [1, 1]} : vector<2x128xf32> to vector<2x32xf32>
    %803 = vector.extract_strided_slice %799 {offsets = [0, 64], sizes = [2, 32], strides = [1, 1]} : vector<2x128xf32> to vector<2x32xf32>
    %804 = vector.extract_strided_slice %800 {offsets = [0, 96], sizes = [2, 32], strides = [1, 1]} : vector<2x128xf32> to vector<2x32xf32>
    %805 = arith.mulf %802, %785 : vector<2x32xf32>
    %806 = arith.mulf %801, %804 : vector<2x32xf32>
    %807 = arith.addf %805, %806 : vector<2x32xf32>
    %808 = math.tanh %807 : vector<2x32xf32>
    %809 = arith.mulf %803, %808 : vector<2x32xf32>
    %c0_276 = arith.constant 0 : index
    %c5_277 = arith.constant 5 : index
    %c0_278 = arith.constant 0 : index
    %810 = vector.load %arg16[%c0_276, %c5_277, %c0_278] : memref<2x8x32xf32, #tpu.memory_space<vmem>>, vector<2x1x32xf32>
    %811 = vector.shape_cast %810 : vector<2x1x32xf32> to vector<2x32xf32>
    %812 = vector.shape_cast %809 : vector<2x32xf32> to vector<2x1x32xf32>
    tpu.vector_store %arg16[%c0_276, %c5_277, %c0_278], %812 {strides = array<i32>} : memref<2x8x32xf32, #tpu.memory_space<vmem>>, vector<2x1x32xf32>,
    %813 = vector.extract_strided_slice %676 {offsets = [0, 6, 0], sizes = [2, 1, 128], strides = [1, 1, 1]} : vector<2x8x128xf32> to vector<2x1x128xf32>
    %814 = vector.shape_cast %813 : vector<2x1x128xf32> to vector<2x128xf32>
    %cst_279 = arith.constant dense<0.000000e+00> : vector<2x128xf32>
    %815 = tpu.matmul %809, %678, %cst_279 {dimension_numbers = #tpu.dot_dimension_numbers<[1], [0], [0], [1], [0, 0, 1, 1], [], []>} : vector<2x32xf32>, vector<32x128xf32>, vector<2x128xf32> -> vector<2x128xf32>
    %816 = arith.addf %814, %815 : vector<2x128xf32>
    %817 = arith.negf %816 : vector<2x128xf32>
    %818 = math.exp %817 : vector<2x128xf32>
    %cst_280 = arith.constant 1.000000e+00 : f32
    %819 = vector.broadcast %cst_280 : f32 to vector<2x128xf32>
    %820 = arith.addf %819, %818 : vector<2x128xf32>
    %821 = arith.divf %819, %820 : vector<2x128xf32>
    %822 = math.tanh %816 : vector<2x128xf32>
    %823 = vector.extract_strided_slice %821 {offsets = [0, 0], sizes = [2, 32], strides = [1, 1]} : vector<2x128xf32> to vector<2x32xf32>
    %824 = vector.extract_strided_slice %821 {offsets = [0, 32], sizes = [2, 32], strides = [1, 1]} : vector<2x128xf32> to vector<2x32xf32>
    %825 = vector.extract_strided_slice %821 {offsets = [0, 64], sizes = [2, 32], strides = [1, 1]} : vector<2x128xf32> to vector<2x32xf32>
    %826 = vector.extract_strided_slice %822 {offsets = [0, 96], sizes = [2, 32], strides = [1, 1]} : vector<2x128xf32> to vector<2x32xf32>
    %827 = arith.mulf %824, %807 : vector<2x32xf32>
    %828 = arith.mulf %823, %826 : vector<2x32xf32>
    %829 = arith.addf %827, %828 : vector<2x32xf32>
    %830 = math.tanh %829 : vector<2x32xf32>
    %831 = arith.mulf %825, %830 : vector<2x32xf32>
    %c0_281 = arith.constant 0 : index
    %c6_282 = arith.constant 6 : index
    %c0_283 = arith.constant 0 : index
    %832 = vector.load %arg16[%c0_281, %c6_282, %c0_283] : memref<2x8x32xf32, #tpu.memory_space<vmem>>, vector<2x1x32xf32>
    %833 = vector.shape_cast %832 : vector<2x1x32xf32> to vector<2x32xf32>
    %834 = vector.shape_cast %831 : vector<2x32xf32> to vector<2x1x32xf32>
    tpu.vector_store %arg16[%c0_281, %c6_282, %c0_283], %834 {strides = array<i32>} : memref<2x8x32xf32, #tpu.memory_space<vmem>>, vector<2x1x32xf32>,
    %835 = vector.extract_strided_slice %676 {offsets = [0, 7, 0], sizes = [2, 1, 128], strides = [1, 1, 1]} : vector<2x8x128xf32> to vector<2x1x128xf32>
    %836 = vector.shape_cast %835 : vector<2x1x128xf32> to vector<2x128xf32>
    %cst_284 = arith.constant dense<0.000000e+00> : vector<2x128xf32>
    %837 = tpu.matmul %831, %678, %cst_284 {dimension_numbers = #tpu.dot_dimension_numbers<[1], [0], [0], [1], [0, 0, 1, 1], [], []>} : vector<2x32xf32>, vector<32x128xf32>, vector<2x128xf32> -> vector<2x128xf32>
    %838 = arith.addf %836, %837 : vector<2x128xf32>
    %839 = arith.negf %838 : vector<2x128xf32>
    %840 = math.exp %839 : vector<2x128xf32>
    %cst_285 = arith.constant 1.000000e+00 : f32
    %841 = vector.broadcast %cst_285 : f32 to vector<2x128xf32>
    %842 = arith.addf %841, %840 : vector<2x128xf32>
    %843 = arith.divf %841, %842 : vector<2x128xf32>
    %844 = math.tanh %838 : vector<2x128xf32>
    %845 = vector.extract_strided_slice %843 {offsets = [0, 0], sizes = [2, 32], strides = [1, 1]} : vector<2x128xf32> to vector<2x32xf32>
    %846 = vector.extract_strided_slice %843 {offsets = [0, 32], sizes = [2, 32], strides = [1, 1]} : vector<2x128xf32> to vector<2x32xf32>
    %847 = vector.extract_strided_slice %843 {offsets = [0, 64], sizes = [2, 32], strides = [1, 1]} : vector<2x128xf32> to vector<2x32xf32>
    %848 = vector.extract_strided_slice %844 {offsets = [0, 96], sizes = [2, 32], strides = [1, 1]} : vector<2x128xf32> to vector<2x32xf32>
    %849 = arith.mulf %846, %829 : vector<2x32xf32>
    %850 = arith.mulf %845, %848 : vector<2x32xf32>
    %851 = arith.addf %849, %850 : vector<2x32xf32>
    %852 = math.tanh %851 : vector<2x32xf32>
    %853 = arith.mulf %847, %852 : vector<2x32xf32>
    %c0_286 = arith.constant 0 : index
    %c7_287 = arith.constant 7 : index
    %c0_288 = arith.constant 0 : index
    %854 = vector.load %arg16[%c0_286, %c7_287, %c0_288] : memref<2x8x32xf32, #tpu.memory_space<vmem>>, vector<2x1x32xf32>
    %855 = vector.shape_cast %854 : vector<2x1x32xf32> to vector<2x32xf32>
    %856 = vector.shape_cast %853 : vector<2x32xf32> to vector<2x1x32xf32>
    tpu.vector_store %arg16[%c0_286, %c7_287, %c0_288], %856 {strides = array<i32>} : memref<2x8x32xf32, #tpu.memory_space<vmem>>, vector<2x1x32xf32>,
    %c0_289 = arith.constant 0 : index
    %c0_290 = arith.constant 0 : index
    %c0_291 = arith.constant 0 : index
    %857 = vector.load %arg16[%c0_289, %c0_290, %c0_291] : memref<2x8x32xf32, #tpu.memory_space<vmem>>, vector<2x8x32xf32>
    %858 = vector.shape_cast %857 : vector<2x8x32xf32> to vector<16x32xf32>
    %cst_292 = arith.constant dense<0.000000e+00> : vector<16x32xf32>
    %859 = tpu.matmul %0, %858, %cst_292 {dimension_numbers = #tpu.dot_dimension_numbers<[1], [0], [0], [1], [0, 0, 1, 1], [], []>} : vector<16x16xf32>, vector<16x32xf32>, vector<16x32xf32> -> vector<16x32xf32>
    %860 = arith.select %22, %858, %859 : vector<16x32xi1>, vector<16x32xf32>
    %861 = vector.shape_cast %860 : vector<16x32xf32> to vector<2x8x32xf32>
    %c0_293 = arith.constant 0 : index
    %c0_294 = arith.constant 0 : index
    %862 = vector.load %arg10[%c0_293, %c0_294] : memref<1x32xf32, #tpu.memory_space<vmem>>, vector<1x32xf32>
    %863 = vector.shape_cast %862 : vector<1x32xf32> to vector<1x1x32xf32>
    %864 = vector.broadcast %863 : vector<1x1x32xf32> to vector<2x8x32xf32>
    %865 = arith.mulf %861, %864 : vector<2x8x32xf32>
    %cst_295 = arith.constant dense<0.000000e+00> : vector<2x8xf32>
    %866 = vector.multi_reduction <add>, %865, %cst_295 [2] : vector<2x8x32xf32> to vector<2x8xf32>
    %867 = vector.shape_cast %866 : vector<2x8xf32> to vector<2x8x1xf32>
    %cst_296 = arith.constant dense<0xFF800000> : vector<2x1xf32>
    %868 = vector.multi_reduction <maximumf>, %867, %cst_296 [1] : vector<2x8x1xf32> to vector<2x1xf32>
    %869 = vector.shape_cast %868 : vector<2x1xf32> to vector<2x1x1xf32>
    %870 = vector.broadcast %869 : vector<2x1x1xf32> to vector<2x8x1xf32>
    %871 = arith.subf %867, %870 : vector<2x8x1xf32>
    %872 = math.exp %871 : vector<2x8x1xf32>
    %cst_297 = arith.constant dense<0.000000e+00> : vector<2x1xf32>
    %873 = vector.multi_reduction <add>, %872, %cst_297 [1] : vector<2x8x1xf32> to vector<2x1xf32>
    %874 = vector.shape_cast %873 : vector<2x1xf32> to vector<2x1x1xf32>
    %875 = vector.broadcast %874 : vector<2x1x1xf32> to vector<2x8x1xf32>
    %876 = arith.divf %872, %875 : vector<2x8x1xf32>
    %877 = vector.broadcast %876 : vector<2x8x1xf32> to vector<2x8x32xf32>
    %878 = arith.mulf %861, %877 : vector<2x8x32xf32>
    %cst_298 = arith.constant dense<0.000000e+00> : vector<2x32xf32>
    %879 = vector.multi_reduction <add>, %878, %cst_298 [1] : vector<2x8x32xf32> to vector<2x32xf32>
    %c0_299 = arith.constant 0 : index
    %c0_300 = arith.constant 0 : index
    %880 = vector.load %arg11[%c0_299, %c0_300] : memref<32x64xf32, #tpu.memory_space<vmem>>, vector<32x64xf32>
    %cst_301 = arith.constant dense<0.000000e+00> : vector<2x64xf32>
    %881 = tpu.matmul %879, %880, %cst_301 {dimension_numbers = #tpu.dot_dimension_numbers<[1], [0], [0], [1], [0, 0, 1, 1], [], []>} : vector<2x32xf32>, vector<32x64xf32>, vector<2x64xf32> -> vector<2x64xf32>
    %c0_302 = arith.constant 0 : index
    %c0_303 = arith.constant 0 : index
    %882 = vector.load %arg12[%c0_302, %c0_303] : memref<1x64xf32, #tpu.memory_space<vmem>>, vector<1x64xf32>
    %883 = vector.broadcast %882 : vector<1x64xf32> to vector<2x64xf32>
    %884 = arith.addf %881, %883 : vector<2x64xf32>
    %cst_304 = arith.constant 5.000000e-01 : f32
    %885 = vector.broadcast %cst_304 : f32 to vector<2x64xf32>
    %886 = arith.mulf %885, %884 : vector<2x64xf32>
    %cst_305 = arith.constant 0.707106769 : f32
    %887 = vector.broadcast %cst_305 : f32 to vector<2x64xf32>
    %888 = arith.mulf %884, %887 : vector<2x64xf32>
    %cst_306 = arith.constant 0.000000e+00 : f32
    %889 = vector.broadcast %cst_306 : f32 to vector<2x64xf32>
    %890 = arith.cmpf oge, %888, %889 : vector<2x64xf32>
    %cst_307 = arith.constant 1.000000e+00 : f32
    %cst_308 = arith.constant -1.000000e+00 : f32
    %891 = vector.broadcast %cst_307 : f32 to vector<2x64xf32>
    %892 = vector.broadcast %cst_308 : f32 to vector<2x64xf32>
    %893 = arith.select %890, %891, %892 : vector<2x64xi1>, vector<2x64xf32>
    %894 = math.absf %888 : vector<2x64xf32>
    %cst_309 = arith.constant 0.327591091 : f32
    %895 = vector.broadcast %cst_309 : f32 to vector<2x64xf32>
    %896 = arith.mulf %895, %894 : vector<2x64xf32>
    %cst_310 = arith.constant 1.000000e+00 : f32
    %897 = vector.broadcast %cst_310 : f32 to vector<2x64xf32>
    %898 = arith.addf %897, %896 : vector<2x64xf32>
    %cst_311 = arith.constant 1.000000e+00 : f32
    %899 = vector.broadcast %cst_311 : f32 to vector<2x64xf32>
    %900 = arith.divf %899, %898 : vector<2x64xf32>
    %cst_312 = arith.constant 1.06140542 : f32
    %901 = vector.broadcast %cst_312 : f32 to vector<2x64xf32>
    %902 = arith.mulf %901, %900 : vector<2x64xf32>
    %cst_313 = arith.constant -1.45315206 : f32
    %903 = vector.broadcast %cst_313 : f32 to vector<2x64xf32>
    %904 = arith.addf %902, %903 : vector<2x64xf32>
    %905 = arith.mulf %904, %900 : vector<2x64xf32>
    %cst_314 = arith.constant 1.42141378 : f32
    %906 = vector.broadcast %cst_314 : f32 to vector<2x64xf32>
    %907 = arith.addf %905, %906 : vector<2x64xf32>
    %908 = arith.mulf %907, %900 : vector<2x64xf32>
    %cst_315 = arith.constant -0.284496725 : f32
    %909 = vector.broadcast %cst_315 : f32 to vector<2x64xf32>
    %910 = arith.addf %908, %909 : vector<2x64xf32>
    %911 = arith.mulf %910, %900 : vector<2x64xf32>
    %cst_316 = arith.constant 0.254829586 : f32
    %912 = vector.broadcast %cst_316 : f32 to vector<2x64xf32>
    %913 = arith.addf %911, %912 : vector<2x64xf32>
    %914 = arith.mulf %913, %900 : vector<2x64xf32>
    %cst_317 = arith.constant 0.000000e+00 : f32
    %915 = vector.broadcast %cst_317 : f32 to vector<2x64xf32>
    %916 = arith.subf %915, %894 : vector<2x64xf32>
    %917 = arith.mulf %916, %894 : vector<2x64xf32>
    %918 = math.exp %917 : vector<2x64xf32>
    %919 = arith.mulf %914, %918 : vector<2x64xf32>
    %cst_318 = arith.constant 1.000000e+00 : f32
    %920 = vector.broadcast %cst_318 : f32 to vector<2x64xf32>
    %921 = arith.subf %920, %919 : vector<2x64xf32>
    %922 = arith.mulf %893, %921 : vector<2x64xf32>
    %cst_319 = arith.constant 1.000000e+00 : f32
    %923 = vector.broadcast %cst_319 : f32 to vector<2x64xf32>
    %924 = arith.addf %923, %922 : vector<2x64xf32>
    %925 = arith.mulf %886, %924 : vector<2x64xf32>
    %c0_320 = arith.constant 0 : index
    %c0_321 = arith.constant 0 : index
    %926 = vector.load %arg13[%c0_320, %c0_321] : memref<1x64xf32, #tpu.memory_space<vmem>>, vector<1x64xf32>
    %927 = vector.broadcast %926 : vector<1x64xf32> to vector<2x64xf32>
    %928 = arith.mulf %925, %927 : vector<2x64xf32>
    %cst_322 = arith.constant dense<0.000000e+00> : vector<2xf32>
    %929 = vector.multi_reduction <add>, %928, %cst_322 [1] : vector<2x64xf32> to vector<2xf32>
    %930 = vector.shape_cast %929 : vector<2xf32> to vector<2x1xf32>
    %c0_323 = arith.constant 0 : index
    %c0_324 = arith.constant 0 : index
    %931 = vector.load %arg14[%c0_323, %c0_324] : memref<1x1xf32, #tpu.memory_space<vmem>>, vector<1x1xf32>
    %932 = vector.broadcast %931 : vector<1x1xf32> to vector<2x1xf32>
    %933 = arith.addf %930, %932 : vector<2x1xf32>
    %934 = arith.negf %933 : vector<2x1xf32>
    %935 = math.exp %934 : vector<2x1xf32>
    %cst_325 = arith.constant 1.000000e+00 : f32
    %936 = vector.broadcast %cst_325 : f32 to vector<2x1xf32>
    %937 = arith.addf %936, %935 : vector<2x1xf32>
    %938 = arith.divf %936, %937 : vector<2x1xf32>
    %c0_326 = arith.constant 0 : index
    %c0_327 = arith.constant 0 : index
    %939 = vector.load %arg15[%c0_326, %c0_327] : memref<2x1xf32, #tpu.memory_space<vmem>>, vector<2x1xf32>
    tpu.vector_store %arg15[%c0_326, %c0_327], %938 {strides = array<i32>} : memref<2x1xf32, #tpu.memory_space<vmem>>, vector<2x1xf32>,
    return
  }
}

</mosaic_0001>

<bundles_post_ra>
// kernel: forward.1
= control target key start
LH: loop header
LB: loop body
LE: loop exit
PB: predicated region body
PF: predicated region fallthrough
CT: control target
= control target key end

     0   :  { %s7295_s0 = inlined_call_operand.vmem [shape: s32[16,1], index: 0, kind: input, shape index: {}]   ;;  %s7296_s1 = inlined_call_operand.vmem [shape: f32[16,256], index: 1, kind: input, shape index: {}]   ;;  %s7297_s2 = inlined_call_operand.vmem [shape: f32[16,16], index: 2, kind: input, shape index: {}]   ;;  %s7298_s3 = inlined_call_operand.vmem [shape: f32[256,32], index: 3, kind: input, shape index: {}]   ;;  %s7299_s4 = inlined_call_operand.vmem [shape: f32[7,32,128], index: 4, kind: input, shape index: {}]   ;;  %s7300_s5 = inlined_call_operand.vmem [shape: f32[1,128], index: 5, kind: input, shape index: {}]   ;;  %s7301_s6 = inlined_call_operand.vmem [shape: f32[128,128], index: 6, kind: input, shape index: {}]   ;;  %s7302_s7 = inlined_call_operand.hbm [shape: f32[3,32,128], index: 7, kind: input, shape index: {}]   ;;  %s7303_s8 = inlined_call_operand.hbm [shape: f32[4,32,128], index: 8, kind: input, shape index: {}]   ;;  %s7304_s9 = inlined_call_operand.vmem [shape: f32[4,1,128], index: 9, kind: input, shape index: {}]   ;;  %s7305_s10 = inlined_call_operand.vmem [shape: f32[1,32], index: 10, kind: input, shape index: {}]   ;;  %s7306_s11 = inlined_call_operand.hbm [shape: f32[32,64], index: 11, kind: input, shape index: {}]   ;;  %s7307_s12 = inlined_call_operand.vmem [shape: f32[1,64], index: 12, kind: input, shape index: {}]   ;;  %s7308_s13 = inlined_call_operand.vmem [shape: f32[1,64], index: 13, kind: input, shape index: {}]   ;;  %s7309_s14 = inlined_call_operand.<no memory space> [shape: f32[1,1], index: 14, kind: input, shape index: {}]   ;;  %s7310_s15 = inlined_call_operand.vmem [shape: f32[2,1], index: 15, kind: output, shape index: {}]  }
   0x1   :  { %v20_v0 = vstv %s7309_s14 }
   0x2   :  { %21 = vst [vmem:[#allocation4] sm:$0x1] %v20_v0 }
   0x3   :  { %22 = vsyncpa [#allocation6], 0 }
   0x4   :  { %23 = vsyncpa [#allocation8], 0  ;;  %s55_s22 = sshll.u32 %s7303_s8, 4  ;;  %s5795_s23 = smov [#allocation7]   ;;  %s56_s22 = int_to_ptr.hbm [resolvable:$true] %s55_s22 }
   0x5   :  { %s57_s24 = sshll.u32 %s5795_s23, 4  ;;  %s42_s27 = sshll.u32 %s7302_s7, 4  ;;  %s58_s24 = int_to_ptr.vmem [resolvable:$true] %s57_s24  ;;  %s43_s27 = int_to_ptr.hbm [resolvable:$true] %s42_s27 }
   0x6   :  { %s5796_s28 = smov 128   ;;  %s5797_s29 = smov 8  }
   0x7   :  { %63 = dma.hbm_to_vmem [thread:$0]  %s56_s22, 2048, %s58_s24, [#allocation8], %s5796_s28, %s5796_s28, %s5797_s29  }
   0x8   :  { %s5798_s14 = smov [#allocation5]   ;;  %s72_s18 = sshll.u32 %s7306_s11, 4  ;;  %s73_s18 = int_to_ptr.hbm [resolvable:$true] %s72_s18 }
   0x9   :  { %s44_s30 = sshll.u32 %s5798_s14, 4  ;;  %s5799_s8 = smov [#allocation9]   ;;  %s45_s30 = int_to_ptr.vmem [resolvable:$true] %s44_s30 }
   0xa   :  { %50 = dma.hbm_to_vmem [thread:$0]  %s43_s27, 1536, %s45_s30, [#allocation6], %s5796_s28, %s5796_s28, %s5797_s29  }
   0xb   :  { %s74_s19 = sshll.u32 %s5799_s8, 4  ;;  %s75_s19 = int_to_ptr.vmem [resolvable:$true] %s74_s19 }
   0xc   :  { %80 = dma.hbm_to_vmem [thread:$0]  %s73_s18, 512, %s75_s19, [#allocation8], %s5796_s28, %s5796_s28, %s5797_s29  }
   0xd   :  { %5791 = dma.done.wait [#allocation6], 1536  }
   0xe   :  { %5792 = vsyncadd [#allocation6], 4294965760 }
   0xf   :  { %5793 = dma.done.wait [#allocation8], 2560  }
  0x10   :  { %5794 = vsyncadd [#allocation8], 4294964736  ;;  %v5800_v1 = vmov 0   ;;  %v117_v2 = vld [vmem:[%s7295_s0] sm:$0xff]  ;;  %v157_v3 = vld [vmem:[%s7298_s3 + $0x78] sm:$0xff]  ;;  %v101_v38 = vlaneseq  ;;  %vm220_vm6 = vcmask 256000  }
  0x11   :  { %5173 = vset.pattern.permute.xlu0 %v5800_v1  ;;  %vm119_vm0 = vcmp.lt.s32.totalorder %v117_v2, 128  ;;  %174 = vmatpush.msra.mxu0 %v157_v3  ;;  %v173_v4 = vld [vmem:[%s7298_s3 + $0xf8] sm:$0xff]  ;;  %v156_v5 = vld [vmem:[%s7298_s3 + $0x70] sm:$0xff]  ;;  %v118_v8 = vld [vmem:[%s7295_s0 + $0x8] sm:$0xff]  ;;  %v5801_v54 = vmov 0.0   ;;  %vm225_vm7 = vcmask 261120  }
  0x12   :  { %v172_v6 = vld [vmem:[%s7298_s3 + $0xf0] sm:$0xff]  ;;  %v121_v7 = vsel %vm119_vm0, %v117_v2, 4294967295  ;;  %197 = vmatpush.msra.mxu1 %v173_v4  ;;  %v155_v9 = vld [vmem:[%s7298_s3 + $0x68] sm:$0xff]  ;;  %v154_v11 = vld [vmem:[%s7298_s3 + $0x60] sm:$0xff]  ;;  %vm120_vm1 = vcmp.lt.s32.totalorder %v118_v8, 128  ;;  %v5999_v39 = vand.u32 127, %v101_v38 }
  0x13   :  { %125 = vperm.xlu0 %5173, %v121_v7   ;;  %175 = vmatpush.msra.mxu0 %v156_v5  ;;  %v171_v10 = vld [vmem:[%s7298_s3 + $0xe8] sm:$0xff]  ;;  %v170_v12 = vld [vmem:[%s7298_s3 + $0xe0] sm:$0xff]  ;;  %v153_v13 = vld [vmem:[%s7298_s3 + $0x58] sm:$0xff]  ;;  %v122_v15 = vsel %vm120_vm1, %v118_v8, 4294967295  ;;  %221 = vst.msk [vmem:[#allocation3] sm:$0x7] %vm220_vm6, %v5801_v54 }
  0x14   :  { %198 = vmatpush.msra.mxu1 %v172_v6  ;;  %v169_v14 = vld [vmem:[%s7298_s3 + $0xd8] sm:$0xff]  ;;  %v152_v16 = vld [vmem:[%s7298_s3 + $0x50] sm:$0xff]  ;;  %v151_v18 = vld [vmem:[%s7298_s3 + $0x48] sm:$0xff]  ;;  %v123_v40 = vadd.s32 128, %v5999_v39  ;;  %222 = vst.msk [vmem:[#allocation3 + $0x10] sm:$0x7] %vm220_vm6, %v5801_v54 }
  0x15   :  { %176 = vmatpush.msra.mxu0 %v155_v9  ;;  %v168_v17 = vld [vmem:[%s7298_s3 + $0xd0] sm:$0xff]  ;;  %v167_v19 = vld [vmem:[%s7298_s3 + $0xc8] sm:$0xff]  ;;  %v150_v20 = vld [vmem:[%s7298_s3 + $0x40] sm:$0xff]  ;;  %223 = vst.msk [vmem:[#allocation3 + $0xb] sm:$0x7] %vm220_vm6, %v5801_v54  ;;  %vm7312_vm8 = vcmask 130048  }
  0x16   :  { %199 = vmatpush.msra.mxu1 %v171_v10  ;;  %v166_v21 = vld [vmem:[%s7298_s3 + $0xc0] sm:$0xff]  ;;  %v149_v22 = vld [vmem:[%s7298_s3 + $0x38] sm:$0xff]  ;;  %v148_v24 = vld [vmem:[%s7298_s3 + $0x30] sm:$0xff]  ;;  %224 = vst.msk [vmem:[#allocation3 + $0x1b] sm:$0x7] %vm220_vm6, %v5801_v54  ;;  %s5802_s0 = smov 32  }
  0x17   :  { %177 = vmatpush.msra.mxu0 %v154_v11  ;;  %v165_v23 = vld [vmem:[%s7298_s3 + $0xb8] sm:$0xff]  ;;  %v164_v25 = vld [vmem:[%s7298_s3 + $0xb0] sm:$0xff]  ;;  %v147_v26 = vld [vmem:[%s7298_s3 + $0x28] sm:$0xff]  ;;  %s5803_s7 = smov 64  }
  0x18   :  { %200 = vmatpush.msra.mxu1 %v170_v12  ;;  %v163_v27 = vld [vmem:[%s7298_s3 + $0xa8] sm:$0xff]  ;;  %v146_v28 = vld [vmem:[%s7298_s3 + $0x20] sm:$0xff]  ;;  %v145_v30 = vld [vmem:[%s7298_s3 + $0x18] sm:$0xff] }
  0x19   :  { %178 = vmatpush.msra.mxu0 %v153_v13  ;;  %v162_v29 = vld [vmem:[%s7298_s3 + $0xa0] sm:$0xff]  ;;  %v161_v31 = vld [vmem:[%s7298_s3 + $0x98] sm:$0xff]  ;;  %v144_v32 = vld [vmem:[%s7298_s3 + $0x10] sm:$0xff] }
  0x1a   :  { %201 = vmatpush.msra.mxu1 %v169_v14  ;;  %v160_v33 = vld [vmem:[%s7298_s3 + $0x90] sm:$0xff]  ;;  %v143_v34 = vld [vmem:[%s7298_s3 + $0x8] sm:$0xff]  ;;  %v142_v36 = vld [vmem:[%s7298_s3] sm:$0xff] }
  0x1b   :  { %128 = vperm.xlu0 %5173, %v122_v15   ;;  %179 = vmatpush.msra.mxu0 %v152_v16  ;;  %v159_v35 = vld [vmem:[%s7298_s3 + $0x88] sm:$0xff]  ;;  %v158_v37 = vld [vmem:[%s7298_s3 + $0x80] sm:$0xff]  ;;  %v136_v46 = vld [vmem:[%s7296_s1 + $0x10] sm:$0xff] }
  0x1c   :  { %202 = vmatpush.msra.mxu1 %v168_v17  ;;  %v134_v41 = vld [vmem:[%s7296_s1] sm:$0xff]  ;;  %v135_v42 = vld [vmem:[%s7296_s1 + $0x8] sm:$0xff]  ;;  %v137_v47 = vld [vmem:[%s7296_s1 + $0x18] sm:$0xff] }
  0x1d   :  { %180 = vmatpush.msra.mxu0 %v151_v18  ;;  %v5005_v51 = vld [vmem:[%s7299_s4 + $0x38] sm:$0xff]  ;;  %v5004_v55 = vld [vmem:[%s7299_s4 + $0x30] sm:$0xff]  ;;  %v5003_v58 = vld [vmem:[%s7299_s4 + $0x28] sm:$0xff] }
  0x1e   :  { %203 = vmatpush.msra.mxu1 %v167_v19  ;;  %v233_v52 = vld [vmem:[%s7299_s4 + $0x18] sm:$0xff]  ;;  %259 = vmatpush.msra.mxu2 %v5005_v51  ;;  %v232_v56 = vld [vmem:[%s7299_s4 + $0x10] sm:$0xff]  ;;  %v231_v59 = vld [vmem:[%s7299_s4 + $0x8] sm:$0xff] }
  0x1f   :  { %181 = vmatpush.msra.mxu0 %v150_v20  ;;  %v6025_v53 = vld [vmem:[%s7299_s4 + $0xd8] sm:$0xff]  ;;  %288 = vmatpush.msra.mxu3 %v233_v52  ;;  %v6038_v57 = vld [vmem:[%s7299_s4 + $0xd0] sm:$0xff]  ;;  %v6057_v60 = vld [vmem:[%s7299_s4 + $0xc8] sm:$0xff] }
  0x20   :  { %204 = vmatpush.msra.mxu1 %v166_v21  ;;  %260 = vmatpush.msra.mxu2 %v5004_v55  ;;  %v5002_v61 = vld [vmem:[%s7299_s4 + $0x20] sm:$0xff]  ;;  %v5013_v0 = vld [vmem:[%s7299_s4 + $0x58] sm:$0xff]  ;;  %v5012_v1 = vld [vmem:[%s7299_s4 + $0x50] sm:$0xff] }
  0x21   :  { %182 = vmatpush.msra.mxu0 %v149_v22  ;;  %289 = vmatpush.msra.mxu3 %v232_v56  ;;  %v230_v62 = vld [vmem:[%s7299_s4] sm:$0xff]  ;;  %v5019_v2 = vld [vmem:[%s7299_s4 + $0x78] sm:$0xff]  ;;  %v5018_v3 = vld [vmem:[%s7299_s4 + $0x70] sm:$0xff] }
  0x22   :  { %205 = vmatpush.msra.mxu1 %v165_v23  ;;  %261 = vmatpush.msra.mxu2 %v5003_v58  ;;  %v6069_v63 = vld [vmem:[%s7299_s4 + $0xc0] sm:$0xff]  ;;  %v5011_v4 = vld [vmem:[%s7299_s4 + $0x48] sm:$0xff]  ;;  %v5025_v14 = vld [vmem:[%s7299_s4 + $0x98] sm:$0xff] }
  0x23   :  { %183 = vmatpush.msra.mxu0 %v148_v24  ;;  %290 = vmatpush.msra.mxu3 %v231_v59  ;;  %v5017_v5 = vld [vmem:[%s7299_s4 + $0x68] sm:$0xff]  ;;  %v5010_v6 = vld [vmem:[%s7299_s4 + $0x40] sm:$0xff]  ;;  %v5031_v15 = vld [vmem:[%s7299_s4 + $0xb8] sm:$0xff] }
  0x24   :  { %206 = vmatpush.msra.mxu1 %v164_v25  ;;  %262 = vmatpush.msra.mxu2 %v5002_v61  ;;  %v5016_v7 = vld [vmem:[%s7299_s4 + $0x60] sm:$0xff]  ;;  %v5024_v19 = vld [vmem:[%s7299_s4 + $0x90] sm:$0xff]  ;;  %v5023_v21 = vld [vmem:[%s7299_s4 + $0x88] sm:$0xff] }
  0x25   :  { %184 = vmatpush.msra.mxu0 %v147_v26  ;;  %291 = vmatpush.msra.mxu3 %v230_v62  ;;  %v5030_v20 = vld [vmem:[%s7299_s4 + $0xb0] sm:$0xff]  ;;  %v5029_v22 = vld [vmem:[%s7299_s4 + $0xa8] sm:$0xff]  ;;  %v5022_v23 = vld [vmem:[%s7299_s4 + $0x80] sm:$0xff] }
  0x26   :  { %207 = vmatpush.msra.mxu1 %v163_v27  ;;  %324 = vmatpush.msrb.mxu2 %v5013_v0  ;;  %v5028_v24 = vld [vmem:[%s7299_s4 + $0xa0] sm:$0xff]  ;;  %v508_v38 = vld [vmem:[%s7301_s6 + $0x68] sm:$0xff]  ;;  %v498_v51 = vld [vmem:[%s7301_s6 + $0x18] sm:$0xff] }
  0x27   :  { %185 = vmatpush.msra.mxu0 %v146_v28  ;;  %362 = vmatpush.msrb.mxu3 %v5019_v2  ;;  %v497_v52 = vld [vmem:[%s7301_s6 + $0x10] sm:$0xff] }
  0x28   :  { %208 = vmatpush.msra.mxu1 %v162_v29  ;;  %325 = vmatpush.msrb.mxu2 %v5012_v1 }
  0x29   :  { %186 = vmatpush.msra.mxu0 %v145_v30  ;;  %363 = vmatpush.msrb.mxu3 %v5018_v3 }
  0x2a   :  { %209 = vmatpush.msra.mxu1 %v161_v31  ;;  %326 = vmatpush.msrb.mxu2 %v5011_v4 }
  0x2b   :  { %187 = vmatpush.msra.mxu0 %v144_v32  ;;  %364 = vmatpush.msrb.mxu3 %v5017_v5 }
  0x2c   :  { %210 = vmatpush.msra.mxu1 %v160_v33  ;;  %327 = vmatpush.msrb.mxu2 %v5010_v6  ;;  %v5174_v6 = vld [vmem:[%s7300_s5] ss:$0 sm:$0xff] }
  0x2d   :  { %188 = vmatpush.msra.mxu0 %v143_v34  ;;  %365 = vmatpush.msrb.mxu3 %v5016_v7 }
  0x2e   :  { %211 = vmatpush.msra.mxu1 %v159_v35 }
  0x2f   :  { %189 = vmatpush.msra.mxu0 %v142_v36  ;;  %v510_v36 = vld [vmem:[%s7301_s6 + $0x78] sm:$0xff] }
  0x30   :  { %212 = vmatpush.msra.mxu1 %v158_v37  ;;  %v509_v37 = vld [vmem:[%s7301_s6 + $0x70] sm:$0xff] }
  0x31   :  { %476 = vmatpush.msrb.mxu0 %v6025_v53 }
  0x32   :  { %515 = vmatpush.msrb.mxu1 %v510_v36 }
  0x33   :  { %477 = vmatpush.msrb.mxu0 %v6038_v57 }
  0x34   :  { %516 = vmatpush.msrb.mxu1 %v509_v37 }
  0x35   :  { %478 = vmatpush.msrb.mxu0 %v6057_v60 }
  0x36   :  { %517 = vmatpush.msrb.mxu1 %v508_v38 }
  0x37   :  { %479 = vmatpush.msrb.mxu0 %v6069_v63 }
  0x85   :  { %v126_v43 = vpop.permute.xlu0 %125 }
  0x86   :  { %vm130_vm2 = vcmp.eq.s32.totalorder %v5999_v39, %v126_v43  ;;  %vm131_vm3 = vcmp.eq.s32.totalorder %v123_v40, %v126_v43  ;;  %v504_v43 = vld [vmem:[%s7301_s6 + $0x48] sm:$0xff] }
  0x87   :  { %v138_v44 = vsel %vm130_vm2, 1.0, %v134_v41  ;;  %v139_v45 = vsel %vm131_vm3, 1.0, %v135_v42  ;;  %v506_v41 = vld [vmem:[%s7301_s6 + $0x58] sm:$0xff]  ;;  %v505_v42 = vld [vmem:[%s7301_s6 + $0x50] sm:$0xff]  ;;  %vm689_vm2 = vcmask 1041409  }
  0x88   :  { %190 = vmatmul.f32.vlgmr.msra.gmra.mxu0 %v138_v44  ;;  %213 = vmatmul.f32.vlgmr.msra.gmra.mxu1 %v139_v45  ;;  %v503_v44 = vld [vmem:[%s7301_s6 + $0x40] sm:$0xff]  ;;  %v502_v45 = vld [vmem:[%s7301_s6 + $0x38] sm:$0xff] }
  0x8d   :  { %v129_v48 = vpop.permute.xlu0 %128 }
  0x8e   :  { %vm132_vm4 = vcmp.eq.s32.totalorder %v5999_v39, %v129_v48  ;;  %vm133_vm5 = vcmp.eq.s32.totalorder %v123_v40, %v129_v48  ;;  %v507_v40 = vld [vmem:[%s7301_s6 + $0x60] sm:$0xff] }
  0x8f   :  { %v140_v49 = vsel %vm132_vm4, 1.0, %v136_v46  ;;  %v141_v50 = vsel %vm133_vm5, 1.0, %v137_v47  ;;  %518 = vmatpush.msrb.mxu1 %v507_v40  ;;  %v501_v46 = vld [vmem:[%s7301_s6 + $0x30] sm:$0xff]  ;;  %v500_v47 = vld [vmem:[%s7301_s6 + $0x28] sm:$0xff] }
  0x90   :  { %193 = vmatmul.f32.gmra.mxu0 %v140_v49  ;;  %216 = vmatmul.f32.gmra.mxu1 %v141_v50  ;;  %v499_v50 = vld [vmem:[%s7301_s6 + $0x20] sm:$0xff] }
  0x91   :  { %519 = vmatpush.msrb.mxu1 %v506_v41 }
  0x93   :  { %520 = vmatpush.msrb.mxu1 %v505_v42 }
  0x95   :  { %521 = vmatpush.msrb.mxu1 %v504_v43 }
  0x97   :  { %522 = vmatpush.msrb.mxu1 %v503_v44 }
  0x99   :  { %523 = vmatpush.msrb.mxu1 %v502_v45 }
  0x9b   :  { %524 = vmatpush.msrb.mxu1 %v501_v46 }
  0x9d   :  { %525 = vmatpush.msrb.mxu1 %v500_v47 }
  0x9f   :  { %526 = vmatpush.msrb.mxu1 %v499_v50 }
  0xa1   :  { %527 = vmatpush.msrb.mxu1 %v498_v51 }
  0xa3   :  { %528 = vmatpush.msrb.mxu1 %v497_v52 }
 0x105   :  { %v191_v8 = vpop.f32.mrf.mxu0  ;;  %v214_v9 = vpop.f32.mrf.mxu1 }
 0x106   :  { %v215_v10 = vadd.f32 %v214_v9, %v191_v8 }
 0x108   :  { %226 = vst.msk [vmem:[#allocation3 + $0x3] sm:$0xff] %vm225_vm7, %v215_v10 }
 0x10d   :  { %v194_v11 = vpop.f32.mrf.mxu0  ;;  %v217_v12 = vpop.f32.mrf.mxu1 }
 0x10e   :  { %v218_v13 = vadd.f32 %v217_v12, %v194_v11 }
 0x10f   :  { %v234_v16 = vld [vmem:[#allocation3 + $0x1] sm:$0xff] }
 0x110   :  { %v228_v17 = vld [vmem:[#allocation3] sm:$0xff]  ;;  %227 = vst.msk [vmem:[#allocation3 + $0x13] sm:$0xff] %vm225_vm7, %v218_v13  ;;  %5006 = vmatmul.msk.f32.vlgmr.msra.gmra.mxu2 %vm225_vm7, %v234_v16 }
 0x111   :  { %v451_v18 = vld [vmem:[#allocation3 + $0x6] sm:$0xff]  ;;  %5008 = vmatmul.msk.f32.vlgmr.msra.gmra.mxu3 %vm225_vm7, %v228_v17  ;;  %400 = vmatpush.msra.mxu2 %v5025_v14 }
 0x112   :  { %5038 = vmatmul.msk.f32.vlgmr.msrb.gmra.mxu0 %vm225_vm7, %v451_v18  ;;  %438 = vmatpush.msra.mxu3 %v5031_v15  ;;  %v299_v27 = vld [vmem:[#allocation3 + $0x2] sm:$0xff] }
 0x113   :  { %401 = vmatpush.msra.mxu2 %v5024_v19  ;;  %v337_v28 = vld [vmem:[#allocation3 + $0x3] sm:$0xff]  ;;  %v6191_v19 = vld [vmem:[#allocation7 + $0x18] sm:$0xff] }
 0x114   :  { %439 = vmatpush.msra.mxu3 %v5030_v20  ;;  %v375_v31 = vld [vmem:[#allocation3 + $0x4] sm:$0xff]  ;;  %v6193_v20 = vld [vmem:[#allocation7 + $0x10] sm:$0xff]  ;;  %707 = vmatpush.msra.mxu0 %v6191_v19 }
 0x115   :  { %402 = vmatpush.msra.mxu2 %v5023_v21  ;;  %v413_v32 = vld [vmem:[#allocation3 + $0x5] sm:$0xff] }
 0x116   :  { %440 = vmatpush.msra.mxu3 %v5029_v22  ;;  %v6197_v21 = vld [vmem:[#allocation7 + $0x8] sm:$0xff]  ;;  %708 = vmatpush.msra.mxu0 %v6193_v20  ;;  %v6204_v22 = vld [vmem:[#allocation7] sm:$0xff] }
 0x117   :  { %v235_v25 = vld [vmem:[#allocation3 + $0x11] sm:$0xff]  ;;  %403 = vmatpush.msra.mxu2 %v5022_v23 }
 0x118   :  { %v229_v26 = vld [vmem:[#allocation3 + $0x10] sm:$0xff]  ;;  %5007 = vmatmul.msk.f32.gmra.mxu2 %vm225_vm7, %v235_v25  ;;  %441 = vmatpush.msra.mxu3 %v5028_v24 }
 0x119   :  { %5009 = vmatmul.msk.f32.gmra.mxu3 %vm225_vm7, %v229_v26  ;;  %v300_v29 = vld [vmem:[#allocation3 + $0x12] sm:$0xff]  ;;  %709 = vmatpush.msra.mxu0 %v6197_v21  ;;  %v5175_v24 = vld [vmem:[%s7304_s9] ss:$0 sm:$0xff] }
 0x11a   :  { %v338_v30 = vld [vmem:[#allocation3 + $0x13] sm:$0xff] }
 0x11b   :  { %v376_v33 = vld [vmem:[#allocation3 + $0x14] sm:$0xff]  ;;  %710 = vmatpush.msra.mxu0 %v6204_v22 }
 0x11c   :  { %v414_v34 = vld [vmem:[#allocation3 + $0x15] sm:$0xff] }
 0x11d   :  { %v452_v35 = vld [vmem:[#allocation3 + $0x16] sm:$0xff]  ;;  %955 = vmatpush.msrb.mxu0 %v6191_v19 }
 0x11f   :  { %956 = vmatpush.msrb.mxu0 %v6193_v20 }
 0x120   :  { %5014 = vmatmul.msk.f32.vlgmr.msrb.gmra.mxu2 %vm225_vm7, %v299_v27 }
 0x121   :  { %5020 = vmatmul.msk.f32.vlgmr.msrb.gmra.mxu3 %vm225_vm7, %v337_v28  ;;  %5159 = vmatpush.msrb.mxu2 %v6025_v53  ;;  %v496_v53 = vld [vmem:[%s7301_s6 + $0x8] sm:$0xff]  ;;  %v99_v28 = vld [vmem:[%s7297_s2] sm:$0xff] }
 0x122   :  { %529 = vmatpush.msrb.mxu1 %v496_v53  ;;  %589 = vmatpush.msrb.mxu3 %v6191_v19 }
 0x123   :  { %5160 = vmatpush.msrb.mxu2 %v6038_v57  ;;  %v495_v57 = vld [vmem:[%s7301_s6] sm:$0xff]  ;;  %957 = vmatpush.msrb.mxu0 %v6197_v21 }
 0x124   :  { %530 = vmatpush.msrb.mxu1 %v495_v57  ;;  %590 = vmatpush.msrb.mxu3 %v6193_v20 }
 0x125   :  { %5161 = vmatpush.msrb.mxu2 %v6057_v60  ;;  %958 = vmatpush.msrb.mxu0 %v6204_v22 }
 0x126   :  { %1455 = vmatpush.msra.mxu1 %v6191_v19  ;;  %591 = vmatpush.msrb.mxu3 %v6197_v21 }
 0x127   :  { %5162 = vmatpush.msrb.mxu2 %v6069_v63 }
 0x128   :  { %5015 = vmatmul.msk.f32.gmra.mxu2 %vm225_vm7, %v300_v29  ;;  %1456 = vmatpush.msra.mxu1 %v6193_v20  ;;  %v100_v29 = vld [vmem:[%s7297_s2 + $0x8] sm:$0xff] }
 0x129   :  { %5021 = vmatmul.msk.f32.gmra.mxu3 %vm225_vm7, %v338_v30 }
 0x12a   :  { %1457 = vmatpush.msra.mxu1 %v6197_v21  ;;  %592 = vmatpush.msrb.mxu3 %v6204_v22 }
 0x12c   :  { %1458 = vmatpush.msra.mxu1 %v6204_v22 }
 0x130   :  { %5026 = vmatmul.msk.f32.vlgmr.msra.gmra.mxu2 %vm225_vm7, %v375_v31  ;;  %v107_v31 = vand.u32 31, %v5999_v39 }
 0x131   :  { %5032 = vmatmul.msk.f32.vlgmr.msra.gmra.mxu3 %vm225_vm7, %v413_v32 }
 0x132   :  { %830 = vmatpush.msra.mxu3 %v6191_v19  ;;  %vm6240_vm9 = vcmp.lt.s32.totalorder %v107_v31, 16 }
 0x134   :  { %831 = vmatpush.msra.mxu3 %v6193_v20 }
 0x136   :  { %832 = vmatpush.msra.mxu3 %v6197_v21 }
 0x138   :  { %5027 = vmatmul.msk.f32.gmra.mxu2 %vm225_vm7, %v376_v33  ;;  %833 = vmatpush.msra.mxu3 %v6204_v22 }
 0x139   :  { %5033 = vmatmul.msk.f32.gmra.mxu3 %vm225_vm7, %v414_v34 }
 0x140   :  { %5039 = vmatmul.msk.f32.vlgmr.msrb.gmra.mxu2 %vm225_vm7, %v452_v35 }
 0x141   :  { %593 = vmatmul.f32.vlgmr.msrb.gmra.mxu3 %v5801_v54 }
 0x142   :  { %1205 = vmatpush.msrb.mxu3 %v6191_v19 }
 0x144   :  { %1206 = vmatpush.msrb.mxu3 %v6193_v20 }
 0x146   :  { %1207 = vmatpush.msrb.mxu3 %v6197_v21 }
 0x148   :  { %1208 = vmatpush.msrb.mxu3 %v6204_v22 }
 0x18f   :  { %v481_v7 = vpop.f32.mrf.mxu0 }
 0x193   :  { %v264_v48 = vpop.f32.mrf.mxu2 }
 0x194   :  { %v293_v49 = vpop.f32.mrf.mxu3 }
 0x195   :  { %v294_v62 = vadd.f32 %v293_v49, %v264_v48 }
 0x19b   :  { %v267_v55 = vpop.f32.mrf.mxu2 }
 0x19c   :  { %v296_v56 = vpop.f32.mrf.mxu3 }
 0x19d   :  { %v297_v4 = vadd.f32 %v296_v56, %v267_v55 }
 0x1a3   :  { %v329_v58 = vpop.f32.mrf.mxu2 }
 0x1a4   :  { %v367_v59 = vpop.f32.mrf.mxu3  ;;  %v335_v63 = vadd.f32 %v329_v58, %v294_v62 }
 0x1a6   :  { %v373_v0 = vadd.f32 %v367_v59, %v335_v63 }
 0x1ab   :  { %v332_v60 = vpop.f32.mrf.mxu2 }
 0x1ac   :  { %v370_v61 = vpop.f32.mrf.mxu3  ;;  %v336_v8 = vadd.f32 %v332_v60, %v297_v4 }
 0x1ae   :  { %v374_v12 = vadd.f32 %v370_v61, %v336_v8 }
 0x1b3   :  { %v405_v1 = vpop.f32.mrf.mxu2 }
 0x1b4   :  { %v411_v2 = vadd.f32 %v405_v1, %v373_v0  ;;  %v443_v3 = vpop.f32.mrf.mxu3 }
 0x1b6   :  { %v449_v5 = vadd.f32 %v443_v3, %v411_v2 }
 0x1b8   :  { %v487_v9 = vadd.f32 %v481_v7, %v449_v5 }
 0x1ba   :  { %v493_v10 = vadd.f32 %v5174_v6, %v487_v9 }
 0x1bb   :  { %v408_v11 = vpop.f32.mrf.mxu2 }
 0x1bc   :  { %531 = vmatmul.f32.vlgmr.msrb.gmra.mxu1 %v493_v10  ;;  %v412_v13 = vadd.f32 %v408_v11, %v374_v12  ;;  %v446_v14 = vpop.f32.mrf.mxu3 }
 0x1be   :  { %v450_v15 = vadd.f32 %v446_v14, %v412_v13 }
 0x1c3   :  { %v484_v16 = vpop.f32.mrf.mxu2 }
 0x1c4   :  { %v488_v17 = vadd.f32 %v484_v16, %v450_v15  ;;  %v594_v32 = vpop.f32.mrf.mxu3 }
 0x1c5   :  { %v598_v33 = vrot.slane %v594_v32, 1 }
 0x1c6   :  { %v494_v18 = vadd.f32 %v5174_v6, %v488_v17 }
 0x1c8   :  { %534 = vmatmul.f32.gmra.mxu1 %v494_v18 }
 0x239   :  { %v532_v23 = vpop.f32.mrf.mxu1 }
 0x23a   :  { %v533_v27 = vadd.f32 %v5175_v24, %v532_v23 }
 0x245   :  { %v535_v25 = vpop.f32.mrf.mxu1 }
 0x246   :  { %v536_v26 = vadd.f32 %v5175_v24, %v535_v25 }
 0x248   :  { %559 = vmatpush.msra.mxu2 %v536_v26 }
 0x24a   :  { %560 = vmatpush.msra.mxu2 %v533_v27 }
 0x24b   :  { %5040 = vmatmul.msk.f32.vlgmr.msra.gmra.mxu2 %vm7312_vm8, %v99_v28 }
 0x24c   :  { %1080 = vmatpush.msrb.mxu2 %v6191_v19 }
 0x24e   :  { %1081 = vmatpush.msrb.mxu2 %v6193_v20 }
 0x250   :  { %1082 = vmatpush.msrb.mxu2 %v6197_v21 }
 0x252   :  { %1083 = vmatpush.msrb.mxu2 %v6204_v22 }
 0x253   :  { %5041 = vmatmul.msk.f32.gmra.mxu2 %vm7312_vm8, %v100_v29 }
 0x2ce   :  { %v562_v30 = vpop.f32.mrf.mxu2 }
 0x2cf   :  { %v6251_v38 = vsel %vm6240_vm9, %v533_v27, %v562_v30 }
 0x2d0   :  { %v601_v40 = vadd.f32 %v594_v32, %v6251_v38 }
 0x2d2   :  { %v5042_v44 = vmul.f32 -1.442695, %v601_v40 }
 0x2d6   :  { %v565_v35 = vpop.f32.mrf.mxu2 }
 0x2d7   :  { %v6246_v36 = vsel %vm6240_vm9, %v536_v26, %v565_v35 }
 0x2d8   :  { %v602_v37 = vadd.f32 %v598_v33, %v6246_v36 }
 0x2da   :  { %5183 = vtanh.f32 %v602_v37  ;;  %v5043_v43 = vmul.f32 -1.442695, %v602_v37 }
 0x2db   :  { %5185 = vtanh.f32 %v601_v40 }
 0x2dc   :  { %5187 = vpow2.f32 %v5043_v43 }
 0x2dd   :  { %5189 = vpow2.f32 %v5042_v44 }
 0x2e0   :  { %v5184_v41 = vpop.eup %5183 }
 0x2e1   :  { %649 = vrot.lane.b32.xlu1 %v5184_v41, %s5802_s0  ;;  %v5186_v42 = vpop.eup %5185 }
 0x2e2   :  { %v5188_v45 = vpop.eup %5187 }
 0x2e3   :  { %v610_v46 = vadd.f32 1.0, %v5188_v45  ;;  %v5190_v47 = vpop.eup %5189 }
 0x2e4   :  { %v609_v48 = vadd.f32 1.0, %v5190_v47 }
 0x2e5   :  { %5191 = vrcp.f32 %v610_v46  ;;  %v637_v58 = vand.u32 2147483648, %v610_v46  ;;  %vm631_vm11 = vweird.f32 %v610_v46  ;;  %v635_v59 = vand.u32 2147483647, %v610_v46 }
 0x2e6   :  { %5193 = vrcp.f32 %v609_v48  ;;  %v622_v3 = vand.u32 2147483648, %v609_v48  ;;  %vm616_vm15 = vweird.f32 %v609_v48  ;;  %v620_v4 = vand.u32 2147483647, %v609_v48 }
 0x2e7   :  { %v638_v62 = vor.u32 1.1754944e-38, %v637_v58  ;;  %vm636_vm13 = vcmp.eq.f32.partialorder %v635_v59, 8.507059e+37 }
 0x2e8   :  { %v623_v6 = vor.u32 1.1754944e-38, %v622_v3  ;;  %vm621_vm1 = vcmp.eq.f32.partialorder %v620_v4, 8.507059e+37 }
 0x2e9   :  { %647 = vrot.lane.b32.xlu1 %v5186_v42, %s5802_s0 }
 0x2eb   :  { %v5192_v49 = vpop.eup %5191 }
 0x2ec   :  { %v627_v50 = vmul.f32 %v5192_v49, %v610_v46  ;;  %v5194_v52 = vpop.eup %5193  ;;  %vm632_vm10 = vweird.f32 %v5192_v49 }
 0x2ed   :  { %v612_v55 = vmul.f32 %v5194_v52, %v609_v48  ;;  %vm633_vm12 = vmor %vm631_vm11, %vm632_vm10  ;;  %vm617_vm14 = vweird.f32 %v5194_v52 }
 0x2ee   :  { %v628_v51 = vsub.f32 1.0, %v627_v50  ;;  %vm618_vm0 = vmor %vm616_vm15, %vm617_vm14 }
 0x2ef   :  { %v613_v57 = vsub.f32 1.0, %v612_v55 }
 0x2f0   :  { %v629_v53 = vmul.f32 %v5192_v49, %v628_v51 }
 0x2f1   :  { %v614_v61 = vmul.f32 %v5194_v52, %v613_v57 }
 0x2f2   :  { %v630_v56 = vadd.f32 %v5192_v49, %v629_v53 }
 0x2f3   :  { %v615_v2 = vadd.f32 %v5194_v52, %v614_v61 }
 0x2f4   :  { %v634_v60 = vsel %vm633_vm12, %v5192_v49, %v630_v56 }
 0x2f5   :  { %v639_v0 = vsel %vm636_vm13, %v638_v62, %v634_v60  ;;  %v619_v5 = vsel %vm618_vm0, %v5194_v52, %v615_v2 }
 0x2f6   :  { %v624_v7 = vsel %vm621_vm1, %v623_v6, %v619_v5  ;;  %v644_v10 = vmul.f32 0.0, %v639_v0 }
 0x2f7   :  { %v643_v13 = vmul.f32 0.0, %v624_v7 }
 0x353   :  { %v650_v63 = vpop.permute.xlu1 %649 }
 0x354   :  { %v654_v1 = vmul.f32 %v650_v63, %v639_v0 }
 0x356   :  { %659 = vrot.lane.b32.xlu2 %v654_v1, %s5802_s0 }
 0x35b   :  { %v648_v8 = vpop.permute.xlu1 %647 }
 0x35c   :  { %v653_v9 = vmul.f32 %v648_v8, %v624_v7 }
 0x35e   :  { %657 = vrot.lane.b32.xlu2 %v653_v9, %s5802_s0 }
 0x3b0   :  { %v660_v11 = vpop.permute.xlu2 %659 }
 0x3b1   :  { %v6258_v12 = vadd.f32 %v660_v11, %v644_v10 }
 0x3b3   :  { %5195 = vtanh.f32 %v6258_v12 }
 0x3b8   :  { %v658_v14 = vpop.permute.xlu2 %657 }
 0x3b9   :  { %v5196_v15 = vpop.eup %5195  ;;  %v6261_v16 = vadd.f32 %v658_v14, %v643_v13 }
 0x3ba   :  { %671 = vrot.lane.b32.xlu0 %v5196_v15, %s5802_s0 }
 0x3bb   :  { %5197 = vtanh.f32 %v6261_v16  ;;  %v763_v2 = vrot.slane %v6261_v16, 7 }
 0x3c1   :  { %v5198_v17 = vpop.eup %5197 }
 0x3c2   :  { %669 = vrot.lane.b32.xlu1 %v5198_v17, %s5802_s0 }
 0x42c   :  { %v672_v18 = vpop.permute.xlu0 %671 }
 0x42d   :  { %v6266_v23 = vmul.f32 %v672_v18, %v639_v0 }
 0x42f   :  { %v688_v25 = vrot.slane %v6266_v23, 7 }
 0x434   :  { %v670_v24 = vpop.permute.xlu1 %669 }
 0x435   :  { %v6269_v26 = vmul.f32 %v670_v24, %v624_v7  ;;  %v764_v7 = vrot.slane %v6258_v12, 7 }
 0x437   :  { %v690_v27 = vsel %vm689_vm2, %v688_v25, %v6269_v26 }
 0x438   :  { %691 = vrot.lane.b32.xlu2 %v690_v27, %s5803_s7 }
 0x492   :  { %v692_v28 = vpop.permute.xlu2 %691 }
 0x493   :  { %5044 = vmatmul.msk.f32.vlgmr.msra.gmra.mxu0 %vm225_vm7, %v692_v28 }
 0x494   :  { %1330 = vmatpush.msra.mxu0 %v6191_v19 }
 0x496   :  { %1331 = vmatpush.msra.mxu0 %v6193_v20 }
 0x498   :  { %1332 = vmatpush.msra.mxu0 %v6197_v21 }
 0x49a   :  { %1333 = vmatpush.msra.mxu0 %v6204_v22 }
 0x510   :  { %v712_v29 = vpop.f32.mrf.mxu0 }
 0x511   :  { %v716_v30 = vrot.slane %v712_v29, 7  ;;  %v720_v31 = vadd.f32 %v712_v29, %v6246_v36 }
 0x513   :  { %v719_v32 = vadd.f32 %v716_v30, %v6251_v38  ;;  %5199 = vtanh.f32 %v720_v31  ;;  %v5046_v19 = vmul.f32 -1.442695, %v720_v31 }
 0x515   :  { %5201 = vtanh.f32 %v719_v32  ;;  %v5045_v20 = vmul.f32 -1.442695, %v719_v32 }
 0x516   :  { %5203 = vpow2.f32 %v5046_v19 }
 0x517   :  { %5205 = vpow2.f32 %v5045_v20 }
 0x519   :  { %v5200_v33 = vpop.eup %5199 }
 0x51a   :  { %773 = vrot.lane.b32.xlu1 %v5200_v33, %s5802_s0 }
 0x51b   :  { %v5202_v35 = vpop.eup %5201 }
 0x51c   :  { %771 = vrot.lane.b32.xlu0 %v5202_v35, %s5802_s0  ;;  %v5204_v21 = vpop.eup %5203 }
 0x51d   :  { %v5206_v22 = vpop.eup %5205  ;;  %v728_v37 = vadd.f32 1.0, %v5204_v21 }
 0x51e   :  { %v727_v40 = vadd.f32 1.0, %v5206_v22 }
 0x51f   :  { %5207 = vrcp.f32 %v728_v37  ;;  %v755_v50 = vand.u32 2147483648, %v728_v37  ;;  %vm749_vm4 = vweird.f32 %v728_v37  ;;  %v753_v51 = vand.u32 2147483647, %v728_v37 }
 0x520   :  { %5209 = vrcp.f32 %v727_v40  ;;  %v740_v55 = vand.u32 2147483648, %v727_v40  ;;  %vm734_vm10 = vweird.f32 %v727_v40  ;;  %v738_v57 = vand.u32 2147483647, %v727_v40 }
 0x521   :  { %v756_v56 = vor.u32 1.1754944e-38, %v755_v50  ;;  %vm754_vm11 = vcmp.eq.f32.partialorder %v753_v51, 8.507059e+37 }
 0x522   :  { %v741_v62 = vor.u32 1.1754944e-38, %v740_v55  ;;  %vm739_vm13 = vcmp.eq.f32.partialorder %v738_v57, 8.507059e+37 }
 0x525   :  { %v5208_v41 = vpop.eup %5207 }
 0x526   :  { %v5210_v42 = vpop.eup %5209  ;;  %v745_v43 = vmul.f32 %v5208_v41, %v728_v37  ;;  %vm750_vm3 = vweird.f32 %v5208_v41 }
 0x527   :  { %v730_v44 = vmul.f32 %v5210_v42, %v727_v40  ;;  %vm751_vm5 = vmor %vm749_vm4, %vm750_vm3  ;;  %vm735_vm6 = vweird.f32 %v5210_v42 }
 0x528   :  { %v746_v45 = vsub.f32 1.0, %v745_v43  ;;  %vm736_vm12 = vmor %vm734_vm10, %vm735_vm6 }
 0x529   :  { %v731_v46 = vsub.f32 1.0, %v730_v44 }
 0x52a   :  { %v747_v47 = vmul.f32 %v5208_v41, %v746_v45 }
 0x52b   :  { %v732_v48 = vmul.f32 %v5210_v42, %v731_v46 }
 0x52c   :  { %v748_v49 = vadd.f32 %v5208_v41, %v747_v47 }
 0x52d   :  { %v733_v52 = vadd.f32 %v5210_v42, %v732_v48 }
 0x52e   :  { %v752_v53 = vsel %vm751_vm5, %v5208_v41, %v748_v49 }
 0x52f   :  { %v757_v59 = vsel %vm754_vm11, %v756_v56, %v752_v53  ;;  %v737_v60 = vsel %vm736_vm12, %v5210_v42, %v733_v52 }
 0x530   :  { %v742_v0 = vsel %vm739_vm13, %v741_v62, %v737_v60  ;;  %v768_v8 = vmul.f32 %v764_v7, %v757_v59 }
 0x531   :  { %v767_v3 = vmul.f32 %v763_v2, %v742_v0 }
 0x58c   :  { %v774_v58 = vpop.permute.xlu1 %773 }
 0x58d   :  { %v778_v61 = vmul.f32 %v774_v58, %v757_v59 }
 0x58e   :  { %v772_v63 = vpop.permute.xlu0 %771 }
 0x58f   :  { %783 = vrot.lane.b32.xlu0 %v778_v61, %s5802_s0  ;;  %v777_v1 = vmul.f32 %v772_v63, %v742_v0 }
 0x591   :  { %781 = vrot.lane.b32.xlu2 %v777_v1, %s5802_s0 }
 0x5eb   :  { %v782_v4 = vpop.permute.xlu2 %781 }
 0x5ec   :  { %v6286_v5 = vadd.f32 %v782_v4, %v767_v3 }
 0x5ee   :  { %5211 = vtanh.f32 %v6286_v5  ;;  %v887_v4 = vrot.slane %v6286_v5, 7 }
 0x5f4   :  { %v5212_v6 = vpop.eup %5211 }
 0x5f5   :  { %793 = vrot.lane.b32.xlu1 %v5212_v6, %s5802_s0 }
 0x601   :  { %v784_v9 = vpop.permute.xlu0 %783 }
 0x602   :  { %v6291_v10 = vadd.f32 %v784_v9, %v768_v8 }
 0x604   :  { %5213 = vtanh.f32 %v6291_v10  ;;  %v888_v63 = vrot.slane %v6291_v10, 7 }
 0x60a   :  { %v5214_v11 = vpop.eup %5213 }
 0x60b   :  { %795 = vrot.lane.b32.xlu2 %v5214_v11, %s5802_s0 }
 0x665   :  { %v796_v13 = vpop.permute.xlu2 %795 }
 0x666   :  { %v6297_v16 = vmul.f32 %v796_v13, %v757_v59 }
 0x667   :  { %v794_v14 = vpop.permute.xlu1 %793 }
 0x668   :  { %v6295_v15 = vmul.f32 %v794_v14, %v742_v0 }
 0x66a   :  { %v812_v17 = vrot.slane %v6295_v15, 1 }
 0x66c   :  { %v813_v12 = vsel %vm689_vm2, %v6297_v16, %v812_v17 }
 0x66d   :  { %814 = vrot.lane.b32.xlu0 %v813_v12, %s5803_s7 }
 0x6df   :  { %v815_v18 = vpop.permute.xlu0 %814 }
 0x6e0   :  { %5047 = vmatmul.msk.f32.vlgmr.msra.gmra.mxu3 %vm225_vm7, %v815_v18 }
 0x763   :  { %v835_v24 = vpop.f32.mrf.mxu3 }
 0x764   :  { %v839_v25 = vrot.slane %v835_v24, 6  ;;  %v840_v27 = vrot.slane %v835_v24, 7 }
 0x766   :  { %v843_v28 = vadd.f32 %v839_v25, %v6251_v38  ;;  %v844_v29 = vadd.f32 %v840_v27, %v6246_v36 }
 0x768   :  { %5215 = vtanh.f32 %v843_v28  ;;  %v5049_v32 = vmul.f32 -1.442695, %v844_v29  ;;  %v5048_v20 = vmul.f32 -1.442695, %v843_v28 }
 0x769   :  { %5217 = vtanh.f32 %v844_v29 }
 0x76a   :  { %5219 = vpow2.f32 %v5049_v32 }
 0x76e   :  { %v5216_v30 = vpop.eup %5215 }
 0x76f   :  { %v5218_v31 = vpop.eup %5217  ;;  %895 = vrot.lane.b32.xlu1 %v5216_v30, %s5802_s0 }
 0x770   :  { %897 = vrot.lane.b32.xlu2 %v5218_v31, %s5802_s0  ;;  %v5220_v33 = vpop.eup %5219 }
 0x771   :  { %v852_v35 = vadd.f32 1.0, %v5220_v33 }
 0x773   :  { %5221 = vrcp.f32 %v852_v35  ;;  %v879_v43 = vand.u32 2147483648, %v852_v35  ;;  %vm873_vm15 = vweird.f32 %v852_v35  ;;  %v877_v44 = vand.u32 2147483647, %v852_v35 }
 0x774   :  { %5223 = vpow2.f32 %v5048_v20 }
 0x775   :  { %v880_v46 = vor.u32 1.1754944e-38, %v879_v43  ;;  %vm878_vm1 = vcmp.eq.f32.partialorder %v877_v44, 8.507059e+37 }
 0x779   :  { %v5222_v19 = vpop.eup %5221 }
 0x77a   :  { %v869_v21 = vmul.f32 %v5222_v19, %v852_v35  ;;  %v5224_v37 = vpop.eup %5223  ;;  %vm874_vm14 = vweird.f32 %v5222_v19 }
 0x77b   :  { %v851_v41 = vadd.f32 1.0, %v5224_v37  ;;  %vm875_vm0 = vmor %vm873_vm15, %vm874_vm14 }
 0x77c   :  { %v870_v22 = vsub.f32 1.0, %v869_v21 }
 0x77d   :  { %5225 = vrcp.f32 %v851_v41  ;;  %v864_v56 = vand.u32 2147483648, %v851_v41  ;;  %vm858_vm4 = vweird.f32 %v851_v41  ;;  %v862_v57 = vand.u32 2147483647, %v851_v41 }
 0x77e   :  { %v871_v40 = vmul.f32 %v5222_v19, %v870_v22 }
 0x77f   :  { %v865_v59 = vor.u32 1.1754944e-38, %v864_v56  ;;  %vm863_vm6 = vcmp.eq.f32.partialorder %v862_v57, 8.507059e+37 }
 0x780   :  { %v872_v42 = vadd.f32 %v5222_v19, %v871_v40 }
 0x782   :  { %v876_v45 = vsel %vm875_vm0, %v5222_v19, %v872_v42 }
 0x783   :  { %v881_v48 = vsel %vm878_vm1, %v880_v46, %v876_v45  ;;  %v5226_v49 = vpop.eup %5225 }
 0x784   :  { %v854_v51 = vmul.f32 %v5226_v49, %v851_v41  ;;  %vm859_vm3 = vweird.f32 %v5226_v49  ;;  %v892_v0 = vmul.f32 %v888_v63, %v881_v48 }
 0x785   :  { %vm860_vm5 = vmor %vm858_vm4, %vm859_vm3 }
 0x786   :  { %v855_v52 = vsub.f32 1.0, %v854_v51 }
 0x788   :  { %v856_v53 = vmul.f32 %v5226_v49, %v855_v52 }
 0x78a   :  { %v857_v55 = vadd.f32 %v5226_v49, %v856_v53 }
 0x78c   :  { %v861_v58 = vsel %vm860_vm5, %v5226_v49, %v857_v55 }
 0x78d   :  { %v866_v61 = vsel %vm863_vm6, %v865_v59, %v861_v58 }
 0x78e   :  { %v891_v6 = vmul.f32 %v887_v4, %v866_v61 }
 0x7ca   :  { %v898_v47 = vpop.permute.xlu2 %897 }
 0x7cb   :  { %v902_v50 = vmul.f32 %v898_v47, %v881_v48 }
 0x7cd   :  { %907 = vrot.lane.b32.xlu1 %v902_v50, %s5802_s0 }
 0x7e1   :  { %v896_v60 = vpop.permute.xlu1 %895 }
 0x7e2   :  { %v901_v62 = vmul.f32 %v896_v60, %v866_v61 }
 0x7e4   :  { %905 = vrot.lane.b32.xlu0 %v901_v62, %s5802_s0 }
 0x83f   :  { %v908_v1 = vpop.permute.xlu1 %907 }
 0x840   :  { %v6311_v2 = vadd.f32 %v908_v1, %v892_v0 }
 0x842   :  { %5227 = vtanh.f32 %v6311_v2  ;;  %v1013_v0 = vrot.slane %v6311_v2, 7 }
 0x848   :  { %v5228_v3 = vpop.eup %5227 }
 0x849   :  { %919 = vrot.lane.b32.xlu0 %v5228_v3, %s5802_s0 }
 0x856   :  { %v906_v7 = vpop.permute.xlu0 %905 }
 0x857   :  { %v6316_v8 = vadd.f32 %v906_v7, %v891_v6 }
 0x859   :  { %5229 = vtanh.f32 %v6316_v8  ;;  %v1012_v63 = vrot.slane %v6316_v8, 7 }
 0x85f   :  { %v5230_v9 = vpop.eup %5229 }
 0x860   :  { %917 = vrot.lane.b32.xlu2 %v5230_v9, %s5802_s0 }
 0x8ba   :  { %v918_v10 = vpop.permute.xlu2 %917 }
 0x8bb   :  { %v920_v11 = vpop.permute.xlu0 %919  ;;  %v6320_v13 = vmul.f32 %v918_v10, %v866_v61 }
 0x8bc   :  { %v6322_v14 = vmul.f32 %v920_v11, %v881_v48 }
 0x8bd   :  { %v936_v17 = vrot.slane %v6320_v13, 2 }
 0x8be   :  { %v937_v12 = vrot.slane %v6322_v14, 1 }
 0x8c0   :  { %v938_v5 = vsel %vm689_vm2, %v937_v12, %v936_v17 }
 0x8c1   :  { %939 = vrot.lane.b32.xlu1 %v938_v5, %s5803_s7 }
 0x933   :  { %v940_v18 = vpop.permute.xlu1 %939 }
 0x934   :  { %5050 = vmatmul.msk.f32.vlgmr.msrb.gmra.mxu0 %vm225_vm7, %v940_v18 }
 0x9b1   :  { %v960_v24 = vpop.f32.mrf.mxu0 }
 0x9b2   :  { %v964_v25 = vrot.slane %v960_v24, 5  ;;  %v965_v27 = vrot.slane %v960_v24, 6 }
 0x9b4   :  { %v968_v28 = vadd.f32 %v964_v25, %v6251_v38  ;;  %v969_v29 = vadd.f32 %v965_v27, %v6246_v36 }
 0x9b6   :  { %5231 = vtanh.f32 %v968_v28  ;;  %v5051_v32 = vmul.f32 -1.442695, %v968_v28  ;;  %v5052_v20 = vmul.f32 -1.442695, %v969_v29 }
 0x9b7   :  { %5233 = vtanh.f32 %v969_v29 }
 0x9b8   :  { %5235 = vpow2.f32 %v5051_v32 }
 0x9bc   :  { %v5232_v30 = vpop.eup %5231 }
 0x9bd   :  { %v5234_v31 = vpop.eup %5233  ;;  %1020 = vrot.lane.b32.xlu2 %v5232_v30, %s5802_s0 }
 0x9be   :  { %1022 = vrot.lane.b32.xlu0 %v5234_v31, %s5802_s0  ;;  %v5236_v33 = vpop.eup %5235 }
 0x9bf   :  { %v976_v35 = vadd.f32 1.0, %v5236_v33 }
 0x9c1   :  { %5237 = vrcp.f32 %v976_v35  ;;  %v989_v43 = vand.u32 2147483648, %v976_v35  ;;  %vm983_vm11 = vweird.f32 %v976_v35  ;;  %v987_v44 = vand.u32 2147483647, %v976_v35 }
 0x9c2   :  { %5239 = vpow2.f32 %v5052_v20 }
 0x9c3   :  { %v990_v46 = vor.u32 1.1754944e-38, %v989_v43  ;;  %vm988_vm13 = vcmp.eq.f32.partialorder %v987_v44, 8.507059e+37 }
 0x9c7   :  { %v5238_v19 = vpop.eup %5237 }
 0x9c8   :  { %v979_v21 = vmul.f32 %v5238_v19, %v976_v35  ;;  %v5240_v40 = vpop.eup %5239  ;;  %vm984_vm10 = vweird.f32 %v5238_v19 }
 0x9c9   :  { %v977_v41 = vadd.f32 1.0, %v5240_v40  ;;  %vm985_vm12 = vmor %vm983_vm11, %vm984_vm10 }
 0x9ca   :  { %v980_v22 = vsub.f32 1.0, %v979_v21 }
 0x9cb   :  { %5241 = vrcp.f32 %v977_v41  ;;  %v1004_v56 = vand.u32 2147483648, %v977_v41  ;;  %vm998_vm15 = vweird.f32 %v977_v41  ;;  %v1002_v57 = vand.u32 2147483647, %v977_v41 }
 0x9cc   :  { %v981_v37 = vmul.f32 %v5238_v19, %v980_v22 }
 0x9cd   :  { %v1005_v59 = vor.u32 1.1754944e-38, %v1004_v56  ;;  %vm1003_vm1 = vcmp.eq.f32.partialorder %v1002_v57, 8.507059e+37 }
 0x9ce   :  { %v982_v42 = vadd.f32 %v5238_v19, %v981_v37 }
 0x9d0   :  { %v986_v45 = vsel %vm985_vm12, %v5238_v19, %v982_v42 }
 0x9d1   :  { %v991_v48 = vsel %vm988_vm13, %v990_v46, %v986_v45  ;;  %v5242_v50 = vpop.eup %5241 }
 0x9d2   :  { %v994_v51 = vmul.f32 %v5242_v50, %v977_v41  ;;  %vm999_vm14 = vweird.f32 %v5242_v50  ;;  %v1016_v1 = vmul.f32 %v1012_v63, %v991_v48 }
 0x9d3   :  { %vm1000_vm0 = vmor %vm998_vm15, %vm999_vm14 }
 0x9d4   :  { %v995_v52 = vsub.f32 1.0, %v994_v51 }
 0x9d6   :  { %v996_v53 = vmul.f32 %v5242_v50, %v995_v52 }
 0x9d8   :  { %v997_v55 = vadd.f32 %v5242_v50, %v996_v53 }
 0x9da   :  { %v1001_v58 = vsel %vm1000_vm0, %v5242_v50, %v997_v55 }
 0x9db   :  { %v1006_v61 = vsel %vm1003_vm1, %v1005_v59, %v1001_v58 }
 0x9dc   :  { %v1017_v3 = vmul.f32 %v1013_v0, %v1006_v61 }
 0xa17   :  { %v1021_v47 = vpop.permute.xlu2 %1020 }
 0xa18   :  { %v1026_v49 = vmul.f32 %v1021_v47, %v991_v48 }
 0xa1a   :  { %1030 = vrot.lane.b32.xlu1 %v1026_v49, %s5802_s0 }
 0xa30   :  { %v1023_v60 = vpop.permute.xlu0 %1022 }
 0xa31   :  { %v1027_v62 = vmul.f32 %v1023_v60, %v1006_v61 }
 0xa33   :  { %1032 = vrot.lane.b32.xlu2 %v1027_v62, %s5802_s0 }
 0xa8c   :  { %v1031_v4 = vpop.permute.xlu1 %1030 }
 0xa8d   :  { %v1033_v6 = vpop.permute.xlu2 %1032  ;;  %v6337_v7 = vadd.f32 %v1031_v4, %v1016_v1 }
 0xa8e   :  { %v6339_v9 = vadd.f32 %v1033_v6, %v1017_v3 }
 0xa8f   :  { %5243 = vtanh.f32 %v6337_v7  ;;  %v1137_v1 = vrot.slane %v6337_v7, 7 }
 0xa90   :  { %5245 = vtanh.f32 %v6339_v9 }
 0xa95   :  { %v5244_v10 = vpop.eup %5243 }
 0xa96   :  { %v5246_v11 = vpop.eup %5245  ;;  %1042 = vrot.lane.b32.xlu0 %v5244_v10, %s5802_s0 }
 0xa97   :  { %1044 = vrot.lane.b32.xlu1 %v5246_v11, %s5802_s0  ;;  %v1138_v11 = vrot.slane %v6339_v9, 7 }
 0xb08   :  { %v1043_v8 = vpop.permute.xlu0 %1042 }
 0xb09   :  { %v1045_v2 = vpop.permute.xlu1 %1044  ;;  %v6345_v17 = vmul.f32 %v1043_v8, %v991_v48 }
 0xb0a   :  { %v6347_v12 = vmul.f32 %v1045_v2, %v1006_v61 }
 0xb0b   :  { %v1061_v5 = vrot.slane %v6345_v17, 3 }
 0xb0c   :  { %v1062_v18 = vrot.slane %v6347_v12, 2 }
 0xb0e   :  { %v1063_v24 = vsel %vm689_vm2, %v1062_v18, %v1061_v5 }
 0xb0f   :  { %1064 = vrot.lane.b32.xlu2 %v1063_v24, %s5803_s7 }
 0xb69   :  { %v1065_v25 = vpop.permute.xlu2 %1064 }
 0xb6a   :  { %5053 = vmatmul.msk.f32.vlgmr.msrb.gmra.mxu2 %vm225_vm7, %v1065_v25 }
 0xbed   :  { %v1085_v27 = vpop.f32.mrf.mxu2 }
 0xbee   :  { %v1089_v28 = vrot.slane %v1085_v27, 4  ;;  %v1090_v29 = vrot.slane %v1085_v27, 5 }
 0xbf0   :  { %v1093_v30 = vadd.f32 %v1089_v28, %v6251_v38  ;;  %v1094_v31 = vadd.f32 %v1090_v29, %v6246_v36 }
 0xbf2   :  { %5247 = vtanh.f32 %v1093_v30  ;;  %v5054_v35 = vmul.f32 -1.442695, %v1093_v30  ;;  %v5055_v19 = vmul.f32 -1.442695, %v1094_v31 }
 0xbf3   :  { %5249 = vtanh.f32 %v1094_v31 }
 0xbf4   :  { %5251 = vpow2.f32 %v5054_v35 }
 0xbf5   :  { %5253 = vpow2.f32 %v5055_v19 }
 0xbf8   :  { %v5248_v32 = vpop.eup %5247 }
 0xbf9   :  { %v5250_v33 = vpop.eup %5249  ;;  %1145 = vrot.lane.b32.xlu0 %v5248_v32, %s5802_s0 }
 0xbfa   :  { %1147 = vrot.lane.b32.xlu1 %v5250_v33, %s5802_s0  ;;  %v5252_v20 = vpop.eup %5251 }
 0xbfb   :  { %v5254_v21 = vpop.eup %5253  ;;  %v1101_v22 = vadd.f32 1.0, %v5252_v20 }
 0xbfc   :  { %v1102_v37 = vadd.f32 1.0, %v5254_v21 }
 0xbfd   :  { %5255 = vrcp.f32 %v1101_v22  ;;  %v1114_v50 = vand.u32 2147483648, %v1101_v22  ;;  %vm1108_vm5 = vweird.f32 %v1101_v22  ;;  %v1112_v52 = vand.u32 2147483647, %v1101_v22 }
 0xbfe   :  { %5257 = vrcp.f32 %v1102_v37  ;;  %v1129_v51 = vand.u32 2147483648, %v1102_v37  ;;  %vm1123_vm6 = vweird.f32 %v1102_v37  ;;  %v1127_v53 = vand.u32 2147483647, %v1102_v37 }
 0xbff   :  { %v1115_v57 = vor.u32 1.1754944e-38, %v1114_v50  ;;  %vm1113_vm12 = vcmp.eq.f32.partialorder %v1112_v52, 8.507059e+37 }
 0xc00   :  { %v1130_v58 = vor.u32 1.1754944e-38, %v1129_v51  ;;  %vm1128_vm13 = vcmp.eq.f32.partialorder %v1127_v53, 8.507059e+37 }
 0xc03   :  { %v5256_v40 = vpop.eup %5255 }
 0xc04   :  { %v5258_v41 = vpop.eup %5257  ;;  %v1104_v42 = vmul.f32 %v5256_v40, %v1101_v22  ;;  %vm1109_vm3 = vweird.f32 %v5256_v40 }
 0xc05   :  { %v1119_v43 = vmul.f32 %v5258_v41, %v1102_v37  ;;  %vm1124_vm4 = vweird.f32 %v5258_v41  ;;  %vm1110_vm10 = vmor %vm1108_vm5, %vm1109_vm3 }
 0xc06   :  { %v1105_v44 = vsub.f32 1.0, %v1104_v42  ;;  %vm1125_vm11 = vmor %vm1123_vm6, %vm1124_vm4 }
 0xc07   :  { %v1120_v45 = vsub.f32 1.0, %v1119_v43 }
 0xc08   :  { %v1106_v46 = vmul.f32 %v5256_v40, %v1105_v44 }
 0xc09   :  { %v1121_v47 = vmul.f32 %v5258_v41, %v1120_v45 }
 0xc0a   :  { %v1107_v48 = vadd.f32 %v5256_v40, %v1106_v46 }
 0xc0b   :  { %v1122_v49 = vadd.f32 %v5258_v41, %v1121_v47 }
 0xc0c   :  { %v1111_v55 = vsel %vm1110_vm10, %v5256_v40, %v1107_v48 }
 0xc0d   :  { %v1126_v56 = vsel %vm1125_vm11, %v5258_v41, %v1122_v49  ;;  %v1116_v60 = vsel %vm1113_vm12, %v1115_v57, %v1111_v55 }
 0xc0e   :  { %v1131_v62 = vsel %vm1128_vm13, %v1130_v58, %v1126_v56  ;;  %v1141_v3 = vmul.f32 %v1137_v1, %v1116_v60 }
 0xc0f   :  { %v1142_v8 = vmul.f32 %v1138_v11, %v1131_v62 }
 0xc6b   :  { %v1146_v59 = vpop.permute.xlu0 %1145 }
 0xc6c   :  { %v1148_v61 = vpop.permute.xlu1 %1147  ;;  %v1151_v63 = vmul.f32 %v1146_v59, %v1116_v60 }
 0xc6d   :  { %v1152_v0 = vmul.f32 %v1148_v61, %v1131_v62 }
 0xc6e   :  { %1155 = vrot.lane.b32.xlu2 %v1151_v63, %s5802_s0 }
 0xc6f   :  { %1157 = vrot.lane.b32.xlu0 %v1152_v0, %s5802_s0 }
 0xcc8   :  { %v1156_v4 = vpop.permute.xlu2 %1155 }
 0xcc9   :  { %v6361_v6 = vadd.f32 %v1156_v4, %v1141_v3 }
 0xccb   :  { %5259 = vtanh.f32 %v6361_v6 }
 0xcd1   :  { %v5260_v10 = vpop.eup %5259 }
 0xcd2   :  { %1167 = vrot.lane.b32.xlu1 %v5260_v10, %s5802_s0 }
 0xce1   :  { %v1158_v2 = vpop.permute.xlu0 %1157 }
 0xce2   :  { %v6366_v5 = vadd.f32 %v1158_v2, %v1142_v8 }
 0xce4   :  { %5261 = vtanh.f32 %v6366_v5  ;;  %v1263_v11 = vrot.slane %v6366_v5, 7 }
 0xcea   :  { %v5262_v18 = vpop.eup %5261 }
 0xceb   :  { %1169 = vrot.lane.b32.xlu2 %v5262_v18, %s5802_s0 }
 0xd44   :  { %v1168_v7 = vpop.permute.xlu1 %1167 }
 0xd45   :  { %v1170_v24 = vpop.permute.xlu2 %1169  ;;  %v6370_v25 = vmul.f32 %v1168_v7, %v1116_v60 }
 0xd46   :  { %v6372_v27 = vmul.f32 %v1170_v24, %v1131_v62  ;;  %v1262_v24 = vrot.slane %v6361_v6, 7 }
 0xd47   :  { %v1186_v28 = vrot.slane %v6370_v25, 4 }
 0xd48   :  { %v1187_v29 = vrot.slane %v6372_v27, 3 }
 0xd4a   :  { %v1188_v9 = vsel %vm689_vm2, %v1187_v29, %v1186_v28 }
 0xd4b   :  { %1189 = vrot.lane.b32.xlu0 %v1188_v9, %s5803_s7 }
 0xdbd   :  { %v1190_v30 = vpop.permute.xlu0 %1189 }
 0xdbe   :  { %5056 = vmatmul.msk.f32.vlgmr.msrb.gmra.mxu3 %vm225_vm7, %v1190_v30 }
 0xe41   :  { %v1210_v31 = vpop.f32.mrf.mxu3 }
 0xe42   :  { %v1214_v32 = vrot.slane %v1210_v31, 3  ;;  %v1215_v33 = vrot.slane %v1210_v31, 4 }
 0xe44   :  { %v1218_v35 = vadd.f32 %v1214_v32, %v6251_v38  ;;  %v1219_v19 = vadd.f32 %v1215_v33, %v6246_v36 }
 0xe46   :  { %5263 = vtanh.f32 %v1218_v35  ;;  %v5058_v22 = vmul.f32 -1.442695, %v1219_v19  ;;  %v5057_v42 = vmul.f32 -1.442695, %v1218_v35 }
 0xe47   :  { %5265 = vtanh.f32 %v1219_v19 }
 0xe48   :  { %5267 = vpow2.f32 %v5058_v22 }
 0xe4c   :  { %v5264_v20 = vpop.eup %5263 }
 0xe4d   :  { %v5266_v21 = vpop.eup %5265  ;;  %1270 = vrot.lane.b32.xlu1 %v5264_v20, %s5802_s0 }
 0xe4e   :  { %1272 = vrot.lane.b32.xlu2 %v5266_v21, %s5802_s0  ;;  %v5268_v37 = vpop.eup %5267 }
 0xe4f   :  { %v1227_v40 = vadd.f32 1.0, %v5268_v37 }
 0xe51   :  { %5269 = vrcp.f32 %v1227_v40  ;;  %v1254_v49 = vand.u32 2147483648, %v1227_v40  ;;  %vm1248_vm15 = vweird.f32 %v1227_v40  ;;  %v1252_v50 = vand.u32 2147483647, %v1227_v40 }
 0xe52   :  { %5271 = vpow2.f32 %v5057_v42 }
 0xe53   :  { %v1255_v52 = vor.u32 1.1754944e-38, %v1254_v49  ;;  %vm1253_vm1 = vcmp.eq.f32.partialorder %v1252_v50, 8.507059e+37 }
 0xe57   :  { %v5270_v41 = vpop.eup %5269 }
 0xe58   :  { %v1244_v43 = vmul.f32 %v5270_v41, %v1227_v40  ;;  %v5272_v45 = vpop.eup %5271  ;;  %vm1249_vm14 = vweird.f32 %v5270_v41 }
 0xe59   :  { %v1226_v47 = vadd.f32 1.0, %v5272_v45  ;;  %vm1250_vm0 = vmor %vm1248_vm15, %vm1249_vm14 }
 0xe5a   :  { %v1245_v44 = vsub.f32 1.0, %v1244_v43 }
 0xe5b   :  { %5273 = vrcp.f32 %v1226_v47  ;;  %v1239_v62 = vand.u32 2147483648, %v1226_v47  ;;  %vm1233_vm4 = vweird.f32 %v1226_v47  ;;  %v1237_v63 = vand.u32 2147483647, %v1226_v47 }
 0xe5c   :  { %v1246_v46 = vmul.f32 %v5270_v41, %v1245_v44 }
 0xe5d   :  { %v1240_v1 = vor.u32 1.1754944e-38, %v1239_v62  ;;  %vm1238_vm6 = vcmp.eq.f32.partialorder %v1237_v63, 8.507059e+37 }
 0xe5e   :  { %v1247_v48 = vadd.f32 %v5270_v41, %v1246_v46 }
 0xe60   :  { %v1251_v51 = vsel %vm1250_vm0, %v5270_v41, %v1247_v48 }
 0xe61   :  { %v1256_v55 = vsel %vm1253_vm1, %v1255_v52, %v1251_v51  ;;  %v5274_v56 = vpop.eup %5273 }
 0xe62   :  { %v1229_v58 = vmul.f32 %v5274_v56, %v1226_v47  ;;  %vm1234_vm3 = vweird.f32 %v5274_v56  ;;  %v1267_v8 = vmul.f32 %v1263_v11, %v1256_v55 }
 0xe63   :  { %vm1235_vm5 = vmor %vm1233_vm4, %vm1234_vm3 }
 0xe64   :  { %v1230_v59 = vsub.f32 1.0, %v1229_v58 }
 0xe66   :  { %v1231_v60 = vmul.f32 %v5274_v56, %v1230_v59 }
 0xe68   :  { %v1232_v61 = vadd.f32 %v5274_v56, %v1231_v60 }
 0xe6a   :  { %v1236_v0 = vsel %vm1235_vm5, %v5274_v56, %v1232_v61 }
 0xe6b   :  { %v1241_v4 = vsel %vm1238_vm6, %v1240_v1, %v1236_v0 }
 0xe6c   :  { %v1266_v28 = vmul.f32 %v1262_v24, %v1241_v4 }
 0xea8   :  { %v1273_v53 = vpop.permute.xlu2 %1272 }
 0xea9   :  { %v1277_v57 = vmul.f32 %v1273_v53, %v1256_v55 }
 0xeab   :  { %1282 = vrot.lane.b32.xlu1 %v1277_v57, %s5802_s0 }
 0xebf   :  { %v1271_v3 = vpop.permute.xlu1 %1270 }
 0xec0   :  { %v1276_v10 = vmul.f32 %v1271_v3, %v1241_v4 }
 0xec2   :  { %1280 = vrot.lane.b32.xlu0 %v1276_v10, %s5802_s0 }
 0xf1d   :  { %v1283_v2 = vpop.permute.xlu1 %1282 }
 0xf1e   :  { %v6386_v18 = vadd.f32 %v1283_v2, %v1267_v8 }
 0xf20   :  { %5275 = vtanh.f32 %v6386_v18 }
 0xf26   :  { %v5276_v7 = vpop.eup %5275 }
 0xf27   :  { %1294 = vrot.lane.b32.xlu0 %v5276_v7, %s5802_s0 }
 0xf34   :  { %v1281_v29 = vpop.permute.xlu0 %1280 }
 0xf35   :  { %v6391_v9 = vadd.f32 %v1281_v29, %v1266_v28 }
 0xf37   :  { %5277 = vtanh.f32 %v6391_v9  ;;  %v1387_v29 = vrot.slane %v6391_v9, 7 }
 0xf3d   :  { %v5278_v30 = vpop.eup %5277 }
 0xf3e   :  { %1292 = vrot.lane.b32.xlu2 %v5278_v30, %s5802_s0  ;;  %v1388_v30 = vrot.slane %v6386_v18, 7 }
 0xf98   :  { %v1293_v5 = vpop.permute.xlu2 %1292 }
 0xf99   :  { %v1295_v31 = vpop.permute.xlu0 %1294  ;;  %v6395_v32 = vmul.f32 %v1293_v5, %v1241_v4 }
 0xf9a   :  { %v6397_v33 = vmul.f32 %v1295_v31, %v1256_v55 }
 0xf9b   :  { %v1311_v35 = vrot.slane %v6395_v32, 5 }
 0xf9c   :  { %v1312_v19 = vrot.slane %v6397_v33, 4 }
 0xf9e   :  { %v1313_v6 = vsel %vm689_vm2, %v1312_v19, %v1311_v35 }
 0xf9f   :  { %1314 = vrot.lane.b32.xlu1 %v1313_v6, %s5803_s7 }
0x1011   :  { %v1315_v20 = vpop.permute.xlu1 %1314 }
0x1012   :  { %5059 = vmatmul.msk.f32.vlgmr.msra.gmra.mxu0 %vm225_vm7, %v1315_v20 }
0x108f   :  { %v1335_v21 = vpop.f32.mrf.mxu0 }
0x1090   :  { %v1339_v22 = vrot.slane %v1335_v21, 2  ;;  %v1340_v37 = vrot.slane %v1335_v21, 3 }
0x1092   :  { %v1343_v40 = vadd.f32 %v1339_v22, %v6251_v38  ;;  %v1344_v41 = vadd.f32 %v1340_v37, %v6246_v36 }
0x1094   :  { %5279 = vtanh.f32 %v1343_v40  ;;  %v5060_v44 = vmul.f32 -1.442695, %v1343_v40  ;;  %v5061_v48 = vmul.f32 -1.442695, %v1344_v41 }
0x1095   :  { %5281 = vtanh.f32 %v1344_v41 }
0x1096   :  { %5283 = vpow2.f32 %v5060_v44 }
0x109a   :  { %v5280_v42 = vpop.eup %5279 }
0x109b   :  { %v5282_v43 = vpop.eup %5281  ;;  %1395 = vrot.lane.b32.xlu2 %v5280_v42, %s5802_s0 }
0x109c   :  { %1397 = vrot.lane.b32.xlu0 %v5282_v43, %s5802_s0  ;;  %v5284_v45 = vpop.eup %5283 }
0x109d   :  { %v1351_v46 = vadd.f32 1.0, %v5284_v45 }
0x109f   :  { %5285 = vrcp.f32 %v1351_v46  ;;  %v1364_v56 = vand.u32 2147483648, %v1351_v46  ;;  %vm1358_vm11 = vweird.f32 %v1351_v46  ;;  %v1362_v57 = vand.u32 2147483647, %v1351_v46 }
0x10a0   :  { %5287 = vpow2.f32 %v5061_v48 }
0x10a1   :  { %v1365_v59 = vor.u32 1.1754944e-38, %v1364_v56  ;;  %vm1363_vm13 = vcmp.eq.f32.partialorder %v1362_v57, 8.507059e+37 }
0x10a5   :  { %v5286_v47 = vpop.eup %5285 }
0x10a6   :  { %v1354_v49 = vmul.f32 %v5286_v47, %v1351_v46  ;;  %v5288_v52 = vpop.eup %5287  ;;  %vm1359_vm10 = vweird.f32 %v5286_v47 }
0x10a7   :  { %v1352_v53 = vadd.f32 1.0, %v5288_v52  ;;  %vm1360_vm12 = vmor %vm1358_vm11, %vm1359_vm10 }
0x10a8   :  { %v1355_v50 = vsub.f32 1.0, %v1354_v49 }
0x10a9   :  { %5289 = vrcp.f32 %v1352_v53  ;;  %v1379_v10 = vand.u32 2147483648, %v1352_v53  ;;  %vm1373_vm15 = vweird.f32 %v1352_v53  ;;  %v1377_v11 = vand.u32 2147483647, %v1352_v53 }
0x10aa   :  { %v1356_v51 = vmul.f32 %v5286_v47, %v1355_v50 }
0x10ab   :  { %v1380_v2 = vor.u32 1.1754944e-38, %v1379_v10  ;;  %vm1378_vm1 = vcmp.eq.f32.partialorder %v1377_v11, 8.507059e+37 }
0x10ac   :  { %v1357_v55 = vadd.f32 %v5286_v47, %v1356_v51 }
0x10ae   :  { %v1361_v58 = vsel %vm1360_vm12, %v5286_v47, %v1357_v55 }
0x10af   :  { %v1366_v61 = vsel %vm1363_vm13, %v1365_v59, %v1361_v58  ;;  %v5290_v63 = vpop.eup %5289 }
0x10b0   :  { %v1369_v0 = vmul.f32 %v5290_v63, %v1352_v53  ;;  %vm1374_vm14 = vweird.f32 %v5290_v63  ;;  %v1391_v5 = vmul.f32 %v1387_v29, %v1366_v61 }
0x10b1   :  { %vm1375_vm0 = vmor %vm1373_vm15, %vm1374_vm14  ;;  %vm685_vm14 = vcmask 253952   ;;  %vm1058_vm15 = vcmask 257027  }
0x10b2   :  { %v1370_v1 = vsub.f32 1.0, %v1369_v0 }
0x10b4   :  { %v1371_v3 = vmul.f32 %v5290_v63, %v1370_v1 }
0x10b6   :  { %v1372_v4 = vadd.f32 %v5290_v63, %v1371_v3 }
0x10b8   :  { %v1376_v8 = vsel %vm1375_vm0, %v5290_v63, %v1372_v4  ;;  %vm1433_vm0 = vcmask 260102  }
0x10b9   :  { %v1381_v24 = vsel %vm1378_vm1, %v1380_v2, %v1376_v8  ;;  %vm809_vm1 = vcmask 254977  }
0x10ba   :  { %v1392_v31 = vmul.f32 %v1388_v30, %v1381_v24 }
0x10f5   :  { %v1396_v60 = vpop.permute.xlu2 %1395 }
0x10f6   :  { %v1401_v62 = vmul.f32 %v1396_v60, %v1366_v61 }
0x10f8   :  { %1405 = vrot.lane.b32.xlu1 %v1401_v62, %s5802_s0 }
0x110e   :  { %v1398_v7 = vpop.permute.xlu0 %1397 }
0x110f   :  { %v1402_v28 = vmul.f32 %v1398_v7, %v1381_v24 }
0x1111   :  { %1407 = vrot.lane.b32.xlu2 %v1402_v28, %s5802_s0 }
0x116a   :  { %v1406_v35 = vpop.permute.xlu1 %1405 }
0x116b   :  { %v1408_v19 = vpop.permute.xlu2 %1407  ;;  %v6412_v6 = vadd.f32 %v1406_v35, %v1391_v5 }
0x116c   :  { %v6414_v20 = vadd.f32 %v1408_v19, %v1392_v31 }
0x116d   :  { %5291 = vtanh.f32 %v6412_v6 }
0x116e   :  { %5293 = vtanh.f32 %v6414_v20 }
0x1173   :  { %v5292_v21 = vpop.eup %5291 }
0x1174   :  { %v5294_v22 = vpop.eup %5293  ;;  %1417 = vrot.lane.b32.xlu0 %v5292_v21, %s5802_s0  ;;  %v1513_v21 = vrot.slane %v6414_v20, 7 }
0x1175   :  { %1419 = vrot.lane.b32.xlu1 %v5294_v22, %s5802_s0 }
0x11e6   :  { %v1418_v9 = vpop.permute.xlu0 %1417 }
0x11e7   :  { %v1420_v18 = vpop.permute.xlu1 %1419  ;;  %v6420_v37 = vmul.f32 %v1418_v9, %v1366_v61 }
0x11e8   :  { %v6422_v40 = vmul.f32 %v1420_v18, %v1381_v24 }
0x11e9   :  { %v1436_v41 = vrot.slane %v6420_v37, 6 }
0x11ea   :  { %v1437_v42 = vrot.slane %v6422_v40, 5 }
0x11ec   :  { %v1438_v43 = vsel %vm689_vm2, %v1437_v42, %v1436_v41 }
0x11ed   :  { %1439 = vrot.lane.b32.xlu2 %v1438_v43, %s5803_s7 }
0x1247   :  { %v1440_v44 = vpop.permute.xlu2 %1439 }
0x1248   :  { %5062 = vmatmul.msk.f32.vlgmr.msra.gmra.mxu1 %vm225_vm7, %v1440_v44 }
0x12c5   :  { %v1460_v45 = vpop.f32.mrf.mxu1 }
0x12c6   :  { %v1464_v46 = vrot.slane %v1460_v45, 1  ;;  %v1465_v47 = vrot.slane %v1460_v45, 2 }
0x12c8   :  { %v1468_v48 = vadd.f32 %v1464_v46, %v6251_v38  ;;  %v1469_v49 = vadd.f32 %v1465_v47, %v6246_v36 }
0x12ca   :  { %5295 = vtanh.f32 %v1468_v48  ;;  %v5063_v52 = vmul.f32 -1.442695, %v1468_v48  ;;  %v5064_v53 = vmul.f32 -1.442695, %v1469_v49 }
0x12cb   :  { %5297 = vtanh.f32 %v1469_v49  ;;  %v1590_v49 = vld [vmem:[#allocation5 + $0x10] sm:$0xff] }
0x12cc   :  { %5299 = vpow2.f32 %v5063_v52 }
0x12cd   :  { %5301 = vpow2.f32 %v5064_v53 }
0x12d0   :  { %v5296_v50 = vpop.eup %5295 }
0x12d1   :  { %v5298_v51 = vpop.eup %5297  ;;  %1520 = vrot.lane.b32.xlu1 %v5296_v50, %s5802_s0  ;;  %v1589_v50 = vld [vmem:[#allocation5 + $0x8] sm:$0xff] }
0x12d2   :  { %1522 = vrot.lane.b32.xlu0 %v5298_v51, %s5802_s0  ;;  %v5300_v55 = vpop.eup %5299 }
0x12d3   :  { %v5302_v56 = vpop.eup %5301  ;;  %v1476_v57 = vadd.f32 1.0, %v5300_v55 }
0x12d4   :  { %v1477_v58 = vadd.f32 1.0, %v5302_v56 }
0x12d5   :  { %5303 = vrcp.f32 %v1476_v57  ;;  %v1489_v4 = vand.u32 2147483648, %v1476_v57  ;;  %vm1483_vm5 = vweird.f32 %v1476_v57  ;;  %v1487_v11 = vand.u32 2147483647, %v1476_v57 }
0x12d6   :  { %5305 = vrcp.f32 %v1477_v58  ;;  %v1504_v10 = vand.u32 2147483648, %v1477_v58  ;;  %vm1498_vm6 = vweird.f32 %v1477_v58  ;;  %v1502_v8 = vand.u32 2147483647, %v1477_v58 }
0x12d7   :  { %v1490_v24 = vor.u32 1.1754944e-38, %v1489_v4  ;;  %vm1488_vm12 = vcmp.eq.f32.partialorder %v1487_v11, 8.507059e+37  ;;  %v5176_v4 = vld [vmem:[%s7304_s9 + $0x1] ss:$0 sm:$0xff] }
0x12d8   :  { %v1505_v28 = vor.u32 1.1754944e-38, %v1504_v10  ;;  %vm1503_vm13 = vcmp.eq.f32.partialorder %v1502_v8, 8.507059e+37 }
0x12db   :  { %v5304_v38 = vpop.eup %5303 }
0x12dc   :  { %v5306_v36 = vpop.eup %5305  ;;  %v1479_v59 = vmul.f32 %v5304_v38, %v1476_v57  ;;  %vm1484_vm3 = vweird.f32 %v5304_v38  ;;  %v5711_v57 = vld [vmem:[%s7297_s2] sm:$0xff] }
0x12dd   :  { %v1494_v60 = vmul.f32 %v5306_v36, %v1477_v58  ;;  %vm1499_vm4 = vweird.f32 %v5306_v36  ;;  %vm1485_vm10 = vmor %vm1483_vm5, %vm1484_vm3  ;;  %vm1183_vm3 = vcmask 258052   ;;  %vm7314_vm5 = vcmask 259077   ;;  %v5712_v58 = vld [vmem:[%s7297_s2 + $0x8] sm:$0xff] }
0x12de   :  { %v1480_v61 = vsub.f32 1.0, %v1479_v59  ;;  %vm1500_vm11 = vmor %vm1498_vm6, %vm1499_vm4  ;;  %vm7315_vm4 = vcmask 256002   ;;  %vm7313_vm6 = vcmask 261127  }
0x12df   :  { %v1495_v62 = vsub.f32 1.0, %v1494_v60 }
0x12e0   :  { %v1481_v63 = vmul.f32 %v5304_v38, %v1480_v61 }
0x12e1   :  { %v1496_v0 = vmul.f32 %v5306_v36, %v1495_v62  ;;  %v1655_v62 = vld [vmem:[#allocation7 + $0x38] sm:$0xff] }
0x12e2   :  { %v1482_v1 = vadd.f32 %v5304_v38, %v1481_v63  ;;  %1668 = vmatpush.msrb.mxu1 %v1655_v62  ;;  %v1654_v63 = vld [vmem:[#allocation7 + $0x30] sm:$0xff] }
0x12e3   :  { %v1497_v3 = vadd.f32 %v5306_v36, %v1496_v0  ;;  %v1653_v0 = vld [vmem:[#allocation7 + $0x28] sm:$0xff] }
0x12e4   :  { %v1486_v2 = vsel %vm1485_vm10, %v5304_v38, %v1482_v1  ;;  %v1588_v38 = vld [vmem:[#allocation5] sm:$0xff]  ;;  %vm7311_vm10 = vcmp.lt.s32.totalorder %v5999_v39, 16  ;;  %1669 = vmatpush.msrb.mxu1 %v1654_v63 }
0x12e5   :  { %v1501_v7 = vsel %vm1500_vm11, %v5306_v36, %v1497_v3  ;;  %v1491_v30 = vsel %vm1488_vm12, %v1490_v24, %v1486_v2  ;;  %v1652_v1 = vld [vmem:[#allocation7 + $0x20] sm:$0xff] }
0x12e6   :  { %v1506_v31 = vsel %vm1503_vm13, %v1505_v28, %v1501_v7  ;;  %1670 = vmatpush.msrb.mxu1 %v1653_v0 }
0x12e7   :  { %v1517_v22 = vmul.f32 %v1513_v21, %v1506_v31 }
0x12e8   :  { %1671 = vmatpush.msrb.mxu1 %v1652_v1 }
0x12e9   :  { %1672 = vmatmul.f32.vlgmr.msrb.gmra.mxu1 %v5801_v54 }
0x12ea   :  { %1784 = vmatpush.msra.mxu1 %v1655_v62 }
0x12ec   :  { %1785 = vmatpush.msra.mxu1 %v1654_v63 }
0x12ee   :  { %1786 = vmatpush.msra.mxu1 %v1653_v0 }
0x12f0   :  { %1787 = vmatpush.msra.mxu1 %v1652_v1 }
0x12f2   :  { %2278 = vmatpush.msrb.mxu1 %v1655_v62 }
0x12f4   :  { %2279 = vmatpush.msrb.mxu1 %v1654_v63 }
0x12f6   :  { %2280 = vmatpush.msrb.mxu1 %v1653_v0 }
0x12f8   :  { %2281 = vmatpush.msrb.mxu1 %v1652_v1 }
0x1343   :  { %v1521_v29 = vpop.permute.xlu1 %1520 }
0x1344   :  { %v1523_v5 = vpop.permute.xlu0 %1522  ;;  %v1526_v35 = vmul.f32 %v1521_v29, %v1491_v30 }
0x1345   :  { %v1527_v19 = vmul.f32 %v1523_v5, %v1506_v31 }
0x1346   :  { %1530 = vrot.lane.b32.xlu0 %v1526_v35, %s5802_s0 }
0x1347   :  { %1532 = vrot.lane.b32.xlu2 %v1527_v19, %s5802_s0 }
0x134e   :  { %681 = vrot.lane.b32.xlu0 %v6266_v23, %s5803_s7  ;;  %v1512_v23 = vrot.slane %v6412_v6, 7 }
0x1356   :  { %1054 = vrot.lane.b32.xlu0 %v6347_v12, %s5803_s7  ;;  %v1516_v12 = vmul.f32 %v1512_v23, %v1491_v30 }
0x135e   :  { %1429 = vrot.lane.b32.xlu0 %v6422_v40, %s5803_s7 }
0x1366   :  { %803 = vrot.lane.b32.xlu0 %v6295_v15, %s5803_s7  ;;  %v1673_v2 = vpop.f32.mrf.mxu1 }
0x1367   :  { %v1677_v29 = vrot.slane %v1673_v2, 1 }
0x136e   :  { %1177 = vrot.lane.b32.xlu0 %v6370_v25, %s5803_s7 }
0x13a1   :  { %v1533_v9 = vpop.permute.xlu2 %1532 }
0x13a2   :  { %v1537_v18 = vadd.f32 %v1533_v9, %v1517_v22 }
0x13a4   :  { %5307 = vtanh.f32 %v1537_v18 }
0x13aa   :  { %v5308_v41 = vpop.eup %5307 }
0x13ab   :  { %1544 = vrot.lane.b32.xlu1 %v5308_v41, %s5802_s0 }
0x13b3   :  { %805 = vrot.lane.b32.xlu1 %v6297_v16, %s5803_s7 }
0x13b8   :  { %v1531_v40 = vpop.permute.xlu0 %1530 }
0x13b9   :  { %v1536_v15 = vadd.f32 %v1531_v40, %v1516_v12 }
0x13bb   :  { %5309 = vtanh.f32 %v1536_v15  ;;  %1179 = vrot.lane.b32.xlu1 %v6372_v27, %s5803_s7 }
0x13c0   :  { %v682_v25 = vpop.permute.xlu0 %681 }
0x13c1   :  { %v5310_v20 = vpop.eup %5309  ;;  %687 = vst.msk [vmem:[#allocation2 + $0x8] sm:$0x1] %vm685_vm14, %v682_v25 }
0x13c2   :  { %1542 = vrot.lane.b32.xlu2 %v5310_v20, %s5802_s0 }
0x13c3   :  { %927 = vrot.lane.b32.xlu1 %v6320_v13, %s5803_s7 }
0x13c8   :  { %v1055_v16 = vpop.permute.xlu0 %1054 }
0x13c9   :  { %1060 = vst.msk [vmem:[#allocation2 + $0x8] sm:$0x8] %vm1058_vm15, %v1055_v16 }
0x13ca   :  { %929 = vrot.lane.b32.xlu2 %v6322_v14, %s5803_s7 }
0x13d0   :  { %v1430_v6 = vpop.permute.xlu0 %1429 }
0x13d1   :  { %1435 = vst.msk [vmem:[#allocation2 + $0x8] sm:$0x40] %vm1433_vm0, %v1430_v6 }
0x13d2   :  { %1304 = vrot.lane.b32.xlu2 %v6397_v33, %s5803_s7 }
0x13d8   :  { %v804_v27 = vpop.permute.xlu0 %803 }
0x13d9   :  { %810 = vst.msk [vmem:[#allocation2] sm:$0x2] %vm809_vm1, %v804_v27 }
0x13da   :  { %679 = vrot.lane.b32.xlu2 %v6269_v26, %s5803_s7 }
0x13e0   :  { %v1178_v13 = vpop.permute.xlu0 %1177 }
0x13e1   :  { %1184 = vst.msk [vmem:[#allocation2] sm:$0x10] %vm1183_vm3, %v1178_v13 }
0x13e2   :  { %1052 = vrot.lane.b32.xlu2 %v6345_v17, %s5803_s7 }
0x13ea   :  { %1427 = vrot.lane.b32.xlu2 %v6420_v37, %s5803_s7 }
0x141c   :  { %v1543_v14 = vpop.permute.xlu2 %1542 }
0x141d   :  { %v1545_v42 = vpop.permute.xlu1 %1544  ;;  %v1548_v33 = vmul.f32 %v1543_v14, %v1491_v30 }
0x141e   :  { %v1549_v43 = vmul.f32 %v1545_v42, %v1506_v31 }
0x141f   :  { %1552 = vrot.lane.b32.xlu0 %v1548_v33, %s5803_s7 }
0x1420   :  { %1554 = vrot.lane.b32.xlu1 %v1549_v43, %s5803_s7 }
0x1424   :  { %v930_v26 = vpop.permute.xlu2 %929 }
0x1425   :  { %v806_v44 = vpop.permute.xlu1 %805  ;;  %935 = vst.msk [vmem:[#allocation2 + $0x8] sm:$0x4] %vm7315_vm4, %v930_v26 }
0x1426   :  { %811 = vst.msk [vmem:[#allocation2 + $0x8] sm:$0x2] %vm809_vm1, %v806_v44 }
0x1428   :  { %1302 = vrot.lane.b32.xlu1 %v6395_v32, %s5803_s7  ;;  %v1591_v32 = vld [vmem:[#allocation5 + $0x18] sm:$0xff] }
0x1429   :  { %1615 = vmatpush.msra.mxu3 %v1591_v32 }
0x142b   :  { %1616 = vmatpush.msra.mxu3 %v1590_v49 }
0x142c   :  { %v1305_v17 = vpop.permute.xlu2 %1304 }
0x142d   :  { %v1180_v37 = vpop.permute.xlu1 %1179  ;;  %1310 = vst.msk [vmem:[#allocation2 + $0x8] sm:$0x20] %vm7314_vm5, %v1305_v17  ;;  %1617 = vmatpush.msra.mxu3 %v1589_v50 }
0x142e   :  { %1185 = vst.msk [vmem:[#allocation2 + $0x8] sm:$0x10] %vm1183_vm3, %v1180_v37 }
0x142f   :  { %1618 = vmatpush.msra.mxu3 %v1588_v38 }
0x1431   :  { %2030 = vmatpush.msrb.mxu3 %v1655_v62 }
0x1433   :  { %2031 = vmatpush.msrb.mxu3 %v1654_v63 }
0x1434   :  { %v680_v45 = vpop.permute.xlu2 %679 }
0x1435   :  { %v928_v46 = vpop.permute.xlu1 %927  ;;  %686 = vst.msk [vmem:[#allocation2] sm:$0x1] %vm685_vm14, %v680_v45  ;;  %2032 = vmatpush.msrb.mxu3 %v1653_v0 }
0x1436   :  { %934 = vst.msk [vmem:[#allocation2] sm:$0x4] %vm7315_vm4, %v928_v46 }
0x1437   :  { %2033 = vmatpush.msrb.mxu3 %v1652_v1 }
0x143c   :  { %v1053_v47 = vpop.permute.xlu2 %1052 }
0x143d   :  { %1059 = vst.msk [vmem:[#allocation2] sm:$0x8] %vm1058_vm15, %v1053_v47 }
0x1444   :  { %v1428_v48 = vpop.permute.xlu2 %1427 }
0x1445   :  { %1434 = vst.msk [vmem:[#allocation2] sm:$0x40] %vm1433_vm0, %v1428_v48 }
0x1491   :  { %v1553_v51 = vpop.permute.xlu0 %1552 }
0x1492   :  { %v1555_v52 = vpop.permute.xlu1 %1554  ;;  %1559 = vst.msk [vmem:[#allocation2] sm:$0x80] %vm7313_vm6, %v1553_v51 }
0x1493   :  { %1560 = vst.msk [vmem:[#allocation2 + $0x8] sm:$0x80] %vm7313_vm6, %v1555_v52 }
0x149a   :  { %v1562_v53 = vld [vmem:[#allocation2 + $0x8] sm:$0xff]  ;;  %v1303_v55 = vpop.permute.xlu1 %1302 }
0x149b   :  { %1309 = vst.msk [vmem:[#allocation2] sm:$0x20] %vm7314_vm5, %v1303_v55  ;;  %1577 = vmatpush.msra.mxu2 %v1562_v53 }
0x14a2   :  { %v1561_v56 = vld [vmem:[#allocation2] sm:$0xff] }
0x14a3   :  { %1578 = vmatpush.msra.mxu2 %v1561_v56 }
0x14a4   :  { %5065 = vmatmul.msk.f32.vlgmr.msra.gmra.mxu2 %vm7312_vm8, %v5711_v57 }
0x14a5   :  { %1906 = vmatpush.msrb.mxu2 %v1655_v62 }
0x14a7   :  { %1907 = vmatpush.msrb.mxu2 %v1654_v63 }
0x14a9   :  { %1908 = vmatpush.msrb.mxu2 %v1653_v0 }
0x14ab   :  { %1909 = vmatpush.msrb.mxu2 %v1652_v1 }
0x14ac   :  { %5066 = vmatmul.msk.f32.gmra.mxu2 %vm7312_vm8, %v5712_v58 }
0x14ad   :  { %2402 = vmatpush.msra.mxu2 %v1655_v62 }
0x14af   :  { %2403 = vmatpush.msra.mxu2 %v1654_v63 }
0x14b1   :  { %2404 = vmatpush.msra.mxu2 %v1653_v0 }
0x14b3   :  { %2405 = vmatpush.msra.mxu2 %v1652_v1 }
0x1527   :  { %v1580_v36 = vpop.f32.mrf.mxu2 }
0x1528   :  { %v1586_v59 = vsel %vm7311_vm10, %v1561_v56, %v1580_v36 }
0x1529   :  { %5068 = vmatmul.msk.f32.vlgmr.msra.gmra.mxu3 %vm225_vm7, %v1586_v59 }
0x152a   :  { %2526 = vmatpush.msra.mxu3 %v1655_v62 }
0x152c   :  { %2527 = vmatpush.msra.mxu3 %v1654_v63 }
0x152e   :  { %2528 = vmatpush.msra.mxu3 %v1653_v0 }
0x152f   :  { %v1583_v60 = vpop.f32.mrf.mxu2 }
0x1530   :  { %v1587_v61 = vsel %vm7311_vm10, %v1562_v53, %v1583_v60  ;;  %2529 = vmatpush.msra.mxu3 %v1652_v1 }
0x1531   :  { %5069 = vmatmul.msk.f32.gmra.mxu3 %vm225_vm7, %v1587_v61 }
0x15ac   :  { %v1620_v3 = vpop.f32.mrf.mxu3 }
0x15ad   :  { %v1621_v8 = vadd.f32 %v5176_v4, %v1620_v3 }
0x15b4   :  { %v1623_v10 = vpop.f32.mrf.mxu3 }
0x15b5   :  { %v1624_v11 = vadd.f32 %v5176_v4, %v1623_v10 }
0x15b7   :  { %1640 = vmatpush.msrb.mxu0 %v1624_v11 }
0x15b9   :  { %1641 = vmatpush.msrb.mxu0 %v1621_v8 }
0x15ba   :  { %5070 = vmatmul.msk.f32.vlgmr.msrb.gmra.mxu0 %vm7312_vm8, %v5711_v57 }
0x15bb   :  { %2154 = vmatpush.msra.mxu0 %v1655_v62 }
0x15bd   :  { %2155 = vmatpush.msra.mxu0 %v1654_v63 }
0x15bf   :  { %2156 = vmatpush.msra.mxu0 %v1653_v0 }
0x15c1   :  { %2157 = vmatpush.msra.mxu0 %v1652_v1 }
0x15c2   :  { %5071 = vmatmul.msk.f32.gmra.mxu0 %vm7312_vm8, %v5712_v58 }
0x1637   :  { %v1643_v7 = vpop.f32.mrf.mxu0 }
0x1638   :  { %v6508_v24 = vsel %vm6240_vm9, %v1621_v8, %v1643_v7 }
0x1639   :  { %v1680_v28 = vadd.f32 %v1673_v2, %v6508_v24 }
0x163b   :  { %5311 = vtanh.f32 %v1680_v28  ;;  %v5072_v21 = vmul.f32 -1.442695, %v1680_v28 }
0x163f   :  { %v1646_v30 = vpop.f32.mrf.mxu0 }
0x1640   :  { %v6513_v5 = vsel %vm6240_vm9, %v1624_v11, %v1646_v30 }
0x1641   :  { %v5312_v31 = vpop.eup %5311  ;;  %v1681_v35 = vadd.f32 %v1677_v29, %v6513_v5 }
0x1642   :  { %1726 = vrot.lane.b32.xlu2 %v5312_v31, %s5802_s0 }
0x1643   :  { %5313 = vtanh.f32 %v1681_v35  ;;  %v5073_v12 = vmul.f32 -1.442695, %v1681_v35 }
0x1644   :  { %5315 = vpow2.f32 %v5072_v21 }
0x1649   :  { %v5314_v19 = vpop.eup %5313 }
0x164a   :  { %1728 = vrot.lane.b32.xlu1 %v5314_v19, %s5802_s0  ;;  %v5316_v22 = vpop.eup %5315 }
0x164b   :  { %v1688_v9 = vadd.f32 1.0, %v5316_v22 }
0x164d   :  { %5317 = vrcp.f32 %v1688_v9  ;;  %v1701_v25 = vand.u32 2147483648, %v1688_v9  ;;  %vm1695_vm12 = vweird.f32 %v1688_v9  ;;  %v1699_v20 = vand.u32 2147483647, %v1688_v9 }
0x164e   :  { %5319 = vpow2.f32 %v5073_v12 }
0x164f   :  { %v1702_v27 = vor.u32 1.1754944e-38, %v1701_v25  ;;  %vm1700_vm10 = vcmp.eq.f32.partialorder %v1699_v20, 8.507059e+37 }
0x1653   :  { %v5318_v18 = vpop.eup %5317 }
0x1654   :  { %v1691_v41 = vmul.f32 %v5318_v18, %v1688_v9  ;;  %vm1696_vm11 = vweird.f32 %v5318_v18  ;;  %v5320_v16 = vpop.eup %5319 }
0x1655   :  { %vm1697_vm13 = vmor %vm1695_vm12, %vm1696_vm11  ;;  %v1689_v42 = vadd.f32 1.0, %v5320_v16 }
0x1656   :  { %v1692_v23 = vsub.f32 1.0, %v1691_v41 }
0x1657   :  { %5321 = vrcp.f32 %v1689_v42  ;;  %v1716_v45 = vand.u32 2147483648, %v1689_v42  ;;  %vm1710_vm6 = vweird.f32 %v1689_v42  ;;  %v1714_v46 = vand.u32 2147483647, %v1689_v42 }
0x1658   :  { %v1693_v40 = vmul.f32 %v5318_v18, %v1692_v23 }
0x1659   :  { %v1717_v48 = vor.u32 1.1754944e-38, %v1716_v45  ;;  %vm1715_vm12 = vcmp.eq.f32.partialorder %v1714_v46, 8.507059e+37 }
0x165a   :  { %v1694_v15 = vadd.f32 %v5318_v18, %v1693_v40 }
0x165c   :  { %v1698_v6 = vsel %vm1697_vm13, %v5318_v18, %v1694_v15 }
0x165d   :  { %v1703_v14 = vsel %vm1700_vm10, %v1702_v27, %v1698_v6  ;;  %v5322_v43 = vpop.eup %5321 }
0x165e   :  { %v1706_v26 = vmul.f32 %v5322_v43, %v1689_v42  ;;  %vm1711_vm8 = vweird.f32 %v5322_v43  ;;  %v1722_v51 = vmul.f32 0.0, %v1703_v14 }
0x165f   :  { %vm1712_vm11 = vmor %vm1710_vm6, %vm1711_vm8 }
0x1660   :  { %v1707_v44 = vsub.f32 1.0, %v1706_v26 }
0x1662   :  { %v1708_v17 = vmul.f32 %v5322_v43, %v1707_v44 }
0x1664   :  { %v1709_v37 = vadd.f32 %v5322_v43, %v1708_v17 }
0x1666   :  { %v1713_v47 = vsel %vm1712_vm11, %v5322_v43, %v1709_v37 }
0x1667   :  { %v1718_v49 = vsel %vm1715_vm12, %v1717_v48, %v1713_v47 }
0x1668   :  { %v1723_v56 = vmul.f32 0.0, %v1718_v49 }
0x169c   :  { %v1727_v13 = vpop.permute.xlu2 %1726 }
0x169d   :  { %v1732_v33 = vmul.f32 %v1727_v13, %v1703_v14 }
0x169f   :  { %1736 = vrot.lane.b32.xlu1 %v1732_v33, %s5802_s0 }
0x16bc   :  { %v1729_v32 = vpop.permute.xlu1 %1728 }
0x16bd   :  { %v1733_v50 = vmul.f32 %v1729_v32, %v1718_v49 }
0x16bf   :  { %1738 = vrot.lane.b32.xlu0 %v1733_v50, %s5802_s0 }
0x1711   :  { %v1737_v52 = vpop.permute.xlu1 %1736 }
0x1712   :  { %v6520_v53 = vadd.f32 %v1737_v52, %v1722_v51 }
0x1714   :  { %5323 = vtanh.f32 %v6520_v53  ;;  %v1840_v46 = vrot.slane %v6520_v53, 7 }
0x171a   :  { %v5324_v55 = vpop.eup %5323 }
0x171b   :  { %1748 = vrot.lane.b32.xlu0 %v5324_v55, %s5802_s0 }
0x1731   :  { %v1739_v57 = vpop.permute.xlu0 %1738 }
0x1732   :  { %v6524_v58 = vadd.f32 %v1739_v57, %v1723_v56 }
0x1734   :  { %5325 = vtanh.f32 %v6524_v58  ;;  %v1841_v37 = vrot.slane %v6524_v58, 7 }
0x173a   :  { %v5326_v38 = vpop.eup %5325 }
0x173b   :  { %1750 = vrot.lane.b32.xlu2 %v5326_v38, %s5802_s0 }
0x178d   :  { %v1749_v36 = vpop.permute.xlu0 %1748 }
0x178e   :  { %v6530_v61 = vmul.f32 %v1749_v36, %v1703_v14 }
0x1795   :  { %v1751_v59 = vpop.permute.xlu2 %1750 }
0x1796   :  { %v6528_v60 = vmul.f32 %v1751_v59, %v1718_v49 }
0x1798   :  { %v1766_v62 = vrot.slane %v6528_v60, 7 }
0x179a   :  { %v1767_v63 = vsel %vm689_vm2, %v1766_v62, %v6530_v61 }
0x179b   :  { %1768 = vrot.lane.b32.xlu1 %v1767_v63, %s5803_s7 }
0x180d   :  { %v1769_v0 = vpop.permute.xlu1 %1768 }
0x180e   :  { %5074 = vmatmul.msk.f32.vlgmr.msra.gmra.mxu1 %vm225_vm7, %v1769_v0 }
0x188b   :  { %v1789_v1 = vpop.f32.mrf.mxu1 }
0x188c   :  { %v1793_v3 = vrot.slane %v1789_v1, 7  ;;  %v1797_v4 = vadd.f32 %v1789_v1, %v6513_v5 }
0x188e   :  { %v1796_v10 = vadd.f32 %v1793_v3, %v6508_v24  ;;  %5327 = vtanh.f32 %v1797_v4  ;;  %v5076_v29 = vmul.f32 -1.442695, %v1797_v4 }
0x1890   :  { %5329 = vtanh.f32 %v1796_v10  ;;  %v5075_v2 = vmul.f32 -1.442695, %v1796_v10 }
0x1892   :  { %5331 = vpow2.f32 %v5075_v2 }
0x1894   :  { %v5328_v11 = vpop.eup %5327 }
0x1895   :  { %1850 = vrot.lane.b32.xlu0 %v5328_v11, %s5802_s0 }
0x1896   :  { %v5330_v8 = vpop.eup %5329 }
0x1897   :  { %1848 = vrot.lane.b32.xlu2 %v5330_v8, %s5802_s0 }
0x1898   :  { %v5332_v7 = vpop.eup %5331 }
0x1899   :  { %v1804_v28 = vadd.f32 1.0, %v5332_v7 }
0x189b   :  { %5333 = vrcp.f32 %v1804_v28  ;;  %v1817_v18 = vand.u32 2147483648, %v1804_v28  ;;  %vm1811_vm6 = vweird.f32 %v1804_v28  ;;  %v1815_v41 = vand.u32 2147483647, %v1804_v28 }
0x189c   :  { %5335 = vpow2.f32 %v5076_v29 }
0x189d   :  { %v1818_v12 = vor.u32 1.1754944e-38, %v1817_v18  ;;  %vm1816_vm13 = vcmp.eq.f32.partialorder %v1815_v41, 8.507059e+37 }
0x18a1   :  { %v5334_v30 = vpop.eup %5333 }
0x18a2   :  { %v1807_v31 = vmul.f32 %v5334_v30, %v1804_v28  ;;  %v5336_v19 = vpop.eup %5335  ;;  %vm1812_vm8 = vweird.f32 %v5334_v30 }
0x18a3   :  { %v1805_v21 = vadd.f32 1.0, %v5336_v19  ;;  %vm1813_vm10 = vmor %vm1811_vm6, %vm1812_vm8 }
0x18a4   :  { %v1808_v35 = vsub.f32 1.0, %v1807_v31 }
0x18a5   :  { %5337 = vrcp.f32 %v1805_v21  ;;  %v1832_v14 = vand.u32 2147483648, %v1805_v21  ;;  %vm1826_vm12 = vweird.f32 %v1805_v21  ;;  %v1830_v42 = vand.u32 2147483647, %v1805_v21 }
0x18a6   :  { %v1809_v22 = vmul.f32 %v5334_v30, %v1808_v35 }
0x18a7   :  { %v1833_v43 = vor.u32 1.1754944e-38, %v1832_v14  ;;  %vm1831_vm8 = vcmp.eq.f32.partialorder %v1830_v42, 8.507059e+37 }
0x18a8   :  { %v1810_v9 = vadd.f32 %v5334_v30, %v1809_v22 }
0x18aa   :  { %v1814_v23 = vsel %vm1813_vm10, %v5334_v30, %v1810_v9 }
0x18ab   :  { %v5338_v40 = vpop.eup %5337  ;;  %v1819_v25 = vsel %vm1816_vm13, %v1818_v12, %v1814_v23 }
0x18ac   :  { %v1822_v16 = vmul.f32 %v5338_v40, %v1805_v21  ;;  %vm1827_vm11 = vweird.f32 %v5338_v40  ;;  %v1844_v32 = vmul.f32 %v1840_v46, %v1819_v25 }
0x18ad   :  { %vm1828_vm5 = vmor %vm1826_vm12, %vm1827_vm11 }
0x18ae   :  { %v1823_v6 = vsub.f32 1.0, %v1822_v16 }
0x18b0   :  { %v1824_v27 = vmul.f32 %v5338_v40, %v1823_v6 }
0x18b2   :  { %v1825_v13 = vadd.f32 %v5338_v40, %v1824_v27 }
0x18b4   :  { %v1829_v33 = vsel %vm1828_vm5, %v5338_v40, %v1825_v13 }
0x18b5   :  { %v1834_v44 = vsel %vm1831_vm8, %v1833_v43, %v1829_v33 }
0x18b6   :  { %v1845_v45 = vmul.f32 %v1841_v37, %v1834_v44 }
0x18f1   :  { %v1849_v15 = vpop.permute.xlu2 %1848 }
0x18f2   :  { %v1854_v20 = vmul.f32 %v1849_v15, %v1819_v25 }
0x18f4   :  { %1858 = vrot.lane.b32.xlu1 %v1854_v20, %s5802_s0 }
0x1907   :  { %v1851_v26 = vpop.permute.xlu0 %1850 }
0x1908   :  { %v1855_v17 = vmul.f32 %v1851_v26, %v1834_v44 }
0x190a   :  { %1860 = vrot.lane.b32.xlu2 %v1855_v17, %s5802_s0 }
0x1964   :  { %v1861_v47 = vpop.permute.xlu2 %1860 }
0x1965   :  { %v6545_v48 = vadd.f32 %v1861_v47, %v1845_v45 }
0x1966   :  { %v1859_v49 = vpop.permute.xlu1 %1858 }
0x1967   :  { %5339 = vtanh.f32 %v6545_v48  ;;  %v6548_v50 = vadd.f32 %v1859_v49, %v1844_v32  ;;  %v1964_v46 = vrot.slane %v6545_v48, 7 }
0x1969   :  { %5341 = vtanh.f32 %v6548_v50  ;;  %v1963_v26 = vrot.slane %v6548_v50, 7 }
0x196d   :  { %v5340_v51 = vpop.eup %5339 }
0x196e   :  { %1872 = vrot.lane.b32.xlu1 %v5340_v51, %s5802_s0 }
0x196f   :  { %v5342_v52 = vpop.eup %5341 }
0x1970   :  { %1870 = vrot.lane.b32.xlu0 %v5342_v52, %s5802_s0 }
0x19e0   :  { %v1873_v55 = vpop.permute.xlu1 %1872 }
0x19e1   :  { %v6555_v57 = vmul.f32 %v1873_v55, %v1834_v44 }
0x19e2   :  { %v1871_v56 = vpop.permute.xlu0 %1870 }
0x19e3   :  { %v6553_v53 = vmul.f32 %v1871_v56, %v1819_v25 }
0x19e5   :  { %v1888_v58 = vrot.slane %v6553_v53, 1 }
0x19e7   :  { %v1889_v38 = vsel %vm689_vm2, %v6555_v57, %v1888_v58 }
0x19e8   :  { %1890 = vrot.lane.b32.xlu2 %v1889_v38, %s5803_s7 }
0x1a42   :  { %v1891_v36 = vpop.permute.xlu2 %1890 }
0x1a43   :  { %5077 = vmatmul.msk.f32.vlgmr.msrb.gmra.mxu2 %vm225_vm7, %v1891_v36 }
0x1ac6   :  { %v1911_v59 = vpop.f32.mrf.mxu2 }
0x1ac7   :  { %v1915_v62 = vrot.slane %v1911_v59, 6  ;;  %v1916_v63 = vrot.slane %v1911_v59, 7 }
0x1ac9   :  { %v1919_v0 = vadd.f32 %v1915_v62, %v6508_v24  ;;  %v1920_v1 = vadd.f32 %v1916_v63, %v6513_v5 }
0x1acb   :  { %5343 = vtanh.f32 %v1919_v0  ;;  %v5078_v10 = vmul.f32 -1.442695, %v1919_v0  ;;  %v5079_v11 = vmul.f32 -1.442695, %v1920_v1 }
0x1acc   :  { %5345 = vtanh.f32 %v1920_v1 }
0x1acd   :  { %5347 = vpow2.f32 %v5078_v10 }
0x1ace   :  { %5349 = vpow2.f32 %v5079_v11 }
0x1ad1   :  { %v5344_v3 = vpop.eup %5343 }
0x1ad2   :  { %v5346_v4 = vpop.eup %5345  ;;  %1971 = vrot.lane.b32.xlu0 %v5344_v3, %s5802_s0 }
0x1ad3   :  { %1973 = vrot.lane.b32.xlu1 %v5346_v4, %s5802_s0  ;;  %v5348_v8 = vpop.eup %5347 }
0x1ad4   :  { %v5350_v2 = vpop.eup %5349  ;;  %v1927_v7 = vadd.f32 1.0, %v5348_v8 }
0x1ad5   :  { %v1928_v28 = vadd.f32 1.0, %v5350_v2 }
0x1ad6   :  { %5351 = vrcp.f32 %v1927_v7  ;;  %v1940_v23 = vand.u32 2147483648, %v1927_v7  ;;  %vm1934_vm10 = vweird.f32 %v1927_v7  ;;  %v1938_v40 = vand.u32 2147483647, %v1927_v7 }
0x1ad7   :  { %5353 = vrcp.f32 %v1928_v28  ;;  %v1955_v12 = vand.u32 2147483648, %v1928_v28  ;;  %vm1949_vm13 = vweird.f32 %v1928_v28  ;;  %v1953_v15 = vand.u32 2147483647, %v1928_v28 }
0x1ad8   :  { %v1941_v16 = vor.u32 1.1754944e-38, %v1940_v23  ;;  %vm1939_vm8 = vcmp.eq.f32.partialorder %v1938_v40, 8.507059e+37 }
0x1ad9   :  { %v1956_v6 = vor.u32 1.1754944e-38, %v1955_v12  ;;  %vm1954_vm4 = vcmp.eq.f32.partialorder %v1953_v15, 8.507059e+37 }
0x1adc   :  { %v5352_v29 = vpop.eup %5351 }
0x1add   :  { %v5354_v30 = vpop.eup %5353  ;;  %v1930_v31 = vmul.f32 %v5352_v29, %v1927_v7  ;;  %vm1935_vm5 = vweird.f32 %v5352_v29 }
0x1ade   :  { %v1945_v35 = vmul.f32 %v5354_v30, %v1928_v28  ;;  %vm1950_vm6 = vweird.f32 %v5354_v30  ;;  %vm1936_vm11 = vmor %vm1934_vm10, %vm1935_vm5 }
0x1adf   :  { %v1931_v19 = vsub.f32 1.0, %v1930_v31  ;;  %vm1951_vm12 = vmor %vm1949_vm13, %vm1950_vm6 }
0x1ae0   :  { %v1946_v21 = vsub.f32 1.0, %v1945_v35 }
0x1ae1   :  { %v1932_v22 = vmul.f32 %v5352_v29, %v1931_v19 }
0x1ae2   :  { %v1947_v9 = vmul.f32 %v5354_v30, %v1946_v21 }
0x1ae3   :  { %v1933_v18 = vadd.f32 %v5352_v29, %v1932_v22 }
0x1ae4   :  { %v1948_v41 = vadd.f32 %v5354_v30, %v1947_v9 }
0x1ae5   :  { %v1937_v25 = vsel %vm1936_vm11, %v5352_v29, %v1933_v18 }
0x1ae6   :  { %v1952_v20 = vsel %vm1951_vm12, %v5354_v30, %v1948_v41  ;;  %v1942_v13 = vsel %vm1939_vm8, %v1941_v16, %v1937_v25 }
0x1ae7   :  { %v1957_v42 = vsel %vm1954_vm4, %v1956_v6, %v1952_v20  ;;  %v1967_v44 = vmul.f32 %v1963_v26, %v1942_v13 }
0x1ae8   :  { %v1968_v47 = vmul.f32 %v1964_v46, %v1957_v42 }
0x1b44   :  { %v1972_v27 = vpop.permute.xlu0 %1971 }
0x1b45   :  { %v1974_v14 = vpop.permute.xlu1 %1973  ;;  %v1977_v33 = vmul.f32 %v1972_v27, %v1942_v13 }
0x1b46   :  { %v1978_v43 = vmul.f32 %v1974_v14, %v1957_v42 }
0x1b47   :  { %1981 = vrot.lane.b32.xlu2 %v1977_v33, %s5802_s0 }
0x1b48   :  { %1983 = vrot.lane.b32.xlu0 %v1978_v43, %s5802_s0 }
0x1ba1   :  { %v1982_v17 = vpop.permute.xlu2 %1981 }
0x1ba2   :  { %v6569_v37 = vadd.f32 %v1982_v17, %v1967_v44 }
0x1ba4   :  { %5355 = vtanh.f32 %v6569_v37 }
0x1baa   :  { %v5356_v45 = vpop.eup %5355 }
0x1bab   :  { %1993 = vrot.lane.b32.xlu1 %v5356_v45, %s5802_s0 }
0x1bba   :  { %v1984_v32 = vpop.permute.xlu0 %1983 }
0x1bbb   :  { %v6574_v49 = vadd.f32 %v1984_v32, %v1968_v47  ;;  %v2087_v47 = vrot.slane %v6569_v37, 7 }
0x1bbd   :  { %5357 = vtanh.f32 %v6574_v49  ;;  %v2088_v26 = vrot.slane %v6574_v49, 7 }
0x1bc3   :  { %v5358_v51 = vpop.eup %5357 }
0x1bc4   :  { %1995 = vrot.lane.b32.xlu2 %v5358_v51, %s5802_s0 }
0x1c1d   :  { %v1994_v50 = vpop.permute.xlu1 %1993 }
0x1c1e   :  { %v1996_v52 = vpop.permute.xlu2 %1995  ;;  %v6578_v55 = vmul.f32 %v1994_v50, %v1942_v13 }
0x1c1f   :  { %v6580_v56 = vmul.f32 %v1996_v52, %v1957_v42 }
0x1c20   :  { %v2011_v58 = vrot.slane %v6578_v55, 2 }
0x1c21   :  { %v2012_v38 = vrot.slane %v6580_v56, 1 }
0x1c23   :  { %v2013_v48 = vsel %vm689_vm2, %v2012_v38, %v2011_v58 }
0x1c24   :  { %2014 = vrot.lane.b32.xlu0 %v2013_v48, %s5803_s7 }
0x1c96   :  { %v2015_v36 = vpop.permute.xlu0 %2014 }
0x1c97   :  { %5080 = vmatmul.msk.f32.vlgmr.msrb.gmra.mxu3 %vm225_vm7, %v2015_v36 }
0x1d1a   :  { %v2035_v59 = vpop.f32.mrf.mxu3 }
0x1d1b   :  { %v2039_v62 = vrot.slane %v2035_v59, 5  ;;  %v2040_v63 = vrot.slane %v2035_v59, 6 }
0x1d1d   :  { %v2043_v0 = vadd.f32 %v2039_v62, %v6508_v24  ;;  %v2044_v1 = vadd.f32 %v2040_v63, %v6513_v5 }
0x1d1f   :  { %5359 = vtanh.f32 %v2043_v0  ;;  %v5082_v10 = vmul.f32 -1.442695, %v2044_v1  ;;  %v5081_v7 = vmul.f32 -1.442695, %v2043_v0 }
0x1d20   :  { %5361 = vtanh.f32 %v2044_v1 }
0x1d21   :  { %5363 = vpow2.f32 %v5082_v10 }
0x1d25   :  { %v5360_v3 = vpop.eup %5359 }
0x1d26   :  { %v5362_v4 = vpop.eup %5361  ;;  %2095 = vrot.lane.b32.xlu1 %v5360_v3, %s5802_s0 }
0x1d27   :  { %2097 = vrot.lane.b32.xlu2 %v5362_v4, %s5802_s0  ;;  %v5364_v11 = vpop.eup %5363 }
0x1d28   :  { %v2052_v8 = vadd.f32 1.0, %v5364_v11 }
0x1d2a   :  { %5365 = vrcp.f32 %v2052_v8  ;;  %v2079_v21 = vand.u32 2147483648, %v2052_v8  ;;  %vm2073_vm5 = vweird.f32 %v2052_v8  ;;  %v2077_v22 = vand.u32 2147483647, %v2052_v8 }
0x1d2b   :  { %5367 = vpow2.f32 %v5081_v7 }
0x1d2c   :  { %v2080_v18 = vor.u32 1.1754944e-38, %v2079_v21  ;;  %vm2078_vm10 = vcmp.eq.f32.partialorder %v2077_v22, 8.507059e+37 }
0x1d30   :  { %v5366_v2 = vpop.eup %5365 }
0x1d31   :  { %v2069_v28 = vmul.f32 %v5366_v2, %v2052_v8  ;;  %v5368_v30 = vpop.eup %5367  ;;  %vm2074_vm4 = vweird.f32 %v5366_v2 }
0x1d32   :  { %v2051_v35 = vadd.f32 1.0, %v5368_v30  ;;  %vm2075_vm6 = vmor %vm2073_vm5, %vm2074_vm4 }
0x1d33   :  { %v2070_v29 = vsub.f32 1.0, %v2069_v28 }
0x1d34   :  { %5369 = vrcp.f32 %v2051_v35  ;;  %v2064_v6 = vand.u32 2147483648, %v2051_v35  ;;  %vm2058_vm11 = vweird.f32 %v2051_v35  ;;  %v2062_v27 = vand.u32 2147483647, %v2051_v35 }
0x1d35   :  { %v2071_v31 = vmul.f32 %v5366_v2, %v2070_v29 }
0x1d36   :  { %v2065_v14 = vor.u32 1.1754944e-38, %v2064_v6  ;;  %vm2063_vm8 = vcmp.eq.f32.partialorder %v2062_v27, 8.507059e+37 }
0x1d37   :  { %v2072_v19 = vadd.f32 %v5366_v2, %v2071_v31 }
0x1d39   :  { %v2076_v9 = vsel %vm2075_vm6, %v5366_v2, %v2072_v19 }
0x1d3a   :  { %v2081_v23 = vsel %vm2078_vm10, %v2080_v18, %v2076_v9  ;;  %v5370_v12 = vpop.eup %5369 }
0x1d3b   :  { %v2054_v15 = vmul.f32 %v5370_v12, %v2051_v35  ;;  %vm2059_vm13 = vweird.f32 %v5370_v12  ;;  %v2092_v44 = vmul.f32 %v2088_v26, %v2081_v23 }
0x1d3c   :  { %vm2060_vm12 = vmor %vm2058_vm11, %vm2059_vm13 }
0x1d3d   :  { %v2055_v25 = vsub.f32 1.0, %v2054_v15 }
0x1d3f   :  { %v2056_v20 = vmul.f32 %v5370_v12, %v2055_v25 }
0x1d41   :  { %v2057_v16 = vadd.f32 %v5370_v12, %v2056_v20 }
0x1d43   :  { %v2061_v13 = vsel %vm2060_vm12, %v5370_v12, %v2057_v16 }
0x1d44   :  { %v2066_v33 = vsel %vm2063_vm8, %v2065_v14, %v2061_v13 }
0x1d45   :  { %v2091_v32 = vmul.f32 %v2087_v47, %v2066_v33 }
0x1d81   :  { %v2098_v41 = vpop.permute.xlu2 %2097 }
0x1d82   :  { %v2102_v40 = vmul.f32 %v2098_v41, %v2081_v23 }
0x1d84   :  { %2107 = vrot.lane.b32.xlu1 %v2102_v40, %s5802_s0 }
0x1d98   :  { %v2096_v42 = vpop.permute.xlu1 %2095 }
0x1d99   :  { %v2101_v43 = vmul.f32 %v2096_v42, %v2066_v33 }
0x1d9b   :  { %2105 = vrot.lane.b32.xlu0 %v2101_v43, %s5802_s0 }
0x1df6   :  { %v2108_v17 = vpop.permute.xlu1 %2107 }
0x1df7   :  { %v6594_v45 = vadd.f32 %v2108_v17, %v2092_v44 }
0x1df9   :  { %5371 = vtanh.f32 %v6594_v45 }
0x1dff   :  { %v5372_v46 = vpop.eup %5371 }
0x1e00   :  { %2119 = vrot.lane.b32.xlu0 %v5372_v46, %s5802_s0  ;;  %v2212_v46 = vrot.slane %v6594_v45, 7 }
0x1e0d   :  { %v2106_v51 = vpop.permute.xlu0 %2105 }
0x1e0e   :  { %v6599_v50 = vadd.f32 %v2106_v51, %v2091_v32 }
0x1e10   :  { %5373 = vtanh.f32 %v6599_v50  ;;  %v2211_v17 = vrot.slane %v6599_v50, 7 }
0x1e16   :  { %v5374_v52 = vpop.eup %5373 }
0x1e17   :  { %2117 = vrot.lane.b32.xlu2 %v5374_v52, %s5802_s0 }
0x1e71   :  { %v2118_v49 = vpop.permute.xlu2 %2117 }
0x1e72   :  { %v2120_v58 = vpop.permute.xlu0 %2119  ;;  %v6603_v38 = vmul.f32 %v2118_v49, %v2066_v33 }
0x1e73   :  { %v6605_v48 = vmul.f32 %v2120_v58, %v2081_v23 }
0x1e74   :  { %v2135_v36 = vrot.slane %v6603_v38, 3 }
0x1e75   :  { %v2136_v59 = vrot.slane %v6605_v48, 2 }
0x1e77   :  { %v2137_v37 = vsel %vm689_vm2, %v2136_v59, %v2135_v36 }
0x1e78   :  { %2138 = vrot.lane.b32.xlu1 %v2137_v37, %s5803_s7 }
0x1eea   :  { %v2139_v62 = vpop.permute.xlu1 %2138 }
0x1eeb   :  { %5083 = vmatmul.msk.f32.vlgmr.msra.gmra.mxu0 %vm225_vm7, %v2139_v62 }
0x1f68   :  { %v2159_v63 = vpop.f32.mrf.mxu0 }
0x1f69   :  { %v2163_v0 = vrot.slane %v2159_v63, 4  ;;  %v2164_v1 = vrot.slane %v2159_v63, 5 }
0x1f6b   :  { %v2167_v3 = vadd.f32 %v2163_v0, %v6508_v24  ;;  %v2168_v4 = vadd.f32 %v2164_v1, %v6513_v5 }
0x1f6d   :  { %5375 = vtanh.f32 %v2167_v3  ;;  %v5084_v8 = vmul.f32 -1.442695, %v2167_v3  ;;  %v5085_v29 = vmul.f32 -1.442695, %v2168_v4 }
0x1f6e   :  { %5377 = vtanh.f32 %v2168_v4 }
0x1f6f   :  { %5379 = vpow2.f32 %v5084_v8 }
0x1f73   :  { %v5376_v10 = vpop.eup %5375 }
0x1f74   :  { %v5378_v11 = vpop.eup %5377  ;;  %2219 = vrot.lane.b32.xlu2 %v5376_v10, %s5802_s0 }
0x1f75   :  { %2221 = vrot.lane.b32.xlu0 %v5378_v11, %s5802_s0  ;;  %v5380_v2 = vpop.eup %5379 }
0x1f76   :  { %v2175_v7 = vadd.f32 1.0, %v5380_v2 }
0x1f78   :  { %5381 = vrcp.f32 %v2175_v7  ;;  %v2188_v9 = vand.u32 2147483648, %v2175_v7  ;;  %vm2182_vm5 = vweird.f32 %v2175_v7  ;;  %v2186_v18 = vand.u32 2147483647, %v2175_v7 }
0x1f79   :  { %5383 = vpow2.f32 %v5085_v29 }
0x1f7a   :  { %v2189_v23 = vor.u32 1.1754944e-38, %v2188_v9  ;;  %vm2187_vm10 = vcmp.eq.f32.partialorder %v2186_v18, 8.507059e+37 }
0x1f7e   :  { %v5382_v28 = vpop.eup %5381 }
0x1f7f   :  { %v2178_v30 = vmul.f32 %v5382_v28, %v2175_v7  ;;  %v5384_v19 = vpop.eup %5383  ;;  %vm2183_vm4 = vweird.f32 %v5382_v28 }
0x1f80   :  { %v2176_v21 = vadd.f32 1.0, %v5384_v19  ;;  %vm2184_vm6 = vmor %vm2182_vm5, %vm2183_vm4 }
0x1f81   :  { %v2179_v31 = vsub.f32 1.0, %v2178_v30 }
0x1f82   :  { %5385 = vrcp.f32 %v2176_v21  ;;  %v2203_v13 = vand.u32 2147483648, %v2176_v21  ;;  %vm2197_vm11 = vweird.f32 %v2176_v21  ;;  %v2201_v14 = vand.u32 2147483647, %v2176_v21 }
0x1f83   :  { %v2180_v35 = vmul.f32 %v5382_v28, %v2179_v31 }
0x1f84   :  { %v2204_v33 = vor.u32 1.1754944e-38, %v2203_v13  ;;  %vm2202_vm8 = vcmp.eq.f32.partialorder %v2201_v14, 8.507059e+37 }
0x1f85   :  { %v2181_v22 = vadd.f32 %v5382_v28, %v2180_v35 }
0x1f87   :  { %v2185_v41 = vsel %vm2184_vm6, %v5382_v28, %v2181_v22 }
0x1f88   :  { %v2190_v40 = vsel %vm2187_vm10, %v2189_v23, %v2185_v41  ;;  %v5386_v25 = vpop.eup %5385 }
0x1f89   :  { %v2193_v20 = vmul.f32 %v5386_v25, %v2176_v21  ;;  %vm2198_vm13 = vweird.f32 %v5386_v25  ;;  %v2215_v47 = vmul.f32 %v2211_v17, %v2190_v40 }
0x1f8a   :  { %vm2199_vm12 = vmor %vm2197_vm11, %vm2198_vm13 }
0x1f8b   :  { %v2194_v16 = vsub.f32 1.0, %v2193_v20 }
0x1f8d   :  { %v2195_v6 = vmul.f32 %v5386_v25, %v2194_v16 }
0x1f8f   :  { %v2196_v27 = vadd.f32 %v5386_v25, %v2195_v6 }
0x1f91   :  { %v2200_v42 = vsel %vm2199_vm12, %v5386_v25, %v2196_v27 }
0x1f92   :  { %v2205_v26 = vsel %vm2202_vm8, %v2204_v33, %v2200_v42 }
0x1f93   :  { %v2216_v32 = vmul.f32 %v2212_v46, %v2205_v26 }
0x1fce   :  { %v2220_v12 = vpop.permute.xlu2 %2219 }
0x1fcf   :  { %v2225_v15 = vmul.f32 %v2220_v12, %v2190_v40 }
0x1fd1   :  { %2229 = vrot.lane.b32.xlu1 %v2225_v15, %s5802_s0 }
0x1fe7   :  { %v2222_v43 = vpop.permute.xlu0 %2221 }
0x1fe8   :  { %v2226_v44 = vmul.f32 %v2222_v43, %v2205_v26 }
0x1fea   :  { %2231 = vrot.lane.b32.xlu2 %v2226_v44, %s5802_s0 }
0x2043   :  { %v2230_v51 = vpop.permute.xlu1 %2229 }
0x2044   :  { %v2232_v52 = vpop.permute.xlu2 %2231  ;;  %v6620_v49 = vadd.f32 %v2230_v51, %v2215_v47 }
0x2045   :  { %v6622_v58 = vadd.f32 %v2232_v52, %v2216_v32 }
0x2046   :  { %5387 = vtanh.f32 %v6620_v49  ;;  %v2335_v51 = vrot.slane %v6620_v49, 7 }
0x2047   :  { %5389 = vtanh.f32 %v6622_v58 }
0x204c   :  { %v5388_v36 = vpop.eup %5387 }
0x204d   :  { %v5390_v59 = vpop.eup %5389  ;;  %2241 = vrot.lane.b32.xlu0 %v5388_v36, %s5802_s0 }
0x204e   :  { %2243 = vrot.lane.b32.xlu1 %v5390_v59, %s5802_s0 }
0x20bf   :  { %v2242_v50 = vpop.permute.xlu0 %2241 }
0x20c0   :  { %v2244_v45 = vpop.permute.xlu1 %2243  ;;  %v6628_v37 = vmul.f32 %v2242_v50, %v2190_v40 }
0x20c1   :  { %v6630_v62 = vmul.f32 %v2244_v45, %v2205_v26  ;;  %v2336_v45 = vrot.slane %v6622_v58, 7 }
0x20c2   :  { %v2259_v63 = vrot.slane %v6628_v37, 4 }
0x20c3   :  { %v2260_v0 = vrot.slane %v6630_v62, 3 }
0x20c5   :  { %v2261_v1 = vsel %vm689_vm2, %v2260_v0, %v2259_v63 }
0x20c6   :  { %2262 = vrot.lane.b32.xlu2 %v2261_v1, %s5803_s7 }
0x2120   :  { %v2263_v3 = vpop.permute.xlu2 %2262 }
0x2121   :  { %5086 = vmatmul.msk.f32.vlgmr.msrb.gmra.mxu1 %vm225_vm7, %v2263_v3 }
0x219e   :  { %v2283_v4 = vpop.f32.mrf.mxu1 }
0x219f   :  { %v2287_v10 = vrot.slane %v2283_v4, 3  ;;  %v2288_v11 = vrot.slane %v2283_v4, 4 }
0x21a1   :  { %v2291_v8 = vadd.f32 %v2287_v10, %v6508_v24  ;;  %v2292_v2 = vadd.f32 %v2288_v11, %v6513_v5 }
0x21a3   :  { %5391 = vtanh.f32 %v2291_v8  ;;  %v5087_v29 = vmul.f32 -1.442695, %v2291_v8  ;;  %v5088_v30 = vmul.f32 -1.442695, %v2292_v2 }
0x21a4   :  { %5393 = vtanh.f32 %v2292_v2 }
0x21a5   :  { %5395 = vpow2.f32 %v5087_v29 }
0x21a6   :  { %5397 = vpow2.f32 %v5088_v30 }
0x21a9   :  { %v5392_v7 = vpop.eup %5391 }
0x21aa   :  { %v5394_v28 = vpop.eup %5393  ;;  %2343 = vrot.lane.b32.xlu0 %v5392_v7, %s5802_s0 }
0x21ab   :  { %2345 = vrot.lane.b32.xlu1 %v5394_v28, %s5802_s0  ;;  %v5396_v31 = vpop.eup %5395 }
0x21ac   :  { %v5398_v35 = vpop.eup %5397  ;;  %v2299_v19 = vadd.f32 1.0, %v5396_v31 }
0x21ad   :  { %v2300_v21 = vadd.f32 1.0, %v5398_v35 }
0x21ae   :  { %5399 = vrcp.f32 %v2299_v19  ;;  %v2312_v16 = vand.u32 2147483648, %v2299_v19  ;;  %vm2306_vm6 = vweird.f32 %v2299_v19  ;;  %v2310_v27 = vand.u32 2147483647, %v2299_v19 }
0x21af   :  { %5401 = vrcp.f32 %v2300_v21  ;;  %v2327_v6 = vand.u32 2147483648, %v2300_v21  ;;  %vm2321_vm10 = vweird.f32 %v2300_v21  ;;  %v2325_v13 = vand.u32 2147483647, %v2300_v21 }
0x21b0   :  { %v2313_v33 = vor.u32 1.1754944e-38, %v2312_v16  ;;  %vm2311_vm12 = vcmp.eq.f32.partialorder %v2310_v27, 8.507059e+37 }
0x21b1   :  { %v2328_v43 = vor.u32 1.1754944e-38, %v2327_v6  ;;  %vm2326_vm8 = vcmp.eq.f32.partialorder %v2325_v13, 8.507059e+37 }
0x21b4   :  { %v5400_v22 = vpop.eup %5399 }
0x21b5   :  { %v5402_v9 = vpop.eup %5401  ;;  %v2302_v18 = vmul.f32 %v5400_v22, %v2299_v19  ;;  %vm2307_vm4 = vweird.f32 %v5400_v22 }
0x21b6   :  { %v2317_v41 = vmul.f32 %v5402_v9, %v2300_v21  ;;  %vm2322_vm5 = vweird.f32 %v5402_v9  ;;  %vm2308_vm13 = vmor %vm2306_vm6, %vm2307_vm4 }
0x21b7   :  { %v2303_v23 = vsub.f32 1.0, %v2302_v18  ;;  %vm2323_vm11 = vmor %vm2321_vm10, %vm2322_vm5 }
0x21b8   :  { %v2318_v12 = vsub.f32 1.0, %v2317_v41 }
0x21b9   :  { %v2304_v40 = vmul.f32 %v5400_v22, %v2303_v23 }
0x21ba   :  { %v2319_v15 = vmul.f32 %v5402_v9, %v2318_v12 }
0x21bb   :  { %v2305_v25 = vadd.f32 %v5400_v22, %v2304_v40 }
0x21bc   :  { %v2320_v20 = vadd.f32 %v5402_v9, %v2319_v15 }
0x21bd   :  { %v2309_v14 = vsel %vm2308_vm13, %v5400_v22, %v2305_v25 }
0x21be   :  { %v2324_v42 = vsel %vm2323_vm11, %v5402_v9, %v2320_v20  ;;  %v2314_v44 = vsel %vm2311_vm12, %v2313_v33, %v2309_v14 }
0x21bf   :  { %v2329_v46 = vsel %vm2326_vm8, %v2328_v43, %v2324_v42  ;;  %v2339_v52 = vmul.f32 %v2335_v51, %v2314_v44 }
0x21c0   :  { %v2340_v63 = vmul.f32 %v2336_v45, %v2329_v46 }
0x221c   :  { %v2344_v26 = vpop.permute.xlu0 %2343 }
0x221d   :  { %v2346_v17 = vpop.permute.xlu1 %2345  ;;  %v2349_v47 = vmul.f32 %v2344_v26, %v2314_v44 }
0x221e   :  { %v2350_v32 = vmul.f32 %v2346_v17, %v2329_v46 }
0x221f   :  { %2353 = vrot.lane.b32.xlu2 %v2349_v47, %s5802_s0 }
0x2220   :  { %2355 = vrot.lane.b32.xlu0 %v2350_v32, %s5802_s0 }
0x2279   :  { %v2354_v36 = vpop.permute.xlu2 %2353 }
0x227a   :  { %v6644_v59 = vadd.f32 %v2354_v36, %v2339_v52 }
0x227c   :  { %5403 = vtanh.f32 %v6644_v59 }
0x2282   :  { %v5404_v50 = vpop.eup %5403 }
0x2283   :  { %2365 = vrot.lane.b32.xlu1 %v5404_v50, %s5802_s0 }
0x2292   :  { %v2356_v0 = vpop.permute.xlu0 %2355 }
0x2293   :  { %v6649_v1 = vadd.f32 %v2356_v0, %v2340_v63 }
0x2295   :  { %5405 = vtanh.f32 %v6649_v1  ;;  %v2460_v0 = vrot.slane %v6649_v1, 7 }
0x229b   :  { %v5406_v3 = vpop.eup %5405 }
0x229c   :  { %2367 = vrot.lane.b32.xlu2 %v5406_v3, %s5802_s0 }
0x22f5   :  { %v2366_v49 = vpop.permute.xlu1 %2365 }
0x22f6   :  { %v2368_v4 = vpop.permute.xlu2 %2367  ;;  %v6653_v10 = vmul.f32 %v2366_v49, %v2314_v44 }
0x22f7   :  { %v6655_v11 = vmul.f32 %v2368_v4, %v2329_v46 }
0x22f8   :  { %v2383_v8 = vrot.slane %v6653_v10, 5 }
0x22f9   :  { %v2384_v2 = vrot.slane %v6655_v11, 4 }
0x22fb   :  { %v2385_v58 = vsel %vm689_vm2, %v2384_v2, %v2383_v8  ;;  %v2459_v2 = vrot.slane %v6644_v59, 7 }
0x22fc   :  { %2386 = vrot.lane.b32.xlu0 %v2385_v58, %s5803_s7 }
0x236e   :  { %v2387_v7 = vpop.permute.xlu0 %2386 }
0x236f   :  { %5089 = vmatmul.msk.f32.vlgmr.msra.gmra.mxu2 %vm225_vm7, %v2387_v7 }
0x23f2   :  { %v2407_v28 = vpop.f32.mrf.mxu2 }
0x23f3   :  { %v2411_v29 = vrot.slane %v2407_v28, 2  ;;  %v2412_v30 = vrot.slane %v2407_v28, 3 }
0x23f5   :  { %v2415_v31 = vadd.f32 %v2411_v29, %v6508_v24  ;;  %v2416_v35 = vadd.f32 %v2412_v30, %v6513_v5 }
0x23f7   :  { %5407 = vtanh.f32 %v2415_v31  ;;  %v5091_v22 = vmul.f32 -1.442695, %v2416_v35  ;;  %v5090_v23 = vmul.f32 -1.442695, %v2415_v31 }
0x23f8   :  { %5409 = vtanh.f32 %v2416_v35 }
0x23f9   :  { %5411 = vpow2.f32 %v5091_v22 }
0x23fd   :  { %v5408_v19 = vpop.eup %5407 }
0x23fe   :  { %v5410_v21 = vpop.eup %5409  ;;  %2467 = vrot.lane.b32.xlu1 %v5408_v19, %s5802_s0 }
0x23ff   :  { %2469 = vrot.lane.b32.xlu2 %v5410_v21, %s5802_s0  ;;  %v5412_v9 = vpop.eup %5411 }
0x2400   :  { %v2424_v18 = vadd.f32 1.0, %v5412_v9 }
0x2402   :  { %5413 = vrcp.f32 %v2424_v18  ;;  %v2451_v6 = vand.u32 2147483648, %v2424_v18  ;;  %vm2445_vm5 = vweird.f32 %v2424_v18  ;;  %v2449_v27 = vand.u32 2147483647, %v2424_v18 }
0x2403   :  { %5415 = vpow2.f32 %v5090_v23 }
0x2404   :  { %v2452_v14 = vor.u32 1.1754944e-38, %v2451_v6  ;;  %vm2450_vm10 = vcmp.eq.f32.partialorder %v2449_v27, 8.507059e+37 }
0x2408   :  { %v5414_v41 = vpop.eup %5413 }
0x2409   :  { %v2441_v12 = vmul.f32 %v5414_v41, %v2424_v18  ;;  %v5416_v15 = vpop.eup %5415  ;;  %vm2446_vm4 = vweird.f32 %v5414_v41 }
0x240a   :  { %v2423_v20 = vadd.f32 1.0, %v5416_v15  ;;  %vm2447_vm6 = vmor %vm2445_vm5, %vm2446_vm4 }
0x240b   :  { %v2442_v40 = vsub.f32 1.0, %v2441_v12 }
0x240c   :  { %5417 = vrcp.f32 %v2423_v20  ;;  %v2436_v32 = vand.u32 2147483648, %v2423_v20  ;;  %vm2430_vm11 = vweird.f32 %v2423_v20  ;;  %v2434_v51 = vand.u32 2147483647, %v2423_v20 }
0x240d   :  { %v2443_v25 = vmul.f32 %v5414_v41, %v2442_v40 }
0x240e   :  { %v2437_v36 = vor.u32 1.1754944e-38, %v2436_v32  ;;  %vm2435_vm8 = vcmp.eq.f32.partialorder %v2434_v51, 8.507059e+37 }
0x240f   :  { %v2444_v16 = vadd.f32 %v5414_v41, %v2443_v25 }
0x2411   :  { %v2448_v13 = vsel %vm2447_vm6, %v5414_v41, %v2444_v16 }
0x2412   :  { %v2453_v33 = vsel %vm2450_vm10, %v2452_v14, %v2448_v13  ;;  %v5418_v43 = vpop.eup %5417 }
0x2413   :  { %v2426_v44 = vmul.f32 %v5418_v43, %v2423_v20  ;;  %vm2431_vm13 = vweird.f32 %v5418_v43  ;;  %v2464_v3 = vmul.f32 %v2460_v0, %v2453_v33 }
0x2414   :  { %vm2432_vm12 = vmor %vm2430_vm11, %vm2431_vm13 }
0x2415   :  { %v2427_v17 = vsub.f32 1.0, %v2426_v44 }
0x2417   :  { %v2428_v46 = vmul.f32 %v5418_v43, %v2427_v17 }
0x2419   :  { %v2429_v47 = vadd.f32 %v5418_v43, %v2428_v46 }
0x241b   :  { %v2433_v52 = vsel %vm2432_vm12, %v5418_v43, %v2429_v47 }
0x241c   :  { %v2438_v45 = vsel %vm2435_vm8, %v2437_v36, %v2433_v52 }
0x241d   :  { %v2463_v58 = vmul.f32 %v2459_v2, %v2438_v45 }
0x2459   :  { %v2470_v42 = vpop.permute.xlu2 %2469 }
0x245a   :  { %v2474_v26 = vmul.f32 %v2470_v42, %v2453_v33 }
0x245c   :  { %2479 = vrot.lane.b32.xlu1 %v2474_v26, %s5802_s0 }
0x2470   :  { %v2468_v50 = vpop.permute.xlu1 %2467 }
0x2471   :  { %v2473_v63 = vmul.f32 %v2468_v50, %v2438_v45 }
0x2473   :  { %2477 = vrot.lane.b32.xlu0 %v2473_v63, %s5802_s0 }
0x24ce   :  { %v2480_v49 = vpop.permute.xlu1 %2479 }
0x24cf   :  { %v6669_v4 = vadd.f32 %v2480_v49, %v2464_v3 }
0x24d1   :  { %5419 = vtanh.f32 %v6669_v4 }
0x24d7   :  { %v5420_v8 = vpop.eup %5419 }
0x24d8   :  { %2491 = vrot.lane.b32.xlu0 %v5420_v8, %s5802_s0 }
0x24e5   :  { %v2478_v7 = vpop.permute.xlu0 %2477 }
0x24e6   :  { %v6674_v28 = vadd.f32 %v2478_v7, %v2463_v58 }
0x24e8   :  { %5421 = vtanh.f32 %v6674_v28  ;;  %v2583_v7 = vrot.slane %v6674_v28, 7 }
0x24ee   :  { %v5422_v29 = vpop.eup %5421 }
0x24ef   :  { %2489 = vrot.lane.b32.xlu2 %v5422_v29, %s5802_s0  ;;  %v2584_v29 = vrot.slane %v6669_v4, 7 }
0x2549   :  { %v2490_v1 = vpop.permute.xlu2 %2489 }
0x254a   :  { %v2492_v30 = vpop.permute.xlu0 %2491  ;;  %v6678_v31 = vmul.f32 %v2490_v1, %v2438_v45 }
0x254b   :  { %v6680_v35 = vmul.f32 %v2492_v30, %v2453_v33 }
0x254c   :  { %v2507_v19 = vrot.slane %v6678_v31, 6 }
0x254d   :  { %v2508_v21 = vrot.slane %v6680_v35, 5 }
0x254f   :  { %v2509_v59 = vsel %vm689_vm2, %v2508_v21, %v2507_v19 }
0x2550   :  { %2510 = vrot.lane.b32.xlu1 %v2509_v59, %s5803_s7 }
0x25c2   :  { %v2511_v22 = vpop.permute.xlu1 %2510 }
0x25c3   :  { %5092 = vmatmul.msk.f32.vlgmr.msra.gmra.mxu3 %vm225_vm7, %v2511_v22 }
0x2646   :  { %v2531_v9 = vpop.f32.mrf.mxu3 }
0x2647   :  { %v2535_v18 = vrot.slane %v2531_v9, 1  ;;  %v2536_v41 = vrot.slane %v2531_v9, 2 }
0x2649   :  { %v2539_v23 = vadd.f32 %v2535_v18, %v6508_v24  ;;  %v2540_v12 = vadd.f32 %v2536_v41, %v6513_v5 }
0x264b   :  { %5423 = vtanh.f32 %v2539_v23  ;;  %v5094_v25 = vmul.f32 -1.442695, %v2540_v12  ;;  %v5093_v27 = vmul.f32 -1.442695, %v2539_v23 }
0x264c   :  { %5425 = vtanh.f32 %v2540_v12 }
0x264d   :  { %5427 = vpow2.f32 %v5094_v25 }
0x2651   :  { %v5424_v40 = vpop.eup %5423 }
0x2652   :  { %v5426_v15 = vpop.eup %5425  ;;  %2591 = vrot.lane.b32.xlu0 %v5424_v40, %s5802_s0  ;;  %v2661_v40 = vld [vmem:[#allocation5 + $0x30] sm:$0xff] }
0x2653   :  { %2593 = vrot.lane.b32.xlu2 %v5426_v15, %s5802_s0  ;;  %v5428_v20 = vpop.eup %5427  ;;  %v2660_v15 = vld [vmem:[#allocation5 + $0x28] sm:$0xff] }
0x2654   :  { %v2548_v16 = vadd.f32 1.0, %v5428_v20 }
0x2656   :  { %5429 = vrcp.f32 %v2548_v16  ;;  %v2575_v43 = vand.u32 2147483648, %v2548_v16  ;;  %vm2569_vm5 = vweird.f32 %v2548_v16  ;;  %v2573_v26 = vand.u32 2147483647, %v2548_v16 }
0x2657   :  { %5431 = vpow2.f32 %v5093_v27  ;;  %v5713_v27 = vld [vmem:[%s7297_s2] sm:$0xff] }
0x2658   :  { %v2576_v17 = vor.u32 1.1754944e-38, %v2575_v43  ;;  %vm2574_vm10 = vcmp.eq.f32.partialorder %v2573_v26, 8.507059e+37  ;;  %v2726_v43 = vld [vmem:[#allocation7 + $0x58] sm:$0xff]  ;;  %v2725_v26 = vld [vmem:[#allocation7 + $0x50] sm:$0xff] }
0x2659   :  { %2739 = vmatpush.msrb.mxu3 %v2726_v43 }
0x265b   :  { %2740 = vmatpush.msrb.mxu3 %v2725_v26 }
0x265c   :  { %v5430_v6 = vpop.eup %5429 }
0x265d   :  { %v2565_v13 = vmul.f32 %v5430_v6, %v2548_v16  ;;  %v5432_v14 = vpop.eup %5431  ;;  %vm2570_vm4 = vweird.f32 %v5430_v6 }
0x265e   :  { %v2547_v42 = vadd.f32 1.0, %v5432_v14  ;;  %vm2571_vm6 = vmor %vm2569_vm5, %vm2570_vm4  ;;  %vm7318_vm4 = vcmask 256002   ;;  %vm7319_vm5 = vcmask 259077  }
0x265f   :  { %v2566_v24 = vsub.f32 1.0, %v2565_v13  ;;  %v5714_v13 = vld [vmem:[%s7297_s2 + $0x8] sm:$0xff] }
0x2660   :  { %5433 = vrcp.f32 %v2547_v42  ;;  %v2560_v63 = vand.u32 2147483648, %v2547_v42  ;;  %vm2554_vm11 = vweird.f32 %v2547_v42  ;;  %v2558_v0 = vand.u32 2147483647, %v2547_v42 }
0x2661   :  { %v2567_v5 = vmul.f32 %v5430_v6, %v2566_v24  ;;  %v2659_v24 = vld [vmem:[#allocation5 + $0x20] sm:$0xff] }
0x2662   :  { %v2561_v49 = vor.u32 1.1754944e-38, %v2560_v63  ;;  %vm2559_vm8 = vcmp.eq.f32.partialorder %v2558_v0, 8.507059e+37 }
0x2663   :  { %v2568_v33 = vadd.f32 %v5430_v6, %v2567_v5 }
0x2665   :  { %v2572_v44 = vsel %vm2571_vm6, %v5430_v6, %v2568_v33  ;;  %vm7320_vm6 = vmmov %vm7318_vm4 }
0x2666   :  { %v2577_v47 = vsel %vm2574_vm10, %v2576_v17, %v2572_v44  ;;  %v5434_v32 = vpop.eup %5433  ;;  %vm7321_vm10 = vcmask 261127   ;;  %v2724_v44 = vld [vmem:[#allocation7 + $0x48] sm:$0xff]  ;;  %v2723_v17 = vld [vmem:[#allocation7 + $0x40] sm:$0xff] }
0x2667   :  { %v2550_v52 = vmul.f32 %v5434_v32, %v2547_v42  ;;  %vm2555_vm13 = vweird.f32 %v5434_v32  ;;  %v2588_v30 = vmul.f32 %v2584_v29, %v2577_v47  ;;  %2741 = vmatpush.msrb.mxu3 %v2724_v44 }
0x2668   :  { %vm2556_vm12 = vmor %vm2554_vm11, %vm2555_vm13 }
0x2669   :  { %v2551_v36 = vsub.f32 1.0, %v2550_v52  ;;  %vm7322_vm13 = vmmov %vm7321_vm10  ;;  %2742 = vmatpush.msrb.mxu3 %v2723_v17 }
0x266a   :  { %vm7323_vm11 = vmmov %vm7319_vm5  ;;  %2743 = vmatmul.f32.vlgmr.msrb.gmra.mxu3 %v5801_v54 }
0x266b   :  { %v2552_v50 = vmul.f32 %v5434_v32, %v2551_v36  ;;  %2855 = vmatpush.msra.mxu3 %v2726_v43 }
0x266d   :  { %v2553_v45 = vadd.f32 %v5434_v32, %v2552_v50  ;;  %2856 = vmatpush.msra.mxu3 %v2725_v26 }
0x266f   :  { %v2557_v3 = vsel %vm2556_vm12, %v5434_v32, %v2553_v45  ;;  %vm7324_vm12 = vcmask 130048   ;;  %2857 = vmatpush.msra.mxu3 %v2724_v44 }
0x2670   :  { %v2562_v2 = vsel %vm2559_vm8, %v2561_v49, %v2557_v3  ;;  %vm7325_vm8 = vmmov %vm7324_vm12 }
0x2671   :  { %v2587_v1 = vmul.f32 %v2583_v7, %v2562_v2  ;;  %2858 = vmatpush.msra.mxu3 %v2723_v17 }
0x2673   :  { %3349 = vmatpush.msrb.mxu3 %v2726_v43 }
0x2675   :  { %3350 = vmatpush.msrb.mxu3 %v2725_v26 }
0x2677   :  { %3351 = vmatpush.msrb.mxu3 %v2724_v44 }
0x2679   :  { %3352 = vmatpush.msrb.mxu3 %v2723_v17 }
0x26ad   :  { %v2594_v46 = vpop.permute.xlu2 %2593 }
0x26ae   :  { %v2598_v51 = vmul.f32 %v2594_v46, %v2577_v47 }
0x26b0   :  { %2603 = vrot.lane.b32.xlu1 %v2598_v51, %s5802_s0 }
0x26c4   :  { %v2592_v8 = vpop.permute.xlu0 %2591 }
0x26c5   :  { %v2597_v58 = vmul.f32 %v2592_v8, %v2562_v2 }
0x26c7   :  { %2601 = vrot.lane.b32.xlu2 %v2597_v58, %s5802_s0 }
0x26cf   :  { %1760 = vrot.lane.b32.xlu2 %v6528_v60, %s5803_s7 }
0x26d7   :  { %2129 = vrot.lane.b32.xlu2 %v6605_v48, %s5803_s7 }
0x26df   :  { %2501 = vrot.lane.b32.xlu2 %v6680_v35, %s5803_s7 }
0x26e7   :  { %1880 = vrot.lane.b32.xlu2 %v6553_v53, %s5803_s7 }
0x26ed   :  { %v2744_v36 = vpop.f32.mrf.mxu3 }
0x26ee   :  { %v2748_v0 = vrot.slane %v2744_v36, 1 }
0x26ef   :  { %2251 = vrot.lane.b32.xlu2 %v6628_v37, %s5803_s7 }
0x2721   :  { %v2602_v19 = vpop.permute.xlu2 %2601 }
0x2722   :  { %v2604_v60 = vpop.permute.xlu1 %2603  ;;  %v2607_v21 = vadd.f32 %v2602_v19, %v2587_v1 }
0x2723   :  { %v2608_v59 = vadd.f32 %v2604_v60, %v2588_v30 }
0x2724   :  { %5435 = vtanh.f32 %v2607_v21 }
0x2725   :  { %5437 = vtanh.f32 %v2608_v59 }
0x2729   :  { %v1761_v48 = vpop.permute.xlu2 %1760 }
0x272a   :  { %v5436_v35 = vpop.eup %5435  ;;  %1765 = vst.msk [vmem:[#allocation2 + $0x8] sm:$0x1] %vm685_vm14, %v1761_v48 }
0x272b   :  { %v5438_v53 = vpop.eup %5437  ;;  %2613 = vrot.lane.b32.xlu1 %v5436_v35, %s5802_s0 }
0x272c   :  { %2615 = vrot.lane.b32.xlu0 %v5438_v53, %s5802_s0 }
0x2731   :  { %v2130_v37 = vpop.permute.xlu2 %2129 }
0x2732   :  { %2134 = vst.msk [vmem:[#allocation2 + $0x8] sm:$0x8] %vm1058_vm15, %v2130_v37 }
0x2733   :  { %2005 = vrot.lane.b32.xlu1 %v6580_v56, %s5803_s7 }
0x2734   :  { %1882 = vrot.lane.b32.xlu0 %v6555_v57, %s5803_s7 }
0x2739   :  { %v2502_v4 = vpop.permute.xlu2 %2501 }
0x273a   :  { %2506 = vst.msk [vmem:[#allocation2 + $0x8] sm:$0x40] %vm1433_vm0, %v2502_v4 }
0x273b   :  { %2377 = vrot.lane.b32.xlu1 %v6655_v11, %s5803_s7 }
0x273c   :  { %2253 = vrot.lane.b32.xlu0 %v6630_v62, %s5803_s7 }
0x2741   :  { %v1881_v28 = vpop.permute.xlu2 %1880 }
0x2742   :  { %1886 = vst.msk [vmem:[#allocation2] sm:$0x2] %vm809_vm1, %v1881_v28 }
0x2743   :  { %1758 = vrot.lane.b32.xlu1 %v6530_v61, %s5803_s7 }
0x2744   :  { %2003 = vrot.lane.b32.xlu0 %v6578_v55, %s5803_s7 }
0x2749   :  { %v2252_v56 = vpop.permute.xlu2 %2251 }
0x274a   :  { %2257 = vst.msk [vmem:[#allocation2] sm:$0x10] %vm1183_vm3, %v2252_v56 }
0x274b   :  { %2127 = vrot.lane.b32.xlu1 %v6603_v38, %s5803_s7 }
0x2753   :  { %2499 = vrot.lane.b32.xlu1 %v6678_v31, %s5803_s7 }
0x279d   :  { %v2614_v57 = vpop.permute.xlu1 %2613 }
0x279e   :  { %v2616_v62 = vpop.permute.xlu0 %2615  ;;  %v2619_v11 = vmul.f32 %v2614_v57, %v2562_v2 }
0x279f   :  { %v2620_v22 = vmul.f32 %v2616_v62, %v2577_v47  ;;  %v5177_v47 = vld [vmem:[%s7304_s9 + $0x2] ss:$0 sm:$0xff] }
0x27a0   :  { %2623 = vrot.lane.b32.xlu2 %v2619_v11, %s5803_s7 }
0x27a1   :  { %2625 = vrot.lane.b32.xlu0 %v2620_v22, %s5803_s7 }
0x27a5   :  { %v2006_v61 = vpop.permute.xlu1 %2005 }
0x27a6   :  { %v1883_v9 = vpop.permute.xlu0 %1882  ;;  %2010 = vst.msk [vmem:[#allocation2 + $0x8] sm:$0x4] %vm7318_vm4, %v2006_v61  ;;  %vm7326_vm4 = vcmp.lt.s32.totalorder %v5999_v39, 16 }
0x27a7   :  { %1887 = vst.msk [vmem:[#allocation2 + $0x8] sm:$0x2] %vm809_vm1, %v1883_v9 }
0x27a9   :  { %2375 = vrot.lane.b32.xlu0 %v6653_v10, %s5803_s7  ;;  %v2662_v10 = vld [vmem:[#allocation5 + $0x38] sm:$0xff] }
0x27aa   :  { %2686 = vmatpush.msra.mxu1 %v2662_v10 }
0x27ac   :  { %2687 = vmatpush.msra.mxu1 %v2661_v40 }
0x27ad   :  { %v2378_v55 = vpop.permute.xlu1 %2377 }
0x27ae   :  { %v2254_v38 = vpop.permute.xlu0 %2253  ;;  %2382 = vst.msk [vmem:[#allocation2 + $0x8] sm:$0x20] %vm7319_vm5, %v2378_v55  ;;  %2688 = vmatpush.msra.mxu1 %v2660_v15  ;;  %vm7327_vm5 = vmmov %vm7326_vm4 }
0x27af   :  { %2258 = vst.msk [vmem:[#allocation2 + $0x8] sm:$0x10] %vm1183_vm3, %v2254_v38 }
0x27b0   :  { %2689 = vmatpush.msra.mxu1 %v2659_v24 }
0x27b2   :  { %3101 = vmatpush.msrb.mxu1 %v2726_v43 }
0x27b4   :  { %3102 = vmatpush.msrb.mxu1 %v2725_v26 }
0x27b5   :  { %v1759_v31 = vpop.permute.xlu1 %1758 }
0x27b6   :  { %v2004_v18 = vpop.permute.xlu0 %2003  ;;  %1764 = vst.msk [vmem:[#allocation2] sm:$0x1] %vm685_vm14, %v1759_v31  ;;  %3103 = vmatpush.msrb.mxu1 %v2724_v44 }
0x27b7   :  { %2009 = vst.msk [vmem:[#allocation2] sm:$0x4] %vm7320_vm6, %v2004_v18  ;;  %vm7328_vm6 = vmmov %vm7325_vm8 }
0x27b8   :  { %3104 = vmatpush.msrb.mxu1 %v2723_v17 }
0x27bd   :  { %v2128_v41 = vpop.permute.xlu1 %2127 }
0x27be   :  { %2133 = vst.msk [vmem:[#allocation2] sm:$0x8] %vm1058_vm15, %v2128_v41 }
0x27c5   :  { %v2500_v23 = vpop.permute.xlu1 %2499 }
0x27c6   :  { %2505 = vst.msk [vmem:[#allocation2] sm:$0x40] %vm1433_vm0, %v2500_v23 }
0x27fa   :  { %v2624_v12 = vpop.permute.xlu2 %2623 }
0x27fb   :  { %2629 = vst.msk [vmem:[#allocation2] sm:$0x80] %vm7321_vm10, %v2624_v12  ;;  %vm7329_vm10 = vmmov %vm7328_vm6 }
0x2813   :  { %v2626_v25 = vpop.permute.xlu0 %2625 }
0x2814   :  { %2630 = vst.msk [vmem:[#allocation2 + $0x8] sm:$0x80] %vm7322_vm13, %v2626_v25 }
0x281b   :  { %v2632_v20 = vld [vmem:[#allocation2 + $0x8] sm:$0xff]  ;;  %v2376_v16 = vpop.permute.xlu0 %2375 }
0x281c   :  { %2381 = vst.msk [vmem:[#allocation2] sm:$0x20] %vm7323_vm11, %v2376_v16  ;;  %2647 = vmatpush.msrb.mxu0 %v2632_v20 }
0x2823   :  { %v2631_v6 = vld [vmem:[#allocation2] sm:$0xff] }
0x2824   :  { %2648 = vmatpush.msrb.mxu0 %v2631_v6 }
0x2825   :  { %5095 = vmatmul.msk.f32.vlgmr.msrb.gmra.mxu0 %vm7324_vm12, %v5713_v27 }
0x2826   :  { %2977 = vmatpush.msra.mxu0 %v2726_v43 }
0x2828   :  { %2978 = vmatpush.msra.mxu0 %v2725_v26 }
0x282a   :  { %2979 = vmatpush.msra.mxu0 %v2724_v44 }
0x282c   :  { %2980 = vmatpush.msra.mxu0 %v2723_v17 }
0x282d   :  { %5096 = vmatmul.msk.f32.gmra.mxu0 %vm7325_vm8, %v5714_v13 }
0x282e   :  { %3473 = vmatpush.msrb.mxu0 %v2726_v43 }
0x2830   :  { %3474 = vmatpush.msrb.mxu0 %v2725_v26 }
0x2832   :  { %3475 = vmatpush.msrb.mxu0 %v2724_v44 }
0x2834   :  { %3476 = vmatpush.msrb.mxu0 %v2723_v17 }
0x28a2   :  { %v2650_v14 = vpop.f32.mrf.mxu0 }
0x28a3   :  { %v2656_v5 = vsel %vm7326_vm4, %v2631_v6, %v2650_v14 }
0x28a4   :  { %5098 = vmatmul.msk.f32.vlgmr.msra.gmra.mxu1 %vm225_vm7, %v2656_v5 }
0x28a5   :  { %3597 = vmatpush.msra.mxu1 %v2726_v43 }
0x28a7   :  { %3598 = vmatpush.msra.mxu1 %v2725_v26 }
0x28a9   :  { %3599 = vmatpush.msra.mxu1 %v2724_v44 }
0x28aa   :  { %v2653_v42 = vpop.f32.mrf.mxu0 }
0x28ab   :  { %v2657_v33 = vsel %vm7327_vm5, %v2632_v20, %v2653_v42  ;;  %3600 = vmatpush.msra.mxu1 %v2723_v17 }
0x28ac   :  { %5099 = vmatmul.msk.f32.gmra.mxu1 %vm225_vm7, %v2657_v33 }
0x2921   :  { %v2691_v46 = vpop.f32.mrf.mxu1 }
0x2922   :  { %v2692_v52 = vadd.f32 %v5177_v47, %v2691_v46 }
0x2929   :  { %v2694_v32 = vpop.f32.mrf.mxu1 }
0x292a   :  { %v2695_v51 = vadd.f32 %v5177_v47, %v2694_v32 }
0x292c   :  { %2711 = vmatpush.msrb.mxu2 %v2695_v51 }
0x292e   :  { %2712 = vmatpush.msrb.mxu2 %v2692_v52 }
0x292f   :  { %5100 = vmatmul.msk.f32.vlgmr.msrb.gmra.mxu2 %vm7328_vm6, %v5713_v27 }
0x2930   :  { %3225 = vmatpush.msra.mxu2 %v2726_v43 }
0x2932   :  { %3226 = vmatpush.msra.mxu2 %v2725_v26 }
0x2934   :  { %3227 = vmatpush.msra.mxu2 %v2724_v44 }
0x2936   :  { %3228 = vmatpush.msra.mxu2 %v2723_v17 }
0x2937   :  { %5101 = vmatmul.msk.f32.gmra.mxu2 %vm7329_vm10, %v5714_v13 }
0x29b2   :  { %v2714_v50 = vpop.f32.mrf.mxu2 }
0x29b3   :  { %v6765_v45 = vsel %vm6240_vm9, %v2692_v52, %v2714_v50 }
0x29b4   :  { %v2751_v63 = vadd.f32 %v2744_v36, %v6765_v45 }
0x29b6   :  { %5439 = vtanh.f32 %v2751_v63  ;;  %v5102_v7 = vmul.f32 -1.442695, %v2751_v63 }
0x29ba   :  { %v2717_v3 = vpop.f32.mrf.mxu2 }
0x29bb   :  { %v6770_v49 = vsel %vm6240_vm9, %v2695_v51, %v2717_v3 }
0x29bc   :  { %v5440_v8 = vpop.eup %5439  ;;  %v2752_v2 = vadd.f32 %v2748_v0, %v6770_v49 }
0x29bd   :  { %2797 = vrot.lane.b32.xlu1 %v5440_v8, %s5802_s0 }
0x29be   :  { %5441 = vtanh.f32 %v2752_v2  ;;  %v5103_v29 = vmul.f32 -1.442695, %v2752_v2 }
0x29bf   :  { %5443 = vpow2.f32 %v5102_v7 }
0x29c0   :  { %5445 = vpow2.f32 %v5103_v29 }
0x29c4   :  { %v5442_v58 = vpop.eup %5441 }
0x29c5   :  { %2799 = vrot.lane.b32.xlu0 %v5442_v58, %s5802_s0  ;;  %v5444_v1 = vpop.eup %5443 }
0x29c6   :  { %v2759_v30 = vadd.f32 1.0, %v5444_v1  ;;  %v5446_v19 = vpop.eup %5445 }
0x29c7   :  { %v2760_v60 = vadd.f32 1.0, %v5446_v19 }
0x29c8   :  { %5447 = vrcp.f32 %v2759_v30  ;;  %v2772_v56 = vand.u32 2147483648, %v2759_v30  ;;  %vm2766_vm11 = vweird.f32 %v2759_v30  ;;  %v2770_v57 = vand.u32 2147483647, %v2759_v30 }
0x29c9   :  { %5449 = vrcp.f32 %v2760_v60  ;;  %v2787_v31 = vand.u32 2147483648, %v2760_v60  ;;  %vm2781_vm5 = vweird.f32 %v2760_v60  ;;  %v2785_v18 = vand.u32 2147483647, %v2760_v60 }
0x29ca   :  { %v2773_v22 = vor.u32 1.1754944e-38, %v2772_v56  ;;  %vm2771_vm8 = vcmp.eq.f32.partialorder %v2770_v57, 8.507059e+37 }
0x29cb   :  { %v2788_v23 = vor.u32 1.1754944e-38, %v2787_v31  ;;  %vm2786_vm10 = vcmp.eq.f32.partialorder %v2785_v18, 8.507059e+37 }
0x29ce   :  { %v5448_v21 = vpop.eup %5447 }
0x29cf   :  { %v2762_v59 = vmul.f32 %v5448_v21, %v2759_v30  ;;  %v5450_v35 = vpop.eup %5449  ;;  %vm2767_vm13 = vweird.f32 %v5448_v21 }
0x29d0   :  { %v2777_v37 = vmul.f32 %v5450_v35, %v2760_v60  ;;  %vm2768_vm12 = vmor %vm2766_vm11, %vm2767_vm13  ;;  %vm2782_vm4 = vweird.f32 %v5450_v35 }
0x29d1   :  { %v2763_v48 = vsub.f32 1.0, %v2762_v59  ;;  %vm2783_vm6 = vmor %vm2781_vm5, %vm2782_vm4 }
0x29d2   :  { %v2778_v28 = vsub.f32 1.0, %v2777_v37 }
0x29d3   :  { %v2764_v53 = vmul.f32 %v5448_v21, %v2763_v48 }
0x29d4   :  { %v2779_v11 = vmul.f32 %v5450_v35, %v2778_v28 }
0x29d5   :  { %v2765_v4 = vadd.f32 %v5448_v21, %v2764_v53 }
0x29d6   :  { %v2780_v38 = vadd.f32 %v5450_v35, %v2779_v11 }
0x29d7   :  { %v2769_v62 = vsel %vm2768_vm12, %v5448_v21, %v2765_v4 }
0x29d8   :  { %v2774_v9 = vsel %vm2771_vm8, %v2773_v22, %v2769_v62  ;;  %v2784_v41 = vsel %vm2783_vm6, %v5450_v35, %v2780_v38 }
0x29d9   :  { %v2789_v10 = vsel %vm2786_vm10, %v2788_v23, %v2784_v41  ;;  %v2793_v6 = vmul.f32 0.0, %v2774_v9 }
0x29da   :  { %v2794_v15 = vmul.f32 0.0, %v2789_v10 }
0x2a2f   :  { %v2798_v61 = vpop.permute.xlu1 %2797 }
0x2a30   :  { %v2803_v55 = vmul.f32 %v2798_v61, %v2774_v9 }
0x2a32   :  { %2807 = vrot.lane.b32.xlu0 %v2803_v55, %s5802_s0 }
0x2a37   :  { %v2800_v12 = vpop.permute.xlu0 %2799 }
0x2a38   :  { %v2804_v40 = vmul.f32 %v2800_v12, %v2789_v10 }
0x2a3a   :  { %2809 = vrot.lane.b32.xlu2 %v2804_v40, %s5802_s0 }
0x2a94   :  { %v2810_v25 = vpop.permute.xlu2 %2809 }
0x2a95   :  { %v6777_v20 = vadd.f32 %v2810_v25, %v2794_v15 }
0x2a97   :  { %5451 = vtanh.f32 %v6777_v20  ;;  %v2912_v38 = vrot.slane %v6777_v20, 7 }
0x2a9d   :  { %v5452_v16 = vpop.eup %5451 }
0x2a9e   :  { %2821 = vrot.lane.b32.xlu1 %v5452_v16, %s5802_s0 }
0x2aa4   :  { %v2808_v27 = vpop.permute.xlu0 %2807 }
0x2aa5   :  { %v6781_v13 = vadd.f32 %v2808_v27, %v2793_v6 }
0x2aa7   :  { %5453 = vtanh.f32 %v6781_v13  ;;  %v2911_v12 = vrot.slane %v6781_v13, 7 }
0x2aad   :  { %v5454_v24 = vpop.eup %5453 }
0x2aae   :  { %2819 = vrot.lane.b32.xlu2 %v5454_v24, %s5802_s0 }
0x2b08   :  { %v2820_v14 = vpop.permute.xlu2 %2819 }
0x2b09   :  { %v6787_v33 = vmul.f32 %v2820_v14, %v2774_v9 }
0x2b10   :  { %v2822_v5 = vpop.permute.xlu1 %2821 }
0x2b11   :  { %v6785_v42 = vmul.f32 %v2822_v5, %v2789_v10 }
0x2b13   :  { %v2837_v43 = vrot.slane %v6785_v42, 7 }
0x2b15   :  { %v2838_v26 = vsel %vm689_vm2, %v2837_v43, %v6787_v33 }
0x2b16   :  { %2839 = vrot.lane.b32.xlu0 %v2838_v26, %s5803_s7 }
0x2b88   :  { %v2840_v44 = vpop.permute.xlu0 %2839 }
0x2b89   :  { %5104 = vmatmul.msk.f32.vlgmr.msra.gmra.mxu3 %vm225_vm7, %v2840_v44 }
0x2c0c   :  { %v2860_v17 = vpop.f32.mrf.mxu3 }
0x2c0d   :  { %v2864_v46 = vrot.slane %v2860_v17, 7  ;;  %v2868_v47 = vadd.f32 %v2860_v17, %v6770_v49 }
0x2c0f   :  { %v2867_v32 = vadd.f32 %v2864_v46, %v6765_v45  ;;  %5455 = vtanh.f32 %v2868_v47  ;;  %v5106_v36 = vmul.f32 -1.442695, %v2868_v47 }
0x2c11   :  { %5457 = vtanh.f32 %v2867_v32  ;;  %v5105_v8 = vmul.f32 -1.442695, %v2867_v32 }
0x2c12   :  { %5459 = vpow2.f32 %v5106_v36 }
0x2c15   :  { %v5456_v51 = vpop.eup %5455 }
0x2c16   :  { %2921 = vrot.lane.b32.xlu2 %v5456_v51, %s5802_s0 }
0x2c17   :  { %v5458_v52 = vpop.eup %5457 }
0x2c18   :  { %2919 = vrot.lane.b32.xlu1 %v5458_v52, %s5802_s0  ;;  %v5460_v50 = vpop.eup %5459 }
0x2c19   :  { %v2876_v63 = vadd.f32 1.0, %v5460_v50 }
0x2c1b   :  { %5461 = vrcp.f32 %v2876_v63  ;;  %v2903_v1 = vand.u32 2147483648, %v2876_v63  ;;  %vm2897_vm11 = vweird.f32 %v2876_v63  ;;  %v2901_v19 = vand.u32 2147483647, %v2876_v63 }
0x2c1c   :  { %5463 = vpow2.f32 %v5105_v8 }
0x2c1d   :  { %v2904_v21 = vor.u32 1.1754944e-38, %v2903_v1  ;;  %vm2902_vm8 = vcmp.eq.f32.partialorder %v2901_v19, 8.507059e+37 }
0x2c21   :  { %v5462_v0 = vpop.eup %5461 }
0x2c22   :  { %v2893_v3 = vmul.f32 %v5462_v0, %v2876_v63  ;;  %v5464_v7 = vpop.eup %5463  ;;  %vm2898_vm13 = vweird.f32 %v5462_v0 }
0x2c23   :  { %v2875_v30 = vadd.f32 1.0, %v5464_v7  ;;  %vm2899_vm12 = vmor %vm2897_vm11, %vm2898_vm13 }
0x2c24   :  { %v2894_v2 = vsub.f32 1.0, %v2893_v3 }
0x2c25   :  { %5465 = vrcp.f32 %v2875_v30  ;;  %v2888_v57 = vand.u32 2147483648, %v2875_v30  ;;  %vm2882_vm5 = vweird.f32 %v2875_v30  ;;  %v2886_v62 = vand.u32 2147483647, %v2875_v30 }
0x2c26   :  { %v2895_v58 = vmul.f32 %v5462_v0, %v2894_v2 }
0x2c27   :  { %v2889_v22 = vor.u32 1.1754944e-38, %v2888_v57  ;;  %vm2887_vm10 = vcmp.eq.f32.partialorder %v2886_v62, 8.507059e+37 }
0x2c28   :  { %v2896_v29 = vadd.f32 %v5462_v0, %v2895_v58 }
0x2c2a   :  { %v2900_v60 = vsel %vm2899_vm12, %v5462_v0, %v2896_v29 }
0x2c2b   :  { %v2905_v48 = vsel %vm2902_vm8, %v2904_v21, %v2900_v60  ;;  %v5466_v53 = vpop.eup %5465 }
0x2c2c   :  { %v2878_v37 = vmul.f32 %v5466_v53, %v2875_v30  ;;  %vm2883_vm4 = vweird.f32 %v5466_v53  ;;  %v2916_v31 = vmul.f32 %v2912_v38, %v2905_v48 }
0x2c2d   :  { %vm2884_vm6 = vmor %vm2882_vm5, %vm2883_vm4 }
0x2c2e   :  { %v2879_v4 = vsub.f32 1.0, %v2878_v37 }
0x2c30   :  { %v2880_v28 = vmul.f32 %v5466_v53, %v2879_v4 }
0x2c32   :  { %v2881_v56 = vadd.f32 %v5466_v53, %v2880_v28 }
0x2c34   :  { %v2885_v11 = vsel %vm2884_vm6, %v5466_v53, %v2881_v56 }
0x2c35   :  { %v2890_v9 = vsel %vm2887_vm10, %v2889_v22, %v2885_v11 }
0x2c36   :  { %v2915_v10 = vmul.f32 %v2911_v12, %v2890_v9 }
0x2c70   :  { %v2922_v59 = vpop.permute.xlu2 %2921 }
0x2c71   :  { %v2926_v35 = vmul.f32 %v2922_v59, %v2905_v48 }
0x2c73   :  { %2931 = vrot.lane.b32.xlu1 %v2926_v35, %s5802_s0 }
0x2c8a   :  { %v2920_v61 = vpop.permute.xlu1 %2919 }
0x2c8b   :  { %v2925_v55 = vmul.f32 %v2920_v61, %v2890_v9 }
0x2c8d   :  { %2929 = vrot.lane.b32.xlu0 %v2925_v55, %s5802_s0 }
0x2ce5   :  { %v2932_v18 = vpop.permute.xlu1 %2931 }
0x2ce6   :  { %v6801_v41 = vadd.f32 %v2932_v18, %v2916_v31 }
0x2ce8   :  { %5467 = vtanh.f32 %v6801_v41 }
0x2cee   :  { %v5468_v23 = vpop.eup %5467 }
0x2cef   :  { %2943 = vrot.lane.b32.xlu0 %v5468_v23, %s5802_s0 }
0x2cff   :  { %v2930_v40 = vpop.permute.xlu0 %2929 }
0x2d00   :  { %v6806_v15 = vadd.f32 %v2930_v40, %v2915_v10 }
0x2d02   :  { %5469 = vtanh.f32 %v6806_v15  ;;  %v3034_v61 = vrot.slane %v6806_v15, 7 }
0x2d08   :  { %v5470_v25 = vpop.eup %5469 }
0x2d09   :  { %2941 = vrot.lane.b32.xlu2 %v5470_v25, %s5802_s0 }
0x2d61   :  { %v2944_v20 = vpop.permute.xlu0 %2943 }
0x2d62   :  { %v6812_v27 = vmul.f32 %v2944_v20, %v2905_v48 }
0x2d63   :  { %v2942_v16 = vpop.permute.xlu2 %2941 }
0x2d64   :  { %v6810_v6 = vmul.f32 %v2942_v16, %v2890_v9  ;;  %v3035_v9 = vrot.slane %v6801_v41, 7 }
0x2d66   :  { %v2959_v24 = vrot.slane %v6810_v6, 1 }
0x2d68   :  { %v2960_v13 = vsel %vm689_vm2, %v6812_v27, %v2959_v24 }
0x2d69   :  { %2961 = vrot.lane.b32.xlu1 %v2960_v13, %s5803_s7 }
0x2ddb   :  { %v2962_v14 = vpop.permute.xlu1 %2961 }
0x2ddc   :  { %5107 = vmatmul.msk.f32.vlgmr.msra.gmra.mxu0 %vm225_vm7, %v2962_v14 }
0x2e59   :  { %v2982_v5 = vpop.f32.mrf.mxu0 }
0x2e5a   :  { %v2986_v43 = vrot.slane %v2982_v5, 6  ;;  %v2987_v26 = vrot.slane %v2982_v5, 7 }
0x2e5c   :  { %v2990_v44 = vadd.f32 %v2986_v43, %v6765_v45  ;;  %v2991_v17 = vadd.f32 %v2987_v26, %v6770_v49 }
0x2e5e   :  { %5471 = vtanh.f32 %v2990_v44  ;;  %v5108_v32 = vmul.f32 -1.442695, %v2990_v44  ;;  %v5109_v50 = vmul.f32 -1.442695, %v2991_v17 }
0x2e5f   :  { %5473 = vtanh.f32 %v2991_v17 }
0x2e60   :  { %5475 = vpow2.f32 %v5108_v32 }
0x2e64   :  { %v5472_v46 = vpop.eup %5471 }
0x2e65   :  { %v5474_v47 = vpop.eup %5473  ;;  %3042 = vrot.lane.b32.xlu2 %v5472_v46, %s5802_s0 }
0x2e66   :  { %3044 = vrot.lane.b32.xlu0 %v5474_v47, %s5802_s0  ;;  %v5476_v51 = vpop.eup %5475 }
0x2e67   :  { %v2998_v52 = vadd.f32 1.0, %v5476_v51 }
0x2e69   :  { %5477 = vrcp.f32 %v2998_v52  ;;  %v3011_v7 = vand.u32 2147483648, %v2998_v52  ;;  %vm3005_vm11 = vweird.f32 %v2998_v52  ;;  %v3009_v29 = vand.u32 2147483647, %v2998_v52 }
0x2e6a   :  { %5479 = vpow2.f32 %v5109_v50 }
0x2e6b   :  { %v3012_v30 = vor.u32 1.1754944e-38, %v3011_v7  ;;  %vm3010_vm8 = vcmp.eq.f32.partialorder %v3009_v29, 8.507059e+37 }
0x2e6f   :  { %v5478_v36 = vpop.eup %5477 }
0x2e70   :  { %v3001_v63 = vmul.f32 %v5478_v36, %v2998_v52  ;;  %v5480_v8 = vpop.eup %5479  ;;  %vm3006_vm13 = vweird.f32 %v5478_v36 }
0x2e71   :  { %v2999_v2 = vadd.f32 1.0, %v5480_v8  ;;  %vm3007_vm12 = vmor %vm3005_vm11, %vm3006_vm13 }
0x2e72   :  { %v3002_v0 = vsub.f32 1.0, %v3001_v63 }
0x2e73   :  { %5481 = vrcp.f32 %v2999_v2  ;;  %v3026_v4 = vand.u32 2147483648, %v2999_v2  ;;  %vm3020_vm5 = vweird.f32 %v2999_v2  ;;  %v3024_v28 = vand.u32 2147483647, %v2999_v2 }
0x2e74   :  { %v3003_v3 = vmul.f32 %v5478_v36, %v3002_v0 }
0x2e75   :  { %v3027_v57 = vor.u32 1.1754944e-38, %v3026_v4  ;;  %vm3025_vm10 = vcmp.eq.f32.partialorder %v3024_v28, 8.507059e+37 }
0x2e76   :  { %v3004_v58 = vadd.f32 %v5478_v36, %v3003_v3 }
0x2e78   :  { %v3008_v1 = vsel %vm3007_vm12, %v5478_v36, %v3004_v58 }
0x2e79   :  { %v3013_v60 = vsel %vm3010_vm8, %v3012_v30, %v3008_v1  ;;  %v5482_v59 = vpop.eup %5481 }
0x2e7a   :  { %v3016_v48 = vmul.f32 %v5482_v59, %v2999_v2  ;;  %vm3021_vm4 = vweird.f32 %v5482_v59  ;;  %v3038_v55 = vmul.f32 %v3034_v61, %v3013_v60 }
0x2e7b   :  { %vm3022_vm6 = vmor %vm3020_vm5, %vm3021_vm4 }
0x2e7c   :  { %v3017_v35 = vsub.f32 1.0, %v3016_v48 }
0x2e7e   :  { %v3018_v53 = vmul.f32 %v5482_v59, %v3017_v35 }
0x2e80   :  { %v3019_v37 = vadd.f32 %v5482_v59, %v3018_v53 }
0x2e82   :  { %v3023_v56 = vsel %vm3022_vm6, %v5482_v59, %v3019_v37 }
0x2e83   :  { %v3028_v11 = vsel %vm3025_vm10, %v3027_v57, %v3023_v56 }
0x2e84   :  { %v3039_v38 = vmul.f32 %v3035_v9, %v3028_v11 }
0x2ebf   :  { %v3043_v19 = vpop.permute.xlu2 %3042 }
0x2ec0   :  { %v3048_v21 = vmul.f32 %v3043_v19, %v3013_v60 }
0x2ec2   :  { %3052 = vrot.lane.b32.xlu1 %v3048_v21, %s5802_s0 }
0x2ed8   :  { %v3045_v62 = vpop.permute.xlu0 %3044 }
0x2ed9   :  { %v3049_v22 = vmul.f32 %v3045_v62, %v3028_v11 }
0x2edb   :  { %3054 = vrot.lane.b32.xlu2 %v3049_v22, %s5802_s0 }
0x2f34   :  { %v3053_v31 = vpop.permute.xlu1 %3052 }
0x2f35   :  { %v3055_v18 = vpop.permute.xlu2 %3054  ;;  %v6827_v23 = vadd.f32 %v3053_v31, %v3038_v55 }
0x2f36   :  { %v6829_v12 = vadd.f32 %v3055_v18, %v3039_v38 }
0x2f37   :  { %5483 = vtanh.f32 %v6827_v23  ;;  %v3158_v61 = vrot.slane %v6827_v23, 7 }
0x2f38   :  { %5485 = vtanh.f32 %v6829_v12  ;;  %v3159_v18 = vrot.slane %v6829_v12, 7 }
0x2f3d   :  { %v5484_v10 = vpop.eup %5483 }
0x2f3e   :  { %v5486_v40 = vpop.eup %5485  ;;  %3064 = vrot.lane.b32.xlu0 %v5484_v10, %s5802_s0 }
0x2f3f   :  { %3066 = vrot.lane.b32.xlu1 %v5486_v40, %s5802_s0 }
0x2fb0   :  { %v3065_v15 = vpop.permute.xlu0 %3064 }
0x2fb1   :  { %v3067_v41 = vpop.permute.xlu1 %3066  ;;  %v6835_v25 = vmul.f32 %v3065_v15, %v3013_v60 }
0x2fb2   :  { %v6837_v20 = vmul.f32 %v3067_v41, %v3028_v11 }
0x2fb3   :  { %v3082_v16 = vrot.slane %v6835_v25, 2 }
0x2fb4   :  { %v3083_v24 = vrot.slane %v6837_v20, 1 }
0x2fb6   :  { %v3084_v13 = vsel %vm689_vm2, %v3083_v24, %v3082_v16 }
0x2fb7   :  { %3085 = vrot.lane.b32.xlu2 %v3084_v13, %s5803_s7 }
0x3011   :  { %v3086_v14 = vpop.permute.xlu2 %3085 }
0x3012   :  { %5110 = vmatmul.msk.f32.vlgmr.msrb.gmra.mxu1 %vm225_vm7, %v3086_v14 }
0x308f   :  { %v3106_v5 = vpop.f32.mrf.mxu1 }
0x3090   :  { %v3110_v43 = vrot.slane %v3106_v5, 5  ;;  %v3111_v26 = vrot.slane %v3106_v5, 6 }
0x3092   :  { %v3114_v44 = vadd.f32 %v3110_v43, %v6765_v45  ;;  %v3115_v17 = vadd.f32 %v3111_v26, %v6770_v49 }
0x3094   :  { %5487 = vtanh.f32 %v3114_v44  ;;  %v5111_v32 = vmul.f32 -1.442695, %v3114_v44  ;;  %v5112_v51 = vmul.f32 -1.442695, %v3115_v17 }
0x3095   :  { %5489 = vtanh.f32 %v3115_v17 }
0x3096   :  { %5491 = vpow2.f32 %v5111_v32 }
0x3097   :  { %5493 = vpow2.f32 %v5112_v51 }
0x309a   :  { %v5488_v46 = vpop.eup %5487 }
0x309b   :  { %v5490_v47 = vpop.eup %5489  ;;  %3166 = vrot.lane.b32.xlu0 %v5488_v46, %s5802_s0 }
0x309c   :  { %3168 = vrot.lane.b32.xlu1 %v5490_v47, %s5802_s0  ;;  %v5492_v52 = vpop.eup %5491 }
0x309d   :  { %v5494_v36 = vpop.eup %5493  ;;  %v3122_v50 = vadd.f32 1.0, %v5492_v52 }
0x309e   :  { %v3123_v63 = vadd.f32 1.0, %v5494_v36 }
0x309f   :  { %5495 = vrcp.f32 %v3122_v50  ;;  %v3135_v60 = vand.u32 2147483648, %v3122_v50  ;;  %vm3129_vm12 = vweird.f32 %v3122_v50  ;;  %v3133_v59 = vand.u32 2147483647, %v3122_v50 }
0x30a0   :  { %5497 = vrcp.f32 %v3123_v63  ;;  %v3150_v21 = vand.u32 2147483648, %v3123_v63  ;;  %vm3144_vm8 = vweird.f32 %v3123_v63  ;;  %v3148_v48 = vand.u32 2147483647, %v3123_v63 }
0x30a1   :  { %v3136_v37 = vor.u32 1.1754944e-38, %v3135_v60  ;;  %vm3134_vm6 = vcmp.eq.f32.partialorder %v3133_v59, 8.507059e+37 }
0x30a2   :  { %v3151_v4 = vor.u32 1.1754944e-38, %v3150_v21  ;;  %vm3149_vm10 = vcmp.eq.f32.partialorder %v3148_v48, 8.507059e+37 }
0x30a5   :  { %v5496_v0 = vpop.eup %5495 }
0x30a6   :  { %v5498_v3 = vpop.eup %5497  ;;  %v3125_v8 = vmul.f32 %v5496_v0, %v3122_v50  ;;  %vm3130_vm13 = vweird.f32 %v5496_v0 }
0x30a7   :  { %v3140_v2 = vmul.f32 %v5498_v3, %v3123_v63  ;;  %vm3145_vm11 = vweird.f32 %v5498_v3  ;;  %vm3131_vm4 = vmor %vm3129_vm12, %vm3130_vm13 }
0x30a8   :  { %v3126_v58 = vsub.f32 1.0, %v3125_v8  ;;  %vm3146_vm5 = vmor %vm3144_vm8, %vm3145_vm11 }
0x30a9   :  { %v3141_v7 = vsub.f32 1.0, %v3140_v2 }
0x30aa   :  { %v3127_v29 = vmul.f32 %v5496_v0, %v3126_v58 }
0x30ab   :  { %v3142_v1 = vmul.f32 %v5498_v3, %v3141_v7 }
0x30ac   :  { %v3128_v30 = vadd.f32 %v5496_v0, %v3127_v29 }
0x30ad   :  { %v3143_v19 = vadd.f32 %v5498_v3, %v3142_v1 }
0x30ae   :  { %v3132_v35 = vsel %vm3131_vm4, %v5496_v0, %v3128_v30 }
0x30af   :  { %v3147_v53 = vsel %vm3146_vm5, %v5498_v3, %v3143_v19  ;;  %v3137_v56 = vsel %vm3134_vm6, %v3136_v37, %v3132_v35 }
0x30b0   :  { %v3152_v62 = vsel %vm3149_vm10, %v3151_v4, %v3147_v53  ;;  %v3162_v9 = vmul.f32 %v3158_v61, %v3137_v56 }
0x30b1   :  { %v3163_v10 = vmul.f32 %v3159_v18, %v3152_v62 }
0x310d   :  { %v3167_v28 = vpop.permute.xlu0 %3166 }
0x310e   :  { %v3169_v57 = vpop.permute.xlu1 %3168  ;;  %v3172_v11 = vmul.f32 %v3167_v28, %v3137_v56 }
0x310f   :  { %v3173_v22 = vmul.f32 %v3169_v57, %v3152_v62 }
0x3110   :  { %3176 = vrot.lane.b32.xlu2 %v3172_v11, %s5802_s0 }
0x3111   :  { %3178 = vrot.lane.b32.xlu0 %v3173_v22, %s5802_s0 }
0x316a   :  { %v3177_v55 = vpop.permute.xlu2 %3176 }
0x316b   :  { %v6851_v38 = vadd.f32 %v3177_v55, %v3162_v9 }
0x316d   :  { %5499 = vtanh.f32 %v6851_v38 }
0x3173   :  { %v5500_v31 = vpop.eup %5499 }
0x3174   :  { %3188 = vrot.lane.b32.xlu1 %v5500_v31, %s5802_s0 }
0x3183   :  { %v3179_v40 = vpop.permute.xlu0 %3178 }
0x3184   :  { %v6856_v15 = vadd.f32 %v3179_v40, %v3163_v10 }
0x3186   :  { %5501 = vtanh.f32 %v6856_v15  ;;  %v3283_v55 = vrot.slane %v6856_v15, 7 }
0x318c   :  { %v5502_v41 = vpop.eup %5501 }
0x318d   :  { %3190 = vrot.lane.b32.xlu2 %v5502_v41, %s5802_s0  ;;  %v3282_v41 = vrot.slane %v6851_v38, 7 }
0x31e6   :  { %v3189_v23 = vpop.permute.xlu1 %3188 }
0x31e7   :  { %v3191_v16 = vpop.permute.xlu2 %3190  ;;  %v6860_v24 = vmul.f32 %v3189_v23, %v3137_v56 }
0x31e8   :  { %v6862_v13 = vmul.f32 %v3191_v16, %v3152_v62 }
0x31e9   :  { %v3206_v14 = vrot.slane %v6860_v24, 3 }
0x31ea   :  { %v3207_v5 = vrot.slane %v6862_v13, 2 }
0x31ec   :  { %v3208_v12 = vsel %vm689_vm2, %v3207_v5, %v3206_v14 }
0x31ed   :  { %3209 = vrot.lane.b32.xlu0 %v3208_v12, %s5803_s7 }
0x325f   :  { %v3210_v43 = vpop.permute.xlu0 %3209 }
0x3260   :  { %5113 = vmatmul.msk.f32.vlgmr.msra.gmra.mxu2 %vm225_vm7, %v3210_v43 }
0x32e3   :  { %v3230_v26 = vpop.f32.mrf.mxu2 }
0x32e4   :  { %v3234_v44 = vrot.slane %v3230_v26, 4  ;;  %v3235_v17 = vrot.slane %v3230_v26, 5 }
0x32e6   :  { %v3238_v46 = vadd.f32 %v3234_v44, %v6765_v45  ;;  %v3239_v47 = vadd.f32 %v3235_v17, %v6770_v49 }
0x32e8   :  { %5503 = vtanh.f32 %v3238_v46  ;;  %v5115_v52 = vmul.f32 -1.442695, %v3239_v47  ;;  %v5114_v0 = vmul.f32 -1.442695, %v3238_v46 }
0x32e9   :  { %5505 = vtanh.f32 %v3239_v47 }
0x32ea   :  { %5507 = vpow2.f32 %v5115_v52 }
0x32ee   :  { %v5504_v32 = vpop.eup %5503 }
0x32ef   :  { %v5506_v51 = vpop.eup %5505  ;;  %3290 = vrot.lane.b32.xlu1 %v5504_v32, %s5802_s0 }
0x32f0   :  { %3292 = vrot.lane.b32.xlu2 %v5506_v51, %s5802_s0  ;;  %v5508_v36 = vpop.eup %5507 }
0x32f1   :  { %v3247_v50 = vadd.f32 1.0, %v5508_v36 }
0x32f3   :  { %5509 = vrcp.f32 %v3247_v50  ;;  %v3274_v1 = vand.u32 2147483648, %v3247_v50  ;;  %vm3268_vm11 = vweird.f32 %v3247_v50  ;;  %v3272_v30 = vand.u32 2147483647, %v3247_v50 }
0x32f4   :  { %5511 = vpow2.f32 %v5114_v0 }
0x32f5   :  { %v3275_v60 = vor.u32 1.1754944e-38, %v3274_v1  ;;  %vm3273_vm8 = vcmp.eq.f32.partialorder %v3272_v30, 8.507059e+37 }
0x32f9   :  { %v5510_v63 = vpop.eup %5509 }
0x32fa   :  { %v3264_v3 = vmul.f32 %v5510_v63, %v3247_v50  ;;  %v5512_v2 = vpop.eup %5511  ;;  %vm3269_vm13 = vweird.f32 %v5510_v63 }
0x32fb   :  { %v3246_v7 = vadd.f32 1.0, %v5512_v2  ;;  %vm3270_vm12 = vmor %vm3268_vm11, %vm3269_vm13 }
0x32fc   :  { %v3265_v8 = vsub.f32 1.0, %v3264_v3 }
0x32fd   :  { %5513 = vrcp.f32 %v3246_v7  ;;  %v3259_v56 = vand.u32 2147483648, %v3246_v7  ;;  %vm3253_vm5 = vweird.f32 %v3246_v7  ;;  %v3257_v57 = vand.u32 2147483647, %v3246_v7 }
0x32fe   :  { %v3266_v58 = vmul.f32 %v5510_v63, %v3265_v8 }
0x32ff   :  { %v3260_v11 = vor.u32 1.1754944e-38, %v3259_v56  ;;  %vm3258_vm10 = vcmp.eq.f32.partialorder %v3257_v57, 8.507059e+37 }
0x3300   :  { %v3267_v29 = vadd.f32 %v5510_v63, %v3266_v58 }
0x3302   :  { %v3271_v19 = vsel %vm3270_vm12, %v5510_v63, %v3267_v29 }
0x3303   :  { %v3276_v59 = vsel %vm3273_vm8, %v3275_v60, %v3271_v19  ;;  %v5514_v48 = vpop.eup %5513 }
0x3304   :  { %v3249_v53 = vmul.f32 %v5514_v48, %v3246_v7  ;;  %vm3254_vm4 = vweird.f32 %v5514_v48  ;;  %v3287_v31 = vmul.f32 %v3283_v55, %v3276_v59 }
0x3305   :  { %vm3255_vm6 = vmor %vm3253_vm5, %vm3254_vm4 }
0x3306   :  { %v3250_v37 = vsub.f32 1.0, %v3249_v53 }
0x3308   :  { %v3251_v4 = vmul.f32 %v5514_v48, %v3250_v37 }
0x330a   :  { %v3252_v28 = vadd.f32 %v5514_v48, %v3251_v4 }
0x330c   :  { %v3256_v62 = vsel %vm3255_vm6, %v5514_v48, %v3252_v28 }
0x330d   :  { %v3261_v61 = vsel %vm3258_vm10, %v3260_v11, %v3256_v62 }
0x330e   :  { %v3286_v23 = vmul.f32 %v3282_v41, %v3261_v61 }
0x334a   :  { %v3293_v21 = vpop.permute.xlu2 %3292 }
0x334b   :  { %v3297_v35 = vmul.f32 %v3293_v21, %v3276_v59 }
0x334d   :  { %3302 = vrot.lane.b32.xlu1 %v3297_v35, %s5802_s0 }
0x3361   :  { %v3291_v22 = vpop.permute.xlu1 %3290 }
0x3362   :  { %v3296_v9 = vmul.f32 %v3291_v22, %v3261_v61 }
0x3364   :  { %3300 = vrot.lane.b32.xlu0 %v3296_v9, %s5802_s0 }
0x33bf   :  { %v3303_v18 = vpop.permute.xlu1 %3302 }
0x33c0   :  { %v6876_v10 = vadd.f32 %v3303_v18, %v3287_v31 }
0x33c2   :  { %5515 = vtanh.f32 %v6876_v10 }
0x33c8   :  { %v5516_v40 = vpop.eup %5515 }
0x33c9   :  { %3314 = vrot.lane.b32.xlu0 %v5516_v40, %s5802_s0 }
0x33d6   :  { %v3301_v16 = vpop.permute.xlu0 %3300 }
0x33d7   :  { %v6881_v14 = vadd.f32 %v3301_v16, %v3286_v23  ;;  %v3407_v23 = vrot.slane %v6876_v10, 7 }
0x33d9   :  { %5517 = vtanh.f32 %v6881_v14  ;;  %v3406_v41 = vrot.slane %v6881_v14, 7 }
0x33df   :  { %v5518_v5 = vpop.eup %5517 }
0x33e0   :  { %3312 = vrot.lane.b32.xlu2 %v5518_v5, %s5802_s0 }
0x343a   :  { %v3313_v15 = vpop.permute.xlu2 %3312 }
0x343b   :  { %v3315_v12 = vpop.permute.xlu0 %3314  ;;  %v6885_v43 = vmul.f32 %v3313_v15, %v3261_v61 }
0x343c   :  { %v6887_v26 = vmul.f32 %v3315_v12, %v3276_v59 }
0x343d   :  { %v3330_v44 = vrot.slane %v6885_v43, 4 }
0x343e   :  { %v3331_v17 = vrot.slane %v6887_v26, 3 }
0x3440   :  { %v3332_v38 = vsel %vm689_vm2, %v3331_v17, %v3330_v44 }
0x3441   :  { %3333 = vrot.lane.b32.xlu1 %v3332_v38, %s5803_s7 }
0x34b3   :  { %v3334_v46 = vpop.permute.xlu1 %3333 }
0x34b4   :  { %5116 = vmatmul.msk.f32.vlgmr.msrb.gmra.mxu3 %vm225_vm7, %v3334_v46 }
0x3537   :  { %v3354_v47 = vpop.f32.mrf.mxu3 }
0x3538   :  { %v3358_v32 = vrot.slane %v3354_v47, 3  ;;  %v3359_v51 = vrot.slane %v3354_v47, 4 }
0x353a   :  { %v3362_v52 = vadd.f32 %v3358_v32, %v6765_v45  ;;  %v3363_v36 = vadd.f32 %v3359_v51, %v6770_v49 }
0x353c   :  { %5519 = vtanh.f32 %v3362_v52  ;;  %v5117_v0 = vmul.f32 -1.442695, %v3362_v52  ;;  %v5118_v58 = vmul.f32 -1.442695, %v3363_v36 }
0x353d   :  { %5521 = vtanh.f32 %v3363_v36 }
0x353e   :  { %5523 = vpow2.f32 %v5117_v0 }
0x3542   :  { %v5520_v50 = vpop.eup %5519 }
0x3543   :  { %v5522_v63 = vpop.eup %5521  ;;  %3414 = vrot.lane.b32.xlu2 %v5520_v50, %s5802_s0 }
0x3544   :  { %3416 = vrot.lane.b32.xlu0 %v5522_v63, %s5802_s0  ;;  %v5524_v3 = vpop.eup %5523 }
0x3545   :  { %v3370_v8 = vadd.f32 1.0, %v5524_v3 }
0x3547   :  { %5525 = vrcp.f32 %v3370_v8  ;;  %v3383_v21 = vand.u32 2147483648, %v3370_v8  ;;  %vm3377_vm11 = vweird.f32 %v3370_v8  ;;  %v3381_v59 = vand.u32 2147483647, %v3370_v8 }
0x3548   :  { %5527 = vpow2.f32 %v5118_v58 }
0x3549   :  { %v3384_v35 = vor.u32 1.1754944e-38, %v3383_v21  ;;  %vm3382_vm8 = vcmp.eq.f32.partialorder %v3381_v59, 8.507059e+37 }
0x354d   :  { %v5526_v2 = vpop.eup %5525 }
0x354e   :  { %v3373_v7 = vmul.f32 %v5526_v2, %v3370_v8  ;;  %v5528_v30 = vpop.eup %5527  ;;  %vm3378_vm13 = vweird.f32 %v5526_v2 }
0x354f   :  { %v3371_v19 = vadd.f32 1.0, %v5528_v30  ;;  %vm3379_vm12 = vmor %vm3377_vm11, %vm3378_vm13 }
0x3550   :  { %v3374_v29 = vsub.f32 1.0, %v3373_v7 }
0x3551   :  { %5529 = vrcp.f32 %v3371_v19  ;;  %v3398_v22 = vand.u32 2147483648, %v3371_v19  ;;  %vm3392_vm5 = vweird.f32 %v3371_v19  ;;  %v3396_v61 = vand.u32 2147483647, %v3371_v19 }
0x3552   :  { %v3375_v1 = vmul.f32 %v5526_v2, %v3374_v29 }
0x3553   :  { %v3399_v55 = vor.u32 1.1754944e-38, %v3398_v22  ;;  %vm3397_vm10 = vcmp.eq.f32.partialorder %v3396_v61, 8.507059e+37 }
0x3554   :  { %v3376_v60 = vadd.f32 %v5526_v2, %v3375_v1 }
0x3556   :  { %v3380_v48 = vsel %vm3379_vm12, %v5526_v2, %v3376_v60 }
0x3557   :  { %v3385_v37 = vsel %vm3382_vm8, %v3384_v35, %v3380_v48  ;;  %v5530_v28 = vpop.eup %5529 }
0x3558   :  { %v3388_v56 = vmul.f32 %v5530_v28, %v3371_v19  ;;  %vm3393_vm4 = vweird.f32 %v5530_v28  ;;  %v3410_v16 = vmul.f32 %v3406_v41, %v3385_v37 }
0x3559   :  { %vm3394_vm6 = vmor %vm3392_vm5, %vm3393_vm4 }
0x355a   :  { %v3389_v57 = vsub.f32 1.0, %v3388_v56 }
0x355c   :  { %v3390_v62 = vmul.f32 %v5530_v28, %v3389_v57 }
0x355e   :  { %v3391_v11 = vadd.f32 %v5530_v28, %v3390_v62 }
0x3560   :  { %v3395_v9 = vsel %vm3394_vm6, %v5530_v28, %v3391_v11 }
0x3561   :  { %v3400_v18 = vsel %vm3397_vm10, %v3399_v55, %v3395_v9 }
0x3562   :  { %v3411_v5 = vmul.f32 %v3407_v23, %v3400_v18 }
0x359d   :  { %v3415_v53 = vpop.permute.xlu2 %3414 }
0x359e   :  { %v3420_v4 = vmul.f32 %v3415_v53, %v3385_v37 }
0x35a0   :  { %3424 = vrot.lane.b32.xlu1 %v3420_v4, %s5802_s0 }
0x35b6   :  { %v3417_v31 = vpop.permute.xlu0 %3416 }
0x35b7   :  { %v3421_v40 = vmul.f32 %v3417_v31, %v3400_v18 }
0x35b9   :  { %3426 = vrot.lane.b32.xlu2 %v3421_v40, %s5802_s0 }
0x3612   :  { %v3425_v15 = vpop.permute.xlu1 %3424 }
0x3613   :  { %v3427_v12 = vpop.permute.xlu2 %3426  ;;  %v6902_v44 = vadd.f32 %v3425_v15, %v3410_v16 }
0x3614   :  { %v6904_v17 = vadd.f32 %v3427_v12, %v3411_v5 }
0x3615   :  { %5531 = vtanh.f32 %v6902_v44 }
0x3616   :  { %5533 = vtanh.f32 %v6904_v17 }
0x361b   :  { %v5532_v38 = vpop.eup %5531 }
0x361c   :  { %v5534_v46 = vpop.eup %5533  ;;  %3436 = vrot.lane.b32.xlu0 %v5532_v38, %s5802_s0  ;;  %v3530_v38 = vrot.slane %v6902_v44, 7 }
0x361d   :  { %3438 = vrot.lane.b32.xlu1 %v5534_v46, %s5802_s0 }
0x368e   :  { %v3437_v14 = vpop.permute.xlu0 %3436 }
0x368f   :  { %v3439_v10 = vpop.permute.xlu1 %3438  ;;  %v6910_v47 = vmul.f32 %v3437_v14, %v3385_v37 }
0x3690   :  { %v6912_v32 = vmul.f32 %v3439_v10, %v3400_v18 }
0x3691   :  { %v3454_v51 = vrot.slane %v6910_v47, 5 }
0x3692   :  { %v3455_v52 = vrot.slane %v6912_v32, 4 }
0x3694   :  { %v3456_v36 = vsel %vm689_vm2, %v3455_v52, %v3454_v51  ;;  %v3531_v52 = vrot.slane %v6904_v17, 7 }
0x3695   :  { %3457 = vrot.lane.b32.xlu2 %v3456_v36, %s5803_s7 }
0x36ef   :  { %v3458_v50 = vpop.permute.xlu2 %3457 }
0x36f0   :  { %5119 = vmatmul.msk.f32.vlgmr.msrb.gmra.mxu0 %vm225_vm7, %v3458_v50 }
0x376d   :  { %v3478_v63 = vpop.f32.mrf.mxu0 }
0x376e   :  { %v3482_v0 = vrot.slane %v3478_v63, 2  ;;  %v3483_v3 = vrot.slane %v3478_v63, 3 }
0x3770   :  { %v3486_v8 = vadd.f32 %v3482_v0, %v6765_v45  ;;  %v3487_v2 = vadd.f32 %v3483_v3, %v6770_v49 }
0x3772   :  { %5535 = vtanh.f32 %v3486_v8  ;;  %v5120_v29 = vmul.f32 -1.442695, %v3486_v8  ;;  %v5121_v1 = vmul.f32 -1.442695, %v3487_v2 }
0x3773   :  { %5537 = vtanh.f32 %v3487_v2 }
0x3774   :  { %5539 = vpow2.f32 %v5120_v29 }
0x3775   :  { %5541 = vpow2.f32 %v5121_v1 }
0x3778   :  { %v5536_v58 = vpop.eup %5535 }
0x3779   :  { %v5538_v7 = vpop.eup %5537  ;;  %3538 = vrot.lane.b32.xlu0 %v5536_v58, %s5802_s0 }
0x377a   :  { %3540 = vrot.lane.b32.xlu1 %v5538_v7, %s5802_s0  ;;  %v5540_v30 = vpop.eup %5539 }
0x377b   :  { %v5542_v19 = vpop.eup %5541  ;;  %v3494_v60 = vadd.f32 1.0, %v5540_v30 }
0x377c   :  { %v3495_v21 = vadd.f32 1.0, %v5542_v19 }
0x377d   :  { %5543 = vrcp.f32 %v3494_v60  ;;  %v3507_v11 = vand.u32 2147483648, %v3494_v60  ;;  %vm3501_vm12 = vweird.f32 %v3494_v60  ;;  %v3505_v61 = vand.u32 2147483647, %v3494_v60 }
0x377e   :  { %5545 = vrcp.f32 %v3495_v21  ;;  %v3522_v22 = vand.u32 2147483648, %v3495_v21  ;;  %vm3516_vm8 = vweird.f32 %v3495_v21  ;;  %v3520_v9 = vand.u32 2147483647, %v3495_v21 }
0x377f   :  { %v3508_v18 = vor.u32 1.1754944e-38, %v3507_v11  ;;  %vm3506_vm6 = vcmp.eq.f32.partialorder %v3505_v61, 8.507059e+37 }
0x3780   :  { %v3523_v40 = vor.u32 1.1754944e-38, %v3522_v22  ;;  %vm3521_vm10 = vcmp.eq.f32.partialorder %v3520_v9, 8.507059e+37 }
0x3783   :  { %v5544_v59 = vpop.eup %5543 }
0x3784   :  { %v5546_v48 = vpop.eup %5545  ;;  %v3497_v35 = vmul.f32 %v5544_v59, %v3494_v60  ;;  %vm3502_vm13 = vweird.f32 %v5544_v59 }
0x3785   :  { %v3512_v53 = vmul.f32 %v5546_v48, %v3495_v21  ;;  %vm3517_vm11 = vweird.f32 %v5546_v48  ;;  %vm3503_vm4 = vmor %vm3501_vm12, %vm3502_vm13 }
0x3786   :  { %v3498_v37 = vsub.f32 1.0, %v3497_v35  ;;  %vm3518_vm5 = vmor %vm3516_vm8, %vm3517_vm11 }
0x3787   :  { %v3513_v4 = vsub.f32 1.0, %v3512_v53 }
0x3788   :  { %v3499_v28 = vmul.f32 %v5544_v59, %v3498_v37 }
0x3789   :  { %v3514_v56 = vmul.f32 %v5546_v48, %v3513_v4 }
0x378a   :  { %v3500_v57 = vadd.f32 %v5544_v59, %v3499_v28 }
0x378b   :  { %v3515_v62 = vadd.f32 %v5546_v48, %v3514_v56 }
0x378c   :  { %v3504_v55 = vsel %vm3503_vm4, %v5544_v59, %v3500_v57 }
0x378d   :  { %v3519_v31 = vsel %vm3518_vm5, %v5546_v48, %v3515_v62  ;;  %v3509_v23 = vsel %vm3506_vm6, %v3508_v18, %v3504_v55 }
0x378e   :  { %v3524_v5 = vsel %vm3521_vm10, %v3523_v40, %v3519_v31  ;;  %v3534_v46 = vmul.f32 %v3530_v38, %v3509_v23 }
0x378f   :  { %v3535_v36 = vmul.f32 %v3531_v52, %v3524_v5 }
0x37eb   :  { %v3539_v41 = vpop.permute.xlu0 %3538 }
0x37ec   :  { %v3541_v16 = vpop.permute.xlu1 %3540  ;;  %v3544_v15 = vmul.f32 %v3539_v41, %v3509_v23 }
0x37ed   :  { %v3545_v12 = vmul.f32 %v3541_v16, %v3524_v5 }
0x37ee   :  { %3548 = vrot.lane.b32.xlu2 %v3544_v15, %s5802_s0 }
0x37ef   :  { %3550 = vrot.lane.b32.xlu0 %v3545_v12, %s5802_s0 }
0x3848   :  { %v3549_v14 = vpop.permute.xlu2 %3548 }
0x3849   :  { %v6926_v10 = vadd.f32 %v3549_v14, %v3534_v46 }
0x384b   :  { %5547 = vtanh.f32 %v6926_v10 }
0x3851   :  { %v5548_v51 = vpop.eup %5547 }
0x3852   :  { %3560 = vrot.lane.b32.xlu1 %v5548_v51, %s5802_s0 }
0x3861   :  { %v3551_v50 = vpop.permute.xlu0 %3550 }
0x3862   :  { %v6931_v63 = vadd.f32 %v3551_v50, %v3535_v36 }
0x3864   :  { %5549 = vtanh.f32 %v6931_v63 }
0x386a   :  { %v5550_v0 = vpop.eup %5549 }
0x386b   :  { %3562 = vrot.lane.b32.xlu2 %v5550_v0, %s5802_s0 }
0x38c4   :  { %v3561_v44 = vpop.permute.xlu1 %3560 }
0x38c5   :  { %v3563_v3 = vpop.permute.xlu2 %3562  ;;  %v6935_v8 = vmul.f32 %v3561_v44, %v3509_v23 }
0x38c6   :  { %v6937_v2 = vmul.f32 %v3563_v3, %v3524_v5 }
0x38c7   :  { %v3578_v58 = vrot.slane %v6935_v8, 6 }
0x38c8   :  { %v3579_v7 = vrot.slane %v6937_v2, 5 }
0x38ca   :  { %v3580_v17 = vsel %vm689_vm2, %v3579_v7, %v3578_v58 }
0x38cb   :  { %3581 = vrot.lane.b32.xlu0 %v3580_v17, %s5803_s7 }
0x393d   :  { %v3582_v29 = vpop.permute.xlu0 %3581 }
0x393e   :  { %5122 = vmatmul.msk.f32.vlgmr.msra.gmra.mxu1 %vm225_vm7, %v3582_v29 }
0x39bb   :  { %v3602_v1 = vpop.f32.mrf.mxu1 }
0x39bc   :  { %v3606_v30 = vrot.slane %v3602_v1, 1  ;;  %v3607_v19 = vrot.slane %v3602_v1, 2 }
0x39be   :  { %v3610_v60 = vadd.f32 %v3606_v30, %v6765_v45  ;;  %v3611_v21 = vadd.f32 %v3607_v19, %v6770_v49 }
0x39c0   :  { %5551 = vtanh.f32 %v3610_v60  ;;  %v5123_v35 = vmul.f32 -1.442695, %v3610_v60  ;;  %v5124_v28 = vmul.f32 -1.442695, %v3611_v21 }
0x39c1   :  { %5553 = vtanh.f32 %v3611_v21 }
0x39c2   :  { %5555 = vpow2.f32 %v5123_v35  ;;  %v3732_v35 = vld [vmem:[#allocation5 + $0x50] sm:$0xff] }
0x39c6   :  { %v5552_v59 = vpop.eup %5551 }
0x39c7   :  { %v5554_v48 = vpop.eup %5553  ;;  %3662 = vrot.lane.b32.xlu2 %v5552_v59, %s5802_s0 }
0x39c8   :  { %3664 = vrot.lane.b32.xlu1 %v5554_v48, %s5802_s0  ;;  %v5556_v53 = vpop.eup %5555  ;;  %v3733_v48 = vld [vmem:[#allocation5 + $0x58] sm:$0xff] }
0x39c9   :  { %v3618_v37 = vadd.f32 1.0, %v5556_v53  ;;  %3757 = vmatpush.msra.mxu3 %v3733_v48  ;;  %v3731_v53 = vld [vmem:[#allocation5 + $0x48] sm:$0xff] }
0x39cb   :  { %5557 = vrcp.f32 %v3618_v37  ;;  %v3631_v22 = vand.u32 2147483648, %v3618_v37  ;;  %vm3625_vm11 = vweird.f32 %v3618_v37  ;;  %v3629_v61 = vand.u32 2147483647, %v3618_v37  ;;  %3758 = vmatpush.msra.mxu3 %v3732_v35 }
0x39cc   :  { %5559 = vpow2.f32 %v5124_v28  ;;  %v5715_v28 = vld [vmem:[%s7297_s2] sm:$0xff] }
0x39cd   :  { %v3632_v55 = vor.u32 1.1754944e-38, %v3631_v22  ;;  %vm3630_vm8 = vcmp.eq.f32.partialorder %v3629_v61, 8.507059e+37  ;;  %3759 = vmatpush.msra.mxu3 %v3731_v53  ;;  %v3797_v22 = vld [vmem:[#allocation7 + $0x78] sm:$0xff]  ;;  %v3796_v61 = vld [vmem:[#allocation7 + $0x70] sm:$0xff] }
0x39ce   :  { %3810 = vmatpush.msrb.mxu1 %v3797_v22 }
0x39d0   :  { %3811 = vmatpush.msrb.mxu1 %v3796_v61 }
0x39d1   :  { %v5558_v4 = vpop.eup %5557 }
0x39d2   :  { %v3621_v56 = vmul.f32 %v5558_v4, %v3618_v37  ;;  %v5560_v49 = vpop.eup %5559  ;;  %vm3626_vm13 = vweird.f32 %v5558_v4 }
0x39d3   :  { %v3619_v62 = vadd.f32 1.0, %v5560_v49  ;;  %vm3627_vm12 = vmor %vm3625_vm11, %vm3626_vm13  ;;  %vm7330_vm13 = vcmask 256002   ;;  %vm7331_vm11 = vcmask 259077  }
0x39d4   :  { %v3622_v45 = vsub.f32 1.0, %v3621_v56  ;;  %v5716_v56 = vld [vmem:[%s7297_s2 + $0x8] sm:$0xff] }
0x39d5   :  { %5561 = vrcp.f32 %v3619_v62  ;;  %v3646_v12 = vand.u32 2147483648, %v3619_v62  ;;  %vm3640_vm5 = vweird.f32 %v3619_v62  ;;  %v3644_v38 = vand.u32 2147483647, %v3619_v62 }
0x39d6   :  { %v3623_v57 = vmul.f32 %v5558_v4, %v3622_v45  ;;  %v3730_v45 = vld [vmem:[#allocation5 + $0x40] sm:$0xff] }
0x39d7   :  { %v3647_v14 = vor.u32 1.1754944e-38, %v3646_v12  ;;  %vm3645_vm10 = vcmp.eq.f32.partialorder %v3644_v38, 8.507059e+37  ;;  %3760 = vmatpush.msra.mxu3 %v3730_v45 }
0x39d8   :  { %v3624_v11 = vadd.f32 %v5558_v4, %v3623_v57 }
0x39d9   :  { %4172 = vmatpush.msrb.mxu3 %v3797_v22 }
0x39da   :  { %v3628_v9 = vsel %vm3627_vm12, %v5558_v4, %v3624_v11  ;;  %vm7332_vm12 = vmmov %vm7330_vm13 }
0x39db   :  { %v3633_v18 = vsel %vm3630_vm8, %v3632_v55, %v3628_v9  ;;  %v5562_v41 = vpop.eup %5561  ;;  %vm7333_vm8 = vcmask 261127   ;;  %v3795_v9 = vld [vmem:[#allocation7 + $0x68] sm:$0xff]  ;;  %4173 = vmatpush.msrb.mxu3 %v3796_v61  ;;  %v3794_v55 = vld [vmem:[#allocation7 + $0x60] sm:$0xff] }
0x39dc   :  { %v3636_v23 = vmul.f32 %v5562_v41, %v3619_v62  ;;  %vm3641_vm4 = vweird.f32 %v5562_v41  ;;  %3812 = vmatpush.msrb.mxu1 %v3795_v9 }
0x39dd   :  { %vm3642_vm6 = vmor %vm3640_vm5, %vm3641_vm4  ;;  %4174 = vmatpush.msrb.mxu3 %v3795_v9 }
0x39de   :  { %v3637_v16 = vsub.f32 1.0, %v3636_v23  ;;  %vm7334_vm4 = vmmov %vm7331_vm11  ;;  %3813 = vmatpush.msrb.mxu1 %v3794_v55 }
0x39df   :  { %vm7335_vm5 = vmmov %vm7333_vm8  ;;  %3814 = vmatmul.f32.vlgmr.msrb.gmra.mxu1 %v5801_v54  ;;  %4175 = vmatpush.msrb.mxu3 %v3794_v55  ;;  %v5178_v54 = vld [vmem:[%s7304_s9 + $0x3] ss:$0 sm:$0xff] }
0x39e0   :  { %v3638_v5 = vmul.f32 %v5562_v41, %v3637_v16  ;;  %3926 = vmatpush.msra.mxu1 %v3797_v22 }
0x39e2   :  { %v3639_v15 = vadd.f32 %v5562_v41, %v3638_v5  ;;  %3927 = vmatpush.msra.mxu1 %v3796_v61 }
0x39e4   :  { %v3643_v46 = vsel %vm3642_vm6, %v5562_v41, %v3639_v15  ;;  %vm7336_vm6 = vcmask 130048   ;;  %3928 = vmatpush.msra.mxu1 %v3795_v9 }
0x39e5   :  { %v3648_v52 = vsel %vm3645_vm10, %v3647_v14, %v3643_v46  ;;  %vm7337_vm10 = vmmov %vm7336_vm6 }
0x39e6   :  { %3929 = vmatpush.msra.mxu1 %v3794_v55 }
0x39e8   :  { %4420 = vmatpush.msrb.mxu1 %v3797_v22 }
0x39ea   :  { %4421 = vmatpush.msrb.mxu1 %v3796_v61 }
0x39ec   :  { %4422 = vmatpush.msrb.mxu1 %v3795_v9 }
0x39ee   :  { %4423 = vmatpush.msrb.mxu1 %v3794_v55 }
0x3a21   :  { %v3663_v31 = vpop.permute.xlu2 %3662 }
0x3a22   :  { %v3668_v40 = vmul.f32 %v3663_v31, %v3633_v18 }
0x3a24   :  { %3672 = vrot.lane.b32.xlu1 %v3668_v40, %s5802_s0 }
0x3a2c   :  { %2831 = vrot.lane.b32.xlu1 %v6785_v42, %s5803_s7  ;;  %v3654_v42 = vrot.slane %v6926_v10, 7 }
0x3a34   :  { %3200 = vrot.lane.b32.xlu1 %v6862_v13, %s5803_s7  ;;  %v3658_v13 = vmul.f32 %v3654_v42, %v3633_v18 }
0x3a3a   :  { %v3665_v51 = vpop.permute.xlu1 %3664 }
0x3a3b   :  { %v3669_v36 = vmul.f32 %v3665_v51, %v3648_v52 }
0x3a3c   :  { %3572 = vrot.lane.b32.xlu1 %v6937_v2, %s5803_s7 }
0x3a3d   :  { %3674 = vrot.lane.b32.xlu0 %v3669_v36, %s5802_s0 }
0x3a44   :  { %2951 = vrot.lane.b32.xlu1 %v6810_v6, %s5803_s7  ;;  %v3655_v6 = vrot.slane %v6931_v63, 7 }
0x3a4c   :  { %3322 = vrot.lane.b32.xlu1 %v6885_v43, %s5803_s7  ;;  %v3659_v43 = vmul.f32 %v3655_v6, %v3648_v52 }
0x3a5c   :  { %v3815_v23 = vpop.f32.mrf.mxu1 }
0x3a5d   :  { %v3819_v12 = vrot.slane %v3815_v23, 1 }
0x3a96   :  { %v3673_v50 = vpop.permute.xlu1 %3672 }
0x3a97   :  { %v3678_v0 = vadd.f32 %v3673_v50, %v3658_v13 }
0x3a99   :  { %5563 = vtanh.f32 %v3678_v0 }
0x3a9e   :  { %v2832_v44 = vpop.permute.xlu1 %2831 }
0x3a9f   :  { %v5564_v3 = vpop.eup %5563  ;;  %2836 = vst.msk [vmem:[#allocation2 + $0x8] sm:$0x1] %vm685_vm14, %v2832_v44 }
0x3aa0   :  { %3684 = vrot.lane.b32.xlu0 %v5564_v3, %s5802_s0 }
0x3aa6   :  { %v3201_v2 = vpop.permute.xlu1 %3200 }
0x3aa7   :  { %3205 = vst.msk [vmem:[#allocation2 + $0x8] sm:$0x8] %vm1058_vm15, %v3201_v2 }
0x3aa8   :  { %3076 = vrot.lane.b32.xlu0 %v6837_v20, %s5803_s7 }
0x3aae   :  { %v3573_v10 = vpop.permute.xlu1 %3572 }
0x3aaf   :  { %v3675_v58 = vpop.permute.xlu0 %3674  ;;  %3577 = vst.msk [vmem:[#allocation2 + $0x8] sm:$0x40] %vm1433_vm0, %v3573_v10 }
0x3ab0   :  { %v3679_v7 = vadd.f32 %v3675_v58, %v3659_v43  ;;  %3448 = vrot.lane.b32.xlu0 %v6912_v32, %s5803_s7 }
0x3ab2   :  { %5565 = vtanh.f32 %v3679_v7 }
0x3ab6   :  { %v2952_v17 = vpop.permute.xlu1 %2951 }
0x3ab7   :  { %2957 = vst.msk [vmem:[#allocation2] sm:$0x2] %vm809_vm1, %v2952_v17 }
0x3ab8   :  { %v5566_v29 = vpop.eup %5565  ;;  %2829 = vrot.lane.b32.xlu0 %v6787_v33, %s5803_s7 }
0x3ab9   :  { %3686 = vrot.lane.b32.xlu2 %v5566_v29, %s5802_s0 }
0x3abe   :  { %v3323_v20 = vpop.permute.xlu1 %3322 }
0x3abf   :  { %3328 = vst.msk [vmem:[#allocation2] sm:$0x10] %vm1183_vm3, %v3323_v20 }
0x3ac0   :  { %3198 = vrot.lane.b32.xlu0 %v6860_v24, %s5803_s7 }
0x3ac1   :  { %2953 = vrot.lane.b32.xlu2 %v6812_v27, %s5803_s7 }
0x3ac8   :  { %3570 = vrot.lane.b32.xlu0 %v6935_v8, %s5803_s7 }
0x3ac9   :  { %3324 = vrot.lane.b32.xlu2 %v6887_v26, %s5803_s7 }
0x3ad1   :  { %3074 = vrot.lane.b32.xlu2 %v6835_v25, %s5803_s7 }
0x3b12   :  { %v3685_v33 = vpop.permute.xlu0 %3684 }
0x3b13   :  { %v3687_v32 = vpop.permute.xlu2 %3686  ;;  %v3690_v63 = vmul.f32 %v3685_v33, %v3633_v18 }
0x3b14   :  { %v3691_v1 = vmul.f32 %v3687_v32, %v3648_v52 }
0x3b15   :  { %3694 = vrot.lane.b32.xlu1 %v3690_v63, %s5803_s7 }
0x3b16   :  { %3696 = vrot.lane.b32.xlu2 %v3691_v1, %s5803_s7 }
0x3b1a   :  { %v3077_v24 = vpop.permute.xlu0 %3076 }
0x3b1b   :  { %v2954_v30 = vpop.permute.xlu2 %2953  ;;  %3081 = vst.msk [vmem:[#allocation2 + $0x8] sm:$0x4] %vm7330_vm13, %v3077_v24  ;;  %vm7338_vm13 = vcmp.lt.s32.totalorder %v5999_v39, 16 }
0x3b1c   :  { %2958 = vst.msk [vmem:[#allocation2 + $0x8] sm:$0x2] %vm809_vm1, %v2954_v30 }
0x3b1e   :  { %3446 = vrot.lane.b32.xlu2 %v6910_v47, %s5803_s7 }
0x3b22   :  { %v3449_v27 = vpop.permute.xlu0 %3448 }
0x3b23   :  { %v3325_v26 = vpop.permute.xlu2 %3324  ;;  %3453 = vst.msk [vmem:[#allocation2 + $0x8] sm:$0x20] %vm7331_vm11, %v3449_v27  ;;  %vm7339_vm11 = vmmov %vm7338_vm13 }
0x3b24   :  { %3329 = vst.msk [vmem:[#allocation2 + $0x8] sm:$0x10] %vm1183_vm3, %v3325_v26 }
0x3b2a   :  { %v2830_v25 = vpop.permute.xlu0 %2829 }
0x3b2b   :  { %v3075_v8 = vpop.permute.xlu2 %3074  ;;  %2835 = vst.msk [vmem:[#allocation2] sm:$0x1] %vm685_vm14, %v2830_v25 }
0x3b2c   :  { %3080 = vst.msk [vmem:[#allocation2] sm:$0x4] %vm7332_vm12, %v3075_v8  ;;  %vm7340_vm12 = vmmov %vm7336_vm6 }
0x3b32   :  { %v3199_v19 = vpop.permute.xlu0 %3198 }
0x3b33   :  { %3204 = vst.msk [vmem:[#allocation2] sm:$0x8] %vm1058_vm15, %v3199_v19 }
0x3b3a   :  { %v3571_v60 = vpop.permute.xlu0 %3570 }
0x3b3b   :  { %3576 = vst.msk [vmem:[#allocation2] sm:$0x40] %vm1433_vm0, %v3571_v60 }
0x3b70   :  { %v3697_v21 = vpop.permute.xlu2 %3696 }
0x3b71   :  { %3701 = vst.msk [vmem:[#allocation2 + $0x8] sm:$0x80] %vm7333_vm8, %v3697_v21  ;;  %vm7341_vm8 = vmmov %vm7336_vm6 }
0x3b78   :  { %v3447_v47 = vpop.permute.xlu2 %3446  ;;  %v3703_v59 = vld [vmem:[#allocation2 + $0x8] sm:$0xff] }
0x3b79   :  { %3452 = vst.msk [vmem:[#allocation2] sm:$0x20] %vm7334_vm4, %v3447_v47  ;;  %3718 = vmatpush.msrb.mxu2 %v3703_v59 }
0x3b87   :  { %v3695_v37 = vpop.permute.xlu1 %3694 }
0x3b88   :  { %3700 = vst.msk [vmem:[#allocation2] sm:$0x80] %vm7335_vm5, %v3695_v37 }
0x3b8f   :  { %v3702_v4 = vld [vmem:[#allocation2] sm:$0xff] }
0x3b90   :  { %3719 = vmatpush.msrb.mxu2 %v3702_v4 }
0x3b91   :  { %5125 = vmatmul.msk.f32.vlgmr.msrb.gmra.mxu2 %vm7336_vm6, %v5715_v28 }
0x3b92   :  { %4048 = vmatpush.msra.mxu2 %v3797_v22 }
0x3b94   :  { %4049 = vmatpush.msra.mxu2 %v3796_v61 }
0x3b96   :  { %4050 = vmatpush.msra.mxu2 %v3795_v9 }
0x3b98   :  { %4051 = vmatpush.msra.mxu2 %v3794_v55 }
0x3b99   :  { %5126 = vmatmul.msk.f32.gmra.mxu2 %vm7337_vm10, %v5716_v56 }
0x3b9a   :  { %4544 = vmatpush.msrb.mxu2 %v3797_v22 }
0x3b9c   :  { %4545 = vmatpush.msrb.mxu2 %v3796_v61 }
0x3b9e   :  { %4546 = vmatpush.msrb.mxu2 %v3795_v9 }
0x3ba0   :  { %4547 = vmatpush.msrb.mxu2 %v3794_v55 }
0x3c14   :  { %v3721_v57 = vpop.f32.mrf.mxu2 }
0x3c15   :  { %v3727_v49 = vsel %vm7338_vm13, %v3702_v4, %v3721_v57 }
0x3c16   :  { %5128 = vmatmul.msk.f32.vlgmr.msra.gmra.mxu3 %vm225_vm7, %v3727_v49 }
0x3c17   :  { %4668 = vmatpush.msra.mxu3 %v3797_v22 }
0x3c19   :  { %4669 = vmatpush.msra.mxu3 %v3796_v61 }
0x3c1b   :  { %4670 = vmatpush.msra.mxu3 %v3795_v9 }
0x3c1c   :  { %v3724_v62 = vpop.f32.mrf.mxu2 }
0x3c1d   :  { %v3728_v11 = vsel %vm7339_vm11, %v3703_v59, %v3724_v62  ;;  %4671 = vmatpush.msra.mxu3 %v3794_v55 }
0x3c1e   :  { %5129 = vmatmul.msk.f32.gmra.mxu3 %vm225_vm7, %v3728_v11 }
0x3c99   :  { %v3762_v31 = vpop.f32.mrf.mxu3 }
0x3c9a   :  { %v3763_v41 = vadd.f32 %v5178_v54, %v3762_v31 }
0x3ca1   :  { %v3765_v18 = vpop.f32.mrf.mxu3 }
0x3ca2   :  { %v3766_v40 = vadd.f32 %v5178_v54, %v3765_v18 }
0x3ca4   :  { %3782 = vmatpush.msra.mxu0 %v3766_v40 }
0x3ca6   :  { %3783 = vmatpush.msra.mxu0 %v3763_v41 }
0x3ca7   :  { %5130 = vmatmul.msk.f32.vlgmr.msra.gmra.mxu0 %vm7340_vm12, %v5715_v28 }
0x3ca8   :  { %4296 = vmatpush.msrb.mxu0 %v3797_v22 }
0x3caa   :  { %4297 = vmatpush.msrb.mxu0 %v3796_v61 }
0x3cac   :  { %4298 = vmatpush.msrb.mxu0 %v3795_v9 }
0x3cae   :  { %4299 = vmatpush.msrb.mxu0 %v3794_v55 }
0x3caf   :  { %5131 = vmatmul.msk.f32.gmra.mxu0 %vm7341_vm8, %v5716_v56 }
0x3d24   :  { %v3785_v16 = vpop.f32.mrf.mxu0 }
0x3d25   :  { %v7022_v5 = vsel %vm6240_vm9, %v3763_v41, %v3785_v16 }
0x3d26   :  { %v3822_v15 = vadd.f32 %v3815_v23, %v7022_v5 }
0x3d28   :  { %5567 = vtanh.f32 %v3822_v15  ;;  %v5132_v50 = vmul.f32 -1.442695, %v3822_v15 }
0x3d2c   :  { %v3788_v38 = vpop.f32.mrf.mxu0 }
0x3d2d   :  { %v7027_v46 = vsel %vm6240_vm9, %v3766_v40, %v3788_v38 }
0x3d2e   :  { %v5568_v14 = vpop.eup %5567  ;;  %v3823_v51 = vadd.f32 %v3819_v12, %v7027_v46 }
0x3d2f   :  { %3868 = vrot.lane.b32.xlu0 %v5568_v14, %s5802_s0 }
0x3d30   :  { %5569 = vtanh.f32 %v3823_v51  ;;  %v5133_v36 = vmul.f32 -1.442695, %v3823_v51 }
0x3d32   :  { %5571 = vpow2.f32 %v5133_v36 }
0x3d36   :  { %v5570_v52 = vpop.eup %5569 }
0x3d37   :  { %3870 = vrot.lane.b32.xlu2 %v5570_v52, %s5802_s0 }
0x3d38   :  { %v5572_v42 = vpop.eup %5571 }
0x3d39   :  { %v3831_v13 = vadd.f32 1.0, %v5572_v42 }
0x3d3b   :  { %5573 = vrcp.f32 %v3831_v13  ;;  %v3858_v58 = vand.u32 2147483648, %v3831_v13  ;;  %vm3852_vm4 = vweird.f32 %v3831_v13  ;;  %v3856_v7 = vand.u32 2147483647, %v3831_v13 }
0x3d3c   :  { %5575 = vpow2.f32 %v5132_v50 }
0x3d3d   :  { %v3859_v20 = vor.u32 1.1754944e-38, %v3858_v58  ;;  %vm3857_vm6 = vcmp.eq.f32.partialorder %v3856_v7, 8.507059e+37 }
0x3d41   :  { %v5574_v0 = vpop.eup %5573 }
0x3d42   :  { %v5576_v34 = vpop.eup %5575  ;;  %v3848_v44 = vmul.f32 %v5574_v0, %v3831_v13  ;;  %vm3853_vm9 = vweird.f32 %v5574_v0 }
0x3d43   :  { %v3830_v3 = vadd.f32 1.0, %v5576_v34  ;;  %vm3854_vm5 = vmor %vm3852_vm4, %vm3853_vm9 }
0x3d44   :  { %v3849_v2 = vsub.f32 1.0, %v3848_v44 }
0x3d45   :  { %5577 = vrcp.f32 %v3830_v3  ;;  %v3843_v27 = vand.u32 2147483648, %v3830_v3  ;;  %vm3837_vm13 = vweird.f32 %v3830_v3  ;;  %v3841_v26 = vand.u32 2147483647, %v3830_v3 }
0x3d46   :  { %v3850_v6 = vmul.f32 %v5574_v0, %v3849_v2 }
0x3d47   :  { %v3844_v8 = vor.u32 1.1754944e-38, %v3843_v27  ;;  %vm3842_vm12 = vcmp.eq.f32.partialorder %v3841_v26, 8.507059e+37 }
0x3d48   :  { %v3851_v43 = vadd.f32 %v5574_v0, %v3850_v6 }
0x3d4a   :  { %v3855_v17 = vsel %vm3854_vm5, %v5574_v0, %v3851_v43 }
0x3d4b   :  { %v5578_v10 = vpop.eup %5577  ;;  %v3860_v32 = vsel %vm3857_vm6, %v3859_v20, %v3855_v17 }
0x3d4c   :  { %v3833_v29 = vmul.f32 %v5578_v10, %v3830_v3  ;;  %vm3838_vm10 = vweird.f32 %v5578_v10  ;;  %v3865_v35 = vmul.f32 0.0, %v3860_v32 }
0x3d4d   :  { %vm3839_vm11 = vmor %vm3837_vm13, %vm3838_vm10 }
0x3d4e   :  { %v3834_v1 = vsub.f32 1.0, %v3833_v29 }
0x3d50   :  { %v3835_v24 = vmul.f32 %v5578_v10, %v3834_v1 }
0x3d52   :  { %v3836_v30 = vadd.f32 %v5578_v10, %v3835_v24 }
0x3d54   :  { %v3840_v25 = vsel %vm3839_vm11, %v5578_v10, %v3836_v30 }
0x3d55   :  { %v3845_v60 = vsel %vm3842_vm12, %v3844_v8, %v3840_v25 }
0x3d56   :  { %v3864_v47 = vmul.f32 0.0, %v3845_v60 }
0x3d91   :  { %v3871_v33 = vpop.permute.xlu2 %3870 }
0x3d92   :  { %v3875_v63 = vmul.f32 %v3871_v33, %v3860_v32 }
0x3d94   :  { %3880 = vrot.lane.b32.xlu1 %v3875_v63, %s5802_s0 }
0x3da1   :  { %v3869_v19 = vpop.permute.xlu0 %3868 }
0x3da2   :  { %v3874_v21 = vmul.f32 %v3869_v19, %v3845_v60 }
0x3da4   :  { %3878 = vrot.lane.b32.xlu2 %v3874_v21, %s5802_s0 }
0x3dfe   :  { %v3879_v59 = vpop.permute.xlu2 %3878 }
0x3dff   :  { %v7034_v48 = vadd.f32 %v3879_v59, %v3864_v47 }
0x3e01   :  { %5579 = vtanh.f32 %v7034_v48  ;;  %v3982_v1 = vrot.slane %v7034_v48, 7 }
0x3e06   :  { %v3881_v53 = vpop.permute.xlu1 %3880 }
0x3e07   :  { %v5580_v37 = vpop.eup %5579  ;;  %v7037_v4 = vadd.f32 %v3881_v53, %v3865_v35 }
0x3e08   :  { %3890 = vrot.lane.b32.xlu1 %v5580_v37, %s5802_s0 }
0x3e09   :  { %5581 = vtanh.f32 %v7037_v4  ;;  %v3983_v25 = vrot.slane %v7037_v4, 7 }
0x3e0f   :  { %v5582_v28 = vpop.eup %5581 }
0x3e10   :  { %3892 = vrot.lane.b32.xlu0 %v5582_v28, %s5802_s0 }
0x3e7a   :  { %v3891_v56 = vpop.permute.xlu1 %3890 }
0x3e7b   :  { %v7044_v49 = vmul.f32 %v3891_v56, %v3845_v60 }
0x3e82   :  { %v3893_v45 = vpop.permute.xlu0 %3892 }
0x3e83   :  { %v7042_v57 = vmul.f32 %v3893_v45, %v3860_v32 }
0x3e85   :  { %v3908_v62 = vrot.slane %v7042_v57, 7 }
0x3e87   :  { %v3909_v11 = vsel %vm689_vm2, %v3908_v62, %v7044_v49 }
0x3e88   :  { %3910 = vrot.lane.b32.xlu2 %v3909_v11, %s5803_s7 }
0x3ee2   :  { %v3911_v22 = vpop.permute.xlu2 %3910 }
0x3ee3   :  { %5134 = vmatmul.msk.f32.vlgmr.msra.gmra.mxu1 %vm225_vm7, %v3911_v22 }
0x3f60   :  { %v3931_v61 = vpop.f32.mrf.mxu1 }
0x3f61   :  { %v3935_v9 = vrot.slane %v3931_v61, 7  ;;  %v3939_v55 = vadd.f32 %v3931_v61, %v7027_v46 }
0x3f63   :  { %v3938_v31 = vadd.f32 %v3935_v9, %v7022_v5  ;;  %5583 = vtanh.f32 %v3939_v55  ;;  %v5136_v40 = vmul.f32 -1.442695, %v3939_v55 }
0x3f65   :  { %5585 = vtanh.f32 %v3938_v31  ;;  %v5135_v41 = vmul.f32 -1.442695, %v3938_v31 }
0x3f66   :  { %5587 = vpow2.f32 %v5136_v40 }
0x3f67   :  { %5589 = vpow2.f32 %v5135_v41 }
0x3f69   :  { %v5584_v54 = vpop.eup %5583 }
0x3f6a   :  { %3992 = vrot.lane.b32.xlu1 %v5584_v54, %s5802_s0 }
0x3f6b   :  { %v5586_v18 = vpop.eup %5585 }
0x3f6c   :  { %3990 = vrot.lane.b32.xlu0 %v5586_v18, %s5802_s0  ;;  %v5588_v23 = vpop.eup %5587 }
0x3f6d   :  { %v5590_v16 = vpop.eup %5589  ;;  %v3947_v15 = vadd.f32 1.0, %v5588_v23 }
0x3f6e   :  { %v3946_v12 = vadd.f32 1.0, %v5590_v16 }
0x3f6f   :  { %5591 = vrcp.f32 %v3947_v15  ;;  %v3974_v34 = vand.u32 2147483648, %v3947_v15  ;;  %vm3968_vm9 = vweird.f32 %v3947_v15  ;;  %v3972_v44 = vand.u32 2147483647, %v3947_v15 }
0x3f70   :  { %5593 = vrcp.f32 %v3946_v12  ;;  %v3959_v6 = vand.u32 2147483648, %v3946_v12  ;;  %vm3953_vm6 = vweird.f32 %v3946_v12  ;;  %v3957_v10 = vand.u32 2147483647, %v3946_v12 }
0x3f71   :  { %v3975_v43 = vor.u32 1.1754944e-38, %v3974_v34  ;;  %vm3973_vm10 = vcmp.eq.f32.partialorder %v3972_v44, 8.507059e+37 }
0x3f72   :  { %v3960_v20 = vor.u32 1.1754944e-38, %v3959_v6  ;;  %vm3958_vm11 = vcmp.eq.f32.partialorder %v3957_v10, 8.507059e+37 }
0x3f75   :  { %v5592_v38 = vpop.eup %5591 }
0x3f76   :  { %v5594_v14 = vpop.eup %5593  ;;  %v3964_v51 = vmul.f32 %v5592_v38, %v3947_v15  ;;  %vm3969_vm8 = vweird.f32 %v5592_v38 }
0x3f77   :  { %v3949_v52 = vmul.f32 %v5594_v14, %v3946_v12  ;;  %vm3970_vm4 = vmor %vm3968_vm9, %vm3969_vm8  ;;  %vm3954_vm5 = vweird.f32 %v5594_v14 }
0x3f78   :  { %v3965_v36 = vsub.f32 1.0, %v3964_v51  ;;  %vm3955_vm13 = vmor %vm3953_vm6, %vm3954_vm5 }
0x3f79   :  { %v3950_v42 = vsub.f32 1.0, %v3949_v52 }
0x3f7a   :  { %v3966_v13 = vmul.f32 %v5592_v38, %v3965_v36 }
0x3f7b   :  { %v3951_v50 = vmul.f32 %v5594_v14, %v3950_v42 }
0x3f7c   :  { %v3967_v0 = vadd.f32 %v5592_v38, %v3966_v13 }
0x3f7d   :  { %v3952_v3 = vadd.f32 %v5594_v14, %v3951_v50 }
0x3f7e   :  { %v3971_v2 = vsel %vm3970_vm4, %v5592_v38, %v3967_v0 }
0x3f7f   :  { %v3976_v7 = vsel %vm3973_vm10, %v3975_v43, %v3971_v2  ;;  %v3956_v17 = vsel %vm3955_vm13, %v5594_v14, %v3952_v3 }
0x3f80   :  { %v3961_v32 = vsel %vm3958_vm11, %v3960_v20, %v3956_v17  ;;  %v3987_v8 = vmul.f32 %v3983_v25, %v3976_v7 }
0x3f81   :  { %v3986_v24 = vmul.f32 %v3982_v1, %v3961_v32 }
0x3fdc   :  { %v3993_v58 = vpop.permute.xlu1 %3992 }
0x3fdd   :  { %v3997_v29 = vmul.f32 %v3993_v58, %v3976_v7 }
0x3fde   :  { %v3991_v33 = vpop.permute.xlu0 %3990 }
0x3fdf   :  { %4002 = vrot.lane.b32.xlu0 %v3997_v29, %s5802_s0  ;;  %v3996_v63 = vmul.f32 %v3991_v33, %v3961_v32 }
0x3fe1   :  { %4000 = vrot.lane.b32.xlu2 %v3996_v63, %s5802_s0 }
0x403b   :  { %v4001_v30 = vpop.permute.xlu2 %4000 }
0x403c   :  { %v7058_v27 = vadd.f32 %v4001_v30, %v3986_v24 }
0x403e   :  { %5595 = vtanh.f32 %v7058_v27  ;;  %v4105_v1 = vrot.slane %v7058_v27, 7 }
0x4044   :  { %v5596_v26 = vpop.eup %5595 }
0x4045   :  { %4012 = vrot.lane.b32.xlu1 %v5596_v26, %s5802_s0 }
0x4051   :  { %v4003_v19 = vpop.permute.xlu0 %4002 }
0x4052   :  { %v7063_v60 = vadd.f32 %v4003_v19, %v3987_v8 }
0x4054   :  { %5597 = vtanh.f32 %v7063_v60  ;;  %v4106_v29 = vrot.slane %v7063_v60, 7 }
0x405a   :  { %v5598_v21 = vpop.eup %5597 }
0x405b   :  { %4014 = vrot.lane.b32.xlu2 %v5598_v21, %s5802_s0 }
0x40b5   :  { %v4015_v47 = vpop.permute.xlu2 %4014 }
0x40b6   :  { %v7069_v35 = vmul.f32 %v4015_v47, %v3976_v7 }
0x40b7   :  { %v4013_v59 = vpop.permute.xlu1 %4012 }
0x40b8   :  { %v7067_v48 = vmul.f32 %v4013_v59, %v3961_v32 }
0x40ba   :  { %v4030_v53 = vrot.slane %v7067_v48, 1 }
0x40bc   :  { %v4031_v37 = vsel %vm689_vm2, %v7069_v35, %v4030_v53 }
0x40bd   :  { %4032 = vrot.lane.b32.xlu0 %v4031_v37, %s5803_s7 }
0x412f   :  { %v4033_v4 = vpop.permute.xlu0 %4032 }
0x4130   :  { %5137 = vmatmul.msk.f32.vlgmr.msra.gmra.mxu2 %vm225_vm7, %v4033_v4 }
0x41b3   :  { %v4053_v28 = vpop.f32.mrf.mxu2 }
0x41b4   :  { %v4057_v56 = vrot.slane %v4053_v28, 6  ;;  %v4058_v45 = vrot.slane %v4053_v28, 7 }
0x41b6   :  { %v4061_v62 = vadd.f32 %v4057_v56, %v7022_v5  ;;  %v4062_v11 = vadd.f32 %v4058_v45, %v7027_v46 }
0x41b8   :  { %5599 = vtanh.f32 %v4061_v62  ;;  %v5139_v9 = vmul.f32 -1.442695, %v4062_v11  ;;  %v5138_v18 = vmul.f32 -1.442695, %v4061_v62 }
0x41b9   :  { %5601 = vtanh.f32 %v4062_v11 }
0x41ba   :  { %5603 = vpow2.f32 %v5139_v9 }
0x41be   :  { %v5600_v22 = vpop.eup %5599 }
0x41bf   :  { %v5602_v61 = vpop.eup %5601  ;;  %4113 = vrot.lane.b32.xlu1 %v5600_v22, %s5802_s0 }
0x41c0   :  { %4115 = vrot.lane.b32.xlu2 %v5602_v61, %s5802_s0  ;;  %v5604_v55 = vpop.eup %5603 }
0x41c1   :  { %v4070_v31 = vadd.f32 1.0, %v5604_v55 }
0x41c3   :  { %5605 = vrcp.f32 %v4070_v31  ;;  %v4097_v38 = vand.u32 2147483648, %v4070_v31  ;;  %vm4091_vm8 = vweird.f32 %v4070_v31  ;;  %v4095_v14 = vand.u32 2147483647, %v4070_v31 }
0x41c4   :  { %5607 = vpow2.f32 %v5138_v18 }
0x41c5   :  { %v4098_v52 = vor.u32 1.1754944e-38, %v4097_v38  ;;  %vm4096_vm4 = vcmp.eq.f32.partialorder %v4095_v14, 8.507059e+37 }
0x41c9   :  { %v5606_v54 = vpop.eup %5605 }
0x41ca   :  { %v4087_v40 = vmul.f32 %v5606_v54, %v4070_v31  ;;  %v5608_v23 = vpop.eup %5607  ;;  %vm4092_vm12 = vweird.f32 %v5606_v54 }
0x41cb   :  { %v4069_v15 = vadd.f32 1.0, %v5608_v23  ;;  %vm4093_vm9 = vmor %vm4091_vm8, %vm4092_vm12 }
0x41cc   :  { %v4088_v41 = vsub.f32 1.0, %v4087_v40 }
0x41cd   :  { %5609 = vrcp.f32 %v4069_v15  ;;  %v4082_v2 = vand.u32 2147483648, %v4069_v15  ;;  %vm4076_vm6 = vweird.f32 %v4069_v15  ;;  %v4080_v6 = vand.u32 2147483647, %v4069_v15 }
0x41ce   :  { %v4089_v16 = vmul.f32 %v5606_v54, %v4088_v41 }
0x41cf   :  { %v4083_v10 = vor.u32 1.1754944e-38, %v4082_v2  ;;  %vm4081_vm13 = vcmp.eq.f32.partialorder %v4080_v6, 8.507059e+37 }
0x41d0   :  { %v4090_v12 = vadd.f32 %v5606_v54, %v4089_v16 }
0x41d2   :  { %v4094_v51 = vsel %vm4093_vm9, %v5606_v54, %v4090_v12 }
0x41d3   :  { %v4099_v42 = vsel %vm4096_vm4, %v4098_v52, %v4094_v51  ;;  %v5610_v13 = vpop.eup %5609 }
0x41d4   :  { %v4072_v0 = vmul.f32 %v5610_v13, %v4069_v15  ;;  %vm4077_vm5 = vweird.f32 %v5610_v13  ;;  %v4110_v20 = vmul.f32 %v4106_v29, %v4099_v42 }
0x41d5   :  { %vm4078_vm10 = vmor %vm4076_vm6, %vm4077_vm5 }
0x41d6   :  { %v4073_v34 = vsub.f32 1.0, %v4072_v0 }
0x41d8   :  { %v4074_v44 = vmul.f32 %v5610_v13, %v4073_v34 }
0x41da   :  { %v4075_v3 = vadd.f32 %v5610_v13, %v4074_v44 }
0x41dc   :  { %v4079_v43 = vsel %vm4078_vm10, %v5610_v13, %v4075_v3 }
0x41dd   :  { %v4084_v7 = vsel %vm4081_vm13, %v4083_v10, %v4079_v43 }
0x41de   :  { %v4109_v24 = vmul.f32 %v4105_v1, %v4084_v7 }
0x421a   :  { %v4116_v36 = vpop.permute.xlu2 %4115 }
0x421b   :  { %v4120_v50 = vmul.f32 %v4116_v36, %v4099_v42 }
0x421d   :  { %4125 = vrot.lane.b32.xlu1 %v4120_v50, %s5802_s0 }
0x4231   :  { %v4114_v58 = vpop.permute.xlu1 %4113 }
0x4232   :  { %v4119_v17 = vmul.f32 %v4114_v58, %v4084_v7 }
0x4234   :  { %4123 = vrot.lane.b32.xlu0 %v4119_v17, %s5802_s0 }
0x428f   :  { %v4126_v33 = vpop.permute.xlu1 %4125 }
0x4290   :  { %v7083_v32 = vadd.f32 %v4126_v33, %v4110_v20 }
0x4292   :  { %5611 = vtanh.f32 %v7083_v32  ;;  %v4230_v17 = vrot.slane %v7083_v32, 7 }
0x4298   :  { %v5612_v63 = vpop.eup %5611 }
0x4299   :  { %4137 = vrot.lane.b32.xlu0 %v5612_v63, %s5802_s0 }
0x42a6   :  { %v4124_v30 = vpop.permute.xlu0 %4123 }
0x42a7   :  { %v7088_v26 = vadd.f32 %v4124_v30, %v4109_v24 }
0x42a9   :  { %5613 = vtanh.f32 %v7088_v26 }
0x42af   :  { %v5614_v25 = vpop.eup %5613 }
0x42b0   :  { %4135 = vrot.lane.b32.xlu2 %v5614_v25, %s5802_s0 }
0x430a   :  { %v4136_v8 = vpop.permute.xlu2 %4135 }
0x430b   :  { %v4138_v19 = vpop.permute.xlu0 %4137  ;;  %v7092_v60 = vmul.f32 %v4136_v8, %v4084_v7  ;;  %v4229_v7 = vrot.slane %v7088_v26, 7 }
0x430c   :  { %v7094_v21 = vmul.f32 %v4138_v19, %v4099_v42 }
0x430d   :  { %v4153_v47 = vrot.slane %v7092_v60, 2 }
0x430e   :  { %v4154_v59 = vrot.slane %v7094_v21, 1 }
0x4310   :  { %v4155_v27 = vsel %vm689_vm2, %v4154_v59, %v4153_v47 }
0x4311   :  { %4156 = vrot.lane.b32.xlu1 %v4155_v27, %s5803_s7 }
0x4383   :  { %v4157_v53 = vpop.permute.xlu1 %4156 }
0x4384   :  { %5140 = vmatmul.msk.f32.vlgmr.msrb.gmra.mxu3 %vm225_vm7, %v4157_v53 }
0x4407   :  { %v4177_v37 = vpop.f32.mrf.mxu3 }
0x4408   :  { %v4181_v4 = vrot.slane %v4177_v37, 5  ;;  %v4182_v28 = vrot.slane %v4177_v37, 6 }
0x440a   :  { %v4185_v56 = vadd.f32 %v4181_v4, %v7022_v5  ;;  %v4186_v45 = vadd.f32 %v4182_v28, %v7027_v46 }
0x440c   :  { %5615 = vtanh.f32 %v4185_v56  ;;  %v5141_v22 = vmul.f32 -1.442695, %v4185_v56  ;;  %v5142_v31 = vmul.f32 -1.442695, %v4186_v45 }
0x440d   :  { %5617 = vtanh.f32 %v4186_v45 }
0x440e   :  { %5619 = vpow2.f32 %v5141_v22 }
0x4412   :  { %v5616_v62 = vpop.eup %5615 }
0x4413   :  { %v5618_v11 = vpop.eup %5617  ;;  %4237 = vrot.lane.b32.xlu2 %v5616_v62, %s5802_s0 }
0x4414   :  { %4239 = vrot.lane.b32.xlu0 %v5618_v11, %s5802_s0  ;;  %v5620_v61 = vpop.eup %5619 }
0x4415   :  { %v4193_v9 = vadd.f32 1.0, %v5620_v61 }
0x4417   :  { %5621 = vrcp.f32 %v4193_v9  ;;  %v4206_v15 = vand.u32 2147483648, %v4193_v9  ;;  %vm4200_vm12 = vweird.f32 %v4193_v9  ;;  %v4204_v12 = vand.u32 2147483647, %v4193_v9 }
0x4418   :  { %5623 = vpow2.f32 %v5142_v31 }
0x4419   :  { %v4207_v14 = vor.u32 1.1754944e-38, %v4206_v15  ;;  %vm4205_vm9 = vcmp.eq.f32.partialorder %v4204_v12, 8.507059e+37 }
0x441d   :  { %v5622_v55 = vpop.eup %5621 }
0x441e   :  { %v4196_v54 = vmul.f32 %v5622_v55, %v4193_v9  ;;  %v5624_v41 = vpop.eup %5623  ;;  %vm4201_vm11 = vweird.f32 %v5622_v55 }
0x441f   :  { %v4194_v23 = vadd.f32 1.0, %v5624_v41  ;;  %vm4202_vm8 = vmor %vm4200_vm12, %vm4201_vm11 }
0x4420   :  { %v4197_v18 = vsub.f32 1.0, %v4196_v54 }
0x4421   :  { %5625 = vrcp.f32 %v4194_v23  ;;  %v4221_v44 = vand.u32 2147483648, %v4194_v23  ;;  %vm4215_vm5 = vweird.f32 %v4194_v23  ;;  %v4219_v3 = vand.u32 2147483647, %v4194_v23 }
0x4422   :  { %v4198_v40 = vmul.f32 %v5622_v55, %v4197_v18 }
0x4423   :  { %v4222_v6 = vor.u32 1.1754944e-38, %v4221_v44  ;;  %vm4220_vm10 = vcmp.eq.f32.partialorder %v4219_v3, 8.507059e+37 }
0x4424   :  { %v4199_v16 = vadd.f32 %v5622_v55, %v4198_v40 }
0x4426   :  { %v4203_v38 = vsel %vm4202_vm8, %v5622_v55, %v4199_v16 }
0x4427   :  { %v4208_v52 = vsel %vm4205_vm9, %v4207_v14, %v4203_v38  ;;  %v5626_v42 = vpop.eup %5625 }
0x4428   :  { %v4211_v13 = vmul.f32 %v5626_v42, %v4194_v23  ;;  %vm4216_vm4 = vweird.f32 %v5626_v42  ;;  %v4233_v29 = vmul.f32 %v4229_v7, %v4208_v52 }
0x4429   :  { %vm4217_vm6 = vmor %vm4215_vm5, %vm4216_vm4 }
0x442a   :  { %v4212_v50 = vsub.f32 1.0, %v4211_v13 }
0x442c   :  { %v4213_v0 = vmul.f32 %v5626_v42, %v4212_v50 }
0x442e   :  { %v4214_v34 = vadd.f32 %v5626_v42, %v4213_v0 }
0x4430   :  { %v4218_v2 = vsel %vm4217_vm6, %v5626_v42, %v4214_v34 }
0x4431   :  { %v4223_v10 = vsel %vm4220_vm10, %v4222_v6, %v4218_v2 }
0x4432   :  { %v4234_v20 = vmul.f32 %v4230_v17, %v4223_v10 }
0x446d   :  { %v4238_v51 = vpop.permute.xlu2 %4237 }
0x446e   :  { %v4243_v36 = vmul.f32 %v4238_v51, %v4208_v52 }
0x4470   :  { %4247 = vrot.lane.b32.xlu1 %v4243_v36, %s5802_s0 }
0x4486   :  { %v4240_v43 = vpop.permute.xlu0 %4239 }
0x4487   :  { %v4244_v58 = vmul.f32 %v4240_v43, %v4223_v10 }
0x4489   :  { %4249 = vrot.lane.b32.xlu2 %v4244_v58, %s5802_s0 }
0x44e2   :  { %v4248_v33 = vpop.permute.xlu1 %4247 }
0x44e3   :  { %v4250_v63 = vpop.permute.xlu2 %4249  ;;  %v7109_v1 = vadd.f32 %v4248_v33, %v4233_v29 }
0x44e4   :  { %v7111_v24 = vadd.f32 %v4250_v63, %v4234_v20 }
0x44e5   :  { %5627 = vtanh.f32 %v7109_v1  ;;  %v4353_v7 = vrot.slane %v7109_v1, 7 }
0x44e6   :  { %5629 = vtanh.f32 %v7111_v24  ;;  %v4354_v63 = vrot.slane %v7111_v24, 7 }
0x44eb   :  { %v5628_v30 = vpop.eup %5627 }
0x44ec   :  { %v5630_v25 = vpop.eup %5629  ;;  %4259 = vrot.lane.b32.xlu0 %v5628_v30, %s5802_s0 }
0x44ed   :  { %4261 = vrot.lane.b32.xlu1 %v5630_v25, %s5802_s0 }
0x455e   :  { %v4260_v26 = vpop.permute.xlu0 %4259 }
0x455f   :  { %v4262_v32 = vpop.permute.xlu1 %4261  ;;  %v7117_v8 = vmul.f32 %v4260_v26, %v4208_v52 }
0x4560   :  { %v7119_v19 = vmul.f32 %v4262_v32, %v4223_v10 }
0x4561   :  { %v4277_v47 = vrot.slane %v7117_v8, 3 }
0x4562   :  { %v4278_v59 = vrot.slane %v7119_v19, 2 }
0x4564   :  { %v4279_v27 = vsel %vm689_vm2, %v4278_v59, %v4277_v47 }
0x4565   :  { %4280 = vrot.lane.b32.xlu2 %v4279_v27, %s5803_s7 }
0x45bf   :  { %v4281_v53 = vpop.permute.xlu2 %4280 }
0x45c0   :  { %5143 = vmatmul.msk.f32.vlgmr.msrb.gmra.mxu0 %vm225_vm7, %v4281_v53 }
0x463d   :  { %v4301_v37 = vpop.f32.mrf.mxu0 }
0x463e   :  { %v4305_v4 = vrot.slane %v4301_v37, 4  ;;  %v4306_v28 = vrot.slane %v4301_v37, 5 }
0x4640   :  { %v4309_v56 = vadd.f32 %v4305_v4, %v7022_v5  ;;  %v4310_v45 = vadd.f32 %v4306_v28, %v7027_v46 }
0x4642   :  { %5631 = vtanh.f32 %v4309_v56  ;;  %v5144_v22 = vmul.f32 -1.442695, %v4309_v56  ;;  %v5145_v61 = vmul.f32 -1.442695, %v4310_v45 }
0x4643   :  { %5633 = vtanh.f32 %v4310_v45 }
0x4644   :  { %5635 = vpow2.f32 %v5144_v22 }
0x4645   :  { %5637 = vpow2.f32 %v5145_v61 }
0x4648   :  { %v5632_v62 = vpop.eup %5631 }
0x4649   :  { %v5634_v11 = vpop.eup %5633  ;;  %4361 = vrot.lane.b32.xlu0 %v5632_v62, %s5802_s0 }
0x464a   :  { %4363 = vrot.lane.b32.xlu1 %v5634_v11, %s5802_s0  ;;  %v5636_v9 = vpop.eup %5635 }
0x464b   :  { %v5638_v55 = vpop.eup %5637  ;;  %v4317_v31 = vadd.f32 1.0, %v5636_v9 }
0x464c   :  { %v4318_v54 = vadd.f32 1.0, %v5638_v55 }
0x464d   :  { %5639 = vrcp.f32 %v4317_v31  ;;  %v4330_v52 = vand.u32 2147483648, %v4317_v31  ;;  %vm4324_vm12 = vweird.f32 %v4317_v31  ;;  %v4328_v42 = vand.u32 2147483647, %v4317_v31 }
0x464e   :  { %5641 = vrcp.f32 %v4318_v54  ;;  %v4345_v36 = vand.u32 2147483648, %v4318_v54  ;;  %vm4339_vm8 = vweird.f32 %v4318_v54  ;;  %v4343_v13 = vand.u32 2147483647, %v4318_v54 }
0x464f   :  { %v4331_v34 = vor.u32 1.1754944e-38, %v4330_v52  ;;  %vm4329_vm5 = vcmp.eq.f32.partialorder %v4328_v42, 8.507059e+37 }
0x4650   :  { %v4346_v44 = vor.u32 1.1754944e-38, %v4345_v36  ;;  %vm4344_vm6 = vcmp.eq.f32.partialorder %v4343_v13, 8.507059e+37 }
0x4653   :  { %v5640_v18 = vpop.eup %5639 }
0x4654   :  { %v5642_v40 = vpop.eup %5641  ;;  %v4320_v41 = vmul.f32 %v5640_v18, %v4317_v31  ;;  %vm4325_vm13 = vweird.f32 %v5640_v18 }
0x4655   :  { %v4335_v23 = vmul.f32 %v5642_v40, %v4318_v54  ;;  %vm4340_vm11 = vweird.f32 %v5642_v40  ;;  %vm4326_vm9 = vmor %vm4324_vm12, %vm4325_vm13 }
0x4656   :  { %v4321_v16 = vsub.f32 1.0, %v4320_v41  ;;  %vm4341_vm4 = vmor %vm4339_vm8, %vm4340_vm11 }
0x4657   :  { %v4336_v15 = vsub.f32 1.0, %v4335_v23 }
0x4658   :  { %v4322_v12 = vmul.f32 %v5640_v18, %v4321_v16 }
0x4659   :  { %v4337_v38 = vmul.f32 %v5642_v40, %v4336_v15 }
0x465a   :  { %v4323_v14 = vadd.f32 %v5640_v18, %v4322_v12 }
0x465b   :  { %v4338_v51 = vadd.f32 %v5642_v40, %v4337_v38 }
0x465c   :  { %v4327_v50 = vsel %vm4326_vm9, %v5640_v18, %v4323_v14 }
0x465d   :  { %v4342_v0 = vsel %vm4341_vm4, %v5642_v40, %v4338_v51  ;;  %v4332_v2 = vsel %vm4329_vm5, %v4331_v34, %v4327_v50 }
0x465e   :  { %v4347_v43 = vsel %vm4344_vm6, %v4346_v44, %v4342_v0  ;;  %v4357_v17 = vmul.f32 %v4353_v7, %v4332_v2 }
0x465f   :  { %v4358_v30 = vmul.f32 %v4354_v63, %v4347_v43 }
0x46bb   :  { %v4362_v3 = vpop.permute.xlu0 %4361 }
0x46bc   :  { %v4364_v6 = vpop.permute.xlu1 %4363  ;;  %v4367_v10 = vmul.f32 %v4362_v3, %v4332_v2 }
0x46bd   :  { %v4368_v58 = vmul.f32 %v4364_v6, %v4347_v43 }
0x46be   :  { %4371 = vrot.lane.b32.xlu2 %v4367_v10, %s5802_s0 }
0x46bf   :  { %4373 = vrot.lane.b32.xlu0 %v4368_v58, %s5802_s0 }
0x4718   :  { %v4372_v29 = vpop.permute.xlu2 %4371 }
0x4719   :  { %v7133_v20 = vadd.f32 %v4372_v29, %v4357_v17 }
0x471b   :  { %5643 = vtanh.f32 %v7133_v20 }
0x4721   :  { %v5644_v33 = vpop.eup %5643 }
0x4722   :  { %4383 = vrot.lane.b32.xlu1 %v5644_v33, %s5802_s0 }
0x4731   :  { %v4374_v25 = vpop.permute.xlu0 %4373 }
0x4732   :  { %v7138_v26 = vadd.f32 %v4374_v25, %v4358_v30 }
0x4734   :  { %5645 = vtanh.f32 %v7138_v26  ;;  %v4478_v29 = vrot.slane %v7138_v26, 7 }
0x473a   :  { %v5646_v32 = vpop.eup %5645 }
0x473b   :  { %4385 = vrot.lane.b32.xlu2 %v5646_v32, %s5802_s0  ;;  %v4477_v32 = vrot.slane %v7133_v20, 7 }
0x4794   :  { %v4384_v1 = vpop.permute.xlu1 %4383 }
0x4795   :  { %v4386_v47 = vpop.permute.xlu2 %4385  ;;  %v7142_v59 = vmul.f32 %v4384_v1, %v4332_v2 }
0x4796   :  { %v7144_v27 = vmul.f32 %v4386_v47, %v4347_v43 }
0x4797   :  { %v4401_v53 = vrot.slane %v7142_v59, 4 }
0x4798   :  { %v4402_v37 = vrot.slane %v7144_v27, 3 }
0x479a   :  { %v4403_v24 = vsel %vm689_vm2, %v4402_v37, %v4401_v53 }
0x479b   :  { %4404 = vrot.lane.b32.xlu0 %v4403_v24, %s5803_s7 }
0x480d   :  { %v4405_v4 = vpop.permute.xlu0 %4404 }
0x480e   :  { %5146 = vmatmul.msk.f32.vlgmr.msrb.gmra.mxu1 %vm225_vm7, %v4405_v4 }
0x488b   :  { %v4425_v28 = vpop.f32.mrf.mxu1 }
0x488c   :  { %v4429_v56 = vrot.slane %v4425_v28, 3  ;;  %v4430_v45 = vrot.slane %v4425_v28, 4 }
0x488e   :  { %v4433_v62 = vadd.f32 %v4429_v56, %v7022_v5  ;;  %v4434_v11 = vadd.f32 %v4430_v45, %v7027_v46 }
0x4890   :  { %5647 = vtanh.f32 %v4433_v62  ;;  %v5148_v9 = vmul.f32 -1.442695, %v4434_v11  ;;  %v5147_v18 = vmul.f32 -1.442695, %v4433_v62 }
0x4891   :  { %5649 = vtanh.f32 %v4434_v11 }
0x4892   :  { %5651 = vpow2.f32 %v5148_v9 }
0x4896   :  { %v5648_v22 = vpop.eup %5647 }
0x4897   :  { %v5650_v61 = vpop.eup %5649  ;;  %4485 = vrot.lane.b32.xlu1 %v5648_v22, %s5802_s0 }
0x4898   :  { %4487 = vrot.lane.b32.xlu2 %v5650_v61, %s5802_s0  ;;  %v5652_v55 = vpop.eup %5651 }
0x4899   :  { %v4442_v31 = vadd.f32 1.0, %v5652_v55 }
0x489b   :  { %5653 = vrcp.f32 %v4442_v31  ;;  %v4469_v38 = vand.u32 2147483648, %v4442_v31  ;;  %vm4463_vm13 = vweird.f32 %v4442_v31  ;;  %v4467_v14 = vand.u32 2147483647, %v4442_v31 }
0x489c   :  { %5655 = vpow2.f32 %v5147_v18 }
0x489d   :  { %v4470_v52 = vor.u32 1.1754944e-38, %v4469_v38  ;;  %vm4468_vm12 = vcmp.eq.f32.partialorder %v4467_v14, 8.507059e+37 }
0x48a1   :  { %v5654_v54 = vpop.eup %5653 }
0x48a2   :  { %v4459_v40 = vmul.f32 %v5654_v54, %v4442_v31  ;;  %v5656_v23 = vpop.eup %5655  ;;  %vm4464_vm10 = vweird.f32 %v5654_v54 }
0x48a3   :  { %v4441_v15 = vadd.f32 1.0, %v5656_v23  ;;  %vm4465_vm11 = vmor %vm4463_vm13, %vm4464_vm10 }
0x48a4   :  { %v4460_v41 = vsub.f32 1.0, %v4459_v40 }
0x48a5   :  { %5657 = vrcp.f32 %v4441_v15  ;;  %v4454_v2 = vand.u32 2147483648, %v4441_v15  ;;  %vm4448_vm9 = vweird.f32 %v4441_v15  ;;  %v4452_v6 = vand.u32 2147483647, %v4441_v15 }
0x48a6   :  { %v4461_v16 = vmul.f32 %v5654_v54, %v4460_v41 }
0x48a7   :  { %v4455_v10 = vor.u32 1.1754944e-38, %v4454_v2  ;;  %vm4453_vm5 = vcmp.eq.f32.partialorder %v4452_v6, 8.507059e+37 }
0x48a8   :  { %v4462_v12 = vadd.f32 %v5654_v54, %v4461_v16 }
0x48aa   :  { %v4466_v51 = vsel %vm4465_vm11, %v5654_v54, %v4462_v12 }
0x48ab   :  { %v4471_v42 = vsel %vm4468_vm12, %v4470_v52, %v4466_v51  ;;  %v5658_v13 = vpop.eup %5657 }
0x48ac   :  { %v4444_v0 = vmul.f32 %v5658_v13, %v4441_v15  ;;  %vm4449_vm8 = vweird.f32 %v5658_v13  ;;  %v4482_v33 = vmul.f32 %v4478_v29, %v4471_v42 }
0x48ad   :  { %vm4450_vm4 = vmor %vm4448_vm9, %vm4449_vm8 }
0x48ae   :  { %v4445_v34 = vsub.f32 1.0, %v4444_v0 }
0x48b0   :  { %v4446_v44 = vmul.f32 %v5658_v13, %v4445_v34 }
0x48b2   :  { %v4447_v3 = vadd.f32 %v5658_v13, %v4446_v44 }
0x48b4   :  { %v4451_v43 = vsel %vm4450_vm4, %v5658_v13, %v4447_v3 }
0x48b5   :  { %v4456_v7 = vsel %vm4453_vm5, %v4455_v10, %v4451_v43 }
0x48b6   :  { %v4481_v1 = vmul.f32 %v4477_v32, %v4456_v7 }
0x48f2   :  { %v4488_v36 = vpop.permute.xlu2 %4487 }
0x48f3   :  { %v4492_v50 = vmul.f32 %v4488_v36, %v4471_v42 }
0x48f5   :  { %4497 = vrot.lane.b32.xlu1 %v4492_v50, %s5802_s0 }
0x4909   :  { %v4486_v58 = vpop.permute.xlu1 %4485 }
0x490a   :  { %v4491_v17 = vmul.f32 %v4486_v58, %v4456_v7 }
0x490c   :  { %4495 = vrot.lane.b32.xlu0 %v4491_v17, %s5802_s0 }
0x4967   :  { %v4498_v63 = vpop.permute.xlu1 %4497 }
0x4968   :  { %v7158_v30 = vadd.f32 %v4498_v63, %v4482_v33 }
0x496a   :  { %5659 = vtanh.f32 %v7158_v30 }
0x4970   :  { %v5660_v25 = vpop.eup %5659 }
0x4971   :  { %4509 = vrot.lane.b32.xlu0 %v5660_v25, %s5802_s0 }
0x497e   :  { %v4496_v47 = vpop.permute.xlu0 %4495 }
0x497f   :  { %v7163_v53 = vadd.f32 %v4496_v47, %v4481_v1  ;;  %v4602_v1 = vrot.slane %v7158_v30, 7 }
0x4981   :  { %5661 = vtanh.f32 %v7163_v53  ;;  %v4601_v32 = vrot.slane %v7163_v53, 7 }
0x4987   :  { %v5662_v37 = vpop.eup %5661 }
0x4988   :  { %4507 = vrot.lane.b32.xlu2 %v5662_v37, %s5802_s0 }
0x49e2   :  { %v4508_v26 = vpop.permute.xlu2 %4507 }
0x49e3   :  { %v4510_v24 = vpop.permute.xlu0 %4509  ;;  %v7167_v4 = vmul.f32 %v4508_v26, %v4456_v7 }
0x49e4   :  { %v7169_v28 = vmul.f32 %v4510_v24, %v4471_v42 }
0x49e5   :  { %v4525_v56 = vrot.slane %v7167_v4, 5 }
0x49e6   :  { %v4526_v45 = vrot.slane %v7169_v28, 4 }
0x49e8   :  { %v4527_v20 = vsel %vm689_vm2, %v4526_v45, %v4525_v56 }
0x49e9   :  { %4528 = vrot.lane.b32.xlu1 %v4527_v20, %s5803_s7 }
0x4a5b   :  { %v4529_v62 = vpop.permute.xlu1 %4528 }
0x4a5c   :  { %5149 = vmatmul.msk.f32.vlgmr.msrb.gmra.mxu2 %vm225_vm7, %v4529_v62 }
0x4adf   :  { %v4549_v11 = vpop.f32.mrf.mxu2 }
0x4ae0   :  { %v4553_v22 = vrot.slane %v4549_v11, 2  ;;  %v4554_v61 = vrot.slane %v4549_v11, 3 }
0x4ae2   :  { %v4557_v9 = vadd.f32 %v4553_v22, %v7022_v5  ;;  %v4558_v55 = vadd.f32 %v4554_v61, %v7027_v46 }
0x4ae4   :  { %5663 = vtanh.f32 %v4557_v9  ;;  %v5150_v18 = vmul.f32 -1.442695, %v4557_v9  ;;  %v5151_v16 = vmul.f32 -1.442695, %v4558_v55 }
0x4ae5   :  { %5665 = vtanh.f32 %v4558_v55 }
0x4ae6   :  { %5667 = vpow2.f32 %v5150_v18 }
0x4aea   :  { %v5664_v31 = vpop.eup %5663 }
0x4aeb   :  { %v5666_v54 = vpop.eup %5665  ;;  %4609 = vrot.lane.b32.xlu2 %v5664_v31, %s5802_s0 }
0x4aec   :  { %4611 = vrot.lane.b32.xlu0 %v5666_v54, %s5802_s0  ;;  %v5668_v40 = vpop.eup %5667 }
0x4aed   :  { %v4565_v41 = vadd.f32 1.0, %v5668_v40 }
0x4aef   :  { %5669 = vrcp.f32 %v4565_v41  ;;  %v4578_v36 = vand.u32 2147483648, %v4565_v41  ;;  %vm4572_vm10 = vweird.f32 %v4565_v41  ;;  %v4576_v42 = vand.u32 2147483647, %v4565_v41 }
0x4af0   :  { %5671 = vpow2.f32 %v5151_v16 }
0x4af1   :  { %v4579_v50 = vor.u32 1.1754944e-38, %v4578_v36  ;;  %vm4577_vm11 = vcmp.eq.f32.partialorder %v4576_v42, 8.507059e+37 }
0x4af5   :  { %v5670_v23 = vpop.eup %5669 }
0x4af6   :  { %v4568_v15 = vmul.f32 %v5670_v23, %v4565_v41  ;;  %v5672_v14 = vpop.eup %5671  ;;  %vm4573_vm6 = vweird.f32 %v5670_v23 }
0x4af7   :  { %v4566_v51 = vadd.f32 1.0, %v5672_v14  ;;  %vm4574_vm13 = vmor %vm4572_vm10, %vm4573_vm6 }
0x4af8   :  { %v4569_v12 = vsub.f32 1.0, %v4568_v15 }
0x4af9   :  { %5673 = vrcp.f32 %v4566_v51  ;;  %v4593_v58 = vand.u32 2147483648, %v4566_v51  ;;  %vm4587_vm8 = vweird.f32 %v4566_v51  ;;  %v4591_v7 = vand.u32 2147483647, %v4566_v51 }
0x4afa   :  { %v4570_v38 = vmul.f32 %v5670_v23, %v4569_v12 }
0x4afb   :  { %v4594_v29 = vor.u32 1.1754944e-38, %v4593_v58  ;;  %vm4592_vm4 = vcmp.eq.f32.partialorder %v4591_v7, 8.507059e+37 }
0x4afc   :  { %v4571_v52 = vadd.f32 %v5670_v23, %v4570_v38 }
0x4afe   :  { %v4575_v13 = vsel %vm4574_vm13, %v5670_v23, %v4571_v52 }
0x4aff   :  { %v4580_v34 = vsel %vm4577_vm11, %v4579_v50, %v4575_v13  ;;  %v5674_v3 = vpop.eup %5673 }
0x4b00   :  { %v4583_v2 = vmul.f32 %v5674_v3, %v4566_v51  ;;  %vm4588_vm12 = vweird.f32 %v5674_v3  ;;  %v4605_v47 = vmul.f32 %v4601_v32, %v4580_v34 }
0x4b01   :  { %vm4589_vm9 = vmor %vm4587_vm8, %vm4588_vm12 }
0x4b02   :  { %v4584_v6 = vsub.f32 1.0, %v4583_v2 }
0x4b04   :  { %v4585_v43 = vmul.f32 %v5674_v3, %v4584_v6 }
0x4b06   :  { %v4586_v10 = vadd.f32 %v5674_v3, %v4585_v43 }
0x4b08   :  { %v4590_v17 = vsel %vm4589_vm9, %v5674_v3, %v4586_v10 }
0x4b09   :  { %v4595_v63 = vsel %vm4592_vm4, %v4594_v29, %v4590_v17  ;;  %vm7342_vm4 = vcmask 256002  }
0x4b0a   :  { %v4606_v37 = vmul.f32 %v4602_v1, %v4595_v63 }
0x4b45   :  { %v4610_v0 = vpop.permute.xlu2 %4609 }
0x4b46   :  { %v4615_v44 = vmul.f32 %v4610_v0, %v4580_v34 }
0x4b48   :  { %4619 = vrot.lane.b32.xlu1 %v4615_v44, %s5802_s0 }
0x4b5e   :  { %v4612_v33 = vpop.permute.xlu0 %4611 }
0x4b5f   :  { %v4616_v25 = vmul.f32 %v4612_v33, %v4595_v63 }
0x4b61   :  { %4621 = vrot.lane.b32.xlu2 %v4616_v25, %s5802_s0 }
0x4bba   :  { %v4620_v26 = vpop.permute.xlu1 %4619 }
0x4bbb   :  { %v4622_v24 = vpop.permute.xlu2 %4621  ;;  %v7184_v56 = vadd.f32 %v4620_v26, %v4605_v47 }
0x4bbc   :  { %v7186_v45 = vadd.f32 %v4622_v24, %v4606_v37 }
0x4bbd   :  { %5675 = vtanh.f32 %v7184_v56 }
0x4bbe   :  { %5677 = vtanh.f32 %v7186_v45  ;;  %v4726_v26 = vrot.slane %v7186_v45, 7 }
0x4bc3   :  { %v5676_v20 = vpop.eup %5675 }
0x4bc4   :  { %v5678_v62 = vpop.eup %5677  ;;  %4631 = vrot.lane.b32.xlu0 %v5676_v20, %s5802_s0 }
0x4bc5   :  { %4633 = vrot.lane.b32.xlu1 %v5678_v62, %s5802_s0 }
0x4c36   :  { %v4632_v53 = vpop.permute.xlu0 %4631 }
0x4c37   :  { %v4634_v30 = vpop.permute.xlu1 %4633  ;;  %v7192_v11 = vmul.f32 %v4632_v53, %v4580_v34 }
0x4c38   :  { %v7194_v22 = vmul.f32 %v4634_v30, %v4595_v63 }
0x4c39   :  { %v4649_v61 = vrot.slane %v7192_v11, 6 }
0x4c3a   :  { %v4650_v9 = vrot.slane %v7194_v22, 5 }
0x4c3c   :  { %v4651_v55 = vsel %vm689_vm2, %v4650_v9, %v4649_v61 }
0x4c3d   :  { %4652 = vrot.lane.b32.xlu2 %v4651_v55, %s5803_s7 }
0x4c97   :  { %v4653_v31 = vpop.permute.xlu2 %4652 }
0x4c98   :  { %5152 = vmatmul.msk.f32.vlgmr.msra.gmra.mxu3 %vm225_vm7, %v4653_v31 }
0x4d1b   :  { %v4673_v54 = vpop.f32.mrf.mxu3 }
0x4d1c   :  { %v4677_v18 = vrot.slane %v4673_v54, 1  ;;  %v4678_v40 = vrot.slane %v4673_v54, 2 }
0x4d1e   :  { %v4681_v41 = vadd.f32 %v4677_v18, %v7022_v5  ;;  %v4682_v23 = vadd.f32 %v4678_v40, %v7027_v46 }
0x4d20   :  { %5679 = vtanh.f32 %v4681_v41  ;;  %v5153_v12 = vmul.f32 -1.442695, %v4681_v41  ;;  %v5154_v38 = vmul.f32 -1.442695, %v4682_v23 }
0x4d21   :  { %5681 = vtanh.f32 %v4682_v23 }
0x4d22   :  { %5683 = vpow2.f32 %v5153_v12  ;;  %v5718_v12 = vld [vmem:[%s7297_s2 + $0x8] sm:$0xff] }
0x4d23   :  { %5685 = vpow2.f32 %v5154_v38  ;;  %v5179_v38 = vld [vmem:[%s7305_s10] ss:$0 sm:$0xff] }
0x4d26   :  { %v5680_v16 = vpop.eup %5679 }
0x4d27   :  { %v5682_v15 = vpop.eup %5681  ;;  %4733 = vrot.lane.b32.xlu1 %v5680_v16, %s5802_s0 }
0x4d28   :  { %4735 = vrot.lane.b32.xlu0 %v5682_v15, %s5802_s0  ;;  %v5684_v14 = vpop.eup %5683  ;;  %v5717_v15 = vld [vmem:[%s7297_s2] sm:$0xff] }
0x4d29   :  { %v5686_v51 = vpop.eup %5685  ;;  %v4689_v52 = vadd.f32 1.0, %v5684_v14 }
0x4d2a   :  { %v4690_v36 = vadd.f32 1.0, %v5686_v51 }
0x4d2b   :  { %5687 = vrcp.f32 %v4689_v52  ;;  %v4702_v6 = vand.u32 2147483648, %v4689_v52  ;;  %vm4696_vm10 = vweird.f32 %v4689_v52  ;;  %v4700_v10 = vand.u32 2147483647, %v4689_v52 }
0x4d2c   :  { %5689 = vrcp.f32 %v4690_v36  ;;  %v4717_v43 = vand.u32 2147483648, %v4690_v36  ;;  %vm4711_vm13 = vweird.f32 %v4690_v36  ;;  %v4715_v58 = vand.u32 2147483647, %v4690_v36 }
0x4d2d   :  { %v4703_v29 = vor.u32 1.1754944e-38, %v4702_v6  ;;  %vm4701_vm8 = vcmp.eq.f32.partialorder %v4700_v10, 8.507059e+37 }
0x4d2e   :  { %v4718_v33 = vor.u32 1.1754944e-38, %v4717_v43  ;;  %vm4716_vm9 = vcmp.eq.f32.partialorder %v4715_v58, 8.507059e+37 }
0x4d31   :  { %v5688_v5 = vpop.eup %5687 }
0x4d32   :  { %v5690_v46 = vpop.eup %5689  ;;  %v4692_v42 = vmul.f32 %v5688_v5, %v4689_v52  ;;  %vm4697_vm5 = vweird.f32 %v5688_v5 }
0x4d33   :  { %v4707_v13 = vmul.f32 %v5690_v46, %v4690_v36  ;;  %vm4712_vm6 = vweird.f32 %v5690_v46  ;;  %vm4698_vm11 = vmor %vm4696_vm10, %vm4697_vm5  ;;  %vm7343_vm5 = vcmask 259077  }
0x4d34   :  { %v4693_v50 = vsub.f32 1.0, %v4692_v42  ;;  %vm4713_vm12 = vmor %vm4711_vm13, %vm4712_vm6 }
0x4d35   :  { %v4708_v0 = vsub.f32 1.0, %v4707_v13  ;;  %vm7344_vm6 = vmmov %vm7342_vm4 }
0x4d36   :  { %v4694_v34 = vmul.f32 %v5688_v5, %v4693_v50 }
0x4d37   :  { %v4709_v44 = vmul.f32 %v5690_v46, %v4708_v0 }
0x4d38   :  { %v4695_v3 = vadd.f32 %v5688_v5, %v4694_v34 }
0x4d39   :  { %v4710_v2 = vadd.f32 %v5690_v46, %v4709_v44 }
0x4d3a   :  { %v4699_v7 = vsel %vm4698_vm11, %v5688_v5, %v4695_v3 }
0x4d3b   :  { %v4714_v17 = vsel %vm4713_vm12, %v5690_v46, %v4710_v2  ;;  %v4704_v25 = vsel %vm4701_vm8, %v4703_v29, %v4699_v7 }
0x4d3c   :  { %v4719_v1 = vsel %vm4716_vm9, %v4718_v33, %v4714_v17 }
0x4d3d   :  { %v4730_v24 = vmul.f32 %v4726_v26, %v4719_v1 }
0x4d99   :  { %v4734_v63 = vpop.permute.xlu1 %4733 }
0x4d9a   :  { %v4736_v32 = vpop.permute.xlu0 %4735  ;;  %v4739_v47 = vmul.f32 %v4734_v63, %v4704_v25 }
0x4d9b   :  { %v4740_v37 = vmul.f32 %v4736_v32, %v4719_v1 }
0x4d9c   :  { %4743 = vrot.lane.b32.xlu0 %v4739_v47, %s5802_s0 }
0x4d9d   :  { %4745 = vrot.lane.b32.xlu2 %v4740_v37, %s5802_s0 }
0x4da4   :  { %3902 = vrot.lane.b32.xlu0 %v7042_v57, %s5803_s7  ;;  %v4725_v57 = vrot.slane %v7184_v56, 7 }
0x4dac   :  { %4271 = vrot.lane.b32.xlu0 %v7119_v19, %s5803_s7  ;;  %v4729_v19 = vmul.f32 %v4725_v57, %v4704_v25 }
0x4db4   :  { %4643 = vrot.lane.b32.xlu0 %v7194_v22, %s5803_s7 }
0x4dbc   :  { %4022 = vrot.lane.b32.xlu0 %v7067_v48, %s5803_s7 }
0x4dc4   :  { %4393 = vrot.lane.b32.xlu0 %v7142_v59, %s5803_s7 }
0x4df7   :  { %v4746_v20 = vpop.permute.xlu2 %4745 }
0x4df8   :  { %v4750_v62 = vadd.f32 %v4746_v20, %v4730_v24  ;;  %v4891_v20 = vld [vmem:[#allocation9 + $0x18] sm:$0xff] }
0x4df9   :  { %4913 = vmatpush.msra.mxu1 %v4891_v20 }
0x4dfa   :  { %5691 = vtanh.f32 %v4750_v62  ;;  %v4890_v62 = vld [vmem:[#allocation9 + $0x10] sm:$0xff] }
0x4dfb   :  { %4914 = vmatpush.msra.mxu1 %v4890_v62 }
0x4e00   :  { %v5692_v53 = vpop.eup %5691 }
0x4e01   :  { %4757 = vrot.lane.b32.xlu1 %v5692_v53, %s5802_s0 }
0x4e09   :  { %4024 = vrot.lane.b32.xlu1 %v7069_v35, %s5803_s7 }
0x4e0e   :  { %v4744_v30 = vpop.permute.xlu0 %4743 }
0x4e0f   :  { %v4749_v48 = vadd.f32 %v4744_v30, %v4729_v19  ;;  %v4889_v30 = vld [vmem:[#allocation9 + $0x8] sm:$0xff] }
0x4e10   :  { %4915 = vmatpush.msra.mxu1 %v4889_v30 }
0x4e11   :  { %5693 = vtanh.f32 %v4749_v48  ;;  %4395 = vrot.lane.b32.xlu1 %v7144_v27, %s5803_s7 }
0x4e16   :  { %v3903_v59 = vpop.permute.xlu0 %3902 }
0x4e17   :  { %v5694_v45 = vpop.eup %5693  ;;  %3907 = vst.msk [vmem:[#allocation2 + $0x8] sm:$0x1] %vm685_vm14, %v3903_v59 }
0x4e18   :  { %4755 = vrot.lane.b32.xlu2 %v5694_v45, %s5802_s0  ;;  %v4888_v45 = vld [vmem:[#allocation9] sm:$0xff] }
0x4e19   :  { %4145 = vrot.lane.b32.xlu1 %v7092_v60, %s5803_s7  ;;  %4916 = vmatpush.msra.mxu1 %v4888_v45 }
0x4e1e   :  { %v4272_v22 = vpop.permute.xlu0 %4271 }
0x4e1f   :  { %4276 = vst.msk [vmem:[#allocation2 + $0x8] sm:$0x8] %vm1058_vm15, %v4272_v22 }
0x4e20   :  { %4147 = vrot.lane.b32.xlu2 %v7094_v21, %s5803_s7 }
0x4e26   :  { %v4644_v35 = vpop.permute.xlu0 %4643 }
0x4e27   :  { %4648 = vst.msk [vmem:[#allocation2 + $0x8] sm:$0x40] %vm1433_vm0, %v4644_v35 }
0x4e28   :  { %4519 = vrot.lane.b32.xlu2 %v7169_v28, %s5803_s7 }
0x4e2e   :  { %v4023_v27 = vpop.permute.xlu0 %4022 }
0x4e2f   :  { %4028 = vst.msk [vmem:[#allocation2] sm:$0x2] %vm809_vm1, %v4023_v27 }
0x4e30   :  { %3900 = vrot.lane.b32.xlu2 %v7044_v49, %s5803_s7 }
0x4e36   :  { %v4394_v56 = vpop.permute.xlu0 %4393 }
0x4e37   :  { %4399 = vst.msk [vmem:[#allocation2] sm:$0x10] %vm1183_vm3, %v4394_v56 }
0x4e38   :  { %4269 = vrot.lane.b32.xlu2 %v7117_v8, %s5803_s7 }
0x4e40   :  { %4641 = vrot.lane.b32.xlu2 %v7192_v11, %s5803_s7 }
0x4e72   :  { %v4756_v60 = vpop.permute.xlu2 %4755 }
0x4e73   :  { %v4758_v21 = vpop.permute.xlu1 %4757  ;;  %v4761_v61 = vmul.f32 %v4756_v60, %v4704_v25 }
0x4e74   :  { %v4762_v9 = vmul.f32 %v4758_v21, %v4719_v1 }
0x4e75   :  { %4765 = vrot.lane.b32.xlu0 %v4761_v61, %s5803_s7 }
0x4e76   :  { %4767 = vrot.lane.b32.xlu1 %v4762_v9, %s5803_s7 }
0x4e7a   :  { %v4148_v28 = vpop.permute.xlu2 %4147 }
0x4e7b   :  { %v4025_v55 = vpop.permute.xlu1 %4024  ;;  %4152 = vst.msk [vmem:[#allocation2 + $0x8] sm:$0x4] %vm7342_vm4, %v4148_v28 }
0x4e7c   :  { %4029 = vst.msk [vmem:[#allocation2 + $0x8] sm:$0x2] %vm809_vm1, %v4025_v55  ;;  %vm7345_vm1 = vcmask 261127  }
0x4e7d   :  { %vm7346_vm10 = vmmov %vm7345_vm1 }
0x4e7e   :  { %4517 = vrot.lane.b32.xlu1 %v7167_v4, %s5803_s7 }
0x4e82   :  { %v4520_v49 = vpop.permute.xlu2 %4519 }
0x4e83   :  { %v4396_v8 = vpop.permute.xlu1 %4395  ;;  %4524 = vst.msk [vmem:[#allocation2 + $0x8] sm:$0x20] %vm7343_vm5, %v4520_v49 }
0x4e84   :  { %4400 = vst.msk [vmem:[#allocation2 + $0x8] sm:$0x10] %vm1183_vm3, %v4396_v8  ;;  %vm7347_vm3 = vmmov %vm7343_vm5 }
0x4e8a   :  { %v3901_v11 = vpop.permute.xlu2 %3900 }
0x4e8b   :  { %v4146_v31 = vpop.permute.xlu1 %4145  ;;  %3906 = vst.msk [vmem:[#allocation2] sm:$0x1] %vm685_vm14, %v3901_v11  ;;  %vm7348_vm14 = vcmask 130048  }
0x4e8c   :  { %4151 = vst.msk [vmem:[#allocation2] sm:$0x4] %vm7344_vm6, %v4146_v31 }
0x4e92   :  { %v4270_v54 = vpop.permute.xlu2 %4269 }
0x4e93   :  { %4275 = vst.msk [vmem:[#allocation2] sm:$0x8] %vm1058_vm15, %v4270_v54  ;;  %vm7349_vm15 = vmmov %vm7348_vm14 }
0x4e9a   :  { %v4642_v18 = vpop.permute.xlu2 %4641 }
0x4e9b   :  { %4647 = vst.msk [vmem:[#allocation2] sm:$0x40] %vm1433_vm0, %v4642_v18  ;;  %vm7350_vm0 = vcmp.lt.s32.totalorder %v5999_v39, 16 }
0x4e9c   :  { %vm7351_vm13 = vmmov %vm7350_vm0 }
0x4ee7   :  { %v4766_v40 = vpop.permute.xlu0 %4765 }
0x4ee8   :  { %v4768_v4 = vpop.permute.xlu1 %4767  ;;  %4771 = vst.msk [vmem:[#allocation2] sm:$0x80] %vm7345_vm1, %v4766_v40 }
0x4ee9   :  { %4772 = vst.msk [vmem:[#allocation2 + $0x8] sm:$0x80] %vm7346_vm10, %v4768_v4 }
0x4ef0   :  { %v4518_v41 = vpop.permute.xlu1 %4517  ;;  %v4774_v23 = vld [vmem:[#allocation2 + $0x8] sm:$0xff] }
0x4ef1   :  { %4523 = vst.msk [vmem:[#allocation2] sm:$0x20] %vm7347_vm3, %v4518_v41  ;;  %4789 = vmatpush.msra.mxu0 %v4774_v23 }
0x4ef8   :  { %v4773_v16 = vld [vmem:[#allocation2] sm:$0xff] }
0x4ef9   :  { %4790 = vmatpush.msra.mxu0 %v4773_v16 }
0x4efa   :  { %5155 = vmatmul.msk.f32.vlgmr.msra.gmra.mxu0 %vm7348_vm14, %v5717_v15 }
0x4f02   :  { %5156 = vmatmul.msk.f32.gmra.mxu0 %vm7349_vm15, %v5718_v12  ;;  %vm4966_vm15 = vcmask 517120  }
0x4f77   :  { %v4792_v14 = vpop.f32.mrf.mxu0 }
0x4f78   :  { %v7270_v51 = vsel %vm7350_vm0, %v4773_v16, %v4792_v14 }
0x4f79   :  { %v4804_v52 = vmul.f32 %v5179_v38, %v7270_v51 }
0x4f7b   :  { %v4806_v36 = vsel %vm225_vm7, %v4804_v52, 0.0 }
0x4f7c   :  { %4807 = vadd.xlane.f32.xlu1 %v4806_v36 }
0x4f7f   :  { %v4795_v5 = vpop.f32.mrf.mxu0 }
0x4f80   :  { %v7276_v46 = vsel %vm7351_vm13, %v4774_v23, %v4795_v5 }
0x4f81   :  { %v4805_v42 = vmul.f32 %v5179_v38, %v7276_v46 }
0x4f83   :  { %v4809_v13 = vsel %vm225_vm7, %v4805_v42, 0.0 }
0x4f84   :  { %4810 = vadd.xlane.f32.xlu2 %v4809_v13 }
0x4fef   :  { %v4808_v50 = vpop.xlane.xlu1 %4807 }
0x4ff0   :  { %v4812_v0 = vrot.slane %v4808_v50, 4 }
0x4ff2   :  { %v4813_v34 = vmax.f32 %v4808_v50, %v4812_v0 }
0x4ff4   :  { %v4814_v44 = vrot.slane %v4813_v34, 2 }
0x4ff6   :  { %v4815_v3 = vmax.f32 %v4813_v34, %v4814_v44 }
0x4ff7   :  { %v4811_v2 = vpop.xlane.xlu2 %4810 }
0x4ff8   :  { %v4816_v6 = vrot.slane %v4815_v3, 1  ;;  %v4818_v43 = vrot.slane %v4811_v2, 4 }
0x4ffa   :  { %v4817_v10 = vmax.f32 %v4815_v3, %v4816_v6  ;;  %v4819_v58 = vmax.f32 %v4811_v2, %v4818_v43 }
0x4ffc   :  { %v4824_v7 = vsub.f32 %v4808_v50, %v4817_v10  ;;  %v4820_v17 = vrot.slane %v4819_v58, 2 }
0x4ffe   :  { %v4826_v39 = vmul.f32 1.442695, %v4824_v7  ;;  %v4821_v29 = vmax.f32 %v4819_v58, %v4820_v17 }
0x5000   :  { %5695 = vpow2.f32 %v4826_v39  ;;  %v4822_v33 = vrot.slane %v4821_v29, 1 }
0x5002   :  { %v4823_v63 = vmax.f32 %v4821_v29, %v4822_v33 }
0x5004   :  { %v4825_v25 = vsub.f32 %v4811_v2, %v4823_v63 }
0x5006   :  { %v5696_v32 = vpop.eup %5695  ;;  %v4828_v1 = vmul.f32 1.442695, %v4825_v25 }
0x5007   :  { %v4830_v47 = vrot.slane %v5696_v32, 4 }
0x5008   :  { %5697 = vpow2.f32 %v4828_v1 }
0x5009   :  { %v4831_v37 = vadd.f32 %v5696_v32, %v4830_v47 }
0x500b   :  { %v4832_v26 = vrot.slane %v4831_v37, 2 }
0x500d   :  { %v4833_v24 = vadd.f32 %v4832_v26, %v4831_v37 }
0x500e   :  { %v5698_v53 = vpop.eup %5697 }
0x500f   :  { %v4834_v57 = vrot.slane %v4833_v24, 1  ;;  %v4836_v19 = vrot.slane %v5698_v53, 4 }
0x5011   :  { %v4835_v48 = vadd.f32 %v4834_v57, %v4833_v24  ;;  %v4837_v59 = vadd.f32 %v5698_v53, %v4836_v19 }
0x5013   :  { %5699 = vrcp.f32 %v4835_v48  ;;  %v4838_v22 = vrot.slane %v4837_v59, 2  ;;  %v4853_v9 = vand.u32 2147483648, %v4835_v48  ;;  %v4851_v55 = vand.u32 2147483647, %v4835_v48 }
0x5014   :  { %vm4847_vm12 = vweird.f32 %v4835_v48 }
0x5015   :  { %v4839_v35 = vadd.f32 %v4838_v22, %v4837_v59  ;;  %v4854_v8 = vor.u32 1.1754944e-38, %v4853_v9  ;;  %vm4852_vm9 = vcmp.eq.f32.partialorder %v4851_v55, 8.507059e+37 }
0x5017   :  { %v4840_v27 = vrot.slane %v4839_v35, 1 }
0x5019   :  { %v5700_v56 = vpop.eup %5699  ;;  %v4841_v21 = vadd.f32 %v4840_v27, %v4839_v35 }
0x501a   :  { %v4843_v60 = vmul.f32 %v5700_v56, %v4835_v48  ;;  %vm4848_vm11 = vweird.f32 %v5700_v56 }
0x501b   :  { %5701 = vrcp.f32 %v4841_v21  ;;  %vm4849_vm8 = vmor %vm4847_vm12, %vm4848_vm11  ;;  %v4868_v41 = vand.u32 2147483648, %v4841_v21  ;;  %v4866_v15 = vand.u32 2147483647, %v4841_v21  ;;  %vm4862_vm5 = vweird.f32 %v4841_v21 }
0x501c   :  { %v4844_v61 = vsub.f32 1.0, %v4843_v60  ;;  %vm4994_vm11 = vcmask 1024  }
0x501d   :  { %v4869_v52 = vor.u32 1.1754944e-38, %v4868_v41  ;;  %vm4867_vm1 = vcmp.eq.f32.partialorder %v4866_v15, 8.507059e+37 }
0x501e   :  { %v4845_v28 = vmul.f32 %v5700_v56, %v4844_v61 }
0x5020   :  { %v4846_v49 = vadd.f32 %v5700_v56, %v4845_v28 }
0x5021   :  { %v5702_v11 = vpop.eup %5701 }
0x5022   :  { %v4850_v31 = vsel %vm4849_vm8, %v5700_v56, %v4846_v49  ;;  %v4858_v18 = vmul.f32 %v5702_v11, %v4841_v21  ;;  %vm4863_vm4 = vweird.f32 %v5702_v11 }
0x5023   :  { %v4855_v54 = vsel %vm4852_vm9, %v4854_v8, %v4850_v31  ;;  %vm4864_vm6 = vmor %vm4862_vm5, %vm4863_vm4  ;;  %v5804_v8 = vmov -1.0  }
0x5024   :  { %v4856_v40 = vmul.f32 %v5696_v32, %v4855_v54  ;;  %v4859_v4 = vsub.f32 1.0, %v4858_v18 }
0x5026   :  { %v4872_v23 = vmul.f32 %v4856_v40, %v7270_v51  ;;  %v4860_v16 = vmul.f32 %v5702_v11, %v4859_v4  ;;  %v5181_v40 = vld [vmem:[%s7308_s13] ss:$0 sm:$0xff] }
0x5028   :  { %v4874_v12 = vsel %vm225_vm7, %v4872_v23, 0.0  ;;  %v4861_v38 = vadd.f32 %v5702_v11, %v4860_v16  ;;  %v5182_v16 = vld [vmem:[#allocation4] ss:$0 sm:$0xff] }
0x5029   :  { %v4875_v14 = vrot.slane %v4874_v12, 4 }
0x502a   :  { %v4865_v36 = vsel %vm4864_vm6, %v5702_v11, %v4861_v38 }
0x502b   :  { %v4870_v5 = vsel %vm4867_vm1, %v4869_v52, %v4865_v36  ;;  %v4876_v42 = vadd.f32 %v4875_v14, %v4874_v12 }
0x502c   :  { %v4871_v13 = vmul.f32 %v5698_v53, %v4870_v5 }
0x502d   :  { %v4877_v0 = vrot.slane %v4876_v42, 2 }
0x502e   :  { %v4873_v50 = vmul.f32 %v4871_v13, %v7276_v46  ;;  %v5180_v46 = vld [vmem:[%s7307_s12] ss:$0 sm:$0xff] }
0x502f   :  { %v4878_v44 = vadd.f32 %v4877_v0, %v4876_v42 }
0x5030   :  { %v4881_v51 = vsel %vm225_vm7, %v4873_v50, 0.0 }
0x5031   :  { %v4882_v34 = vrot.slane %v4881_v51, 4  ;;  %v4879_v6 = vrot.slane %v4878_v44, 1 }
0x5033   :  { %v4883_v3 = vadd.f32 %v4882_v34, %v4881_v51  ;;  %v4880_v58 = vadd.f32 %v4879_v6, %v4878_v44 }
0x5035   :  { %v4884_v2 = vrot.slane %v4883_v3, 2 }
0x5037   :  { %v4885_v43 = vadd.f32 %v4884_v2, %v4883_v3 }
0x5039   :  { %v4886_v10 = vrot.slane %v4885_v43, 1 }
0x503b   :  { %v4887_v7 = vadd.f32 %v4886_v10, %v4885_v43 }
0x503d   :  { %v4898_v17 = vsel %vm689_vm2, %v4887_v7, %v4880_v58 }
0x503e   :  { %5157 = vmatmul.msk.f32.vlgmr.msra.gmra.mxu1 %vm225_vm7, %v4898_v17 }
0x50bb   :  { %v4918_v39 = vpop.f32.mrf.mxu1 }
0x50bc   :  { %v4919_v29 = vadd.f32 %v5180_v46, %v4918_v39 }
0x50be   :  { %v4922_v33 = vmul.f32 0.70710677, %v4919_v29  ;;  %v4921_v54 = vmul.f32 0.5, %v4919_v29 }
0x50c0   :  { %v4925_v63 = vand.u32 2147483647, %v4922_v33  ;;  %vm4923_vm14 = vcmp.ge.f32.partialorder %v4922_v33, 0.0 }
0x50c1   :  { %v4924_v11 = vsel %vm4923_vm14, 1.0, %v5804_v8 }
0x50c2   :  { %v4926_v25 = vmul.f32 0.3275911, %v4925_v63  ;;  %v4952_v30 = vsub.f32 0.0, %v4925_v63 }
0x50c4   :  { %v4927_v32 = vadd.f32 1.0, %v4926_v25  ;;  %v4953_v45 = vmul.f32 %v4952_v30, %v4925_v63 }
0x50c6   :  { %5703 = vrcp.f32 %v4927_v32  ;;  %v4939_v26 = vand.u32 2147483648, %v4927_v32  ;;  %v4937_v20 = vand.u32 2147483647, %v4927_v32  ;;  %vm4933_vm7 = vweird.f32 %v4927_v32 }
0x50c7   :  { %v4954_v27 = vmul.f32 1.442695, %v4953_v45 }
0x50c8   :  { %v4940_v53 = vor.u32 1.1754944e-38, %v4939_v26  ;;  %vm4938_vm3 = vcmp.eq.f32.partialorder %v4937_v20, 8.507059e+37 }
0x50c9   :  { %5705 = vpow2.f32 %v4954_v27 }
0x50cc   :  { %v5704_v1 = vpop.eup %5703 }
0x50cd   :  { %v4929_v47 = vmul.f32 %v5704_v1, %v4927_v32  ;;  %vm4934_vm10 = vweird.f32 %v5704_v1 }
0x50ce   :  { %vm4935_vm2 = vmor %vm4933_vm7, %vm4934_vm10 }
0x50cf   :  { %v4930_v37 = vsub.f32 1.0, %v4929_v47  ;;  %v5706_v28 = vpop.eup %5705 }
0x50d1   :  { %v4931_v24 = vmul.f32 %v5704_v1, %v4930_v37 }
0x50d3   :  { %v4932_v62 = vadd.f32 %v5704_v1, %v4931_v24 }
0x50d5   :  { %v4936_v57 = vsel %vm4935_vm2, %v5704_v1, %v4932_v62 }
0x50d6   :  { %v4941_v19 = vsel %vm4938_vm3, %v4940_v53, %v4936_v57 }
0x50d7   :  { %v4943_v48 = vmul.f32 1.0614054, %v4941_v19 }
0x50d9   :  { %v4944_v59 = vadd.f32 -1.4531521, %v4943_v48 }
0x50db   :  { %v4945_v22 = vmul.f32 %v4944_v59, %v4941_v19 }
0x50dd   :  { %v4946_v35 = vadd.f32 1.4214138, %v4945_v22 }
0x50df   :  { %v4947_v56 = vmul.f32 %v4946_v35, %v4941_v19 }
0x50e1   :  { %v4948_v60 = vadd.f32 -0.28449672, %v4947_v56 }
0x50e3   :  { %v4949_v21 = vmul.f32 %v4948_v60, %v4941_v19 }
0x50e5   :  { %v4950_v61 = vadd.f32 0.2548296, %v4949_v21 }
0x50e7   :  { %v4951_v9 = vmul.f32 %v4950_v61, %v4941_v19 }
0x50e9   :  { %v4956_v55 = vmul.f32 %v5706_v28, %v4951_v9 }
0x50eb   :  { %v4957_v49 = vsub.f32 1.0, %v4956_v55 }
0x50ed   :  { %v4958_v31 = vmul.f32 %v4957_v49, %v4924_v11 }
0x50ef   :  { %v4959_v18 = vadd.f32 1.0, %v4958_v31 }
0x50f1   :  { %v4960_v4 = vmul.f32 %v4959_v18, %v4921_v54 }
0x50f3   :  { %v4965_v41 = vmul.f32 %v5181_v40, %v4960_v4 }
0x50f5   :  { %v4967_v23 = vsel %vm4966_vm15, %v4965_v41, 0.0 }
0x50f6   :  { %4968 = vadd.xlane.f32.xlu0 %v4967_v23 }
0x5169   :  { %v4969_v15 = vpop.xlane.xlu0 %4968 }
0x516a   :  { %v4974_v12 = vadd.f32 %v5182_v16, %v4969_v15 }
0x516c   :  { %v5158_v38 = vmul.f32 -1.442695, %v4974_v12 }
0x516e   :  { %5707 = vpow2.f32 %v5158_v38 }
0x5174   :  { %v5708_v14 = vpop.eup %5707 }
0x5175   :  { %v4978_v52 = vadd.f32 1.0, %v5708_v14 }
0x5177   :  { %5709 = vrcp.f32 %v4978_v52  ;;  %v4990_v13 = vand.u32 2147483648, %v4978_v52  ;;  %v4988_v0 = vand.u32 2147483647, %v4978_v52  ;;  %vm4984_vm13 = vweird.f32 %v4978_v52 }
0x5179   :  { %v4991_v34 = vor.u32 1.1754944e-38, %v4990_v13  ;;  %vm4989_vm8 = vcmp.eq.f32.partialorder %v4988_v0, 8.507059e+37 }
0x517d   :  { %v5710_v36 = vpop.eup %5709 }
0x517e   :  { %v4980_v5 = vmul.f32 %v5710_v36, %v4978_v52  ;;  %vm4985_vm0 = vweird.f32 %v5710_v36 }
0x517f   :  { %vm4986_vm12 = vmor %vm4984_vm13, %vm4985_vm0 }
0x5180   :  { %v4981_v42 = vsub.f32 1.0, %v4980_v5 }
0x5182   :  { %v4982_v50 = vmul.f32 %v5710_v36, %v4981_v42 }
0x5184   :  { %v4983_v51 = vadd.f32 %v5710_v36, %v4982_v50 }
0x5186   :  { %v4987_v44 = vsel %vm4986_vm12, %v5710_v36, %v4983_v51 }
0x5187   :  { %v4992_v3 = vsel %vm4989_vm8, %v4991_v34, %v4987_v44 }
0x5188   :  { %4995 = vst.msk [vmem:[%s7310_s15] sm:$0x3] %vm4994_vm11, %v4992_v3 }
0x5189   :  { %5000 = vsyncpa [#allocation6], 1 }
0x518a   :  { %5001 = vsyncpa [#allocation8], 1 }

</bundles_post_ra>
